<compile_context>
chip_gen: v6e
topology: v6e:2x2x1
jax: 0.10.0
libtpu: 0.0.40
codegen_flags: <defaults>
</compile_context>

<pallas_src>
import functools

import jax
import jax.numpy as jnp
from jax import lax
from jax.experimental import pallas as pl
from jax.experimental.pallas import tpu as pltpu


def downmix_ffn_kernel(xs_ref, w1_ref, b1_ref, w2_ref, b2_ref, w3_ref, b3_ref,
                       o_ref, h1_ref, h3_ref, *, rows, width, c2):
    """One (batch, row-strip) grid step.

    xs_ref : (1, 1, Mi, D) bf16  strip tokens incl. 1-row halo, Mi=(rows+2)*W
    w1_ref : (D, C4)  bf16  conv_1 (1x1)           b1_ref : (1, C4) f32
    w2_ref : (3,3,C4) f32   conv_2 (3x3 depthwise) b2_ref : (1, C4) f32
    w3_ref : (C2, D)  bf16  conv_3 (1x1)           b3_ref : (1, D)  f32
    o_ref  : (1, rows//2, W//2, D)                 pooled output rows
    h1_ref : VMEM (Mi, C4) bf16                    staged conv_1 output
    h3_ref : VMEM (rows//2, W, D) f32              H-pooled conv_3 output
    """
    W = width
    Mi, C4 = h1_ref.shape
    C2 = c2
    D = o_ref.shape[-1]
    m_out = rows * W
    hs = rows // 2
    wo = W // 2
    assert Mi == (rows + 2) * W

    s = pl.program_id(1)
    last_strip = pl.num_programs(1) - 1

    # ---- conv_1: one (Mi, D) @ (D, C4) bf16 matmul with f32 accumulation ----
    h1 = jnp.dot(xs_ref[0, 0], w1_ref[...],
                 preferred_element_type=jnp.float32) + b1_ref[...]
    # Stage once in bf16: halves the largest scratch and the depthwise-stage
    # load bytes (bf16 VALU on v6e/v7x); taps below accumulate in f32.
    h1_ref[...] = h1.astype(jnp.bfloat16)

    # Halo rows that fall outside the image must be zero (conv_2 zero-pads its
    # input), not conv_1(0) = b1.  Only the edge strips touch these rows.
    @pl.when(s == 0)
    def _():
        h1_ref[pl.ds(0, W), :] = jnp.zeros((W, C4), jnp.bfloat16)

    @pl.when(s == last_strip)
    def _():
        h1_ref[pl.ds(Mi - W, W), :] = jnp.zeros((W, C4), jnp.bfloat16)

    # ---- conv_2: depthwise 3x3, padding=1 ------------------------------------
    # ky taps: 3 row-aligned strip loads (offsets 0, W, 2W -- multiples of 8).
    # kx = -1/+1 taps: XLU roll along the sublane axis + image-edge column
    # mask (the roll only wraps into columns that the mask zeroes anyway).
    w2 = w2_ref[...]                                             # (3, 3, C4)
    ridx = lax.broadcasted_iota(jnp.int32, (m_out, 1), 0)
    if (W & (W - 1)) == 0:
        xpos = ridx & (W - 1)        # column index, power-of-two width
    else:
        xpos = ridx % W              # general width fallback
    not_left = xpos != 0
    not_right = xpos != (W - 1)

    acc = None
    for ky in range(3):
        rows_k = h1_ref[pl.ds(ky * W, m_out), :].astype(jnp.float32)
        center = rows_k * w2[ky, 1]
        acc = center if acc is None else acc + center
        lft = pltpu.roll(rows_k, shift=1, axis=0)                # h1[y, x-1]
        acc = acc + jnp.where(not_left, lft, 0.0) * w2[ky, 0]
        rgt = pltpu.roll(rows_k, shift=m_out - 1, axis=0)        # h1[y, x+1]
        acc = acc + jnp.where(not_right, rgt, 0.0) * w2[ky, 2]
    acc = acc + b2_ref[...]                                      # (m_out, C4)

    # ---- gated chunk: gate = relu(first C2 channels) scales the second half -
    gate = jnp.maximum(acc[:, :C2], 0.0)
    val = acc[:, C2:] * gate                                     # (m_out, C2)

    # ---- conv_3: one (m_out, C2) @ (C2, D) bf16 matmul, f32 accumulation ----
    h3 = jnp.dot(val.astype(jnp.bfloat16), w3_ref[...],
                 preferred_element_type=jnp.float32) + b3_ref[...]

    # ---- MaxPool2d(2, 2): pool H in registers, store the halved result, then
    # pool W with two stride-2 reads of the small scratch. --------------------
    h3_pairs = h3.reshape(hs, 2, W, D)
    h3_ref[...] = jnp.maximum(h3_pairs[:, 0], h3_pairs[:, 1])    # (hs, W, D)
    p0 = h3_ref[:, pl.ds(0, wo, 2), :]
    p1 = h3_ref[:, pl.ds(1, wo, 2), :]
    o_ref[0] = jnp.maximum(p0, p1).astype(o_ref.dtype)


def downmix_ffn(x, params, *, strip_rows=8):
    """x: (B, N, D) float32 tokens; returns (B, N // 4, D)."""
    w1, b1, w2, b2, w3, b3 = params
    B, N, D = x.shape
    H = W = int(round(N ** 0.5))
    assert H * W == N, "token count must form a square spatial grid"
    assert W % 8 == 0, "grid width must be a multiple of 8 (sublane tiling)"
    C4 = w1.shape[1]
    C2 = C4 // 2
    assert C2 % 128 == 0 and D % 128 == 0, "channel dims must be lane-dense"

    rows = min(strip_rows, H)
    if H % rows != 0:
        rows = H                       # fall back to one strip per image
    assert rows % 2 == 0
    S = H // rows                      # row strips per image
    Mi = (rows + 2) * W                # strip tokens incl. 1-row halo
    Ho, Wo, hs = H // 2, W // 2, rows // 2
    m_out = rows * W

    # bf16 at the call boundary: halves x / w1 / w3 DMA and VMEM blocks.
    xs = x.reshape(B, H, W, D).astype(jnp.bfloat16)
    xp = jnp.pad(xs, ((0, 0), (1, 1), (0, 0), (0, 0)))
    strips = jnp.stack(
        [xp[:, s * rows:s * rows + rows + 2] for s in range(S)], axis=1)
    strips = strips.reshape(B, S, Mi, D)
    w1b = w1.astype(jnp.bfloat16)
    w3b = w3.astype(jnp.bfloat16)

    kern = functools.partial(downmix_ffn_kernel, rows=rows, width=W, c2=C2)

    # vmem_limit sized to the real per-step footprint (+ headroom).
    est = (2 * Mi * D * 2                                 # x strip (bf16, 2x)
           + 2 * hs * Wo * D * 4                          # out block (2x)
           + 2 * ((D * C4 + C2 * D) * 2 + (11 * C4 + D) * 4)   # weights
           + Mi * C4 * 2 + hs * W * D * 4                 # scratches
           + 8 * m_out * C4 * 4)                          # f32 intermediates
    vmem_limit = int(min(max(est * 5 // 4, 32 * 1024 * 1024),
                         48 * 1024 * 1024))

    def make_call(single_buffer_weights):
        def wspec(shape):
            imap = (lambda b, s: (0,) * len(shape))
            if single_buffer_weights:
                return pl.BlockSpec(shape, imap, pipeline_mode=pl.Buffered(1))
            return pl.BlockSpec(shape, imap)

        grid_spec = pltpu.PrefetchScalarGridSpec(
            num_scalar_prefetch=0,
            grid=(B, S),
            in_specs=[
                pl.BlockSpec((1, 1, Mi, D), lambda b, s: (b, s, 0, 0)),  # x
                wspec((D, C4)),            # w1 (bf16)
                wspec((1, C4)),            # b1
                wspec((3, 3, C4)),         # w2
                wspec((1, C4)),            # b2
                wspec((C2, D)),            # w3 (bf16)
                wspec((1, D)),             # b3
            ],
            out_specs=pl.BlockSpec((1, hs, Wo, D), lambda b, s: (b, s, 0, 0)),
            scratch_shapes=[
                pltpu.VMEM((Mi, C4), jnp.bfloat16),   # staged conv_1 output
                pltpu.VMEM((hs, W, D), jnp.float32),  # H-pooled conv_3 output
            ],
        )
        return pl.pallas_call(
            kern,
            out_shape=jax.ShapeDtypeStruct((B, Ho, Wo, D), x.dtype),
            grid_spec=grid_spec,
            compiler_params=pltpu.CompilerParams(
                dimension_semantics=("parallel", "parallel"),
                vmem_limit_bytes=vmem_limit),
        )

    args = (strips, w1b, b1, w2, b2, w3b, b3)
    try:
        out = jax.block_until_ready(make_call(True)(*args))
    except Exception:
        # pl.Buffered(1) (single-buffered constant weights) not supported on
        # this jax version -> fall back to default double buffering.
        out = make_call(False)(*args)
    return out.reshape(B, Ho * Wo, D)


def ref_downmix_ffn(x, params):
    """Pure-JAX f32 reference with the module's semantics (for verification)."""
    w1, b1, w2, b2, w3, b3 = params
    B, N, D = x.shape
    H = W = int(round(N ** 0.5))
    C4 = w1.shape[1]
    C2 = C4 // 2
    xs = x.reshape(B, H, W, D)
    h1 = jnp.einsum('bhwc,cd->bhwd', xs, w1) + b1[0]
    p = jnp.pad(h1, ((0, 0), (1, 1), (1, 1), (0, 0)))
    acc = jnp.zeros_like(h1)
    for ky in range(3):
        for kx in range(3):
            acc = acc + p[:, ky:ky + H, kx:kx + W, :] * w2[ky, kx]
    h2 = acc + b2[0]
    gate = jax.nn.relu(h2[..., :C2])
    val = h2[..., C2:] * gate
    h3 = jnp.einsum('bhwc,cd->bhwd', val, w3) + b3[0]
    pooled = h3.reshape(B, H // 2, 2, W // 2, 2, D).max(axis=(2, 4))
    return pooled.reshape(B, (H // 2) * (W // 2), D)


def init_params(key, d_model):
    """Deterministic synthetic params matching DownMixFFN's shapes:
    conv_1: (4d, d, 1, 1)+b -> w1 (d, 4d);  conv_2 depthwise: (4d,1,3,3)+b ->
    w2 (3,3,4d);  conv_3: (d, 2d, 1, 1)+b -> w3 (2d, d)."""
    C4 = 4 * d_model
    C2 = C4 // 2
    ks = jax.random.split(key, 6)
    s = 0.1
    w1 = s * jax.random.normal(ks[0], (d_model, C4), jnp.float32)
    b1 = s * jax.random.normal(ks[1], (1, C4), jnp.float32)
    w2 = s * jax.random.normal(ks[2], (3, 3, C4), jnp.float32)
    b2 = s * jax.random.normal(ks[3], (1, C4), jnp.float32)
    w3 = s * jax.random.normal(ks[4], (C2, d_model), jnp.float32)
    b3 = s * jax.random.normal(ks[5], (1, d_model), jnp.float32)
    return (w1, b1, w2, b2, w3, b3)


if __name__ == "__main__":
    key = jax.random.PRNGKey(0)
    # 256 tokens -> 16x16 spatial grid -> two 8-row strips per image; D = 128
    # keeps every channel dim lane-dense.  grid = (2, 2) parallel steps.
    B, N, D = 2, 256, 128
    kx_, kp_ = jax.random.split(key)
    x = jax.random.normal(kx_, (B, N, D), jnp.float32)
    params = init_params(kp_, D)

    out = jax.block_until_ready(downmix_ffn(x, params))
    ref = jax.block_until_ready(ref_downmix_ffn(x, params))

    assert out.shape == (B, N // 4, D), out.shape
    # bf16 matmul operands + bf16-staged h1 vs the f32 reference -> allow
    # small numeric slack.
    err = float(jnp.max(jnp.abs(out - ref)))
    assert jnp.allclose(out, ref, atol=3e-2, rtol=3e-2), (
        "max abs err = %g" % err)
    print("KERNEL_OK")
</pallas_src>

<mosaic_0001>
module attributes {stable_mosaic.version = 11 : i64} {
  func.func @downmix_ffn_kernel(%arg0: i32, %arg1: i32, %arg2: memref<1x1x160x128xbf16, #tpu.memory_space<vmem>>, %arg3: memref<128x512xbf16, #tpu.memory_space<vmem>>, %arg4: memref<1x512xf32, #tpu.memory_space<vmem>>, %arg5: memref<3x3x512xf32, #tpu.memory_space<vmem>>, %arg6: memref<1x512xf32, #tpu.memory_space<vmem>>, %arg7: memref<256x128xbf16, #tpu.memory_space<vmem>>, %arg8: memref<1x128xf32, #tpu.memory_space<vmem>>, %arg9: memref<1x4x8x128xf32, #tpu.memory_space<vmem>>, %arg10: memref<160x512xbf16, #tpu.memory_space<vmem>>, %arg11: memref<4x16x128xf32, #tpu.memory_space<vmem>>) attributes {dimension_semantics = [#tpu.dimension_semantics<parallel>, #tpu.dimension_semantics<parallel>], iteration_bounds = array<i64: 2, 2>, scalar_prefetch = 0 : i64, scratch_operands = 2 : i64, tpu.core_type = #tpu.core_type<tc>, window_params = [{transform_indices = @transform_0, window_bounds = array<i64: 1, 1, 160, 128>}, {pipeline_mode = #tpu.pipeline_mode<synchronous>, transform_indices = @transform_1, window_bounds = array<i64: 128, 512>}, {pipeline_mode = #tpu.pipeline_mode<synchronous>, transform_indices = @transform_2, window_bounds = array<i64: 1, 512>}, {pipeline_mode = #tpu.pipeline_mode<synchronous>, transform_indices = @transform_3, window_bounds = array<i64: 3, 3, 512>}, {pipeline_mode = #tpu.pipeline_mode<synchronous>, transform_indices = @transform_4, window_bounds = array<i64: 1, 512>}, {pipeline_mode = #tpu.pipeline_mode<synchronous>, transform_indices = @transform_5, window_bounds = array<i64: 256, 128>}, {pipeline_mode = #tpu.pipeline_mode<synchronous>, transform_indices = @transform_6, window_bounds = array<i64: 1, 128>}, {transform_indices = @transform_7, window_bounds = array<i64: 1, 4, 8, 128>}]} {
    %c0 = arith.constant 0 : index
    %c0_0 = arith.constant 0 : index
    %c0_1 = arith.constant 0 : index
    %c0_2 = arith.constant 0 : index
    %0 = vector.load %arg2[%c0, %c0_0, %c0_1, %c0_2] : memref<1x1x160x128xbf16, #tpu.memory_space<vmem>>, vector<1x1x160x128xbf16>
    %1 = vector.shape_cast %0 : vector<1x1x160x128xbf16> to vector<160x128xbf16>
    %c0_3 = arith.constant 0 : index
    %c0_4 = arith.constant 0 : index
    %2 = vector.load %arg3[%c0_3, %c0_4] : memref<128x512xbf16, #tpu.memory_space<vmem>>, vector<128x512xbf16>
    %cst = arith.constant dense<0.000000e+00> : vector<160x512xf32>
    %3 = tpu.matmul %1, %2, %cst {dimension_numbers = #tpu.dot_dimension_numbers<[1], [0], [0], [1], [0, 0, 1, 1], [], []>} : vector<160x128xbf16>, vector<128x512xbf16>, vector<160x512xf32> -> vector<160x512xf32>
    %c0_5 = arith.constant 0 : index
    %c0_6 = arith.constant 0 : index
    %4 = vector.load %arg4[%c0_5, %c0_6] : memref<1x512xf32, #tpu.memory_space<vmem>>, vector<1x512xf32>
    %5 = vector.broadcast %4 : vector<1x512xf32> to vector<160x512xf32>
    %6 = arith.addf %3, %5 : vector<160x512xf32>
    %7 = arith.truncf %6 : vector<160x512xf32> to vector<160x512xbf16>
    %c0_7 = arith.constant 0 : index
    %c0_8 = arith.constant 0 : index
    %8 = vector.load %arg10[%c0_7, %c0_8] : memref<160x512xbf16, #tpu.memory_space<vmem>>, vector<160x512xbf16>
    tpu.vector_store %arg10[%c0_7, %c0_8], %7 {strides = array<i32>} : memref<160x512xbf16, #tpu.memory_space<vmem>>, vector<160x512xbf16>,
    %c0_i32 = arith.constant 0 : i32
    %9 = arith.cmpi eq, %arg1, %c0_i32 : i32
    %10 = arith.extui %9 : i1 to i32
    %c0_i32_9 = arith.constant 0 : i32
    %11 = arith.cmpi ne, %10, %c0_i32_9 : i32
    scf.if %11 {
      %cst_51 = arith.constant 0.000000e+00 : bf16
      %139 = vector.broadcast %cst_51 : bf16 to vector<16x512xbf16>
      %c0_52 = arith.constant 0 : index
      %c0_53 = arith.constant 0 : index
      %140 = vector.load %arg10[%c0_52, %c0_53] : memref<160x512xbf16, #tpu.memory_space<vmem>>, vector<16x512xbf16>
      tpu.vector_store %arg10[%c0_52, %c0_53], %139 {strides = array<i32>} : memref<160x512xbf16, #tpu.memory_space<vmem>>, vector<16x512xbf16>,
    } else {
    }
    %c1_i32 = arith.constant 1 : i32
    %12 = arith.cmpi eq, %arg1, %c1_i32 : i32
    %13 = arith.extui %12 : i1 to i32
    %c0_i32_10 = arith.constant 0 : i32
    %14 = arith.cmpi ne, %13, %c0_i32_10 : i32
    scf.if %14 {
      %cst_51 = arith.constant 0.000000e+00 : bf16
      %139 = vector.broadcast %cst_51 : bf16 to vector<16x512xbf16>
      %c144 = arith.constant 144 : index
      %c0_52 = arith.constant 0 : index
      %140 = vector.load %arg10[%c144, %c0_52] : memref<160x512xbf16, #tpu.memory_space<vmem>>, vector<16x512xbf16>
      tpu.vector_store %arg10[%c144, %c0_52], %139 {strides = array<i32>} : memref<160x512xbf16, #tpu.memory_space<vmem>>, vector<16x512xbf16>,
    } else {
    }
    %c0_11 = arith.constant 0 : index
    %c0_12 = arith.constant 0 : index
    %c0_13 = arith.constant 0 : index
    %15 = vector.load %arg5[%c0_11, %c0_12, %c0_13] : memref<3x3x512xf32, #tpu.memory_space<vmem>>, vector<3x3x512xf32>
    %16 = tpu.iota {dimensions = array<i32: 0>} : vector<128x1xi32>
    %c15_i32 = arith.constant 15 : i32
    %17 = vector.broadcast %c15_i32 : i32 to vector<128x1xi32>
    %18 = arith.andi %16, %17 : vector<128x1xi32>
    %c0_i32_14 = arith.constant 0 : i32
    %19 = vector.broadcast %c0_i32_14 : i32 to vector<128x1xi32>
    %20 = arith.cmpi ne, %18, %19 : vector<128x1xi32>
    %c15_i32_15 = arith.constant 15 : i32
    %21 = vector.broadcast %c15_i32_15 : i32 to vector<128x1xi32>
    %22 = arith.cmpi ne, %18, %21 : vector<128x1xi32>
    %c0_16 = arith.constant 0 : index
    %c0_17 = arith.constant 0 : index
    %23 = vector.load %arg10[%c0_16, %c0_17] : memref<160x512xbf16, #tpu.memory_space<vmem>>, vector<128x512xbf16>
    %24 = arith.extf %23 : vector<128x512xbf16> to vector<128x512xf32>
    %25 = vector.extract_strided_slice %15 {offsets = [0, 1, 0], sizes = [1, 1, 512], strides = [1, 1, 1]} : vector<3x3x512xf32> to vector<1x1x512xf32>
    %26 = vector.shape_cast %25 : vector<1x1x512xf32> to vector<512xf32>
    %27 = vector.shape_cast %26 : vector<512xf32> to vector<1x512xf32>
    %28 = vector.broadcast %27 : vector<1x512xf32> to vector<128x512xf32>
    %29 = arith.mulf %24, %28 : vector<128x512xf32>
    %c1_i32_18 = arith.constant 1 : i32
    %30 = tpu.dynamic_rotate %24 by %c1_i32_18 dim 0 : vector<128x512xf32>, i32 -> vector<128x512xf32>
    %cst_19 = arith.constant 0.000000e+00 : f32
    %31 = vector.shape_cast %20 : vector<128x1xi1> to vector<128x1xi1>
    %32 = vector.broadcast %31 : vector<128x1xi1> to vector<128x512xi1>
    %33 = vector.broadcast %cst_19 : f32 to vector<128x512xf32>
    %34 = arith.select %32, %30, %33 : vector<128x512xi1>, vector<128x512xf32>
    %35 = vector.extract_strided_slice %15 {offsets = [0, 0, 0], sizes = [1, 1, 512], strides = [1, 1, 1]} : vector<3x3x512xf32> to vector<1x1x512xf32>
    %36 = vector.shape_cast %35 : vector<1x1x512xf32> to vector<512xf32>
    %37 = vector.shape_cast %36 : vector<512xf32> to vector<1x512xf32>
    %38 = vector.broadcast %37 : vector<1x512xf32> to vector<128x512xf32>
    %39 = arith.mulf %34, %38 : vector<128x512xf32>
    %40 = arith.addf %29, %39 : vector<128x512xf32>
    %c127_i32 = arith.constant 127 : i32
    %41 = tpu.dynamic_rotate %24 by %c127_i32 dim 0 : vector<128x512xf32>, i32 -> vector<128x512xf32>
    %cst_20 = arith.constant 0.000000e+00 : f32
    %42 = vector.shape_cast %22 : vector<128x1xi1> to vector<128x1xi1>
    %43 = vector.broadcast %42 : vector<128x1xi1> to vector<128x512xi1>
    %44 = vector.broadcast %cst_20 : f32 to vector<128x512xf32>
    %45 = arith.select %43, %41, %44 : vector<128x512xi1>, vector<128x512xf32>
    %46 = vector.extract_strided_slice %15 {offsets = [0, 2, 0], sizes = [1, 1, 512], strides = [1, 1, 1]} : vector<3x3x512xf32> to vector<1x1x512xf32>
    %47 = vector.shape_cast %46 : vector<1x1x512xf32> to vector<512xf32>
    %48 = vector.shape_cast %47 : vector<512xf32> to vector<1x512xf32>
    %49 = vector.broadcast %48 : vector<1x512xf32> to vector<128x512xf32>
    %50 = arith.mulf %45, %49 : vector<128x512xf32>
    %51 = arith.addf %40, %50 : vector<128x512xf32>
    %c16 = arith.constant 16 : index
    %c0_21 = arith.constant 0 : index
    %52 = vector.load %arg10[%c16, %c0_21] : memref<160x512xbf16, #tpu.memory_space<vmem>>, vector<128x512xbf16>
    %53 = arith.extf %52 : vector<128x512xbf16> to vector<128x512xf32>
    %54 = vector.extract_strided_slice %15 {offsets = [1, 1, 0], sizes = [1, 1, 512], strides = [1, 1, 1]} : vector<3x3x512xf32> to vector<1x1x512xf32>
    %55 = vector.shape_cast %54 : vector<1x1x512xf32> to vector<512xf32>
    %56 = vector.shape_cast %55 : vector<512xf32> to vector<1x512xf32>
    %57 = vector.broadcast %56 : vector<1x512xf32> to vector<128x512xf32>
    %58 = arith.mulf %53, %57 : vector<128x512xf32>
    %59 = arith.addf %51, %58 : vector<128x512xf32>
    %c1_i32_22 = arith.constant 1 : i32
    %60 = tpu.dynamic_rotate %53 by %c1_i32_22 dim 0 : vector<128x512xf32>, i32 -> vector<128x512xf32>
    %cst_23 = arith.constant 0.000000e+00 : f32
    %61 = vector.shape_cast %20 : vector<128x1xi1> to vector<128x1xi1>
    %62 = vector.broadcast %61 : vector<128x1xi1> to vector<128x512xi1>
    %63 = vector.broadcast %cst_23 : f32 to vector<128x512xf32>
    %64 = arith.select %62, %60, %63 : vector<128x512xi1>, vector<128x512xf32>
    %65 = vector.extract_strided_slice %15 {offsets = [1, 0, 0], sizes = [1, 1, 512], strides = [1, 1, 1]} : vector<3x3x512xf32> to vector<1x1x512xf32>
    %66 = vector.shape_cast %65 : vector<1x1x512xf32> to vector<512xf32>
    %67 = vector.shape_cast %66 : vector<512xf32> to vector<1x512xf32>
    %68 = vector.broadcast %67 : vector<1x512xf32> to vector<128x512xf32>
    %69 = arith.mulf %64, %68 : vector<128x512xf32>
    %70 = arith.addf %59, %69 : vector<128x512xf32>
    %c127_i32_24 = arith.constant 127 : i32
    %71 = tpu.dynamic_rotate %53 by %c127_i32_24 dim 0 : vector<128x512xf32>, i32 -> vector<128x512xf32>
    %cst_25 = arith.constant 0.000000e+00 : f32
    %72 = vector.shape_cast %22 : vector<128x1xi1> to vector<128x1xi1>
    %73 = vector.broadcast %72 : vector<128x1xi1> to vector<128x512xi1>
    %74 = vector.broadcast %cst_25 : f32 to vector<128x512xf32>
    %75 = arith.select %73, %71, %74 : vector<128x512xi1>, vector<128x512xf32>
    %76 = vector.extract_strided_slice %15 {offsets = [1, 2, 0], sizes = [1, 1, 512], strides = [1, 1, 1]} : vector<3x3x512xf32> to vector<1x1x512xf32>
    %77 = vector.shape_cast %76 : vector<1x1x512xf32> to vector<512xf32>
    %78 = vector.shape_cast %77 : vector<512xf32> to vector<1x512xf32>
    %79 = vector.broadcast %78 : vector<1x512xf32> to vector<128x512xf32>
    %80 = arith.mulf %75, %79 : vector<128x512xf32>
    %81 = arith.addf %70, %80 : vector<128x512xf32>
    %c32 = arith.constant 32 : index
    %c0_26 = arith.constant 0 : index
    %82 = vector.load %arg10[%c32, %c0_26] : memref<160x512xbf16, #tpu.memory_space<vmem>>, vector<128x512xbf16>
    %83 = arith.extf %82 : vector<128x512xbf16> to vector<128x512xf32>
    %84 = vector.extract_strided_slice %15 {offsets = [2, 1, 0], sizes = [1, 1, 512], strides = [1, 1, 1]} : vector<3x3x512xf32> to vector<1x1x512xf32>
    %85 = vector.shape_cast %84 : vector<1x1x512xf32> to vector<512xf32>
    %86 = vector.shape_cast %85 : vector<512xf32> to vector<1x512xf32>
    %87 = vector.broadcast %86 : vector<1x512xf32> to vector<128x512xf32>
    %88 = arith.mulf %83, %87 : vector<128x512xf32>
    %89 = arith.addf %81, %88 : vector<128x512xf32>
    %c1_i32_27 = arith.constant 1 : i32
    %90 = tpu.dynamic_rotate %83 by %c1_i32_27 dim 0 : vector<128x512xf32>, i32 -> vector<128x512xf32>
    %cst_28 = arith.constant 0.000000e+00 : f32
    %91 = vector.shape_cast %20 : vector<128x1xi1> to vector<128x1xi1>
    %92 = vector.broadcast %91 : vector<128x1xi1> to vector<128x512xi1>
    %93 = vector.broadcast %cst_28 : f32 to vector<128x512xf32>
    %94 = arith.select %92, %90, %93 : vector<128x512xi1>, vector<128x512xf32>
    %95 = vector.extract_strided_slice %15 {offsets = [2, 0, 0], sizes = [1, 1, 512], strides = [1, 1, 1]} : vector<3x3x512xf32> to vector<1x1x512xf32>
    %96 = vector.shape_cast %95 : vector<1x1x512xf32> to vector<512xf32>
    %97 = vector.shape_cast %96 : vector<512xf32> to vector<1x512xf32>
    %98 = vector.broadcast %97 : vector<1x512xf32> to vector<128x512xf32>
    %99 = arith.mulf %94, %98 : vector<128x512xf32>
    %100 = arith.addf %89, %99 : vector<128x512xf32>
    %c127_i32_29 = arith.constant 127 : i32
    %101 = tpu.dynamic_rotate %83 by %c127_i32_29 dim 0 : vector<128x512xf32>, i32 -> vector<128x512xf32>
    %cst_30 = arith.constant 0.000000e+00 : f32
    %102 = vector.shape_cast %22 : vector<128x1xi1> to vector<128x1xi1>
    %103 = vector.broadcast %102 : vector<128x1xi1> to vector<128x512xi1>
    %104 = vector.broadcast %cst_30 : f32 to vector<128x512xf32>
    %105 = arith.select %103, %101, %104 : vector<128x512xi1>, vector<128x512xf32>
    %106 = vector.extract_strided_slice %15 {offsets = [2, 2, 0], sizes = [1, 1, 512], strides = [1, 1, 1]} : vector<3x3x512xf32> to vector<1x1x512xf32>
    %107 = vector.shape_cast %106 : vector<1x1x512xf32> to vector<512xf32>
    %108 = vector.shape_cast %107 : vector<512xf32> to vector<1x512xf32>
    %109 = vector.broadcast %108 : vector<1x512xf32> to vector<128x512xf32>
    %110 = arith.mulf %105, %109 : vector<128x512xf32>
    %111 = arith.addf %100, %110 : vector<128x512xf32>
    %c0_31 = arith.constant 0 : index
    %c0_32 = arith.constant 0 : index
    %112 = vector.load %arg6[%c0_31, %c0_32] : memref<1x512xf32, #tpu.memory_space<vmem>>, vector<1x512xf32>
    %113 = vector.broadcast %112 : vector<1x512xf32> to vector<128x512xf32>
    %114 = arith.addf %111, %113 : vector<128x512xf32>
    %115 = vector.extract_strided_slice %114 {offsets = [0, 0], sizes = [128, 256], strides = [1, 1]} : vector<128x512xf32> to vector<128x256xf32>
    %cst_33 = arith.constant 0.000000e+00 : f32
    %116 = vector.broadcast %cst_33 : f32 to vector<128x256xf32>
    %117 = arith.maximumf %115, %116 : vector<128x256xf32>
    %118 = vector.extract_strided_slice %114 {offsets = [0, 256], sizes = [128, 256], strides = [1, 1]} : vector<128x512xf32> to vector<128x256xf32>
    %119 = arith.mulf %118, %117 : vector<128x256xf32>
    %120 = arith.truncf %119 : vector<128x256xf32> to vector<128x256xbf16>
    %c0_34 = arith.constant 0 : index
    %c0_35 = arith.constant 0 : index
    %121 = vector.load %arg7[%c0_34, %c0_35] : memref<256x128xbf16, #tpu.memory_space<vmem>>, vector<256x128xbf16>
    %cst_36 = arith.constant dense<0.000000e+00> : vector<128x128xf32>
    %122 = tpu.matmul %120, %121, %cst_36 {dimension_numbers = #tpu.dot_dimension_numbers<[1], [0], [0], [1], [0, 0, 1, 1], [], []>} : vector<128x256xbf16>, vector<256x128xbf16>, vector<128x128xf32> -> vector<128x128xf32>
    %c0_37 = arith.constant 0 : index
    %c0_38 = arith.constant 0 : index
    %123 = vector.load %arg8[%c0_37, %c0_38] : memref<1x128xf32, #tpu.memory_space<vmem>>, vector<1x128xf32>
    %124 = vector.broadcast %123 : vector<1x128xf32> to vector<128x128xf32>
    %125 = arith.addf %122, %124 : vector<128x128xf32>
    %126 = vector.shape_cast %125 : vector<128x128xf32> to vector<4x2x16x128xf32>
    %127 = vector.extract_strided_slice %126 {offsets = [0, 0, 0, 0], sizes = [4, 1, 16, 128], strides = [1, 1, 1, 1]} : vector<4x2x16x128xf32> to vector<4x1x16x128xf32>
    %128 = vector.shape_cast %127 : vector<4x1x16x128xf32> to vector<4x16x128xf32>
    %129 = vector.extract_strided_slice %126 {offsets = [0, 1, 0, 0], sizes = [4, 1, 16, 128], strides = [1, 1, 1, 1]} : vector<4x2x16x128xf32> to vector<4x1x16x128xf32>
    %130 = vector.shape_cast %129 : vector<4x1x16x128xf32> to vector<4x16x128xf32>
    %131 = arith.maximumf %128, %130 : vector<4x16x128xf32>
    %c0_39 = arith.constant 0 : index
    %c0_40 = arith.constant 0 : index
    %c0_41 = arith.constant 0 : index
    %132 = vector.load %arg11[%c0_39, %c0_40, %c0_41] : memref<4x16x128xf32, #tpu.memory_space<vmem>>, vector<4x16x128xf32>
    tpu.vector_store %arg11[%c0_39, %c0_40, %c0_41], %131 {strides = array<i32>} : memref<4x16x128xf32, #tpu.memory_space<vmem>>, vector<4x16x128xf32>,
    %c0_42 = arith.constant 0 : index
    %c0_43 = arith.constant 0 : index
    %c0_44 = arith.constant 0 : index
    %133 = tpu.strided_load %arg11[%c0_42, %c0_43, %c0_44] {strides = array<i32: 1, 2, 1>} : memref<4x16x128xf32, #tpu.memory_space<vmem>>, vector<4x8x128xf32>
    %c0_45 = arith.constant 0 : index
    %c1 = arith.constant 1 : index
    %c0_46 = arith.constant 0 : index
    %134 = tpu.strided_load %arg11[%c0_45, %c1, %c0_46] {strides = array<i32: 1, 2, 1>} : memref<4x16x128xf32, #tpu.memory_space<vmem>>, vector<4x8x128xf32>
    %135 = arith.maximumf %133, %134 : vector<4x8x128xf32>
    %c0_47 = arith.constant 0 : index
    %c0_48 = arith.constant 0 : index
    %c0_49 = arith.constant 0 : index
    %c0_50 = arith.constant 0 : index
    %136 = vector.load %arg9[%c0_47, %c0_48, %c0_49, %c0_50] : memref<1x4x8x128xf32, #tpu.memory_space<vmem>>, vector<1x4x8x128xf32>
    %137 = vector.shape_cast %136 : vector<1x4x8x128xf32> to vector<4x8x128xf32>
    %138 = vector.shape_cast %135 : vector<4x8x128xf32> to vector<1x4x8x128xf32>
    tpu.vector_store %arg9[%c0_47, %c0_48, %c0_49, %c0_50], %138 {strides = array<i32>} : memref<1x4x8x128xf32, #tpu.memory_space<vmem>>, vector<1x4x8x128xf32>,
    return
  }
  func.func @transform_0(%arg0: i32, %arg1: i32) -> (i32, i32, i32, i32) {
    %c0_i32 = arith.constant 0 : i32
    %c0_i32_0 = arith.constant 0 : i32
    %c0_i32_1 = arith.constant 0 : i32
    return %arg0, %arg1, %c0_i32, %c0_i32_0 : i32, i32, i32, i32
  }
  func.func @transform_1(%arg0: i32, %arg1: i32) -> (i32, i32) {
    %c0_i32 = arith.constant 0 : i32
    %c0_i32_0 = arith.constant 0 : i32
    %c0_i32_1 = arith.constant 0 : i32
    return %c0_i32, %c0_i32_0 : i32, i32
  }
  func.func @transform_2(%arg0: i32, %arg1: i32) -> (i32, i32) {
    %c0_i32 = arith.constant 0 : i32
    %c0_i32_0 = arith.constant 0 : i32
    %c0_i32_1 = arith.constant 0 : i32
    return %c0_i32, %c0_i32_0 : i32, i32
  }
  func.func @transform_3(%arg0: i32, %arg1: i32) -> (i32, i32, i32) {
    %c0_i32 = arith.constant 0 : i32
    %c0_i32_0 = arith.constant 0 : i32
    %c0_i32_1 = arith.constant 0 : i32
    %c0_i32_2 = arith.constant 0 : i32
    return %c0_i32, %c0_i32_0, %c0_i32_1 : i32, i32, i32
  }
  func.func @transform_4(%arg0: i32, %arg1: i32) -> (i32, i32) {
    %c0_i32 = arith.constant 0 : i32
    %c0_i32_0 = arith.constant 0 : i32
    %c0_i32_1 = arith.constant 0 : i32
    return %c0_i32, %c0_i32_0 : i32, i32
  }
  func.func @transform_5(%arg0: i32, %arg1: i32) -> (i32, i32) {
    %c0_i32 = arith.constant 0 : i32
    %c0_i32_0 = arith.constant 0 : i32
    %c0_i32_1 = arith.constant 0 : i32
    return %c0_i32, %c0_i32_0 : i32, i32
  }
  func.func @transform_6(%arg0: i32, %arg1: i32) -> (i32, i32) {
    %c0_i32 = arith.constant 0 : i32
    %c0_i32_0 = arith.constant 0 : i32
    %c0_i32_1 = arith.constant 0 : i32
    return %c0_i32, %c0_i32_0 : i32, i32
  }
  func.func @transform_7(%arg0: i32, %arg1: i32) -> (i32, i32, i32, i32) {
    %c0_i32 = arith.constant 0 : i32
    %c0_i32_0 = arith.constant 0 : i32
    %c0_i32_1 = arith.constant 0 : i32
    return %arg0, %arg1, %c0_i32, %c0_i32_0 : i32, i32, i32, i32
  }
}

module attributes {stable_mosaic.version = 11 : i64} {
  func.func @downmix_ffn_kernel(%arg0: i32, %arg1: i32, %arg2: memref<1x1x160x128xbf16, #tpu.memory_space<vmem>>, %arg3: memref<128x512xbf16, #tpu.memory_space<vmem>>, %arg4: memref<1x512xf32, #tpu.memory_space<vmem>>, %arg5: memref<3x3x512xf32, #tpu.memory_space<vmem>>, %arg6: memref<1x512xf32, #tpu.memory_space<vmem>>, %arg7: memref<256x128xbf16, #tpu.memory_space<vmem>>, %arg8: memref<1x128xf32, #tpu.memory_space<vmem>>, %arg9: memref<1x4x8x128xf32, #tpu.memory_space<vmem>>, %arg10: memref<160x512xbf16, #tpu.memory_space<vmem>>, %arg11: memref<4x16x128xf32, #tpu.memory_space<vmem>>) attributes {dimension_semantics = [#tpu.dimension_semantics<parallel>, #tpu.dimension_semantics<parallel>], iteration_bounds = array<i64: 2, 2>, scalar_prefetch = 0 : i64, scratch_operands = 2 : i64, tpu.core_type = #tpu.core_type<tc>, window_params = [{transform_indices = @transform_0, window_bounds = array<i64: 1, 1, 160, 128>}, {pipeline_mode = #tpu.pipeline_mode<synchronous>, transform_indices = @transform_1, window_bounds = array<i64: 128, 512>}, {pipeline_mode = #tpu.pipeline_mode<synchronous>, transform_indices = @transform_2, window_bounds = array<i64: 1, 512>}, {pipeline_mode = #tpu.pipeline_mode<synchronous>, transform_indices = @transform_3, window_bounds = array<i64: 3, 3, 512>}, {pipeline_mode = #tpu.pipeline_mode<synchronous>, transform_indices = @transform_4, window_bounds = array<i64: 1, 512>}, {pipeline_mode = #tpu.pipeline_mode<synchronous>, transform_indices = @transform_5, window_bounds = array<i64: 256, 128>}, {pipeline_mode = #tpu.pipeline_mode<synchronous>, transform_indices = @transform_6, window_bounds = array<i64: 1, 128>}, {transform_indices = @transform_7, window_bounds = array<i64: 1, 4, 8, 128>}]} {
    %c0 = arith.constant 0 : index
    %c0_0 = arith.constant 0 : index
    %c0_1 = arith.constant 0 : index
    %c0_2 = arith.constant 0 : index
    %0 = vector.load %arg2[%c0, %c0_0, %c0_1, %c0_2] : memref<1x1x160x128xbf16, #tpu.memory_space<vmem>>, vector<1x1x160x128xbf16>
    %1 = vector.shape_cast %0 : vector<1x1x160x128xbf16> to vector<160x128xbf16>
    %c0_3 = arith.constant 0 : index
    %c0_4 = arith.constant 0 : index
    %2 = vector.load %arg3[%c0_3, %c0_4] : memref<128x512xbf16, #tpu.memory_space<vmem>>, vector<128x512xbf16>
    %cst = arith.constant dense<0.000000e+00> : vector<160x512xf32>
    %3 = tpu.matmul %1, %2, %cst {dimension_numbers = #tpu.dot_dimension_numbers<[1], [0], [0], [1], [0, 0, 1, 1], [], []>} : vector<160x128xbf16>, vector<128x512xbf16>, vector<160x512xf32> -> vector<160x512xf32>
    %c0_5 = arith.constant 0 : index
    %c0_6 = arith.constant 0 : index
    %4 = vector.load %arg4[%c0_5, %c0_6] : memref<1x512xf32, #tpu.memory_space<vmem>>, vector<1x512xf32>
    %5 = vector.broadcast %4 : vector<1x512xf32> to vector<160x512xf32>
    %6 = arith.addf %3, %5 : vector<160x512xf32>
    %7 = arith.truncf %6 : vector<160x512xf32> to vector<160x512xbf16>
    %c0_7 = arith.constant 0 : index
    %c0_8 = arith.constant 0 : index
    %8 = vector.load %arg10[%c0_7, %c0_8] : memref<160x512xbf16, #tpu.memory_space<vmem>>, vector<160x512xbf16>
    tpu.vector_store %arg10[%c0_7, %c0_8], %7 {strides = array<i32>} : memref<160x512xbf16, #tpu.memory_space<vmem>>, vector<160x512xbf16>,
    %c0_i32 = arith.constant 0 : i32
    %9 = arith.cmpi eq, %arg1, %c0_i32 : i32
    %10 = arith.extui %9 : i1 to i32
    %c0_i32_9 = arith.constant 0 : i32
    %11 = arith.cmpi ne, %10, %c0_i32_9 : i32
    scf.if %11 {
      %cst_51 = arith.constant 0.000000e+00 : bf16
      %139 = vector.broadcast %cst_51 : bf16 to vector<16x512xbf16>
      %c0_52 = arith.constant 0 : index
      %c0_53 = arith.constant 0 : index
      %140 = vector.load %arg10[%c0_52, %c0_53] : memref<160x512xbf16, #tpu.memory_space<vmem>>, vector<16x512xbf16>
      tpu.vector_store %arg10[%c0_52, %c0_53], %139 {strides = array<i32>} : memref<160x512xbf16, #tpu.memory_space<vmem>>, vector<16x512xbf16>,
    } else {
    }
    %c1_i32 = arith.constant 1 : i32
    %12 = arith.cmpi eq, %arg1, %c1_i32 : i32
    %13 = arith.extui %12 : i1 to i32
    %c0_i32_10 = arith.constant 0 : i32
    %14 = arith.cmpi ne, %13, %c0_i32_10 : i32
    scf.if %14 {
      %cst_51 = arith.constant 0.000000e+00 : bf16
      %139 = vector.broadcast %cst_51 : bf16 to vector<16x512xbf16>
      %c144 = arith.constant 144 : index
      %c0_52 = arith.constant 0 : index
      %140 = vector.load %arg10[%c144, %c0_52] : memref<160x512xbf16, #tpu.memory_space<vmem>>, vector<16x512xbf16>
      tpu.vector_store %arg10[%c144, %c0_52], %139 {strides = array<i32>} : memref<160x512xbf16, #tpu.memory_space<vmem>>, vector<16x512xbf16>,
    } else {
    }
    %c0_11 = arith.constant 0 : index
    %c0_12 = arith.constant 0 : index
    %c0_13 = arith.constant 0 : index
    %15 = vector.load %arg5[%c0_11, %c0_12, %c0_13] : memref<3x3x512xf32, #tpu.memory_space<vmem>>, vector<3x3x512xf32>
    %16 = tpu.iota {dimensions = array<i32: 0>} : vector<128x1xi32>
    %c15_i32 = arith.constant 15 : i32
    %17 = vector.broadcast %c15_i32 : i32 to vector<128x1xi32>
    %18 = arith.andi %16, %17 : vector<128x1xi32>
    %c0_i32_14 = arith.constant 0 : i32
    %19 = vector.broadcast %c0_i32_14 : i32 to vector<128x1xi32>
    %20 = arith.cmpi ne, %18, %19 : vector<128x1xi32>
    %c15_i32_15 = arith.constant 15 : i32
    %21 = vector.broadcast %c15_i32_15 : i32 to vector<128x1xi32>
    %22 = arith.cmpi ne, %18, %21 : vector<128x1xi32>
    %c0_16 = arith.constant 0 : index
    %c0_17 = arith.constant 0 : index
    %23 = vector.load %arg10[%c0_16, %c0_17] : memref<160x512xbf16, #tpu.memory_space<vmem>>, vector<128x512xbf16>
    %24 = arith.extf %23 : vector<128x512xbf16> to vector<128x512xf32>
    %25 = vector.extract_strided_slice %15 {offsets = [0, 1, 0], sizes = [1, 1, 512], strides = [1, 1, 1]} : vector<3x3x512xf32> to vector<1x1x512xf32>
    %26 = vector.shape_cast %25 : vector<1x1x512xf32> to vector<512xf32>
    %27 = vector.shape_cast %26 : vector<512xf32> to vector<1x512xf32>
    %28 = vector.broadcast %27 : vector<1x512xf32> to vector<128x512xf32>
    %29 = arith.mulf %24, %28 : vector<128x512xf32>
    %c1_i32_18 = arith.constant 1 : i32
    %30 = tpu.dynamic_rotate %24 by %c1_i32_18 dim 0 : vector<128x512xf32>, i32 -> vector<128x512xf32>
    %cst_19 = arith.constant 0.000000e+00 : f32
    %31 = vector.shape_cast %20 : vector<128x1xi1> to vector<128x1xi1>
    %32 = vector.broadcast %31 : vector<128x1xi1> to vector<128x512xi1>
    %33 = vector.broadcast %cst_19 : f32 to vector<128x512xf32>
    %34 = arith.select %32, %30, %33 : vector<128x512xi1>, vector<128x512xf32>
    %35 = vector.extract_strided_slice %15 {offsets = [0, 0, 0], sizes = [1, 1, 512], strides = [1, 1, 1]} : vector<3x3x512xf32> to vector<1x1x512xf32>
    %36 = vector.shape_cast %35 : vector<1x1x512xf32> to vector<512xf32>
    %37 = vector.shape_cast %36 : vector<512xf32> to vector<1x512xf32>
    %38 = vector.broadcast %37 : vector<1x512xf32> to vector<128x512xf32>
    %39 = arith.mulf %34, %38 : vector<128x512xf32>
    %40 = arith.addf %29, %39 : vector<128x512xf32>
    %c127_i32 = arith.constant 127 : i32
    %41 = tpu.dynamic_rotate %24 by %c127_i32 dim 0 : vector<128x512xf32>, i32 -> vector<128x512xf32>
    %cst_20 = arith.constant 0.000000e+00 : f32
    %42 = vector.shape_cast %22 : vector<128x1xi1> to vector<128x1xi1>
    %43 = vector.broadcast %42 : vector<128x1xi1> to vector<128x512xi1>
    %44 = vector.broadcast %cst_20 : f32 to vector<128x512xf32>
    %45 = arith.select %43, %41, %44 : vector<128x512xi1>, vector<128x512xf32>
    %46 = vector.extract_strided_slice %15 {offsets = [0, 2, 0], sizes = [1, 1, 512], strides = [1, 1, 1]} : vector<3x3x512xf32> to vector<1x1x512xf32>
    %47 = vector.shape_cast %46 : vector<1x1x512xf32> to vector<512xf32>
    %48 = vector.shape_cast %47 : vector<512xf32> to vector<1x512xf32>
    %49 = vector.broadcast %48 : vector<1x512xf32> to vector<128x512xf32>
    %50 = arith.mulf %45, %49 : vector<128x512xf32>
    %51 = arith.addf %40, %50 : vector<128x512xf32>
    %c16 = arith.constant 16 : index
    %c0_21 = arith.constant 0 : index
    %52 = vector.load %arg10[%c16, %c0_21] : memref<160x512xbf16, #tpu.memory_space<vmem>>, vector<128x512xbf16>
    %53 = arith.extf %52 : vector<128x512xbf16> to vector<128x512xf32>
    %54 = vector.extract_strided_slice %15 {offsets = [1, 1, 0], sizes = [1, 1, 512], strides = [1, 1, 1]} : vector<3x3x512xf32> to vector<1x1x512xf32>
    %55 = vector.shape_cast %54 : vector<1x1x512xf32> to vector<512xf32>
    %56 = vector.shape_cast %55 : vector<512xf32> to vector<1x512xf32>
    %57 = vector.broadcast %56 : vector<1x512xf32> to vector<128x512xf32>
    %58 = arith.mulf %53, %57 : vector<128x512xf32>
    %59 = arith.addf %51, %58 : vector<128x512xf32>
    %c1_i32_22 = arith.constant 1 : i32
    %60 = tpu.dynamic_rotate %53 by %c1_i32_22 dim 0 : vector<128x512xf32>, i32 -> vector<128x512xf32>
    %cst_23 = arith.constant 0.000000e+00 : f32
    %61 = vector.shape_cast %20 : vector<128x1xi1> to vector<128x1xi1>
    %62 = vector.broadcast %61 : vector<128x1xi1> to vector<128x512xi1>
    %63 = vector.broadcast %cst_23 : f32 to vector<128x512xf32>
    %64 = arith.select %62, %60, %63 : vector<128x512xi1>, vector<128x512xf32>
    %65 = vector.extract_strided_slice %15 {offsets = [1, 0, 0], sizes = [1, 1, 512], strides = [1, 1, 1]} : vector<3x3x512xf32> to vector<1x1x512xf32>
    %66 = vector.shape_cast %65 : vector<1x1x512xf32> to vector<512xf32>
    %67 = vector.shape_cast %66 : vector<512xf32> to vector<1x512xf32>
    %68 = vector.broadcast %67 : vector<1x512xf32> to vector<128x512xf32>
    %69 = arith.mulf %64, %68 : vector<128x512xf32>
    %70 = arith.addf %59, %69 : vector<128x512xf32>
    %c127_i32_24 = arith.constant 127 : i32
    %71 = tpu.dynamic_rotate %53 by %c127_i32_24 dim 0 : vector<128x512xf32>, i32 -> vector<128x512xf32>
    %cst_25 = arith.constant 0.000000e+00 : f32
    %72 = vector.shape_cast %22 : vector<128x1xi1> to vector<128x1xi1>
    %73 = vector.broadcast %72 : vector<128x1xi1> to vector<128x512xi1>
    %74 = vector.broadcast %cst_25 : f32 to vector<128x512xf32>
    %75 = arith.select %73, %71, %74 : vector<128x512xi1>, vector<128x512xf32>
    %76 = vector.extract_strided_slice %15 {offsets = [1, 2, 0], sizes = [1, 1, 512], strides = [1, 1, 1]} : vector<3x3x512xf32> to vector<1x1x512xf32>
    %77 = vector.shape_cast %76 : vector<1x1x512xf32> to vector<512xf32>
    %78 = vector.shape_cast %77 : vector<512xf32> to vector<1x512xf32>
    %79 = vector.broadcast %78 : vector<1x512xf32> to vector<128x512xf32>
    %80 = arith.mulf %75, %79 : vector<128x512xf32>
    %81 = arith.addf %70, %80 : vector<128x512xf32>
    %c32 = arith.constant 32 : index
    %c0_26 = arith.constant 0 : index
    %82 = vector.load %arg10[%c32, %c0_26] : memref<160x512xbf16, #tpu.memory_space<vmem>>, vector<128x512xbf16>
    %83 = arith.extf %82 : vector<128x512xbf16> to vector<128x512xf32>
    %84 = vector.extract_strided_slice %15 {offsets = [2, 1, 0], sizes = [1, 1, 512], strides = [1, 1, 1]} : vector<3x3x512xf32> to vector<1x1x512xf32>
    %85 = vector.shape_cast %84 : vector<1x1x512xf32> to vector<512xf32>
    %86 = vector.shape_cast %85 : vector<512xf32> to vector<1x512xf32>
    %87 = vector.broadcast %86 : vector<1x512xf32> to vector<128x512xf32>
    %88 = arith.mulf %83, %87 : vector<128x512xf32>
    %89 = arith.addf %81, %88 : vector<128x512xf32>
    %c1_i32_27 = arith.constant 1 : i32
    %90 = tpu.dynamic_rotate %83 by %c1_i32_27 dim 0 : vector<128x512xf32>, i32 -> vector<128x512xf32>
    %cst_28 = arith.constant 0.000000e+00 : f32
    %91 = vector.shape_cast %20 : vector<128x1xi1> to vector<128x1xi1>
    %92 = vector.broadcast %91 : vector<128x1xi1> to vector<128x512xi1>
    %93 = vector.broadcast %cst_28 : f32 to vector<128x512xf32>
    %94 = arith.select %92, %90, %93 : vector<128x512xi1>, vector<128x512xf32>
    %95 = vector.extract_strided_slice %15 {offsets = [2, 0, 0], sizes = [1, 1, 512], strides = [1, 1, 1]} : vector<3x3x512xf32> to vector<1x1x512xf32>
    %96 = vector.shape_cast %95 : vector<1x1x512xf32> to vector<512xf32>
    %97 = vector.shape_cast %96 : vector<512xf32> to vector<1x512xf32>
    %98 = vector.broadcast %97 : vector<1x512xf32> to vector<128x512xf32>
    %99 = arith.mulf %94, %98 : vector<128x512xf32>
    %100 = arith.addf %89, %99 : vector<128x512xf32>
    %c127_i32_29 = arith.constant 127 : i32
    %101 = tpu.dynamic_rotate %83 by %c127_i32_29 dim 0 : vector<128x512xf32>, i32 -> vector<128x512xf32>
    %cst_30 = arith.constant 0.000000e+00 : f32
    %102 = vector.shape_cast %22 : vector<128x1xi1> to vector<128x1xi1>
    %103 = vector.broadcast %102 : vector<128x1xi1> to vector<128x512xi1>
    %104 = vector.broadcast %cst_30 : f32 to vector<128x512xf32>
    %105 = arith.select %103, %101, %104 : vector<128x512xi1>, vector<128x512xf32>
    %106 = vector.extract_strided_slice %15 {offsets = [2, 2, 0], sizes = [1, 1, 512], strides = [1, 1, 1]} : vector<3x3x512xf32> to vector<1x1x512xf32>
    %107 = vector.shape_cast %106 : vector<1x1x512xf32> to vector<512xf32>
    %108 = vector.shape_cast %107 : vector<512xf32> to vector<1x512xf32>
    %109 = vector.broadcast %108 : vector<1x512xf32> to vector<128x512xf32>
    %110 = arith.mulf %105, %109 : vector<128x512xf32>
    %111 = arith.addf %100, %110 : vector<128x512xf32>
    %c0_31 = arith.constant 0 : index
    %c0_32 = arith.constant 0 : index
    %112 = vector.load %arg6[%c0_31, %c0_32] : memref<1x512xf32, #tpu.memory_space<vmem>>, vector<1x512xf32>
    %113 = vector.broadcast %112 : vector<1x512xf32> to vector<128x512xf32>
    %114 = arith.addf %111, %113 : vector<128x512xf32>
    %115 = vector.extract_strided_slice %114 {offsets = [0, 0], sizes = [128, 256], strides = [1, 1]} : vector<128x512xf32> to vector<128x256xf32>
    %cst_33 = arith.constant 0.000000e+00 : f32
    %116 = vector.broadcast %cst_33 : f32 to vector<128x256xf32>
    %117 = arith.maximumf %115, %116 : vector<128x256xf32>
    %118 = vector.extract_strided_slice %114 {offsets = [0, 256], sizes = [128, 256], strides = [1, 1]} : vector<128x512xf32> to vector<128x256xf32>
    %119 = arith.mulf %118, %117 : vector<128x256xf32>
    %120 = arith.truncf %119 : vector<128x256xf32> to vector<128x256xbf16>
    %c0_34 = arith.constant 0 : index
    %c0_35 = arith.constant 0 : index
    %121 = vector.load %arg7[%c0_34, %c0_35] : memref<256x128xbf16, #tpu.memory_space<vmem>>, vector<256x128xbf16>
    %cst_36 = arith.constant dense<0.000000e+00> : vector<128x128xf32>
    %122 = tpu.matmul %120, %121, %cst_36 {dimension_numbers = #tpu.dot_dimension_numbers<[1], [0], [0], [1], [0, 0, 1, 1], [], []>} : vector<128x256xbf16>, vector<256x128xbf16>, vector<128x128xf32> -> vector<128x128xf32>
    %c0_37 = arith.constant 0 : index
    %c0_38 = arith.constant 0 : index
    %123 = vector.load %arg8[%c0_37, %c0_38] : memref<1x128xf32, #tpu.memory_space<vmem>>, vector<1x128xf32>
    %124 = vector.broadcast %123 : vector<1x128xf32> to vector<128x128xf32>
    %125 = arith.addf %122, %124 : vector<128x128xf32>
    %126 = vector.shape_cast %125 : vector<128x128xf32> to vector<4x2x16x128xf32>
    %127 = vector.extract_strided_slice %126 {offsets = [0, 0, 0, 0], sizes = [4, 1, 16, 128], strides = [1, 1, 1, 1]} : vector<4x2x16x128xf32> to vector<4x1x16x128xf32>
    %128 = vector.shape_cast %127 : vector<4x1x16x128xf32> to vector<4x16x128xf32>
    %129 = vector.extract_strided_slice %126 {offsets = [0, 1, 0, 0], sizes = [4, 1, 16, 128], strides = [1, 1, 1, 1]} : vector<4x2x16x128xf32> to vector<4x1x16x128xf32>
    %130 = vector.shape_cast %129 : vector<4x1x16x128xf32> to vector<4x16x128xf32>
    %131 = arith.maximumf %128, %130 : vector<4x16x128xf32>
    %c0_39 = arith.constant 0 : index
    %c0_40 = arith.constant 0 : index
    %c0_41 = arith.constant 0 : index
    %132 = vector.load %arg11[%c0_39, %c0_40, %c0_41] : memref<4x16x128xf32, #tpu.memory_space<vmem>>, vector<4x16x128xf32>
    tpu.vector_store %arg11[%c0_39, %c0_40, %c0_41], %131 {strides = array<i32>} : memref<4x16x128xf32, #tpu.memory_space<vmem>>, vector<4x16x128xf32>,
    %c0_42 = arith.constant 0 : index
    %c0_43 = arith.constant 0 : index
    %c0_44 = arith.constant 0 : index
    %133 = tpu.strided_load %arg11[%c0_42, %c0_43, %c0_44] {strides = array<i32: 1, 2, 1>} : memref<4x16x128xf32, #tpu.memory_space<vmem>>, vector<4x8x128xf32>
    %c0_45 = arith.constant 0 : index
    %c1 = arith.constant 1 : index
    %c0_46 = arith.constant 0 : index
    %134 = tpu.strided_load %arg11[%c0_45, %c1, %c0_46] {strides = array<i32: 1, 2, 1>} : memref<4x16x128xf32, #tpu.memory_space<vmem>>, vector<4x8x128xf32>
    %135 = arith.maximumf %133, %134 : vector<4x8x128xf32>
    %c0_47 = arith.constant 0 : index
    %c0_48 = arith.constant 0 : index
    %c0_49 = arith.constant 0 : index
    %c0_50 = arith.constant 0 : index
    %136 = vector.load %arg9[%c0_47, %c0_48, %c0_49, %c0_50] : memref<1x4x8x128xf32, #tpu.memory_space<vmem>>, vector<1x4x8x128xf32>
    %137 = vector.shape_cast %136 : vector<1x4x8x128xf32> to vector<4x8x128xf32>
    %138 = vector.shape_cast %135 : vector<4x8x128xf32> to vector<1x4x8x128xf32>
    tpu.vector_store %arg9[%c0_47, %c0_48, %c0_49, %c0_50], %138 {strides = array<i32>} : memref<1x4x8x128xf32, #tpu.memory_space<vmem>>, vector<1x4x8x128xf32>,
    return
  }
  func.func @transform_0(%arg0: i32, %arg1: i32) -> (i32, i32, i32, i32) {
    %c0_i32 = arith.constant 0 : i32
    %c0_i32_0 = arith.constant 0 : i32
    %c0_i32_1 = arith.constant 0 : i32
    return %arg0, %arg1, %c0_i32, %c0_i32_0 : i32, i32, i32, i32
  }
  func.func @transform_1(%arg0: i32, %arg1: i32) -> (i32, i32) {
    %c0_i32 = arith.constant 0 : i32
    %c0_i32_0 = arith.constant 0 : i32
    %c0_i32_1 = arith.constant 0 : i32
    return %c0_i32, %c0_i32_0 : i32, i32
  }
  func.func @transform_2(%arg0: i32, %arg1: i32) -> (i32, i32) {
    %c0_i32 = arith.constant 0 : i32
    %c0_i32_0 = arith.constant 0 : i32
    %c0_i32_1 = arith.constant 0 : i32
    return %c0_i32, %c0_i32_0 : i32, i32
  }
  func.func @transform_3(%arg0: i32, %arg1: i32) -> (i32, i32, i32) {
    %c0_i32 = arith.constant 0 : i32
    %c0_i32_0 = arith.constant 0 : i32
    %c0_i32_1 = arith.constant 0 : i32
    %c0_i32_2 = arith.constant 0 : i32
    return %c0_i32, %c0_i32_0, %c0_i32_1 : i32, i32, i32
  }
  func.func @transform_4(%arg0: i32, %arg1: i32) -> (i32, i32) {
    %c0_i32 = arith.constant 0 : i32
    %c0_i32_0 = arith.constant 0 : i32
    %c0_i32_1 = arith.constant 0 : i32
    return %c0_i32, %c0_i32_0 : i32, i32
  }
  func.func @transform_5(%arg0: i32, %arg1: i32) -> (i32, i32) {
    %c0_i32 = arith.constant 0 : i32
    %c0_i32_0 = arith.constant 0 : i32
    %c0_i32_1 = arith.constant 0 : i32
    return %c0_i32, %c0_i32_0 : i32, i32
  }
  func.func @transform_6(%arg0: i32, %arg1: i32) -> (i32, i32) {
    %c0_i32 = arith.constant 0 : i32
    %c0_i32_0 = arith.constant 0 : i32
    %c0_i32_1 = arith.constant 0 : i32
    return %c0_i32, %c0_i32_0 : i32, i32
  }
  func.func @transform_7(%arg0: i32, %arg1: i32) -> (i32, i32, i32, i32) {
    %c0_i32 = arith.constant 0 : i32
    %c0_i32_0 = arith.constant 0 : i32
    %c0_i32_1 = arith.constant 0 : i32
    return %arg0, %arg1, %c0_i32, %c0_i32_0 : i32, i32, i32, i32
  }
}

</mosaic_0001>

<bundles_post_ra>
// kernel: tpu_custom_call.1
= control target key start
LH: loop header
LB: loop body
LE: loop exit
PB: predicated region body
PF: predicated region fallthrough
CT: control target
= control target key end

     0   :  { %s9325_s0 = inlined_call_operand.hbm [shape: bf16[2,2,160,128], index: 0, kind: input, shape index: {}]   ;;  %s9326_s1 = inlined_call_operand.hbm [shape: bf16[128,512], index: 1, kind: input, shape index: {}]   ;;  %s9327_s2 = inlined_call_operand.hbm [shape: f32[1,512], index: 2, kind: input, shape index: {}]   ;;  %s9328_s3 = inlined_call_operand.hbm [shape: f32[3,3,512], index: 3, kind: input, shape index: {}]   ;;  %s9329_s4 = inlined_call_operand.vmem [shape: f32[1,512], index: 4, kind: input, shape index: {}]   ;;  %s9330_s5 = inlined_call_operand.hbm [shape: bf16[256,128], index: 5, kind: input, shape index: {}]   ;;  %s9331_s6 = inlined_call_operand.vmem [shape: f32[1,128], index: 6, kind: input, shape index: {}]   ;;  %s9332_s7 = inlined_call_operand.hbm [shape: f32[2,8,8,128], index: 7, kind: output, shape index: {}]  }
   0x1   :  { %9847 = sst [smem:[#allocation125_spill]] %s9326_s1 }
   0x2   :  { %9848 = sst [smem:[#allocation126_spill]] %s9327_s2 }
   0x3   :  { %9849 = sst [smem:[#allocation127_spill]] %s9328_s3 }
   0x4   :  { %9850 = sst [smem:[#allocation128_spill]] %s9330_s5 }
   0x5   :  { %9851 = sst [smem:[#allocation129_spill]] %s9332_s7 }
   0x6   :  { %12 = vsyncpa [#allocation5], 0 }
   0x7   :  { %14 = vsyncpa [#allocation5 + $0x1], 0 }
   0x8   :  { %15 = vsyncpa [#allocation8], 0 }
   0x9   :  { %16 = vsyncpa [#allocation11], 0 }
   0xa   :  { %17 = vsyncpa [#allocation6], 0 }
   0xb   :  { %19 = vsyncpa [#allocation6 + $0x1], 0  ;;  %s5246_s24 = smov 0   ;;  %s5248_s25 = smov 0  }
   0xc   :  { %s5250_s26 = smov 0   ;;  %s5252_s27 = smov 0  }
   0xd   :  { %s5254_s28 = smov 0   ;;  %s5256_s29 = smov 0  }
   0xe   :  { %s5258_s30 = smov 0   ;;  %s5260_s8 = smov 0  }
   0xf LB: > { %9852 = sst [smem:[#allocation18_spill]] %s5161_s24  ;;  %s4505_s9 = sadd.s32 4294967295, %s5189_s8   ;;  %s5189_s8 = sphi %s5260_s8, %s25_s8   ;;  %s5185_s30 = sphi %s5258_s30, %s10688_s30   ;;  %s5181_s29 = sphi %s5256_s29, %s10687_s29   ;;  %s5177_s28 = sphi %s5254_s28, %s10686_s28   ;;  %s5173_s27 = sphi %s5252_s27, %s10685_s27   ;;  %s5169_s26 = sphi %s5250_s26, %s10684_s26   ;;  %s5165_s25 = sphi %s5248_s25, %s10683_s25   ;;  %s5161_s24 = sphi %s5246_s24, %s10682_s24  }
  0x10   : > { %9853 = sst [smem:[#allocation19_spill]] %s5189_s8  ;;  %s4506_s10 = sadd.s32 4294967294, %s5189_s8  }
  0x11   : > { %p59_p0 = scmp.ne.s32.totalorder %s5165_s25, %s5161_s24  ;;  %p5290_p1 = scmp.eq.s32.totalorder %s4505_s9, 0 }
  0x12   : > { %p5294_p2 = scmp.eq.s32.totalorder %s4505_s9, 3  ;;  %p217_p3 = scmp.eq.s32.totalorder %s4506_s10, 3 }
  0x13   : > { %s9854_s11 = scalar_select %p5290_p1, 1, 0 }
  0x14   : > { %p5300_p4 = por %p5290_p1, %p59_p0  ;;  %p4507_p5 = scmp.ge.s32.totalorder %s5189_s8, 1 }
  0x15   : > { %p5305_p6 = por %p217_p3, %p59_p0  ;;  %p224_p7 = scmp.lt.s32.totalorder %s5189_s8, 5 }
  0x16   : > { %s9856_s13 = scalar_select %p5300_p4, 1, 0 }
  0x17   : > { %s9857_s14 = scalar_select %p5305_p6, 1, 0 }
  0x18   : > { %p5310_p8 = pnand %p4507_p5, %p224_p7  ;;  %s5191_s16 = smov [#allocation7]  }
  0x19   : > { %9858 = sst [smem:[#allocation20_spill]] %s9857_s14  ;;  %s236_s17 = sshll.u32 %s5191_s16, 4  ;;  %s237_s17 = int_to_ptr.vmem [resolvable:$true] %s236_s17 }
  0x1a   : > { %s9859_s15 = scalar_select %p5310_p8, 1, 0 }
  0x1b   : > { %p4771_p9 = pneg %p5310_p8  ;;  %s5192_s19 = smov [#allocation10]  }
  0x1c   : > { %s260_s20 = sshll.u32 %s5192_s19, 4  ;;  %s5193_s21 = smov [#allocation9]   ;;  %s261_s20 = int_to_ptr.vmem [resolvable:$true] %s260_s20 }
  0x1d   : > { %p5318_p10 = pnand %p4771_p9, %p5290_p1  ;;  %s250_s22 = sshll.u32 %s5193_s21, 4  ;;  %s251_s22 = int_to_ptr.vmem [resolvable:$true] %s250_s22 }
  0x1e   : > { %s4964_s23 = scalar_lea.vmem %s237_s17, 4096  ;;  %p4972_p3 = scmp.lt.s32.totalorder %s237_s17, %s237_s17 }
  0x1f   : > { %p4955_p11 = pneg %p5318_p10  ;;  %p4965_p12 = scmp.ne.s32.totalorder %s237_s17, %s4964_s23 }
  0x20   : > { %p4973_p5 = scmp.lt.s32.totalorder %s4964_s23, %s4964_s23 }
  0x21   : > { %p4967_p13 = pnand %p4965_p12, %p4955_p11 }
  0x22   : > { %p4974_p7 = por %p4973_p5, %p4972_p3 }
  0x23   : > { %p4968_p0 = pneg %p4967_p13 }
  0x25   : > { %p4975_p9 = pnand %p4974_p7, %p4968_p0 }
  0x27   : > { %4978 = shalt.err (!%p4975_p9)
}
  0x28   : > { %s5194_s9 = smov 256   ;;  %s5195_s10 = smov 16  }
  0x29   : > { %s9861_s1 = sld [smem:[#allocation125_spill]]  ;;  %s4990_s21 = scalar_lea.vmem %s261_s20, 768 }
  0x2a   : > { %p4991_p6 = scmp.ne.s32.totalorder %s261_s20, %s4990_s21  ;;  %p4998_p1 = scmp.lt.s32.totalorder %s261_s20, %s261_s20 }
  0x2b   : > { %p4999_p4 = scmp.lt.s32.totalorder %s4990_s21, %s4990_s21 }
  0x2c   : > { %p4993_p12 = pnand %p4991_p6, %p4955_p11 }
  0x2d   : > { %p5000_p3 = por %p4999_p4, %p4998_p1 }
  0x2e   : > { %p4994_p13 = pneg %p4993_p12 }
  0x2f   : > { %4774 = dma.hbm_to_vmem [thread:$0]  (!%p5318_p10), %s9861_s1, 4096, %s237_s17, [#allocation8], %s5194_s9, %s5194_s9, %s5195_s10  }
  0x30   : > { %p5001_p0 = pnand %p5000_p3, %p4994_p13 }
  0x32   : > { %5004 = shalt.err (!%p5001_p0)
}
  0x33   : > { %s9862_s3 = sld [smem:[#allocation127_spill]]  ;;  %s5016_s17 = scalar_lea.vmem %s251_s22, 64 }
  0x34   : > { %p5017_p5 = scmp.ne.s32.totalorder %s251_s22, %s5016_s17  ;;  %p5024_p9 = scmp.lt.s32.totalorder %s251_s22, %s251_s22 }
  0x35   : > { %p5025_p12 = scmp.lt.s32.totalorder %s5016_s17, %s5016_s17 }
  0x36   : > { %p5019_p7 = pnand %p5017_p5, %p4955_p11 }
  0x37   : > { %p5026_p8 = por %p5025_p12, %p5024_p9 }
  0x38   : > { %p5020_p6 = pneg %p5019_p7 }
  0x39   : > { %4780 = dma.hbm_to_vmem [thread:$0]  (!%p5318_p10), %s9862_s3, 768, %s261_s20, [#allocation11], %s5194_s9, %s5194_s9, %s5195_s10  }
  0x3a   : > { %p5027_p1 = pnand %p5026_p8, %p5020_p6 }
  0x3c   : > { %5030 = shalt.err (!%p5027_p1)
}
  0x3d   : > { %s9863_s2 = sld [smem:[#allocation126_spill]]  ;;  %s5196_s14 = smov [#allocation12]  }
  0x3e   : > { %s276_s20 = sshll.u32 %s5196_s14, 4  ;;  %s277_s20 = int_to_ptr.vmem [resolvable:$true] %s276_s20 }
  0x3f   : > { %s5042_s9 = scalar_lea.vmem %s277_s20, 2048  ;;  %p5050_p0 = scmp.lt.s32.totalorder %s277_s20, %s277_s20 }
  0x40   : > { %p5043_p4 = scmp.ne.s32.totalorder %s277_s20, %s5042_s9  ;;  %p5051_p5 = scmp.lt.s32.totalorder %s5042_s9, %s5042_s9 }
  0x42   : > { %p5045_p13 = pnand %p5043_p4, %p4955_p11  ;;  %p5052_p8 = por %p5051_p5, %p5050_p0 }
  0x43   : > { %4777 = dma.hbm_to_vmem [thread:$0]  (!%p5318_p10), %s9863_s2, 64, %s251_s22, [#allocation8]  }
  0x44   : > { %p5046_p3 = pneg %p5045_p13 }
  0x46   : > { %p5053_p7 = pnand %p5052_p8, %p5046_p3 }
  0x48   : > { %5056 = shalt.err (!%p5053_p7)
}
  0x49   : > { %s9338_s10 = smov 64   ;;  %s9339_s22 = smov 4  }
  0x4a   : > { %s9864_s5 = sld [smem:[#allocation128_spill]]  ;;  %s34_s17 = sadd.s32 1, %s5181_s29 }
  0x4b   : > { %s37_s16 = sadd.s32 1, %s5185_s30  ;;  %p35_p11 = scmp.ge.s32.totalorder %s34_s17, 2 }
  0x4c   : > { %s46_s19 = sadd.s32 1, %s5169_s26  ;;  %p53_p6 = scmp.ne.s32.totalorder %s5169_s26, %s5165_s25 }
  0x4d   : > { %p54_p9 = scmp.eq.s32.totalorder %s5189_s8, 0  ;;  %s10690_s17 = smov (%p35_p11, %s34_s17), 0 }
  0x4e   : > { %9865 = sst [smem:[#allocation21_spill]] %s10690_s17  ;;  %s10692_s16 = smov (!%p35_p11, %s37_s16), %s5185_s30 }
  0x4f   : > { %s42_s18 = ssub.s32 %s5181_s29, %s10690_s17  ;;  %p5370_p12 = por %p54_p9, %p53_p6 }
  0x50   : > { %4783 = dma.hbm_to_vmem [thread:$0]  (!%p5318_p10), %s9864_s5, 2048, %s277_s20, [#allocation11], %s9338_s10, %s9338_s10, %s9339_s22  }
  0x51   : > { %p39_p10 = scmp.ge.s32.totalorder %s10692_s16, 2  ;;  %p5376_p1 = por %p5294_p2, %p53_p6 }
  0x52   : > { %p4796_p4 = scmp.lt.s32.totalorder %s5189_s8, 4  ;;  %s293_s9 = sand.u32 1, %s5169_s26  }
  0x53   : > { %s10694_s16 = smov (%p39_p10, %s10692_s16), 0  ;;  %s4747_s21 = smul.u32 80, %s293_s9 }
  0x54   : > { %9868 = sst [smem:[#allocation22_spill]] %s10694_s16  ;;  %s41_s23 = ssub.s32 %s5185_s30, %s10694_s16 }
  0x55   : > { %s4748_s10 = smul.u32 20, %s5181_s29  ;;  %s43_s22 = sor.u32 %s42_s18, %s41_s23 }
  0x56   : > { %p44_p13 = scmp.eq.s32.totalorder %s43_s22, 0  ;;  %s4749_s1 = smul.u32 40, %s5185_s30 }
  0x57   : > { %s297_s2 = scalar_lea.vmem [#allocation4], %s4747_s21  ;;  %p5390_p3 = pnand %p4796_p4, %p5370_p12 }
  0x58   : > { %s306_s3 = sshll.u32 %s297_s2, 4  ;;  %s303_s17 = sadd.s32 %s4749_s1, %s4748_s10  ;;  %s307_s3 = int_to_ptr.vmem [resolvable:$true] %s306_s3 }
  0x59   : > { %s5395_s5 = scalar_select %p44_p13, %s5169_s26, %s46_s19  }
  0x5a   : > { %s4513_s24 = sshll.u32 %s303_s17, 6  ;;  %s294_s18 = scalar_lea.sflag [#allocation5], %s293_s9 }
  0x5b   : > { %s305_s16 = scalar_lea.hbm %s9325_s0, %s4513_s24  ;;  %p5059_p2 = pneg %p5390_p3 }
  0x5c   : > { %s5070_s22 = scalar_lea.vmem %s307_s3, 1280  ;;  %s5199_s2 = smov [#allocation4]  }
  0x5d   : > { %p5071_p0 = scmp.ne.s32.totalorder %s307_s3, %s5070_s22  ;;  %s5075_s14 = sshll.u32 %s5199_s2, 4  ;;  %s5076_s14 = int_to_ptr.vmem [resolvable:$false] %s5075_s14 }
  0x5e   : > { %s5077_s21 = scalar_lea.vmem %s5076_s14, 2560  ;;  %p5078_p7 = scmp.lt.s32.totalorder %s307_s3, %s5076_s14 }
  0x5f   : > { %p5073_p5 = pnand %p5071_p0, %p5059_p2  ;;  %p5079_p11 = scmp.lt.s32.totalorder %s5077_s21, %s5070_s22 }
  0x61   : > { %p5074_p8 = pneg %p5073_p5  ;;  %p5080_p6 = por %p5079_p11, %p5078_p7 }
  0x63   : > { %p5081_p9 = pnand %p5080_p6, %p5074_p8 }
  0x65   : > { %5084 = shalt.err (!%p5081_p9)
}
  0x66   : > { %s9870_s1 = smov 4   ;;  %s9871_s7 = smov 64  }
  0x67   : > { %4787 = dma.hbm_to_vmem [thread:$0]  (!%p5390_p3), %s305_s16, 1280, %s307_s3, %s294_s18, %s9871_s7, %s9871_s7, %s9870_s1  }
  0x68   : > { %p9872_p12 = scmp.ne.s32.totalorder %s9859_s15, 0 }
  0x6a   : > { %318 = sbr.rel (%p9872_p12) target bundleno = 1253 (0x4e5), region = 48 }
  0x6f   : > { %s5410_s24 = sand.u32 1, %s5165_s25   ;;  %p9873_p10 = scmp.ne.s32.totalorder %s9856_s13, 0 }
  0x70   : > { %s4750_s8 = smul.u32 80, %s5410_s24  ;;  %s321_s10 = scalar_lea.sflag [#allocation5], %s5410_s24 }
  0x72   : > { %s5414_s17 = scalar_lea.vmem [#allocation4], %s4750_s8 }
  0x73   : > { %5144 = dma.done.wait (%p9873_p10), %s321_s10, 1280  }
  0x74   : > { %5146 = vsyncadd (%p9873_p10), %s321_s10, 4294966016  ;;  %p9874_p4 = scmp.ne.s32.totalorder %s9854_s11, 0 }
  0x76   : > { %5148 = dma.done.wait (%p9874_p4), [#allocation8], 4160  }
  0x77   : > { %5150 = vsyncadd (%p9874_p4), [#allocation8], 4294963136 }
  0x78   : > { %5152 = dma.done.wait (%p9874_p4), [#allocation11], 2816  }
  0x79   : > { %5154 = vsyncadd (%p9874_p4), [#allocation11], 4294964480  ;;  %s4519_s3 = sshll.u32 %s5410_s24, 5  ;;  %v5200_v0 = vmov 0   ;;  %v4879_v1 = vld [vmem:[#allocation7 + $0xe4] ss:$16 sps:$4 sm:$0xff]   ;;  %v427_v43 = vlaneseq }
  0x7a   : > { %759 = vmatprep.mubr.bf16.mxu1 %v5200_v0  ;;  %699 = vmatprep.mubr.bf16.mxu0 %v5200_v0  ;;  %v4881_v2 = vld [vmem:[#allocation7 + $0xe0] ss:$16 sps:$4 sm:$0xff]   ;;  %v4882_v3 = vld [vmem:[#allocation7 + $0xc4] ss:$16 sps:$4 sm:$0xff]   ;;  %v4906_v17 = vld [vmem:[#allocation7 + $0xec] ss:$16 sps:$4 sm:$0xff]  }
  0x7b   : > { %4731 = vmatprep.subr.bf16.mxu1 %v4879_v1  ;;  %667 = vmatprep.subr.bf16.mxu0 %v4879_v1  ;;  %v4884_v4 = vld [vmem:[#allocation7 + $0xc0] ss:$16 sps:$4 sm:$0xff]   ;;  %v4885_v5 = vld [vmem:[#allocation7 + $0xa4] ss:$16 sps:$4 sm:$0xff]   ;;  %v4904_v19 = vld [vmem:[#allocation7 + $0xe8] ss:$16 sps:$4 sm:$0xff]  }
  0x7c   : > { %4739 = vmatpush1.bf16.msra.mxu1 %v4881_v2  ;;  %668 = vmatpush1.bf16.msra.mxu0 %v4881_v2  ;;  %v4887_v6 = vld [vmem:[#allocation7 + $0xa0] ss:$16 sps:$4 sm:$0xff]   ;;  %v4888_v7 = vld [vmem:[#allocation7 + $0x84] ss:$16 sps:$4 sm:$0xff]   ;;  %v4909_v20 = vld [vmem:[#allocation7 + $0xcc] ss:$16 sps:$4 sm:$0xff]  }
  0x7d   : > { %4732 = vmatprep.subr.bf16.mxu1 %v4882_v3  ;;  %669 = vmatprep.subr.bf16.mxu0 %v4882_v3  ;;  %v4890_v8 = vld [vmem:[#allocation7 + $0x80] ss:$16 sps:$4 sm:$0xff]   ;;  %v4891_v9 = vld [vmem:[#allocation7 + $0x64] ss:$16 sps:$4 sm:$0xff]   ;;  %v4907_v22 = vld [vmem:[#allocation7 + $0xc8] ss:$16 sps:$4 sm:$0xff]  }
  0x7e   : > { %v4893_v10 = vld [vmem:[#allocation7 + $0x60] ss:$16 sps:$4 sm:$0xff]   ;;  %v4894_v11 = vld [vmem:[#allocation7 + $0x44] ss:$16 sps:$4 sm:$0xff]   ;;  %v4913_v23 = vld [vmem:[#allocation7 + $0xac] ss:$16 sps:$4 sm:$0xff]  }
  0x7f   : > { %v4896_v12 = vld [vmem:[#allocation7 + $0x40] ss:$16 sps:$4 sm:$0xff]   ;;  %v4897_v13 = vld [vmem:[#allocation7 + $0x24] ss:$16 sps:$4 sm:$0xff]   ;;  %v4910_v24 = vld [vmem:[%s5414_s17 + $0x38] sm:$0xff]   ;;  %v5463_v44 = vshrl.u32 %v427_v43, 7 }
  0x80   : > { %4740 = vmatpush1.bf16.msra.mxu1 %v4884_v4  ;;  %670 = vmatpush1.bf16.msra.mxu0 %v4884_v4  ;;  %v4899_v14 = vld [vmem:[#allocation7 + $0x20] ss:$16 sps:$4 sm:$0xff]   ;;  %v4900_v15 = vld [vmem:[#allocation7 + $0x4] ss:$16 sps:$4 sm:$0xff]   ;;  %v4911_v25 = vld [vmem:[#allocation7 + $0xa8] ss:$16 sps:$4 sm:$0xff]  }
  0x81   : > { %4733 = vmatprep.subr.bf16.mxu1 %v4885_v5  ;;  %671 = vmatprep.subr.bf16.mxu0 %v4885_v5  ;;  %v4902_v16 = vld [vmem:[#allocation7] ss:$16 sps:$4 sm:$0xff]   ;;  %v4916_v26 = vld [vmem:[#allocation7 + $0x8c] ss:$16 sps:$4 sm:$0xff]   ;;  %v4914_v28 = vld [vmem:[#allocation7 + $0x88] ss:$16 sps:$4 sm:$0xff]  }
  0x82   : > { %v5432_v18 = vld [vmem:[%s5414_s17 + $0x30] sm:$0xff]   ;;  %v4931_v21 = vld [vmem:[%s5414_s17] sm:$0xff]   ;;  %v4932_v27 = vld [vmem:[%s5414_s17 + $0x8] sm:$0xff]   ;;  %v5466_v45 = vsub.s32 0, %v5463_v44  ;;  %v5469_v46 = vsub.s32 1, %v5463_v44  ;;  %s5576_s11 = scalar_lea.vmem [#allocation13], %s4519_s3 }
  0x83   : > { %v4920_v29 = vld [vmem:[#allocation7 + $0x6c] ss:$16 sps:$4 sm:$0xff]   ;;  %v4917_v30 = vld [vmem:[%s5414_s17 + $0x40] sm:$0xff]   ;;  %v4918_v31 = vld [vmem:[#allocation7 + $0x68] ss:$16 sps:$4 sm:$0xff]   ;;  %p4602_p13 = scmp.ne.s32.totalorder %s5173_s27, 0 }
  0x84   : > { %4741 = vmatpush1.bf16.msra.mxu1 %v4887_v6  ;;  %672 = vmatpush1.bf16.msra.mxu0 %v4887_v6  ;;  %v4923_v32 = vld [vmem:[#allocation7 + $0x4c] ss:$16 sps:$4 sm:$0xff]   ;;  %v4933_v33 = vld [vmem:[%s5414_s17 + $0x10] sm:$0xff]   ;;  %v4921_v34 = vld [vmem:[#allocation7 + $0x48] ss:$16 sps:$4 sm:$0xff]  }
  0x85   : > { %4734 = vmatprep.subr.bf16.mxu1 %v4888_v7  ;;  %673 = vmatprep.subr.bf16.mxu0 %v4888_v7  ;;  %v4927_v35 = vld [vmem:[#allocation7 + $0x2c] ss:$16 sps:$4 sm:$0xff]   ;;  %v4925_v37 = vld [vmem:[#allocation7 + $0x28] ss:$16 sps:$4 sm:$0xff]   ;;  %v4935_v41 = vld [vmem:[%s5414_s17 + $0x20] sm:$0xff]  }
  0x86   : > { %v4924_v36 = vld [vmem:[%s5414_s17 + $0x48] sm:$0xff]   ;;  %v4934_v39 = vld [vmem:[%s5414_s17 + $0x18] sm:$0xff]   ;;  %v5471_v47 = vld [vmem:[#allocation9] sm:$0xf] }
  0x87   : > { %v4930_v38 = vld [vmem:[#allocation7 + $0xc] ss:$16 sps:$4 sm:$0xff]   ;;  %v4928_v40 = vld [vmem:[#allocation7 + $0x8] ss:$16 sps:$4 sm:$0xff]   ;;  %v5475_v48 = vrot.slane %v5471_v47, %v5466_v45  ;;  %v5479_v49 = vrot.slane %v5471_v47, %v5469_v46 }
  0x88   : > { %4742 = vmatpush1.bf16.msra.mxu1 %v4890_v8  ;;  %674 = vmatpush1.bf16.msra.mxu0 %v4890_v8  ;;  %v4936_v42 = vld [vmem:[%s5414_s17 + $0x28] sm:$0xff]  }
  0x89   : > { %4735 = vmatprep.subr.bf16.mxu1 %v4891_v9  ;;  %675 = vmatprep.subr.bf16.mxu0 %v4891_v9 }
  0x8c   : > { %4743 = vmatpush1.bf16.msra.mxu1 %v4893_v10  ;;  %676 = vmatpush1.bf16.msra.mxu0 %v4893_v10 }
  0x8d   : > { %4736 = vmatprep.subr.bf16.mxu1 %v4894_v11  ;;  %677 = vmatprep.subr.bf16.mxu0 %v4894_v11 }
  0x90   : > { %4744 = vmatpush1.bf16.msra.mxu1 %v4896_v12  ;;  %678 = vmatpush1.bf16.msra.mxu0 %v4896_v12 }
  0x91   : > { %4737 = vmatprep.subr.bf16.mxu1 %v4897_v13  ;;  %679 = vmatprep.subr.bf16.mxu0 %v4897_v13 }
  0x94   : > { %4745 = vmatpush1.bf16.msra.mxu1 %v4899_v14  ;;  %680 = vmatpush1.bf16.msra.mxu0 %v4899_v14 }
  0x95   : > { %4738 = vmatprep.subr.bf16.mxu1 %v4900_v15  ;;  %681 = vmatprep.subr.bf16.mxu0 %v4900_v15 }
  0x98   : > { %4746 = vmatpush1.bf16.msra.mxu1 %v4902_v16  ;;  %682 = vmatpush1.bf16.msra.mxu0 %v4902_v16 }
  0x99   : > { %800 = vmatprep.subr.bf16.mxu1 %v4906_v17 }
  0x9b   : > { %760 = vmatmul.mubr.bf16.vlgmr.msra.gmra.mxu1 %v5432_v18  ;;  %700 = vmatmul.mubr.bf16.vlgmr.msra.gmra.mxu0 %v4931_v21 }
  0x9c   : > { %801 = vmatpush1.bf16.msra.mxu1 %v4904_v19  ;;  %769 = vmatprep.mubr.bf16.mxu1 %v5200_v0 }
  0x9d   : > { %802 = vmatprep.subr.bf16.mxu1 %v4909_v20  ;;  %709 = vmatprep.mubr.bf16.mxu0 %v5200_v0 }
  0xa0   : > { %803 = vmatpush1.bf16.msra.mxu1 %v4907_v22 }
  0xa1   : > { %804 = vmatprep.subr.bf16.mxu1 %v4913_v23 }
  0xa3   : > { %770 = vmatmul.mubr.bf16.gmra.mxu1 %v4910_v24  ;;  %710 = vmatmul.mubr.bf16.gmra.mxu0 %v4932_v27 }
  0xa4   : > { %805 = vmatpush1.bf16.msra.mxu1 %v4911_v25  ;;  %779 = vmatprep.mubr.bf16.mxu1 %v5200_v0 }
  0xa5   : > { %806 = vmatprep.subr.bf16.mxu1 %v4916_v26  ;;  %719 = vmatprep.mubr.bf16.mxu0 %v5200_v0 }
  0xa8   : > { %807 = vmatpush1.bf16.msra.mxu1 %v4914_v28 }
  0xa9   : > { %808 = vmatprep.subr.bf16.mxu1 %v4920_v29 }
  0xab   : > { %780 = vmatmul.mubr.bf16.gmra.mxu1 %v4917_v30  ;;  %720 = vmatmul.mubr.bf16.gmra.mxu0 %v4933_v33 }
  0xac   : > { %809 = vmatpush1.bf16.msra.mxu1 %v4918_v31  ;;  %789 = vmatprep.mubr.bf16.mxu1 %v5200_v0 }
  0xad   : > { %810 = vmatprep.subr.bf16.mxu1 %v4923_v32  ;;  %729 = vmatprep.mubr.bf16.mxu0 %v5200_v0 }
  0xb0   : > { %811 = vmatpush1.bf16.msra.mxu1 %v4921_v34 }
  0xb1   : > { %812 = vmatprep.subr.bf16.mxu1 %v4927_v35 }
  0xb3   : > { %790 = vmatmul.mubr.bf16.gmra.mxu1 %v4924_v36  ;;  %730 = vmatmul.mubr.bf16.gmra.mxu0 %v4934_v39 }
  0xb4   : > { %813 = vmatpush1.bf16.msra.mxu1 %v4925_v37  ;;  %832 = vmatprep.mubr.bf16.mxu1 %v5200_v0 }
  0xb5   : > { %814 = vmatprep.subr.bf16.mxu1 %v4930_v38  ;;  %739 = vmatprep.mubr.bf16.mxu0 %v5200_v0 }
  0xb8   : > { %815 = vmatpush1.bf16.msra.mxu1 %v4928_v40 }
  0xbb   : > { %833 = vmatmul.mubr.bf16.vlgmr.msra.gmra.mxu1 %v4931_v21  ;;  %740 = vmatmul.mubr.bf16.gmra.mxu0 %v4935_v41 }
  0xbc   : > { %842 = vmatprep.mubr.bf16.mxu1 %v5200_v0  ;;  %749 = vmatprep.mubr.bf16.mxu0 %v5200_v0 }
  0xc3   : > { %843 = vmatmul.mubr.bf16.gmra.mxu1 %v4932_v27  ;;  %750 = vmatmul.mubr.bf16.gmra.mxu0 %v4936_v42 }
  0xc4   : > { %852 = vmatprep.mubr.bf16.mxu1 %v5200_v0 }
  0xcb   : > { %853 = vmatmul.mubr.bf16.gmra.mxu1 %v4933_v33 }
  0xcc   : > { %862 = vmatprep.mubr.bf16.mxu1 %v5200_v0 }
  0xd3   : > { %863 = vmatmul.mubr.bf16.gmra.mxu1 %v4934_v39 }
  0xd4   : > { %872 = vmatprep.mubr.bf16.mxu1 %v5200_v0 }
  0xdb   : > { %873 = vmatmul.mubr.bf16.gmra.mxu1 %v4935_v41 }
  0xdc   : > { %882 = vmatprep.mubr.bf16.mxu1 %v5200_v0 }
  0xe3   : > { %883 = vmatmul.mubr.bf16.gmra.mxu1 %v4936_v42 }
  0xe4   : > { %892 = vmatprep.mubr.bf16.mxu1 %v5200_v0 }
  0xeb   : > { %893 = vmatmul.mubr.bf16.gmra.mxu1 %v5432_v18 }
  0xec   : > { %902 = vmatprep.mubr.bf16.mxu1 %v5200_v0 }
  0xf3   : > { %903 = vmatmul.mubr.bf16.gmra.mxu1 %v4910_v24 }
  0xf4   : > { %912 = vmatprep.mubr.bf16.mxu1 %v5200_v0 }
  0xfb   : > { %913 = vmatmul.mubr.bf16.gmra.mxu1 %v4917_v30 }
  0xfc   : > { %922 = vmatprep.mubr.bf16.mxu1 %v5200_v0 }
 0x103   : > { %923 = vmatmul.mubr.bf16.gmra.mxu1 %v4924_v36 }
 0x15b   : > { %v761_v50 = vpop.f32.mrf.mxu1  ;;  %v701_v51 = vpop.f32.mrf.mxu0 }
 0x15c   : > { %v702_v52 = vadd.f32 %v701_v51, %v5475_v48  ;;  %v762_v55 = vadd.f32 %v761_v50, %v5475_v48 }
 0x15d   : > { %v763_v53 = vpop.f32.mrf.mxu1  ;;  %v703_v54 = vpop.f32.mrf.mxu0 }
 0x15e   : > { %v764_v56 = vadd.f32 %v763_v53, %v5479_v49  ;;  %v704_v57 = vadd.f32 %v703_v54, %v5479_v49 }
 0x15f   : > { %v765_v58 = vpop.f32.mrf.mxu1  ;;  %v705_v59 = vpop.f32.mrf.mxu0 }
 0x160   : > { %v4651_v60 = vpack.c.bf16 %v764_v56, %v762_v55  ;;  %v4627_v61 = vpack.c.bf16 %v704_v57, %v702_v52  ;;  %v706_v62 = vadd.f32 %v705_v59, %v5475_v48  ;;  %v766_v1 = vadd.f32 %v765_v58, %v5475_v48 }
 0x161   : > { %v767_v63 = vpop.f32.mrf.mxu1  ;;  %v707_v0 = vpop.f32.mrf.mxu0  ;;  %v5507_v56 = vsub.s32 2, %v5463_v44 }
 0x162   : > { %1197 = vst [vmem:[#allocation2 + $0xc0] sm:$0xff] %v4651_v60  ;;  %v768_v2 = vadd.f32 %v767_v63, %v5479_v49  ;;  %1173 = vst [vmem:[#allocation2 + $0xb0] sm:$0xff] %v4627_v61  ;;  %v708_v3 = vadd.f32 %v707_v0, %v5479_v49  ;;  %v9346_v60 = vsub.s32 3, %v5463_v44 }
 0x163   : > { %v771_v4 = vpop.f32.mrf.mxu1  ;;  %v711_v5 = vpop.f32.mrf.mxu0 }
 0x164   : > { %v4653_v6 = vpack.c.bf16 %v768_v2, %v766_v1  ;;  %v4629_v7 = vpack.c.bf16 %v708_v3, %v706_v62  ;;  %v712_v8 = vadd.f32 %v711_v5, %v5475_v48  ;;  %v772_v11 = vadd.f32 %v771_v4, %v5475_v48 }
 0x165   : > { %v773_v9 = vpop.f32.mrf.mxu1  ;;  %v713_v10 = vpop.f32.mrf.mxu0  ;;  %v5516_v4 = vrot.slane %v5471_v47, %v5507_v56 }
 0x166   : > { %1199 = vst [vmem:[#allocation2 + $0xd8] sm:$0xff] %v4653_v6  ;;  %v774_v12 = vadd.f32 %v773_v9, %v5479_v49  ;;  %1175 = vst [vmem:[#allocation2 + $0x10] sm:$0xff] %v4629_v7  ;;  %v714_v13 = vadd.f32 %v713_v10, %v5479_v49 }
 0x167   : > { %v775_v14 = vpop.f32.mrf.mxu1  ;;  %v715_v15 = vpop.f32.mrf.mxu0 }
 0x168   : > { %v4655_v16 = vpack.c.bf16 %v774_v12, %v772_v11  ;;  %v4631_v17 = vpack.c.bf16 %v714_v13, %v712_v8  ;;  %v716_v18 = vadd.f32 %v715_v15, %v5475_v48  ;;  %v776_v21 = vadd.f32 %v775_v14, %v5475_v48 }
 0x169   : > { %v777_v19 = vpop.f32.mrf.mxu1  ;;  %v717_v20 = vpop.f32.mrf.mxu0  ;;  %v5523_v8 = vrot.slane %v5471_v47, %v9346_v60 }
 0x16a   : > { %1201 = vst [vmem:[#allocation2 + $0x68] sm:$0xff] %v4655_v16  ;;  %v778_v22 = vadd.f32 %v777_v19, %v5479_v49  ;;  %1177 = vst [vmem:[#allocation2 + $0x120] sm:$0xff] %v4631_v17  ;;  %v718_v23 = vadd.f32 %v717_v20, %v5479_v49 }
 0x16b   : > { %v781_v24 = vpop.f32.mrf.mxu1  ;;  %v721_v25 = vpop.f32.mrf.mxu0 }
 0x16c   : > { %v4657_v26 = vpack.c.bf16 %v778_v22, %v776_v21  ;;  %v4633_v27 = vpack.c.bf16 %v718_v23, %v716_v18  ;;  %v722_v28 = vadd.f32 %v721_v25, %v5475_v48  ;;  %v782_v31 = vadd.f32 %v781_v24, %v5475_v48 }
 0x16d   : > { %v783_v29 = vpop.f32.mrf.mxu1  ;;  %v723_v30 = vpop.f32.mrf.mxu0 }
 0x16e   : > { %1203 = vst [vmem:[#allocation2 + $0x50] sm:$0xff] %v4657_v26  ;;  %v784_v32 = vadd.f32 %v783_v29, %v5479_v49  ;;  %1179 = vst [vmem:[#allocation2 + $0xf8] sm:$0xff] %v4633_v27  ;;  %v724_v33 = vadd.f32 %v723_v30, %v5479_v49 }
 0x16f   : > { %v785_v34 = vpop.f32.mrf.mxu1  ;;  %v725_v35 = vpop.f32.mrf.mxu0 }
 0x170   : > { %v4659_v36 = vpack.c.bf16 %v784_v32, %v782_v31  ;;  %v4635_v37 = vpack.c.bf16 %v724_v33, %v722_v28  ;;  %v726_v38 = vadd.f32 %v725_v35, %v5475_v48  ;;  %v786_v41 = vadd.f32 %v785_v34, %v5475_v48 }
 0x171   : > { %v787_v39 = vpop.f32.mrf.mxu1  ;;  %v727_v40 = vpop.f32.mrf.mxu0 }
 0x172   : > { %1205 = vst [vmem:[#allocation2 + $0x58] sm:$0xff] %v4659_v36  ;;  %v788_v42 = vadd.f32 %v787_v39, %v5479_v49  ;;  %1181 = vst [vmem:[#allocation2 + $0x80] sm:$0xff] %v4635_v37  ;;  %v728_v43 = vadd.f32 %v727_v40, %v5479_v49 }
 0x173   : > { %v791_v50 = vpop.f32.mrf.mxu1  ;;  %v731_v51 = vpop.f32.mrf.mxu0 }
 0x174   : > { %v4661_v52 = vpack.c.bf16 %v788_v42, %v786_v41  ;;  %v4637_v53 = vpack.c.bf16 %v728_v43, %v726_v38  ;;  %v732_v54 = vadd.f32 %v731_v51, %v5475_v48  ;;  %v792_v58 = vadd.f32 %v791_v50, %v5475_v48 }
 0x175   : > { %v793_v55 = vpop.f32.mrf.mxu1  ;;  %v733_v57 = vpop.f32.mrf.mxu0 }
 0x176   : > { %1207 = vst [vmem:[#allocation2 + $0x30] sm:$0xff] %v4661_v52  ;;  %v794_v59 = vadd.f32 %v793_v55, %v5479_v49  ;;  %1183 = vst [vmem:[#allocation2 + $0x138] sm:$0xff] %v4637_v53  ;;  %v734_v61 = vadd.f32 %v733_v57, %v5479_v49 }
 0x177   : > { %v795_v62 = vpop.f32.mrf.mxu1  ;;  %v735_v63 = vpop.f32.mrf.mxu0 }
 0x178   : > { %v4663_v0 = vpack.c.bf16 %v794_v59, %v792_v58  ;;  %v4639_v1 = vpack.c.bf16 %v734_v61, %v732_v54  ;;  %v736_v2 = vadd.f32 %v735_v63, %v5475_v48  ;;  %v796_v6 = vadd.f32 %v795_v62, %v5475_v48 }
 0x179   : > { %v797_v3 = vpop.f32.mrf.mxu1  ;;  %v737_v5 = vpop.f32.mrf.mxu0 }
 0x17a   : > { %1209 = vst [vmem:[#allocation2 + $0x28] sm:$0xff] %v4663_v0  ;;  %v798_v7 = vadd.f32 %v797_v3, %v5479_v49  ;;  %1185 = vst [vmem:[#allocation2 + $0x18] sm:$0xff] %v4639_v1  ;;  %v738_v9 = vadd.f32 %v737_v5, %v5479_v49 }
 0x17b   : > { %v834_v10 = vpop.f32.mrf.mxu1  ;;  %v741_v11 = vpop.f32.mrf.mxu0 }
 0x17c   : > { %v4665_v12 = vpack.c.bf16 %v798_v7, %v796_v6  ;;  %v4641_v13 = vpack.c.bf16 %v738_v9, %v736_v2  ;;  %v742_v14 = vadd.f32 %v741_v11, %v5475_v48  ;;  %v835_v17 = vadd.f32 %v834_v10, %v5516_v4 }
 0x17d   : > { %v836_v15 = vpop.f32.mrf.mxu1  ;;  %v743_v16 = vpop.f32.mrf.mxu0 }
 0x17e   : > { %1211 = vst [vmem:[#allocation2 + $0xb8] sm:$0xff] %v4665_v12  ;;  %v837_v18 = vadd.f32 %v836_v15, %v5523_v8  ;;  %1187 = vst [vmem:[#allocation2 + $0x70] sm:$0xff] %v4641_v13  ;;  %v744_v47 = vadd.f32 %v743_v16, %v5479_v49 }
 0x17f   : > { %v838_v19 = vpop.f32.mrf.mxu1  ;;  %v745_v20 = vpop.f32.mrf.mxu0 }
 0x180   : > { %v4628_v21 = vpack.c.bf16 %v837_v18, %v835_v17  ;;  %v4643_v22 = vpack.c.bf16 %v744_v47, %v742_v14  ;;  %v746_v23 = vadd.f32 %v745_v20, %v5475_v48  ;;  %v839_v26 = vadd.f32 %v838_v19, %v5516_v4 }
 0x181   : > { %v840_v24 = vpop.f32.mrf.mxu1  ;;  %v747_v25 = vpop.f32.mrf.mxu0 }
 0x182   : > { %1174 = vst [vmem:[#allocation2 + $0xd0] sm:$0xff] %v4628_v21  ;;  %v841_v27 = vadd.f32 %v840_v24, %v5523_v8  ;;  %1189 = vst [vmem:[#allocation2 + $0x128] sm:$0xff] %v4643_v22  ;;  %v748_v28 = vadd.f32 %v747_v25, %v5479_v49 }
 0x183   : > { %v844_v29 = vpop.f32.mrf.mxu1  ;;  %v751_v30 = vpop.f32.mrf.mxu0 }
 0x184   : > { %v4630_v31 = vpack.c.bf16 %v841_v27, %v839_v26  ;;  %v4645_v32 = vpack.c.bf16 %v748_v28, %v746_v23  ;;  %v752_v33 = vadd.f32 %v751_v30, %v5475_v48  ;;  %v845_v36 = vadd.f32 %v844_v29, %v5516_v4 }
 0x185   : > { %v846_v34 = vpop.f32.mrf.mxu1  ;;  %v753_v35 = vpop.f32.mrf.mxu0 }
 0x186   : > { %1176 = vst [vmem:[#allocation2 + $0x48] sm:$0xff] %v4630_v31  ;;  %v847_v37 = vadd.f32 %v846_v34, %v5523_v8  ;;  %1191 = vst [vmem:[#allocation2 + $0x8] sm:$0xff] %v4645_v32  ;;  %v754_v38 = vadd.f32 %v753_v35, %v5479_v49 }
 0x187   : > { %v848_v39 = vpop.f32.mrf.mxu1  ;;  %v755_v40 = vpop.f32.mrf.mxu0 }
 0x188   : > { %v4632_v41 = vpack.c.bf16 %v847_v37, %v845_v36  ;;  %v4647_v42 = vpack.c.bf16 %v754_v38, %v752_v33  ;;  %v756_v43 = vadd.f32 %v755_v40, %v5475_v48  ;;  %v849_v52 = vadd.f32 %v848_v39, %v5516_v4 }
 0x189   : > { %v850_v50 = vpop.f32.mrf.mxu1  ;;  %v757_v51 = vpop.f32.mrf.mxu0 }
 0x18a   : > { %1178 = vst [vmem:[#allocation2 + $0x38] sm:$0xff] %v4632_v41  ;;  %v851_v53 = vadd.f32 %v850_v50, %v5523_v8  ;;  %1193 = vst [vmem:[#allocation2 + $0xa8] sm:$0xff] %v4647_v42  ;;  %v758_v54 = vadd.f32 %v757_v51, %v5479_v49 }
 0x18b   : > { %v854_v55 = vpop.f32.mrf.mxu1 }
 0x18c   : > { %v4634_v57 = vpack.c.bf16 %v851_v53, %v849_v52  ;;  %v4649_v58 = vpack.c.bf16 %v758_v54, %v756_v43  ;;  %v855_v61 = vadd.f32 %v854_v55, %v5516_v4 }
 0x18d   : > { %v856_v59 = vpop.f32.mrf.mxu1 }
 0x18e   : > { %1180 = vst [vmem:[#allocation2 + $0x100] sm:$0xff] %v4634_v57  ;;  %v857_v62 = vadd.f32 %v856_v59, %v5523_v8  ;;  %1195 = vst [vmem:[#allocation2 + $0xe0] sm:$0xff] %v4649_v58 }
 0x18f   : > { %v858_v48 = vpop.f32.mrf.mxu1 }
 0x190   : > { %v4636_v63 = vpack.c.bf16 %v857_v62, %v855_v61  ;;  %v859_v1 = vadd.f32 %v858_v48, %v5516_v4 }
 0x191   : > { %v860_v0 = vpop.f32.mrf.mxu1 }
 0x192   : > { %1182 = vst [vmem:[#allocation2 + $0x108] sm:$0xff] %v4636_v63  ;;  %v861_v2 = vadd.f32 %v860_v0, %v5523_v8 }
 0x193   : > { %v864_v3 = vpop.f32.mrf.mxu1 }
 0x194   : > { %v4638_v49 = vpack.c.bf16 %v861_v2, %v859_v1  ;;  %v865_v6 = vadd.f32 %v864_v3, %v5516_v4 }
 0x195   : > { %v866_v5 = vpop.f32.mrf.mxu1 }
 0x196   : > { %1184 = vst [vmem:[#allocation2 + $0xf0] sm:$0xff] %v4638_v49  ;;  %v867_v7 = vadd.f32 %v866_v5, %v5523_v8 }
 0x197   : > { %v868_v9 = vpop.f32.mrf.mxu1 }
 0x198   : > { %v4640_v10 = vpack.c.bf16 %v867_v7, %v865_v6  ;;  %v869_v12 = vadd.f32 %v868_v9, %v5516_v4 }
 0x199   : > { %v870_v11 = vpop.f32.mrf.mxu1 }
 0x19a   : > { %1186 = vst [vmem:[#allocation2 + $0xc8] sm:$0xff] %v4640_v10  ;;  %v871_v13 = vadd.f32 %v870_v11, %v5523_v8 }
 0x19b   : > { %v874_v14 = vpop.f32.mrf.mxu1 }
 0x19c   : > { %v4642_v15 = vpack.c.bf16 %v871_v13, %v869_v12  ;;  %v875_v17 = vadd.f32 %v874_v14, %v5516_v4 }
 0x19d   : > { %v876_v16 = vpop.f32.mrf.mxu1 }
 0x19e   : > { %1188 = vst [vmem:[#allocation2 + $0x20] sm:$0xff] %v4642_v15  ;;  %v877_v18 = vadd.f32 %v876_v16, %v5523_v8 }
 0x19f   : > { %v878_v47 = vpop.f32.mrf.mxu1 }
 0x1a0   : > { %v4644_v19 = vpack.c.bf16 %v877_v18, %v875_v17  ;;  %v879_v21 = vadd.f32 %v878_v47, %v5516_v4 }
 0x1a1   : > { %v880_v20 = vpop.f32.mrf.mxu1 }
 0x1a2   : > { %1190 = vst [vmem:[#allocation2 + $0x110] sm:$0xff] %v4644_v19  ;;  %v881_v22 = vadd.f32 %v880_v20, %v5523_v8 }
 0x1a3   : > { %v884_v23 = vpop.f32.mrf.mxu1 }
 0x1a4   : > { %v4646_v24 = vpack.c.bf16 %v881_v22, %v879_v21  ;;  %v885_v26 = vadd.f32 %v884_v23, %v5516_v4 }
 0x1a5   : > { %v886_v25 = vpop.f32.mrf.mxu1 }
 0x1a6   : > { %1192 = vst [vmem:[#allocation2 + $0x98] sm:$0xff] %v4646_v24  ;;  %v887_v27 = vadd.f32 %v886_v25, %v5523_v8 }
 0x1a7   : > { %v888_v28 = vpop.f32.mrf.mxu1 }
 0x1a8   : > { %v4648_v29 = vpack.c.bf16 %v887_v27, %v885_v26  ;;  %v889_v31 = vadd.f32 %v888_v28, %v5516_v4 }
 0x1a9   : > { %v890_v30 = vpop.f32.mrf.mxu1 }
 0x1aa   : > { %1194 = vst [vmem:[#allocation2 + $0x90] sm:$0xff] %v4648_v29  ;;  %v891_v32 = vadd.f32 %v890_v30, %v5523_v8 }
 0x1ab   : > { %v894_v33 = vpop.f32.mrf.mxu1 }
 0x1ac   : > { %v4650_v34 = vpack.c.bf16 %v891_v32, %v889_v31  ;;  %v895_v36 = vadd.f32 %v894_v33, %v5516_v4 }
 0x1ad   : > { %v896_v35 = vpop.f32.mrf.mxu1 }
 0x1ae   : > { %1196 = vst [vmem:[#allocation2 + $0x88] sm:$0xff] %v4650_v34  ;;  %v897_v37 = vadd.f32 %v896_v35, %v5523_v8 }
 0x1af   : > { %v898_v38 = vpop.f32.mrf.mxu1 }
 0x1b0   : > { %v4652_v39 = vpack.c.bf16 %v897_v37, %v895_v36  ;;  %v899_v41 = vadd.f32 %v898_v38, %v5516_v4 }
 0x1b1   : > { %v900_v40 = vpop.f32.mrf.mxu1 }
 0x1b2   : > { %1198 = vst [vmem:[#allocation2 + $0x118] sm:$0xff] %v4652_v39  ;;  %v901_v42 = vadd.f32 %v900_v40, %v5523_v8 }
 0x1b3   : > { %v904_v43 = vpop.f32.mrf.mxu1 }
 0x1b4   : > { %v4654_v50 = vpack.c.bf16 %v901_v42, %v899_v41  ;;  %v905_v52 = vadd.f32 %v904_v43, %v5516_v4 }
 0x1b5   : > { %v906_v51 = vpop.f32.mrf.mxu1 }
 0x1b6   : > { %1200 = vst [vmem:[#allocation2 + $0xa0] sm:$0xff] %v4654_v50  ;;  %v907_v53 = vadd.f32 %v906_v51, %v5523_v8 }
 0x1b7   : > { %v908_v54 = vpop.f32.mrf.mxu1 }
 0x1b8   : > { %v4656_v55 = vpack.c.bf16 %v907_v53, %v905_v52  ;;  %v909_v58 = vadd.f32 %v908_v54, %v5516_v4 }
 0x1b9   : > { %v910_v57 = vpop.f32.mrf.mxu1 }
 0x1ba   : > { %1202 = vst [vmem:[#allocation2 + $0x130] sm:$0xff] %v4656_v55  ;;  %v911_v59 = vadd.f32 %v910_v57, %v5523_v8 }
 0x1bb   : > { %v914_v61 = vpop.f32.mrf.mxu1 }
 0x1bc   : > { %v4658_v62 = vpack.c.bf16 %v911_v59, %v909_v58  ;;  %v915_v63 = vadd.f32 %v914_v61, %v5516_v4 }
 0x1bd   : > { %v916_v48 = vpop.f32.mrf.mxu1 }
 0x1be   : > { %1204 = vst [vmem:[#allocation2 + $0xe8] sm:$0xff] %v4658_v62  ;;  %v917_v0 = vadd.f32 %v916_v48, %v5523_v8 }
 0x1bf   : > { %v918_v1 = vpop.f32.mrf.mxu1 }
 0x1c0   : > { %v4660_v2 = vpack.c.bf16 %v917_v0, %v915_v63  ;;  %v919_v49 = vadd.f32 %v918_v1, %v5516_v4 }
 0x1c1   : > { %v920_v3 = vpop.f32.mrf.mxu1 }
 0x1c2   : > { %1206 = vst [vmem:[#allocation2 + $0x78] sm:$0xff] %v4660_v2  ;;  %v921_v5 = vadd.f32 %v920_v3, %v5523_v8 }
 0x1c3   : > { %v924_v6 = vpop.f32.mrf.mxu1 }
 0x1c4   : > { %v4662_v7 = vpack.c.bf16 %v921_v5, %v919_v49  ;;  %v925_v10 = vadd.f32 %v924_v6, %v5516_v4 }
 0x1c5   : > { %v926_v9 = vpop.f32.mrf.mxu1 }
 0x1c6   : > { %1208 = vst [vmem:[#allocation2 + $0x40] sm:$0xff] %v4662_v7  ;;  %v927_v11 = vadd.f32 %v926_v9, %v5523_v8 }
 0x1c7   : > { %v928_v12 = vpop.f32.mrf.mxu1 }
 0x1c8   : > { %v4664_v13 = vpack.c.bf16 %v927_v11, %v925_v10  ;;  %v929_v15 = vadd.f32 %v928_v12, %v5516_v4 }
 0x1c9   : > { %v930_v14 = vpop.f32.mrf.mxu1 }
 0x1ca   : > { %1210 = vst [vmem:[#allocation2] sm:$0xff] %v4664_v13  ;;  %v931_v16 = vadd.f32 %v930_v14, %v5523_v8  ;;  %1216 = sbr.rel (%p4602_p13) target bundleno = 466 (0x1d2), region = 72 }
 0x1cc   : > { %v4666_v17 = vpack.c.bf16 %v931_v16, %v929_v15 }
 0x1ce   : > { %1212 = vst [vmem:[#allocation2 + $0x60] sm:$0xff] %v4666_v17 }
 0x1cf   : > { %v5201_v18 = vmov 0  }
 0x1d0   : > { %1217 = vst [vmem:[#allocation2 + $0xb0] sm:$0xff] %v5201_v18  ;;  %1218 = vst [vmem:[#allocation2 + $0xd0] sm:$0xff] %v5201_v18 }
 0x1d1   : > { %1219 = vst [vmem:[#allocation2 + $0x10] sm:$0xff] %v5201_v18  ;;  %1220 = vst [vmem:[#allocation2 + $0x48] sm:$0xff] %v5201_v18 }
 0x1d2 PF: > { %p4603_p3 = scmp.ne.s32.totalorder %s5173_s27, 1 }
 0x1d4   : > { %1224 = sbr.rel (%p4603_p3) target bundleno = 476 (0x1dc), region = 76 }
 0x1d9   : > { %v5202_v4 = vmov 0  }
 0x1da   : > { %1225 = vst [vmem:[#allocation2 + $0x28] sm:$0xff] %v5202_v4  ;;  %1226 = vst [vmem:[#allocation2] sm:$0xff] %v5202_v4 }
 0x1db   : > { %1227 = vst [vmem:[#allocation2 + $0xb8] sm:$0xff] %v5202_v4  ;;  %1228 = vst [vmem:[#allocation2 + $0x60] sm:$0xff] %v5202_v4 }
 0x1dc PF: > { %v4937_v8 = vld [vmem:[#allocation12 + $0x78] sm:$0xff]   ;;  %v4939_v19 = vld [vmem:[#allocation12 + $0x70] sm:$0xff]   ;;  %v4941_v21 = vld [vmem:[#allocation12 + $0x68] sm:$0xff]   ;;  %v5581_v23 = vadd.s32 8, %v5463_v44  ;;  %v1238_v25 = vadd.s32 16, %v5463_v44  ;;  %v5585_v26 = vadd.s32 24, %v5463_v44 }
 0x1dd   : > { %v4938_v47 = vld [vmem:[#allocation12 + $0x38] sm:$0xff]   ;;  %4667 = vmatprep.subr.bf16.mxu0 %v4937_v8  ;;  %v4940_v20 = vld [vmem:[#allocation12 + $0x30] sm:$0xff]   ;;  %v4942_v22 = vld [vmem:[#allocation12 + $0x28] sm:$0xff]   ;;  %v1252_v27 = vand.u32 15, %v5463_v44  ;;  %v5590_v32 = vsub.s32 5, %v5463_v44  ;;  %v5593_v33 = vsub.s32 4, %v5463_v44 }
 0x1de   : > { %4668 = vmatpush3.bf16.msra.mxu0 %v4938_v47  ;;  %v4943_v24 = vld [vmem:[#allocation12 + $0x60] sm:$0xff]   ;;  %v1253_v29 = vand.u32 15, %v5581_v23  ;;  %v4945_v30 = vld [vmem:[#allocation12 + $0x58] sm:$0xff]   ;;  %v1254_v31 = vand.u32 15, %v1238_v25  ;;  %v4947_v36 = vld [vmem:[#allocation12 + $0x50] sm:$0xff]   ;;  %v5597_v37 = vsub.s32 6, %v5463_v44 }
 0x1df   : > { %4669 = vmatprep.subr.bf16.mxu0 %v4939_v19  ;;  %v4944_v28 = vld [vmem:[#allocation12 + $0x20] sm:$0xff]   ;;  %v4946_v34 = vld [vmem:[#allocation12 + $0x18] sm:$0xff]   ;;  %v5599_v38 = vld [vmem:[#allocation10] sm:$0x77]  ;;  %vm1562_vm0 = vcmp.lt.s32.totalorder %v5463_v44, 1  ;;  %vm5640_vm1 = vcmp.ne.s32.totalorder %v1252_v27, 0 }
 0x1e0   : > { %v5601_v39 = vld [vmem:[#allocation10 + $0x8] sm:$0x77]  ;;  %v5603_v40 = vld [vmem:[#allocation10 + $0x10] sm:$0x77]  ;;  %v4948_v41 = vld [vmem:[#allocation12 + $0x10] sm:$0xff]   ;;  %v1405_v43 = vrot.slane %v5599_v38, %v5590_v32  ;;  %vm5644_vm2 = vcmp.ne.s32.totalorder %v1254_v31, 0 }
 0x1e1   : > { %v5605_v42 = vld [vmem:[#allocation10 + $0x18] sm:$0x77]  ;;  %v1413_v50 = vrot.slane %v5601_v39, %v5590_v32  ;;  %v1300_v54 = vld [vmem:[#allocation2 + $0xb0] sm:$0xff]  ;;  %v1303_v48 = vld [vmem:[#allocation2 + $0x48] sm:$0xff]  ;;  %v9883_v14 = vmov 0  ;;  %vm1951_vm3 = vcmp.lt.s32.totalorder %v5463_v44, 7 }
 0x1e2   : > { %4670 = vmatpush3.bf16.msra.mxu0 %v4940_v20  ;;  %v4949_v53 = vld [vmem:[#allocation12 + $0x48] sm:$0xff]   ;;  %v1301_v55 = vld [vmem:[#allocation2 + $0xd0] sm:$0xff]  ;;  %v5623_v1 = vunpack.c.l.bf16 %v1300_v54  ;;  %v5625_v2 = vunpack.c.h.bf16 %v1300_v54  ;;  %v5636_v11 = vunpack.c.l.bf16 %v1303_v48  ;;  %v5638_v12 = vunpack.c.h.bf16 %v1303_v48  ;;  %v1309_v15 = vld [vmem:[#allocation2 + $0x108] sm:$0xff]  ;;  %s4622_s9 = sshll.u32 %s5173_s27, 2  ;;  %s4623_s23 = sshll.u32 %s5177_s28, 3 }
 0x1e3   : > { %4671 = vmatprep.subr.bf16.mxu0 %v4941_v21  ;;  %v1302_v57 = vld [vmem:[#allocation2 + $0x10] sm:$0xff]  ;;  %v1304_v63 = vld [vmem:[#allocation2 + $0x120] sm:$0xff]  ;;  %v1305_v0 = vld [vmem:[#allocation2 + $0x38] sm:$0xff]  ;;  %v5627_v3 = vunpack.c.l.bf16 %v1301_v55  ;;  %v5629_v49 = vunpack.c.h.bf16 %v1301_v55  ;;  %v9884_v14 = vsel %vm5644_vm2, 4294967295, %v9883_v14  ;;  %vm5733_vm4 = vcmp.ne.s32.totalorder %v1253_v29, 15  ;;  %s4374_s12 = sadd.s32 %s4623_s23, %s4622_s9  ;;  %s4377_s22 = sshll.u32 %s5576_s11, 4  ;;  %s9271_s22 = int_to_ptr.vmem [resolvable:$true] %s4377_s22 }
 0x1e4   : > { %9875 = vst [vmem:[#allocation23_spill] sm:$0xff] %v5623_v1  ;;  %9876 = vst [vmem:[#allocation24_spill] sm:$0xff] %v5625_v2  ;;  %v1306_v5 = vld [vmem:[#allocation2 + $0xf8] sm:$0xff]  ;;  %v1307_v6 = vld [vmem:[#allocation2 + $0x100] sm:$0xff]  ;;  %v5632_v9 = vunpack.c.l.bf16 %v1302_v57  ;;  %v5634_v10 = vunpack.c.h.bf16 %v1302_v57  ;;  %v5648_v18 = vunpack.c.l.bf16 %v1304_v63  ;;  %v5650_v4 = vunpack.c.h.bf16 %v1304_v63  ;;  %s4624_s18 = sshll.u32 %s4374_s12, 7  ;;  %s10675_s21 = sld [smem:[#allocation129_spill]] }
 0x1e5   : > { %9877 = vst [vmem:[#allocation25_spill] sm:$0xff] %v5627_v3  ;;  %9878 = vst [vmem:[#allocation26_spill] sm:$0xff] %v5629_v49  ;;  %v1308_v7 = vld [vmem:[#allocation2 + $0x80] sm:$0xff]  ;;  %v1330_v16 = vld [vmem:[#allocation2 + $0x50] sm:$0xff]  ;;  %v5652_v8 = vunpack.c.l.bf16 %v1305_v0  ;;  %v5654_v47 = vunpack.c.h.bf16 %v1305_v0  ;;  %v5656_v19 = vunpack.c.l.bf16 %v1306_v5  ;;  %v5658_v20 = vunpack.c.h.bf16 %v1306_v5  ;;  %s4362_s27 = scalar_lea.sflag [#allocation6], %s5410_s24  ;;  %s5085_s28 = scalar_lea.vmem %s9271_s22, 512 }
 0x1e6   : > { %4672 = vmatpush3.bf16.msra.mxu0 %v4942_v22  ;;  %9879 = vst [vmem:[#allocation27_spill] sm:$0xff] %v5632_v9  ;;  %9880 = vst [vmem:[#allocation28_spill] sm:$0xff] %v5636_v11  ;;  %v1331_v17 = vld [vmem:[#allocation2 + $0xe8] sm:$0xff]  ;;  %v5660_v21 = vunpack.c.l.bf16 %v1307_v6  ;;  %v5662_v22 = vunpack.c.h.bf16 %v1307_v6  ;;  %v5664_v25 = vunpack.c.l.bf16 %v1308_v7  ;;  %v5666_v27 = vunpack.c.h.bf16 %v1308_v7  ;;  %v4951_v31 = vld [vmem:[#allocation12 + $0x40] sm:$0xff]   ;;  %p5086_p2 = scmp.ne.s32.totalorder %s9271_s22, %s5085_s28  ;;  %s5203_s7 = smov [#allocation13]  }
 0x1e7   : > { %4673 = vmatprep.subr.bf16.mxu0 %v4943_v24  ;;  %9885 = vst [vmem:[#allocation29_spill] sm:$0xff] %v9884_v14  ;;  %9886 = vst [vmem:[#allocation30_spill] sm:$0xff] %v5648_v18  ;;  %v4950_v24 = vld [vmem:[#allocation12 + $0x8] sm:$0xff]   ;;  %v5676_v54 = vunpack.c.l.bf16 %v1331_v17  ;;  %v5678_v55 = vunpack.c.h.bf16 %v1331_v17  ;;  %v5684_v57 = vrot.slane %v1413_v50, %v5469_v46  ;;  %v1499_v48 = vrot.slane %v5625_v2, 7  ;;  %s5089_s8 = sshll.u32 %s5203_s7, 4  ;;  %s5090_s8 = int_to_ptr.vmem [resolvable:$false] %s5089_s8 }
 0x1e8   : > { %9887 = vst [vmem:[#allocation31_spill] sm:$0xff] %v5652_v8  ;;  %9888 = vst [vmem:[#allocation32_spill] sm:$0xff] %v5656_v19  ;;  %v1501_v63 = vrot.slane %v5629_v49, 7  ;;  %v1505_v0 = vrot.slane %v5638_v12, 7  ;;  %v5691_v5 = vrot.slane %v5650_v4, 7  ;;  %v5694_v6 = vrot.slane %v5654_v47, 7  ;;  %p5087_p0 = pnand %p5086_p2, %p5376_p1  ;;  %p5092_p8 = scmp.lt.s32.totalorder %s9271_s22, %s5090_s8 }
 0x1e9   : > { %9889 = vst [vmem:[#allocation33_spill] sm:$0xff] %v5660_v21  ;;  %9890 = vst [vmem:[#allocation34_spill] sm:$0xff] %v5664_v25  ;;  %v1437_v7 = vmul.f32 %v5684_v57, %v5629_v49  ;;  %v1449_v62 = vmul.f32 %v5684_v57, %v5662_v22  ;;  %v1240_v35 = vadd.s32 32, %v5463_v44  ;;  %s5091_s10 = scalar_lea.vmem %s5090_s8, 1024 }
 0x1ea   : > { %4674 = vmatpush3.bf16.msra.mxu0 %v4944_v28  ;;  %9891 = vst [vmem:[#allocation35_spill] sm:$0xff] %v5666_v27  ;;  %v5668_v28 = vunpack.c.l.bf16 %v1309_v15  ;;  %9896 = vst [vmem:[#allocation40_spill] sm:$0xff] %v5676_v54  ;;  %v1618_v51 = vsel %vm1562_vm0, %v1505_v0, %v5694_v6  ;;  %v1622_v59 = vsel %vm1562_vm0, %v1501_v63, %v1505_v0  ;;  %v9909_v0 = vrot.slane %v5662_v22, 7  ;;  %s9269_s1 = scalar_lea.hbm %s10675_s21, %s4624_s18  ;;  %p5088_p5 = pneg %p5087_p0 }
 0x1eb   : > { %4675 = vmatprep.subr.bf16.mxu0 %v4945_v30  ;;  %v5670_v30 = vunpack.c.h.bf16 %v1309_v15  ;;  %9897 = vst [vmem:[#allocation41_spill] sm:$0xff] %v5678_v55  ;;  %9899 = vst [vmem:[#allocation43_spill] sm:$0xff] %v5684_v57  ;;  %p5093_p7 = scmp.lt.s32.totalorder %s5091_s10, %s5085_s28 }
 0x1ec   : > { %9892 = vst [vmem:[#allocation36_spill] sm:$0xff] %v5668_v28  ;;  %v5755_v23 = vsel %vm1562_vm0, %v5694_v6, %v9909_v0  ;;  %v1670_v0 = vsel %vm5644_vm2, %v1618_v51, 0.0  ;;  %v1894_v51 = vrot.slane %v5638_v12, 1 }
 0x1ed   : > { %9893 = vst [vmem:[#allocation37_spill] sm:$0xff] %v5670_v30  ;;  %p5094_p11 = por %p5093_p7, %p5092_p8 }
 0x1ee   : > { %4676 = vmatpush3.bf16.msra.mxu0 %v4946_v34  ;;  %v5672_v34 = vunpack.c.l.bf16 %v1330_v16 }
 0x1ef   : > { %4677 = vmatprep.subr.bf16.mxu0 %v4947_v36  ;;  %v5674_v36 = vunpack.c.h.bf16 %v1330_v16  ;;  %v1441_v16 = vmul.f32 %v5684_v57, %v5638_v12  ;;  %p5095_p6 = pnand %p5094_p11, %p5088_p5 }
 0x1f0   : > { %9894 = vst [vmem:[#allocation38_spill] sm:$0xff] %v5672_v34 }
 0x1f1   : > { %9895 = vst [vmem:[#allocation39_spill] sm:$0xff] %v5674_v36  ;;  %v5715_v58 = vrot.slane %v5674_v36, 7  ;;  %v9905_v36 = vmov 0 }
 0x1f2   : > { %4678 = vmatpush3.bf16.msra.mxu0 %v4948_v41  ;;  %v5681_v41 = vrot.slane %v1405_v43, %v5469_v46  ;;  %v4952_v43 = vld [vmem:[#allocation12] sm:$0xff]  }
 0x1f3   : > { %4679 = vmatprep.subr.bf16.mxu0 %v4949_v53  ;;  %v1503_v53 = vrot.slane %v5634_v10, 7  ;;  %9900 = vst [vmem:[#allocation44_spill] sm:$0xff] %v5715_v58 }
 0x1f4   : > { %9898 = vst [vmem:[#allocation42_spill] sm:$0xff] %v5681_v41  ;;  %v1435_v50 = vmul.f32 %v5681_v41, %v5625_v2  ;;  %v1439_v15 = vmul.f32 %v5681_v41, %v5634_v10  ;;  %v1443_v17 = vmul.f32 %v5681_v41, %v5650_v4  ;;  %v1447_v60 = vmul.f32 %v5681_v41, %v5658_v20 }
 0x1f5   : > { %v1616_v52 = vsel %vm1562_vm0, %v1503_v53, %v5691_v5  ;;  %v1620_v61 = vsel %vm1562_vm0, %v1499_v48, %v1503_v53  ;;  %v5788_v41 = vrot.slane %v5650_v4, 1 }
 0x1f6   : > { %4680 = vmatpush3.bf16.msra.mxu0 %v4950_v24  ;;  %v1445_v24 = vmul.f32 %v5684_v57, %v5654_v47  ;;  %v9908_v57 = vrot.slane %v5658_v20, 7 }
 0x1f7   : > { %4681 = vmatprep.subr.bf16.mxu0 %v4951_v31  ;;  %v5718_v31 = vrot.slane %v5678_v55, 7  ;;  %v9904_v55 = vand.u32 15, %v5585_v26  ;;  %v1624_v26 = vsel %vm1562_vm0, %v5715_v58, %v1499_v48  ;;  %v9910_v48 = vrot.slane %v5599_v38, %v5593_v33  ;;  %9914 = vst [vmem:[#allocation49_spill] sm:$0xff] %v5788_v41 }
 0x1f8   : > { %v5748_v53 = vsel %vm1562_vm0, %v5691_v5, %v9908_v57 }
 0x1f9   : > { %9901 = vst [vmem:[#allocation45_spill] sm:$0xff] %v5718_v31  ;;  %vm5739_vm5 = vcmp.ne.s32.totalorder %v9904_v55, 15  ;;  %v1626_v29 = vsel %vm1562_vm0, %v5718_v31, %v1501_v63  ;;  %v1660_v55 = vsel %vm5640_vm1, %v1624_v26, 0.0  ;;  %v5775_v58 = vrot.slane %v9910_v48, %v5466_v45 }
 0x1fa   : > { %4682 = vmatpush3.bf16.msra.mxu0 %v4952_v43  ;;  %v9906_v36 = vsel %vm5739_vm5, 4294967295, %v9905_v36  ;;  %v1662_v57 = vsel %vm5640_vm1, %v1626_v29, 0.0  ;;  %v1668_v43 = vsel %vm5644_vm2, %v1616_v52, 0.0  ;;  %v9912_v63 = vrot.slane %v5601_v39, %v5593_v33 }
 0x1fb   : > { %9907 = vst [vmem:[#allocation46_spill] sm:$0xff] %v9906_v36  ;;  %9911 = vst [vmem:[#allocation47_spill] sm:$0xff] %v5775_v58  ;;  %v1892_v52 = vrot.slane %v5634_v10, 1  ;;  %v5791_v48 = vrot.slane %v5654_v47, 1  ;;  %v1760_v14 = vmul.f32 %v5775_v58, %v1660_v55  ;;  %v1768_v31 = vmul.f32 %v5775_v58, %v1668_v43 }
 0x1fc   : > { %v5781_v26 = vrot.slane %v9912_v63, %v5466_v45  ;;  %v1764_v63 = vmul.f32 %v5775_v58, %v1620_v61  ;;  %v1772_v12 = vmul.f32 %v5775_v58, %v5748_v53  ;;  %v1902_v43 = vrot.slane %v5662_v22, 1 }
 0x1fd   : > { %9915 = vst [vmem:[#allocation50_spill] sm:$0xff] %v5791_v48  ;;  %v1824_v54 = vadd.f32 %v1760_v14, %v1435_v50  ;;  %v1832_v19 = vadd.f32 %v1768_v31, %v1443_v17  ;;  %v5809_v58 = vrot.slane %v5670_v30, 1  ;;  %v2005_v14 = vsel %vm1951_vm3, %v1892_v52, %v5788_v41  ;;  %v2279_v31 = vld [vmem:[#allocation2 + $0x40] sm:$0xff] }
 0x1fe   : > { %9913 = vst [vmem:[#allocation48_spill] sm:$0xff] %v5781_v26  ;;  %v1762_v28 = vmul.f32 %v5781_v26, %v1662_v57  ;;  %v1766_v29 = vmul.f32 %v5781_v26, %v1622_v59  ;;  %v1770_v10 = vmul.f32 %v5781_v26, %v1670_v0  ;;  %v1774_v25 = vmul.f32 %v5781_v26, %v5755_v23 }
 0x1ff   : > { %v1828_v21 = vadd.f32 %v1764_v63, %v1439_v15  ;;  %v1836_v8 = vadd.f32 %v1772_v12, %v1447_v60  ;;  %v1900_v59 = vrot.slane %v5658_v20, 1  ;;  %v5806_v0 = vrot.slane %v5666_v27, 1  ;;  %9917 = vst [vmem:[#allocation52_spill] sm:$0xff] %v5809_v58 }
 0x200   : > { %v1826_v34 = vadd.f32 %v1762_v28, %v1437_v7  ;;  %v1830_v55 = vadd.f32 %v1766_v29, %v1441_v16  ;;  %v1834_v57 = vadd.f32 %v1770_v10, %v1445_v24  ;;  %v1838_v61 = vadd.f32 %v1774_v25, %v1449_v62  ;;  %v2278_v7 = vld [vmem:[#allocation2 + $0x30] sm:$0xff] }
 0x201   : > { %9916 = vst [vmem:[#allocation51_spill] sm:$0xff] %v5806_v0  ;;  %v2007_v28 = vsel %vm1951_vm3, %v1894_v51, %v5791_v48  ;;  %v9918_v60 = vrot.slane %v5625_v2, 1  ;;  %v9919_v25 = vrot.slane %v5629_v49, 1  ;;  %v5828_v15 = vsel %vm1951_vm3, %v1900_v59, %v5806_v0 }
 0x202   : > { %v5833_v16 = vsel %vm1951_vm3, %v1902_v43, %v5809_v58  ;;  %v5838_v17 = vsel %vm1951_vm3, %v5788_v41, %v1900_v59  ;;  %v5843_v24 = vsel %vm1951_vm3, %v5791_v48, %v1902_v43  ;;  %v2053_v29 = vsel %vm5733_vm4, %v2005_v14, 0.0 }
 0x203   : > { %v2009_v62 = vsel %vm1951_vm3, %v9918_v60, %v1892_v52  ;;  %v2011_v50 = vsel %vm1951_vm3, %v9919_v25, %v1894_v51  ;;  %v2055_v52 = vsel %vm5733_vm4, %v2007_v28, 0.0  ;;  %v2061_v51 = vsel %vm5739_vm5, %v5828_v15, 0.0 }
 0x204   : > { %v2063_v63 = vsel %vm5739_vm5, %v5833_v16, 0.0  ;;  %v9920_v10 = vrot.slane %v5599_v38, %v5597_v37  ;;  %v9922_v59 = vrot.slane %v5601_v39, %v5597_v37  ;;  %v5867_v14 = vunpack.c.l.bf16 %v2278_v7 }
 0x205   : > { %v5869_v28 = vunpack.c.h.bf16 %v2278_v7  ;;  %v5871_v60 = vunpack.c.l.bf16 %v2279_v31  ;;  %v5873_v25 = vunpack.c.h.bf16 %v2279_v31  ;;  %v9928_v48 = vrot.slane %v5603_v40, %v5590_v32 }
 0x206   : > { %v5859_v12 = vrot.slane %v9920_v10, %v5507_v56  ;;  %v5865_v43 = vrot.slane %v9922_v59, %v5507_v56  ;;  %9924 = vst [vmem:[#allocation55_spill] sm:$0xff] %v5867_v14  ;;  %v9930_v41 = vrot.slane %v5605_v42, %v5590_v32 }
 0x207   : > { %9925 = vst [vmem:[#allocation56_spill] sm:$0xff] %v5869_v28  ;;  %9926 = vst [vmem:[#allocation57_spill] sm:$0xff] %v5871_v60  ;;  %v5879_v10 = vrot.slane %v9928_v48, %v5469_v46 }
 0x208   : > { %9921 = vst [vmem:[#allocation53_spill] sm:$0xff] %v5859_v12  ;;  %9923 = vst [vmem:[#allocation54_spill] sm:$0xff] %v5865_v43  ;;  %v5885_v59 = vrot.slane %v9930_v41, %v5469_v46  ;;  %v2149_v49 = vmul.f32 %v5859_v12, %v2009_v62  ;;  %v2151_v7 = vmul.f32 %v5865_v43, %v2011_v50 }
 0x209   : > { %9927 = vst [vmem:[#allocation58_spill] sm:$0xff] %v5873_v25  ;;  %9929 = vst [vmem:[#allocation59_spill] sm:$0xff] %v5879_v10  ;;  %v2153_v2 = vmul.f32 %v5859_v12, %v2053_v29  ;;  %v2155_v31 = vmul.f32 %v5865_v43, %v2055_v52  ;;  %v2157_v26 = vmul.f32 %v5859_v12, %v5838_v17 }
 0x20a   : > { %9931 = vst [vmem:[#allocation60_spill] sm:$0xff] %v5885_v59  ;;  %v2159_v48 = vmul.f32 %v5865_v43, %v5843_v24  ;;  %v2161_v60 = vmul.f32 %v5859_v12, %v2061_v51  ;;  %v2163_v14 = vmul.f32 %v5865_v43, %v2063_v63  ;;  %v2213_v41 = vadd.f32 %v2149_v49, %v1824_v54 }
 0x20b   : > { %v2215_v36 = vadd.f32 %v2151_v7, %v1826_v34  ;;  %v2217_v18 = vadd.f32 %v2153_v2, %v1828_v21  ;;  %v2219_v62 = vadd.f32 %v2155_v31, %v1830_v55  ;;  %v5897_v11 = vadd.f32 %v2157_v26, %v1832_v19 }
 0x20c   : > { %v5899_v50 = vadd.f32 %v2159_v48, %v1834_v57  ;;  %v5901_v29 = vadd.f32 %v2161_v60, %v1836_v8  ;;  %v5903_v52 = vadd.f32 %v2163_v14, %v1838_v61  ;;  %v2327_v9 = vmul.f32 %v5879_v10, %v5650_v4  ;;  %v2953_v48 = vld [vmem:[#allocation2 + $0xf0] sm:$0xff] }
 0x20d   : > { %9932 = vst [vmem:[#allocation61_spill] sm:$0xff] %v5897_v11  ;;  %v2329_v51 = vmul.f32 %v5885_v59, %v5654_v47  ;;  %v2331_v49 = vmul.f32 %v5879_v10, %v5658_v20  ;;  %v2333_v2 = vmul.f32 %v5885_v59, %v5662_v22  ;;  %v9384_v19 = vrot.slane %v5869_v28, 7 }
 0x20e   : > { %9933 = vst [vmem:[#allocation62_spill] sm:$0xff] %v5899_v50  ;;  %9934 = vst [vmem:[#allocation63_spill] sm:$0xff] %v5901_v29  ;;  %v9383_v21 = vrot.slane %v5873_v25, 7  ;;  %v2545_v8 = vrot.slane %v5603_v40, %v5593_v33  ;;  %v2553_v34 = vrot.slane %v5605_v42, %v5593_v33  ;;  %v2391_v4 = vadd.f32 %v2327_v9, %v2213_v41 }
 0x20f   : > { %9935 = vst [vmem:[#allocation64_spill] sm:$0xff] %v5903_v52  ;;  %v2393_v54 = vadd.f32 %v2329_v51, %v2215_v36  ;;  %v2395_v26 = vadd.f32 %v2331_v49, %v2217_v18  ;;  %v2397_v47 = vadd.f32 %v2333_v2, %v2219_v62  ;;  %v2471_v55 = vsel %vm1562_vm0, %v9384_v19, %v5691_v5  ;;  %v2952_v18 = vld [vmem:[#allocation2 + $0x138] sm:$0xff]  ;;  %v2955_v51 = vld [vmem:[#allocation2 + $0xc8] sm:$0xff] }
 0x210   : > { %v2473_v57 = vsel %vm1562_vm0, %v9383_v21, %v5694_v6  ;;  %v5930_v61 = vrot.slane %v2545_v8, %v5466_v45  ;;  %v5933_v9 = vrot.slane %v2553_v34, %v5466_v45  ;;  %v2475_v36 = vsel %vm5640_vm1, %v2471_v55, 0.0  ;;  %v2954_v62 = vld [vmem:[#allocation2 + $0x18] sm:$0xff] }
 0x211   : > { %v2477_v63 = vsel %vm5640_vm1, %v2473_v57, 0.0  ;;  %v2727_v5 = vsel %vm5733_vm4, %v5828_v15, 0.0  ;;  %v2729_v6 = vsel %vm5733_vm4, %v5833_v16, 0.0  ;;  %v2793_v41 = vrot.slane %v5603_v40, %v5597_v37  ;;  %v2980_v57 = vld [vmem:[#allocation2 + $0xb8] sm:$0xff] }
 0x212   : > { %9936 = vst [vmem:[#allocation65_spill] sm:$0xff] %v5930_v61  ;;  %9937 = vst [vmem:[#allocation66_spill] sm:$0xff] %v5933_v9  ;;  %v2575_v14 = vmul.f32 %v5930_v61, %v2475_v36  ;;  %v2577_v60 = vmul.f32 %v5933_v9, %v2477_v63  ;;  %v2579_v7 = vmul.f32 %v5930_v61, %v5748_v53  ;;  %v5955_v16 = vunpack.c.l.bf16 %v2952_v18  ;;  %v2981_v36 = vld [vmem:[#allocation2 + $0x60] sm:$0xff] }
 0x213   : > { %v2581_v31 = vmul.f32 %v5933_v9, %v5755_v23  ;;  %v2801_v15 = vrot.slane %v5605_v42, %v5597_v37  ;;  %v5957_v49 = vunpack.c.h.bf16 %v2952_v18  ;;  %v5960_v55 = vrot.slane %v2793_v41, %v5507_v56 }
 0x214   : > { %v2639_v2 = vadd.f32 %v2575_v14, %v2391_v4  ;;  %v2641_v8 = vadd.f32 %v2577_v60, %v2393_v54  ;;  %v2643_v34 = vadd.f32 %v2579_v7, %v2395_v26  ;;  %v5965_v63 = vunpack.c.l.bf16 %v2953_v48  ;;  %v5977_v26 = vld [vmem:[#allocation10 + $0x20] sm:$0x77] }
 0x215   : > { %9938 = vst [vmem:[#allocation67_spill] sm:$0xff] %v5957_v49  ;;  %v2645_v53 = vadd.f32 %v2581_v31, %v2397_v47  ;;  %9939 = vst [vmem:[#allocation68_spill] sm:$0xff] %v5960_v55  ;;  %v5963_v23 = vrot.slane %v2801_v15, %v5507_v56  ;;  %v5967_v21 = vunpack.c.h.bf16 %v2953_v48  ;;  %v5969_v19 = vunpack.c.l.bf16 %v2954_v62  ;;  %v5979_v47 = vld [vmem:[#allocation10 + $0x28] sm:$0x77] }
 0x216   : > { %v5971_v18 = vunpack.c.h.bf16 %v2954_v62  ;;  %v5973_v4 = vunpack.c.l.bf16 %v2955_v51  ;;  %v5975_v54 = vunpack.c.h.bf16 %v2955_v51  ;;  %v2823_v14 = vmul.f32 %v5960_v55, %v5838_v17 }
 0x217   : > { %9940 = vst [vmem:[#allocation69_spill] sm:$0xff] %v5963_v23  ;;  %9941 = vst [vmem:[#allocation70_spill] sm:$0xff] %v5967_v21  ;;  %v2825_v60 = vmul.f32 %v5963_v23, %v5843_v24  ;;  %v2827_v7 = vmul.f32 %v5960_v55, %v2727_v5  ;;  %v2829_v31 = vmul.f32 %v5963_v23, %v2729_v6  ;;  %v5987_v48 = vunpack.c.l.bf16 %v2980_v57 }
 0x218   : > { %9942 = vst [vmem:[#allocation71_spill] sm:$0xff] %v5969_v19  ;;  %9943 = vst [vmem:[#allocation72_spill] sm:$0xff] %v5971_v18  ;;  %v5989_v41 = vunpack.c.h.bf16 %v2980_v57  ;;  %v5991_v15 = vunpack.c.l.bf16 %v2981_v36  ;;  %v5993_v62 = vunpack.c.h.bf16 %v2981_v36  ;;  %v2887_v51 = vadd.f32 %v2823_v14, %v2639_v2 }
 0x219   : > { %9944 = vst [vmem:[#allocation73_spill] sm:$0xff] %v5973_v4  ;;  %9945 = vst [vmem:[#allocation74_spill] sm:$0xff] %v5975_v54  ;;  %v2889_v25 = vadd.f32 %v2825_v60, %v2641_v8  ;;  %v2891_v28 = vadd.f32 %v2827_v7, %v2643_v34  ;;  %v2893_v52 = vadd.f32 %v2829_v31, %v2645_v53  ;;  %v6000_v5 = vrot.slane %v5666_v27, 7 }
 0x21a   : > { %9946 = vst [vmem:[#allocation75_spill] sm:$0xff] %v5987_v48  ;;  %9947 = vst [vmem:[#allocation76_spill] sm:$0xff] %v5989_v41  ;;  %v3055_v17 = vrot.slane %v5977_v26, %v5590_v32  ;;  %v3063_v24 = vrot.slane %v5979_v47, %v5590_v32  ;;  %v6003_v6 = vrot.slane %v5670_v30, 7  ;;  %v9390_v57 = vrot.slane %v5957_v49, 7 }
 0x21b   : > { %9948 = vst [vmem:[#allocation77_spill] sm:$0xff] %v5991_v15  ;;  %9949 = vst [vmem:[#allocation78_spill] sm:$0xff] %v5993_v62  ;;  %v9389_v36 = vrot.slane %v5967_v21, 7  ;;  %v9391_v2 = vrot.slane %v5989_v41, 7  ;;  %v9394_v8 = vrot.slane %v5993_v62, 7  ;;  %v3411_v32 = vrot.slane %v5977_v26, %v5593_v33 }
 0x21c   : > { %v6010_v34 = vrot.slane %v3055_v17, %v5469_v46  ;;  %v6013_v53 = vrot.slane %v3063_v24, %v5469_v46  ;;  %v3419_v14 = vrot.slane %v5979_v47, %v5593_v33  ;;  %v6024_v60 = vsel %vm1562_vm0, %v6000_v5, %v9390_v57 }
 0x21d   : > { %v6031_v7 = vsel %vm1562_vm0, %v6003_v6, %v9389_v36  ;;  %v3337_v33 = vsel %vm1562_vm0, %v9391_v2, %v6000_v5  ;;  %v3339_v31 = vsel %vm1562_vm0, %v9394_v8, %v6003_v6  ;;  %v6056_v8 = vrot.slane %v3411_v32, %v5466_v45 }
 0x21e   : > { %9950 = vst [vmem:[#allocation79_spill] sm:$0xff] %v6010_v34  ;;  %9951 = vst [vmem:[#allocation80_spill] sm:$0xff] %v6013_v53  ;;  %v3085_v17 = vmul.f32 %v6010_v34, %v5666_v27  ;;  %v3087_v24 = vmul.f32 %v6013_v53, %v5670_v30  ;;  %v3089_v36 = vmul.f32 %v6010_v34, %v5957_v49  ;;  %v3341_v2 = vsel %vm5640_vm1, %v3337_v33, 0.0  ;;  %v9968_v30 = vld [vmem:[#allocation30_spill] sm:$0xff]  ;;  %v9972_v27 = vld [vmem:[#allocation33_spill] sm:$0xff] }
 0x21f   : > { %9952 = vst [vmem:[#allocation81_spill] sm:$0xff] %v6031_v7  ;;  %v3091_v57 = vmul.f32 %v6013_v53, %v5967_v21  ;;  %v3343_v62 = vsel %vm5640_vm1, %v3339_v31, 0.0  ;;  %9953 = vst [vmem:[#allocation82_spill] sm:$0xff] %v6056_v8  ;;  %v6059_v41 = vrot.slane %v3419_v14, %v5466_v45  ;;  %v3441_v34 = vmul.f32 %v6056_v8, %v3341_v2 }
 0x220   : > { %v3149_v23 = vadd.f32 %v3085_v17, %v2887_v51  ;;  %v3151_v55 = vadd.f32 %v3087_v24, %v2889_v25  ;;  %v3153_v29 = vadd.f32 %v3089_v36, %v2891_v28  ;;  %v3445_v33 = vmul.f32 %v6056_v8, %v6024_v60  ;;  %v9967_v8 = vld [vmem:[#allocation28_spill] sm:$0xff] }
 0x221   : > { %9954 = vst [vmem:[#allocation83_spill] sm:$0xff] %v6059_v41  ;;  %v3155_v50 = vadd.f32 %v3091_v57, %v2893_v52  ;;  %v3443_v53 = vmul.f32 %v6059_v41, %v3343_v62  ;;  %v3447_v31 = vmul.f32 %v6059_v41, %v6031_v7  ;;  %v3573_v32 = vrot.slane %v5957_v49, 1  ;;  %v6074_v62 = vld [vmem:[%s9329_s4] sm:$0xf] }
 0x222   : > { %v3575_v11 = vrot.slane %v5967_v21, 1  ;;  %v9406_v14 = vrot.slane %v5971_v18, 1  ;;  %v9405_v25 = vrot.slane %v5975_v54, 1  ;;  %v3505_v28 = vadd.f32 %v3441_v34, %v3149_v23 }
 0x223   : > { %v3507_v52 = vadd.f32 %v3443_v53, %v3151_v55  ;;  %v3509_v51 = vadd.f32 %v3445_v33, %v3153_v29  ;;  %v3511_v57 = vadd.f32 %v3447_v31, %v3155_v50  ;;  %v6091_v50 = vsel %vm1951_vm3, %v5806_v0, %v3573_v32  ;;  %v9966_v0 = vld [vmem:[#allocation27_spill] sm:$0xff] }
 0x224   : > { %v6080_v36 = vsel %vm1951_vm3, %v3573_v32, %v9406_v14  ;;  %v6086_v2 = vsel %vm1951_vm3, %v3575_v11, %v9405_v25  ;;  %9957 = vst [vmem:[#allocation86_spill] sm:$0xff] %v6091_v50  ;;  %v6096_v29 = vsel %vm1951_vm3, %v5809_v58, %v3575_v11  ;;  %v3767_v34 = vrot.slane %v5977_v26, %v5597_v37 }
 0x225   : > { %9955 = vst [vmem:[#allocation84_spill] sm:$0xff] %v6080_v36  ;;  %9956 = vst [vmem:[#allocation85_spill] sm:$0xff] %v6086_v2  ;;  %v3701_v55 = vsel %vm5733_vm4, %v6080_v36, 0.0  ;;  %v3703_v23 = vsel %vm5733_vm4, %v6086_v2, 0.0  ;;  %v3775_v53 = vrot.slane %v5979_v47, %v5597_v37  ;;  %v6110_v17 = vrot.slane %v6074_v62, %v5469_v46 }
 0x226   : > { %9958 = vst [vmem:[#allocation87_spill] sm:$0xff] %v6096_v29  ;;  %v9960_v11 = vsub.s32 3, %v5463_v44  ;;  %v1401_v33 = vrot.slane %v5599_v38, %v5469_v46  ;;  %v1409_v31 = vrot.slane %v5601_v39, %v5469_v46  ;;  %v6122_v32 = vrot.slane %v3767_v34, %v5507_v56 }
 0x227   : > { %9959 = vst [vmem:[#allocation88_spill] sm:$0xff] %v6110_v17  ;;  %v6125_v37 = vrot.slane %v3775_v53, %v5507_v56  ;;  %v1498_v25 = vrot.slane %v5623_v1, 7  ;;  %v1500_v14 = vrot.slane %v5627_v3, 7 }
 0x228   : > { %v6115_v24 = vrot.slane %v6074_v62, %v9960_v11  ;;  %9962 = vst [vmem:[#allocation90_spill] sm:$0xff] %v6122_v32  ;;  %v6130_v58 = vrot.slane %v1401_v33, %v5469_v46  ;;  %v6133_v11 = vrot.slane %v1409_v31, %v5469_v46  ;;  %v3797_v34 = vmul.f32 %v6122_v32, %v6091_v50 }
 0x229   : > { %9963 = vst [vmem:[#allocation91_spill] sm:$0xff] %v6125_v37  ;;  %v3799_v53 = vmul.f32 %v6125_v37, %v6096_v29  ;;  %v3801_v18 = vmul.f32 %v6122_v32, %v3701_v55  ;;  %v3803_v9 = vmul.f32 %v6125_v37, %v3703_v23  ;;  %v6152_v55 = vrot.slane %v9968_v30, 7  ;;  %v9970_v23 = vld [vmem:[#allocation31_spill] sm:$0xff]  ;;  %v9971_v32 = vld [vmem:[#allocation32_spill] sm:$0xff] }
 0x22a   : > { %9961 = vst [vmem:[#allocation89_spill] sm:$0xff] %v6115_v24  ;;  %9964 = vst [vmem:[#allocation92_spill] sm:$0xff] %v6130_v58  ;;  %v1434_v33 = vmul.f32 %v6130_v58, %v5623_v1  ;;  %v1436_v31 = vmul.f32 %v6133_v11, %v5627_v3  ;;  %v1438_v41 = vmul.f32 %v6130_v58, %v9966_v0  ;;  %v6155_v37 = vrot.slane %v9970_v23, 7 }
 0x22b   : > { %9965 = vst [vmem:[#allocation93_spill] sm:$0xff] %v6133_v11  ;;  %v1440_v54 = vmul.f32 %v6133_v11, %v9967_v8  ;;  %v3861_v61 = vadd.f32 %v3797_v34, %v3505_v28  ;;  %v3863_v21 = vadd.f32 %v3799_v53, %v3507_v52  ;;  %v3865_v49 = vadd.f32 %v3801_v18, %v3509_v51  ;;  %v9973_v18 = vld [vmem:[#allocation38_spill] sm:$0xff]  ;;  %v9975_v52 = vld [vmem:[#allocation40_spill] sm:$0xff] }
 0x22c   : > { %v3867_v59 = vadd.f32 %v3803_v9, %v3511_v57  ;;  %9969 = vst [vmem:[#allocation30_spill] sm:$0xff] %v6152_v55  ;;  %v9445_v10 = vrot.slane %v9971_v32, 7  ;;  %v9446_v29 = vrot.slane %v9972_v27, 7  ;;  %v6164_v9 = vrot.slane %v9973_v18, 7 }
 0x22d   : > { %v3947_v43 = vadd.f32 %v6110_v17, %v3861_v61  ;;  %v3949_v58 = vadd.f32 %v6115_v24, %v3863_v21  ;;  %v3951_v11 = vadd.f32 %v6110_v17, %v3865_v49  ;;  %v6167_v51 = vrot.slane %v9975_v52, 7 }
 0x22e   : > { %v3953_v28 = vadd.f32 %v6115_v24, %v3867_v59  ;;  %9974 = vst [vmem:[#allocation31_spill] sm:$0xff] %v6164_v9  ;;  %v6174_v57 = vsel %vm1562_vm0, %v6152_v55, %v9445_v10  ;;  %v6181_v21 = vsel %vm1562_vm0, %v6155_v37, %v9446_v29  ;;  %v9977_v49 = vrot.slane %v9966_v0, 7 }
 0x22f   : > { %9976 = vst [vmem:[#allocation32_spill] sm:$0xff] %v6167_v51  ;;  %v4011_v59 = vmax.f32 %v3947_v43, 0.0  ;;  %v4013_v61 = vmax.f32 %v3951_v11, 0.0  ;;  %v9978_v53 = vrot.slane %v9967_v8, 7  ;;  %v1623_v52 = vsel %vm1562_vm0, %v6164_v9, %v1498_v25 }
 0x230   : > { %v1619_v34 = vsel %vm1562_vm0, %v1498_v25, %v9977_v49  ;;  %v1625_v29 = vsel %vm1562_vm0, %v6167_v51, %v1500_v14  ;;  %v1726_v43 = vrot.slane %v5599_v38, %v5466_v45  ;;  %v1734_v11 = vrot.slane %v5601_v39, %v5466_v45 }
 0x231   : > { %v1621_v10 = vsel %vm1562_vm0, %v1500_v14, %v9978_v53  ;;  %v4043_v49 = vmul.f32 %v4011_v59, %v3949_v58  ;;  %v4045_v18 = vmul.f32 %v4013_v61, %v3953_v28  ;;  %v1659_v24 = vsel %vm5640_vm1, %v1623_v52, 0.0 }
 0x232   : > { %v1661_v53 = vsel %vm5640_vm1, %v1625_v29, 0.0  ;;  %v6206_v25 = vrot.slane %v1726_v43, %v5466_v45  ;;  %v6209_v9 = vrot.slane %v1734_v11, %v5466_v45  ;;  %v1891_v58 = vrot.slane %v9966_v0, 1  ;;  %v9993_v0 = vld [vmem:[#allocation57_spill] sm:$0xff] }
 0x233   : > { %v4075_v17 = vpack.c.bf16 %v4045_v18, %v4043_v49  ;;  %v1893_v28 = vrot.slane %v9967_v8, 1  ;;  %v6216_v52 = vrot.slane %v9968_v30, 1  ;;  %v6231_v49 = vrot.slane %v9970_v23, 1 }
 0x234   : > { %9979 = vst [vmem:[#allocation33_spill] sm:$0xff] %v6206_v25  ;;  %9980 = vst [vmem:[#allocation94_spill] sm:$0xff] %v6209_v9  ;;  %v1759_v29 = vmul.f32 %v6206_v25, %v1659_v24  ;;  %v1761_v59 = vmul.f32 %v6209_v9, %v1661_v53  ;;  %v1763_v61 = vmul.f32 %v6206_v25, %v1619_v34  ;;  %v1899_v24 = vrot.slane %v9971_v32, 1 }
 0x235   : > { %9981 = vst [vmem:[#allocation95_spill] sm:$0xff] %v6216_v52  ;;  %v1765_v43 = vmul.f32 %v6209_v9, %v1621_v10  ;;  %4257 = vmatprep.mubr.bf16.mxu0 %v4075_v17  ;;  %v6224_v11 = vmul.f32 %v6206_v25, %v6174_v57  ;;  %v6228_v18 = vmul.f32 %v6209_v9, %v6181_v21  ;;  %9984 = vst [vmem:[#allocation98_spill] sm:$0xff] %v6231_v49  ;;  %v9985_v17 = vld [vmem:[#allocation34_spill] sm:$0xff]  ;;  %v9987_v25 = vld [vmem:[#allocation36_spill] sm:$0xff] }
 0x236   : > { %v1823_v51 = vadd.f32 %v1759_v29, %v1434_v33  ;;  %v1825_v53 = vadd.f32 %v1761_v59, %v1436_v31  ;;  %v1827_v14 = vadd.f32 %v1763_v61, %v1438_v41  ;;  %v1901_v10 = vrot.slane %v9972_v27, 1 }
 0x237   : > { %9982 = vst [vmem:[#allocation96_spill] sm:$0xff] %v6224_v11  ;;  %9983 = vst [vmem:[#allocation97_spill] sm:$0xff] %v6228_v18  ;;  %v1829_v34 = vadd.f32 %v1765_v43, %v1440_v54  ;;  %v6236_v8 = vrot.slane %v9985_v17, 1  ;;  %v6239_v11 = vrot.slane %v9987_v25, 1  ;;  %v6244_v18 = vsel %vm1951_vm3, %v6216_v52, %v1899_v24 }
 0x238   : > { %v2004_v33 = vsel %vm1951_vm3, %v1891_v58, %v6216_v52  ;;  %v2006_v54 = vsel %vm1951_vm3, %v1893_v28, %v6231_v49  ;;  %v9989_v41 = vrot.slane %v5623_v1, 1  ;;  %v9990_v29 = vrot.slane %v5627_v3, 1 }
 0x239   : > { %9986 = vst [vmem:[#allocation34_spill] sm:$0xff] %v6236_v8  ;;  %9988 = vst [vmem:[#allocation36_spill] sm:$0xff] %v6239_v11  ;;  %v6263_v61 = vsel %vm1951_vm3, %v1899_v24, %v6236_v8  ;;  %v6268_v43 = vsel %vm1951_vm3, %v1901_v10, %v6239_v11  ;;  %v6273_v52 = vsel %vm1951_vm3, %v6231_v49, %v1901_v10  ;;  %v9992_v49 = vld [vmem:[#allocation55_spill] sm:$0xff] }
 0x23a   : > { %v2008_v31 = vsel %vm1951_vm3, %v9989_v41, %v1891_v58  ;;  %v2010_v59 = vsel %vm1951_vm3, %v9990_v29, %v1893_v28  ;;  %v2052_v58 = vsel %vm5733_vm4, %v2004_v33, 0.0  ;;  %v2054_v28 = vsel %vm5733_vm4, %v2006_v54, 0.0 }
 0x23b   : > { %v2060_v24 = vsel %vm5739_vm5, %v6263_v61, 0.0  ;;  %v2062_v29 = vsel %vm5739_vm5, %v6268_v43, 0.0  ;;  %v2115_v3 = vrot.slane %v5599_v38, %v5507_v56  ;;  %v2123_v10 = vrot.slane %v5601_v39, %v5507_v56 }
 0x23c   : > { %v2293_v33 = vrot.slane %v5603_v40, %v5469_v46  ;;  %v2301_v54 = vrot.slane %v5605_v42, %v5469_v46  ;;  %v9477_v1 = vrot.slane %v9992_v49, 7  ;;  %v2541_v50 = vrot.slane %v5603_v40, %v5466_v45 }
 0x23d   : > { %v6295_v9 = vrot.slane %v2115_v3, %v5507_v56  ;;  %v2549_v38 = vrot.slane %v5605_v42, %v5466_v45  ;;  %v6303_v39 = vrot.slane %v2123_v10, %v5507_v56 }
 0x23e   : > { %v6306_v12 = vrot.slane %v2293_v33, %v5469_v46  ;;  %v6309_v2 = vrot.slane %v2301_v54, %v5469_v46  ;;  %v2470_v3 = vsel %vm1562_vm0, %v9477_v1, %v6152_v55 }
 0x23f   : > { %9994 = vst [vmem:[#allocation99_spill] sm:$0xff] %v6303_v39  ;;  %v2148_v41 = vmul.f32 %v6295_v9, %v2008_v31  ;;  %v2152_v36 = vmul.f32 %v6295_v9, %v2052_v58  ;;  %v6320_v10 = vmul.f32 %v6295_v9, %v6244_v18  ;;  %v6323_v33 = vmul.f32 %v6295_v9, %v2060_v24 }
 0x240   : > { %9995 = vst [vmem:[#allocation100_spill] sm:$0xff] %v6306_v12  ;;  %9996 = vst [vmem:[#allocation101_spill] sm:$0xff] %v6309_v2  ;;  %v2150_v54 = vmul.f32 %v6303_v39, %v2010_v59  ;;  %v2154_v7 = vmul.f32 %v6303_v39, %v2054_v28  ;;  %v6329_v49 = vmul.f32 %v6303_v39, %v6273_v52 }
 0x241   : > { %9997 = vst [vmem:[#allocation102_spill] sm:$0xff] %v6320_v10  ;;  %9998 = vst [vmem:[#allocation103_spill] sm:$0xff] %v6323_v33  ;;  %v6332_v1 = vmul.f32 %v6303_v39, %v2062_v29  ;;  %v2212_v31 = vadd.f32 %v2148_v41, %v1823_v51  ;;  %v2216_v58 = vadd.f32 %v2152_v36, %v1827_v14  ;;  %v10000_v29 = vrot.slane %v9993_v0, 7 }
 0x242   : > { %9999 = vst [vmem:[#allocation104_spill] sm:$0xff] %v6329_v49  ;;  %v2326_v55 = vmul.f32 %v6306_v12, %v9968_v30  ;;  %v2328_v24 = vmul.f32 %v6309_v2, %v9970_v23  ;;  %v2214_v33 = vadd.f32 %v2150_v54, %v1825_v53  ;;  %v2218_v10 = vadd.f32 %v2154_v7, %v1829_v34 }
 0x243   : > { %v2330_v59 = vmul.f32 %v6306_v12, %v9971_v32  ;;  %v2332_v28 = vmul.f32 %v6309_v2, %v9972_v27  ;;  %v2472_v36 = vsel %vm1562_vm0, %v10000_v29, %v6155_v37  ;;  %v2474_v51 = vsel %vm5640_vm1, %v2470_v3, 0.0 }
 0x244   : > { %v2390_v49 = vadd.f32 %v2326_v55, %v2212_v31  ;;  %v6350_v14 = vrot.slane %v2541_v50, %v5466_v45  ;;  %v2392_v7 = vadd.f32 %v2328_v24, %v2214_v33  ;;  %v2476_v41 = vsel %vm5640_vm1, %v2472_v36, 0.0 }
 0x245   : > { %v2394_v53 = vadd.f32 %v2330_v59, %v2216_v58  ;;  %v2396_v34 = vadd.f32 %v2332_v28, %v2218_v10  ;;  %v6355_v55 = vrot.slane %v2549_v38, %v5466_v45  ;;  %v2726_v3 = vsel %vm5733_vm4, %v6263_v61, 0.0 }
 0x246   : > { %10001 = vst [vmem:[#allocation105_spill] sm:$0xff] %v6350_v14  ;;  %v2574_v54 = vmul.f32 %v6350_v14, %v2474_v51  ;;  %v2578_v31 = vmul.f32 %v6350_v14, %v6174_v57  ;;  %v2728_v50 = vsel %vm5733_vm4, %v6268_v43, 0.0  ;;  %v2789_v10 = vrot.slane %v5603_v40, %v5507_v56 }
 0x247   : > { %10002 = vst [vmem:[#allocation106_spill] sm:$0xff] %v6355_v55  ;;  %v2797_v38 = vrot.slane %v5605_v42, %v5507_v56  ;;  %v3051_v33 = vrot.slane %v5977_v26, %v5469_v46  ;;  %v2576_v58 = vmul.f32 %v6355_v55, %v2476_v41  ;;  %v2580_v57 = vmul.f32 %v6355_v55, %v6181_v21 }
 0x248   : > { %v2638_v24 = vadd.f32 %v2574_v54, %v2390_v49  ;;  %v2642_v61 = vadd.f32 %v2578_v31, %v2394_v53  ;;  %v6376_v59 = vrot.slane %v2789_v10, %v5507_v56  ;;  %v3059_v40 = vrot.slane %v5979_v47, %v5469_v46 }
 0x249   : > { %v6379_v43 = vrot.slane %v2797_v38, %v5507_v56  ;;  %v6384_v42 = vrot.slane %v3051_v33, %v5469_v46  ;;  %v2640_v28 = vadd.f32 %v2576_v58, %v2392_v7  ;;  %v2644_v29 = vadd.f32 %v2580_v57, %v2396_v34 }
 0x24a   : > { %10003 = vst [vmem:[#allocation107_spill] sm:$0xff] %v6376_v59  ;;  %v6387_v36 = vrot.slane %v9985_v17, 7  ;;  %v6390_v21 = vrot.slane %v9987_v25, 7  ;;  %v2822_v49 = vmul.f32 %v6376_v59, %v6244_v18  ;;  %v2826_v53 = vmul.f32 %v6376_v59, %v2726_v3 }
 0x24b   : > { %10004 = vst [vmem:[#allocation108_spill] sm:$0xff] %v6379_v43  ;;  %10005 = vst [vmem:[#allocation109_spill] sm:$0xff] %v6384_v42  ;;  %v2824_v51 = vmul.f32 %v6379_v43, %v6273_v52  ;;  %v2828_v41 = vmul.f32 %v6379_v43, %v2728_v50  ;;  %v6399_v54 = vrot.slane %v3059_v40, %v5469_v46  ;;  %v9483_v31 = vrot.slane %v5955_v16, 7 }
 0x24c   : > { %v3084_v7 = vmul.f32 %v6384_v42, %v9985_v17  ;;  %v3088_v34 = vmul.f32 %v6384_v42, %v5955_v16  ;;  %v2886_v10 = vadd.f32 %v2822_v49, %v2638_v24  ;;  %v2890_v38 = vadd.f32 %v2826_v53, %v2642_v61 }
 0x24d   : > { %10006 = vst [vmem:[#allocation110_spill] sm:$0xff] %v6399_v54  ;;  %v2888_v18 = vadd.f32 %v2824_v51, %v2640_v28  ;;  %v2892_v33 = vadd.f32 %v2828_v41, %v2644_v29  ;;  %v3086_v52 = vmul.f32 %v6399_v54, %v9987_v25  ;;  %v3090_v3 = vmul.f32 %v6399_v54, %v5965_v63 }
 0x24e   : > { %v9482_v46 = vrot.slane %v5965_v63, 7  ;;  %v9480_v50 = vrot.slane %v5987_v48, 7  ;;  %v3148_v58 = vadd.f32 %v3084_v7, %v2886_v10  ;;  %v3152_v57 = vadd.f32 %v3088_v34, %v2890_v38 }
 0x24f   : > { %v9479_v40 = vrot.slane %v5991_v15, 7  ;;  %v6418_v24 = vsel %vm1562_vm0, %v6387_v36, %v9483_v31  ;;  %v3150_v61 = vadd.f32 %v3086_v52, %v2888_v18  ;;  %v3154_v28 = vadd.f32 %v3090_v3, %v2892_v33 }
 0x250   : > { %v6425_v29 = vsel %vm1562_vm0, %v6390_v21, %v9482_v46  ;;  %v3336_v49 = vsel %vm1562_vm0, %v9480_v50, %v6387_v36  ;;  %v3407_v41 = vrot.slane %v5977_v26, %v5466_v45  ;;  %v3415_v7 = vrot.slane %v5979_v47, %v5466_v45 }
 0x251   : > { %v3338_v51 = vsel %vm1562_vm0, %v9479_v40, %v6390_v21  ;;  %v3340_v53 = vsel %vm5640_vm1, %v3336_v49, 0.0  ;;  %v3572_v10 = vrot.slane %v5955_v16, 1  ;;  %v3574_v18 = vrot.slane %v5965_v63, 1 }
 0x252   : > { %v3342_v34 = vsel %vm5640_vm1, %v3338_v51, 0.0  ;;  %v9481_v38 = vrot.slane %v5969_v19, 1  ;;  %v6449_v33 = vrot.slane %v3407_v41, %v5466_v45  ;;  %v6452_v52 = vrot.slane %v3415_v7, %v5466_v45 }
 0x253   : > { %v9488_v3 = vrot.slane %v5973_v4, 1  ;;  %v3763_v49 = vrot.slane %v5977_v26, %v5507_v56  ;;  %v6466_v51 = vsel %vm1951_vm3, %v6236_v8, %v3572_v10  ;;  %v6471_v41 = vsel %vm1951_vm3, %v6239_v11, %v3574_v18 }
 0x254   : > { %10007 = vst [vmem:[#allocation111_spill] sm:$0xff] %v6449_v33  ;;  %10008 = vst [vmem:[#allocation112_spill] sm:$0xff] %v6452_v52  ;;  %v6461_v13 = vsel %vm1951_vm3, %v3572_v10, %v9481_v38  ;;  %v3771_v7 = vrot.slane %v5979_v47, %v5507_v56  ;;  %v3440_v26 = vmul.f32 %v6449_v33, %v3340_v53 }
 0x255   : > { %v3442_v40 = vmul.f32 %v6452_v52, %v3342_v34  ;;  %v3444_v50 = vmul.f32 %v6449_v33, %v6418_v24  ;;  %v3446_v38 = vmul.f32 %v6452_v52, %v6425_v29  ;;  %v6485_v10 = vsel %vm1951_vm3, %v3574_v18, %v9488_v3  ;;  %v6595_v52 = vld [vmem:[#allocation2 + $0x70] sm:$0xff] }
 0x256   : > { %v3700_v47 = vsel %vm5733_vm4, %v6461_v13, 0.0  ;;  %v6491_v53 = vrot.slane %v3763_v49, %v5507_v56  ;;  %v6494_v34 = vrot.slane %v3771_v7, %v5507_v56  ;;  %v3504_v46 = vadd.f32 %v3440_v26, %v3148_v58  ;;  %v10115_v33 = vld [vmem:[#allocation43_spill] sm:$0xff] }
 0x257   : > { %v3506_v31 = vadd.f32 %v3442_v40, %v3150_v61  ;;  %v3508_v11 = vadd.f32 %v3444_v50, %v3152_v57  ;;  %v3510_v8 = vadd.f32 %v3446_v38, %v3154_v28  ;;  %v3702_v15 = vsel %vm5733_vm4, %v6485_v10, 0.0 }
 0x258   : > { %10009 = vst [vmem:[#allocation113_spill] sm:$0xff] %v6491_v53  ;;  %10010 = vst [vmem:[#allocation114_spill] sm:$0xff] %v6494_v34  ;;  %v3796_v18 = vmul.f32 %v6491_v53, %v6466_v51  ;;  %v3798_v3 = vmul.f32 %v6494_v34, %v6471_v41  ;;  %v3800_v49 = vmul.f32 %v6491_v53, %v3700_v47  ;;  %v1241_v28 = vadd.s32 40, %v5463_v44 }
 0x259   : > { %v3802_v48 = vmul.f32 %v6494_v34, %v3702_v15  ;;  %v6507_v58 = vrot.slane %v6074_v62, %v5466_v45  ;;  %v6511_v50 = vrot.slane %v6074_v62, %v5507_v56  ;;  %v1256_v7 = vand.u32 15, %v1240_v35  ;;  %v10047_v34 = vld [vmem:[#allocation63_spill] sm:$0xff] }
 0x25a   : > { %v3860_v57 = vadd.f32 %v3796_v18, %v3504_v46  ;;  %v3862_v40 = vadd.f32 %v3798_v3, %v3506_v31  ;;  %v3864_v61 = vadd.f32 %v3800_v49, %v3508_v11  ;;  %v1257_v47 = vand.u32 15, %v1241_v28  ;;  %v10019_v49 = vld [vmem:[#allocation47_spill] sm:$0xff] }
 0x25b   : > { %10011 = vst [vmem:[#allocation115_spill] sm:$0xff] %v6507_v58  ;;  %10012 = vst [vmem:[#allocation116_spill] sm:$0xff] %v6511_v50  ;;  %v3866_v38 = vadd.f32 %v3802_v48, %v3510_v8  ;;  %vm6519_vm6 = vcmp.ne.s32.totalorder %v1256_v7, 0  ;;  %v10017_v48 = vrot.slane %v5658_v20, 7  ;;  %v10018_v46 = vrot.slane %v5662_v22, 7 }
 0x25c   : > { %v3946_v26 = vadd.f32 %v6507_v58, %v3860_v57  ;;  %v3948_v15 = vadd.f32 %v6511_v50, %v3862_v40  ;;  %v3950_v45 = vadd.f32 %v6507_v58, %v3864_v61  ;;  %vm6523_vm7 = vcmp.ne.s32.totalorder %v1257_v47, 15  ;;  %v10021_v57 = vld [vmem:[#allocation48_spill] sm:$0xff]  ;;  %v10022_v40 = vld [vmem:[#allocation81_spill] sm:$0xff] }
 0x25d   : > { %v3952_v0 = vadd.f32 %v6511_v50, %v3866_v38  ;;  %v1608_v8 = vsel %vm1562_vm0, %v10017_v48, %v6000_v5  ;;  %v1610_v3 = vsel %vm1562_vm0, %v10018_v46, %v6003_v6  ;;  %v6541_v35 = vmul.f32 %v6024_v60, %v10019_v49  ;;  %v10026_v38 = vld [vmem:[#allocation84_spill] sm:$0xff]  ;;  %v10028_v47 = vld [vmem:[#allocation53_spill] sm:$0xff]  ;;  %v10032_v48 = vld [vmem:[#allocation87_spill] sm:$0xff] }
 0x25e   : > { %v4010_v62 = vmax.f32 %v3946_v26, 0.0  ;;  %v4012_v31 = vmax.f32 %v3950_v45, 0.0  ;;  %v1676_v18 = vsel %vm6519_vm6, %v1608_v8, 0.0  ;;  %v6545_v61 = vmul.f32 %v10022_v40, %v10021_v57  ;;  %v10027_v26 = vld [vmem:[#allocation85_spill] sm:$0xff]  ;;  %v10040_v50 = vld [vmem:[#allocation67_spill] sm:$0xff] }
 0x25f   : > { %10020 = vst [vmem:[#allocation117_spill] sm:$0xff] %v6541_v35  ;;  %v1678_v5 = vsel %vm6519_vm6, %v1610_v3, 0.0  ;;  %v6550_v22 = vmul.f32 %v10019_v49, %v1676_v18  ;;  %v2069_v7 = vsel %vm6523_vm7, %v10026_v38, 0.0  ;;  %v2071_v45 = vsel %vm6523_vm7, %v10027_v26, 0.0  ;;  %v10037_v35 = vld [vmem:[#allocation59_spill] sm:$0xff]  ;;  %v10045_v58 = vld [vmem:[#allocation61_spill] sm:$0xff] }
 0x260   : > { %10023 = vst [vmem:[#allocation81_spill] sm:$0xff] %v6545_v61  ;;  %v4042_v20 = vmul.f32 %v4010_v62, %v3948_v15  ;;  %v4044_v28 = vmul.f32 %v4012_v31, %v3952_v0  ;;  %v6553_v6 = vmul.f32 %v10021_v57, %v1678_v5  ;;  %v10029_v15 = vld [vmem:[#allocation86_spill] sm:$0xff]  ;;  %v6570_v18 = vmul.f32 %v10028_v47, %v2069_v7  ;;  %v10036_v61 = vld [vmem:[#allocation35_spill] sm:$0xff]  ;;  %v10039_v57 = vld [vmem:[#allocation60_spill] sm:$0xff] }
 0x261   : > { %10024 = vst [vmem:[#allocation118_spill] sm:$0xff] %v6550_v22  ;;  %v6563_v0 = vmul.f32 %v10029_v15, %v10028_v47  ;;  %v10031_v31 = vld [vmem:[#allocation54_spill] sm:$0xff]  ;;  %v10038_v22 = vld [vmem:[#allocation37_spill] sm:$0xff]  ;;  %v2483_v7 = vsel %vm5644_vm2, %v1608_v8, 0.0 }
 0x262   : > { %10025 = vst [vmem:[#allocation119_spill] sm:$0xff] %v6553_v6  ;;  %v4074_v62 = vpack.c.bf16 %v4044_v28, %v4042_v20  ;;  %v6567_v46 = vmul.f32 %v10032_v48, %v10031_v31  ;;  %10034 = vst [vmem:[#allocation86_spill] sm:$0xff] %v6570_v18  ;;  %v6573_v5 = vmul.f32 %v10031_v31, %v2071_v45  ;;  %v10041_v20 = vld [vmem:[#allocation70_spill] sm:$0xff]  ;;  %v2485_v45 = vsel %vm5644_vm2, %v1610_v3, 0.0 }
 0x263   : > { %10030 = vst [vmem:[#allocation84_spill] sm:$0xff] %v6563_v0  ;;  %v2335_v6 = vmul.f32 %v10037_v35, %v10036_v61  ;;  %v2337_v49 = vmul.f32 %v10039_v57, %v10038_v22  ;;  %v2339_v0 = vmul.f32 %v10040_v50, %v10037_v35  ;;  %v2341_v28 = vmul.f32 %v10041_v20, %v10039_v57  ;;  %v10044_v31 = vld [vmem:[#allocation66_spill] sm:$0xff]  ;;  %v10048_v57 = vld [vmem:[#allocation64_spill] sm:$0xff] }
 0x264   : > { %10033 = vst [vmem:[#allocation85_spill] sm:$0xff] %v6567_v46  ;;  %10035 = vst [vmem:[#allocation87_spill] sm:$0xff] %v6573_v5  ;;  %4258 = vmatmul.mubr.bf16.vlgmr.msra.gmra.mxu0 %v4074_v62  ;;  %v10043_v5 = vld [vmem:[#allocation65_spill] sm:$0xff]  ;;  %v2589_v47 = vmul.f32 %v10022_v40, %v10044_v31  ;;  %v10046_v61 = vld [vmem:[#allocation62_spill] sm:$0xff]  ;;  %v2585_v3 = vmul.f32 %v10044_v31, %v2485_v45 }
 0x265   : > { %v2587_v18 = vmul.f32 %v6024_v60, %v10043_v5  ;;  %v2399_v22 = vadd.f32 %v2335_v6, %v10045_v58  ;;  %v2401_v35 = vadd.f32 %v2337_v49, %v10046_v61  ;;  %v2403_v53 = vadd.f32 %v2339_v0, %v10047_v34  ;;  %v6605_v40 = vld [vmem:[#allocation2 + $0x20] sm:$0xff]  ;;  %v6607_v49 = vld [vmem:[#allocation2 + $0x128] sm:$0xff]  ;;  %v6609_v34 = vld [vmem:[#allocation2 + $0x110] sm:$0xff] }
 0x266   : > { %v2405_v62 = vadd.f32 %v2341_v28, %v10048_v57  ;;  %v2583_v8 = vmul.f32 %v10043_v5, %v2483_v7  ;;  %v2735_v60 = vsel %vm5739_vm5, %v10026_v38, 0.0  ;;  %v2737_v58 = vsel %vm5739_vm5, %v10027_v26, 0.0  ;;  %v10050_v6 = vld [vmem:[#allocation68_spill] sm:$0xff]  ;;  %v10051_v28 = vld [vmem:[#allocation69_spill] sm:$0xff] }
 0x267   : > { %v2651_v57 = vadd.f32 %v2587_v18, %v2403_v53  ;;  %v2831_v0 = vmul.f32 %v10029_v15, %v10050_v6  ;;  %v2833_v7 = vmul.f32 %v10032_v48, %v10051_v28  ;;  %v2649_v38 = vadd.f32 %v2585_v3, %v2401_v35  ;;  %v10056_v18 = vld [vmem:[#allocation72_spill] sm:$0xff]  ;;  %v10058_v3 = vld [vmem:[#allocation74_spill] sm:$0xff] }
 0x268   : > { %v2653_v61 = vadd.f32 %v2589_v47, %v2405_v62  ;;  %v2647_v45 = vadd.f32 %v2583_v8, %v2399_v22  ;;  %v2835_v31 = vmul.f32 %v10050_v6, %v2735_v60  ;;  %v2837_v26 = vmul.f32 %v10051_v28, %v2737_v58  ;;  %v10057_v62 = vld [vmem:[#allocation79_spill] sm:$0xff]  ;;  %v10059_v60 = vld [vmem:[#allocation80_spill] sm:$0xff] }
 0x269   : > { %v6618_v5 = vunpack.c.h.bf16 %v6595_v52  ;;  %v6621_v54 = vunpack.c.h.bf16 %v6605_v40  ;;  %v6624_v53 = vunpack.c.h.bf16 %v6607_v49  ;;  %v6627_v47 = vunpack.c.h.bf16 %v6609_v34 }
 0x26a   : > { %v2895_v15 = vadd.f32 %v2831_v0, %v2647_v45  ;;  %v2897_v48 = vadd.f32 %v2833_v7, %v2649_v38  ;;  %v2899_v22 = vadd.f32 %v2835_v31, %v2651_v57  ;;  %v2901_v35 = vadd.f32 %v2837_v26, %v2653_v61 }
 0x26b   : > { %10052 = vst [vmem:[#allocation29_spill] sm:$0xff] %v6618_v5  ;;  %10053 = vst [vmem:[#allocation61_spill] sm:$0xff] %v6621_v54  ;;  %v3093_v8 = vmul.f32 %v10057_v62, %v10056_v18  ;;  %v3095_v58 = vmul.f32 %v10059_v60, %v10058_v3  ;;  %v3097_v28 = vmul.f32 %v10057_v62, %v6618_v5  ;;  %v3221_v4 = vrot.slane %v10056_v18, 7 }
 0x26c   : > { %10054 = vst [vmem:[#allocation62_spill] sm:$0xff] %v6624_v53  ;;  %10055 = vst [vmem:[#allocation63_spill] sm:$0xff] %v6627_v47  ;;  %v3099_v6 = vmul.f32 %v10059_v60, %v6621_v54  ;;  %v3223_v42 = vrot.slane %v10058_v3, 7  ;;  %v9522_v0 = vrot.slane %v6618_v5, 7  ;;  %v9521_v31 = vrot.slane %v6621_v54, 7 }
 0x26d   : > { %v3157_v57 = vadd.f32 %v3093_v8, %v2895_v15  ;;  %v3159_v61 = vadd.f32 %v3095_v58, %v2897_v48  ;;  %v3161_v7 = vadd.f32 %v3097_v28, %v2899_v22  ;;  %v10062_v60 = vrot.slane %v10040_v50, 7 }
 0x26e   : > { %v3163_v45 = vadd.f32 %v3099_v6, %v2901_v35  ;;  %v6645_v38 = vsel %vm1562_vm0, %v3221_v4, %v9522_v0  ;;  %v6651_v26 = vsel %vm1562_vm0, %v3223_v42, %v9521_v31  ;;  %v10064_v6 = vrot.slane %v10041_v20, 7  ;;  %v10066_v35 = vld [vmem:[#allocation82_spill] sm:$0xff] }
 0x26f   : > { %10060 = vst [vmem:[#allocation64_spill] sm:$0xff] %v6645_v38  ;;  %10061 = vst [vmem:[#allocation46_spill] sm:$0xff] %v6651_v26  ;;  %v6657_v15 = vsel %vm1562_vm0, %v10062_v60, %v3221_v4  ;;  %v3453_v8 = vmul.f32 %v10066_v35, %v6645_v38  ;;  %v10067_v4 = vld [vmem:[#allocation83_spill] sm:$0xff]  ;;  %v10068_v38 = vrot.slane %v10056_v18, 1 }
 0x270   : > { %10063 = vst [vmem:[#allocation120_spill] sm:$0xff] %v6657_v15  ;;  %v6663_v28 = vsel %vm1562_vm0, %v10064_v6, %v3223_v42  ;;  %v3349_v48 = vsel %vm5644_vm2, %v6657_v15, 0.0  ;;  %v3455_v60 = vmul.f32 %v10067_v4, %v6651_v26  ;;  %v3581_v42 = vrot.slane %v6618_v5, 1 }
 0x271   : > { %10065 = vst [vmem:[#allocation121_spill] sm:$0xff] %v6663_v28  ;;  %v3351_v22 = vsel %vm5644_vm2, %v6663_v28, 0.0  ;;  %v3449_v58 = vmul.f32 %v10066_v35, %v3349_v48  ;;  %v3583_v6 = vrot.slane %v6621_v54, 1  ;;  %v3517_v0 = vadd.f32 %v3453_v8, %v3161_v7 }
 0x272   : > { %v3451_v31 = vmul.f32 %v10067_v4, %v3351_v22  ;;  %v3519_v62 = vadd.f32 %v3455_v60, %v3163_v45  ;;  %v9535_v15 = vrot.slane %v6624_v53, 1  ;;  %v9534_v28 = vrot.slane %v6627_v47, 1  ;;  %v10072_v45 = vld [vmem:[#allocation91_spill] sm:$0xff] }
 0x273   : > { %v3513_v20 = vadd.f32 %v3449_v58, %v3157_v57  ;;  %v6685_v26 = vsel %vm1951_vm3, %v10068_v38, %v3581_v42  ;;  %v10069_v48 = vrot.slane %v10058_v3, 1  ;;  %v10071_v57 = vld [vmem:[#allocation90_spill] sm:$0xff]  ;;  %v10073_v58 = vld [vmem:[#allocation92_spill] sm:$0xff] }
 0x274   : > { %v3515_v50 = vadd.f32 %v3451_v31, %v3159_v61  ;;  %v6697_v7 = vsel %vm1951_vm3, %v3581_v42, %v9535_v15  ;;  %v6703_v31 = vsel %vm1951_vm3, %v3583_v6, %v9534_v28  ;;  %v3805_v61 = vmul.f32 %v10071_v57, %v6685_v26  ;;  %v10075_v3 = vld [vmem:[#allocation88_spill] sm:$0xff] }
 0x275   : > { %v6691_v22 = vsel %vm1951_vm3, %v10069_v48, %v3583_v6  ;;  %v3709_v8 = vsel %vm5739_vm5, %v6697_v7, 0.0  ;;  %v3711_v60 = vsel %vm5739_vm5, %v6703_v31, 0.0  ;;  %v1442_v42 = vmul.f32 %v10073_v58, %v9968_v30  ;;  %v10074_v6 = vld [vmem:[#allocation93_spill] sm:$0xff] }
 0x276   : > { %10070 = vst [vmem:[#allocation122_spill] sm:$0xff] %v6691_v22  ;;  %v3807_v38 = vmul.f32 %v10072_v45, %v6691_v22  ;;  %v1444_v48 = vmul.f32 %v10074_v6, %v9970_v23  ;;  %v3809_v28 = vmul.f32 %v10071_v57, %v3709_v8  ;;  %v3811_v15 = vmul.f32 %v10072_v45, %v3711_v60  ;;  %v10076_v30 = vld [vmem:[#allocation89_spill] sm:$0xff] }
 0x277   : > { %v3869_v4 = vadd.f32 %v3805_v61, %v3513_v20  ;;  %v1446_v47 = vmul.f32 %v10073_v58, %v9971_v32  ;;  %v1448_v53 = vmul.f32 %v10074_v6, %v9972_v27  ;;  %v10077_v23 = vrot.slane %v9971_v32, 7 }
 0x278   : > { %v3871_v35 = vadd.f32 %v3807_v38, %v3515_v50  ;;  %v3873_v54 = vadd.f32 %v3809_v28, %v3517_v0  ;;  %v3875_v5 = vadd.f32 %v3811_v15, %v3519_v62  ;;  %v10078_v50 = vrot.slane %v9972_v27, 7  ;;  %v10079_v15 = vld [vmem:[#allocation30_spill] sm:$0xff]  ;;  %v10080_v28 = vld [vmem:[#allocation27_spill] sm:$0xff] }
 0x279   : > { %v3955_v18 = vadd.f32 %v10075_v3, %v3869_v4  ;;  %v1607_v8 = vsel %vm1562_vm0, %v10077_v23, %v6387_v36  ;;  %v10082_v4 = vld [vmem:[#allocation28_spill] sm:$0xff]  ;;  %v10084_v23 = vld [vmem:[#allocation33_spill] sm:$0xff] }
 0x27a   : > { %v3957_v22 = vadd.f32 %v10076_v30, %v3871_v35  ;;  %v1609_v20 = vsel %vm1562_vm0, %v10078_v50, %v6390_v21  ;;  %v3959_v61 = vadd.f32 %v10075_v3, %v3873_v54  ;;  %v3961_v62 = vadd.f32 %v10076_v30, %v3875_v5 }
 0x27b   : > { %v4015_v0 = vmax.f32 %v3955_v18, 0.0  ;;  %v10081_v35 = vrot.slane %v10080_v28, 7  ;;  %v10083_v36 = vrot.slane %v10082_v4, 7  ;;  %v1675_v54 = vsel %vm6519_vm6, %v1607_v8, 0.0 }
 0x27c   : > { %v1677_v5 = vsel %vm6519_vm6, %v1609_v20, 0.0  ;;  %v4017_v18 = vmax.f32 %v3959_v61, 0.0 }
 0x27d   : > { %v1615_v32 = vsel %vm1562_vm0, %v10081_v35, %v10079_v15  ;;  %v1617_v27 = vsel %vm1562_vm0, %v10083_v36, %v6155_v37  ;;  %v4047_v38 = vmul.f32 %v4015_v0, %v3957_v22  ;;  %v10085_v15 = vld [vmem:[#allocation94_spill] sm:$0xff]  ;;  %v6760_v37 = vmul.f32 %v10084_v23, %v1675_v54  ;;  %v10087_v0 = vld [vmem:[#allocation96_spill] sm:$0xff] }
 0x27e   : > { %v1667_v21 = vsel %vm5644_vm2, %v1615_v32, 0.0  ;;  %v1669_v60 = vsel %vm5644_vm2, %v1617_v27, 0.0  ;;  %v6763_v35 = vmul.f32 %v10085_v15, %v1677_v5  ;;  %v6767_v32 = vmul.f32 %v6418_v24, %v10084_v23 }
 0x27f   : > { %v1767_v50 = vmul.f32 %v10084_v23, %v1667_v21  ;;  %v1769_v28 = vmul.f32 %v10085_v15, %v1669_v60  ;;  %v4049_v4 = vmul.f32 %v4017_v18, %v3961_v62  ;;  %v6771_v22 = vmul.f32 %v6425_v29, %v10085_v15  ;;  %v10088_v21 = vld [vmem:[#allocation97_spill] sm:$0xff] }
 0x280   : > { %10086 = vst [vmem:[#allocation30_spill] sm:$0xff] %v6767_v32  ;;  %v1835_v36 = vadd.f32 %v10087_v0, %v1446_v47  ;;  %v1837_v60 = vadd.f32 %v10088_v21, %v1448_v53  ;;  %v2068_v54 = vsel %vm6523_vm7, %v6461_v13, 0.0  ;;  %v2070_v5 = vsel %vm6523_vm7, %v6485_v10, 0.0  ;;  %v10095_v0 = vld [vmem:[#allocation103_spill] sm:$0xff] }
 0x281   : > { %v1831_v61 = vadd.f32 %v1767_v50, %v1442_v42  ;;  %v1833_v27 = vadd.f32 %v1769_v28, %v1444_v48  ;;  %v4077_v32 = vpack.c.bf16 %v4049_v4, %v4047_v38  ;;  %v6783_v62 = vmul.f32 %v6466_v51, %v6295_v9  ;;  %v10093_v48 = vld [vmem:[#allocation102_spill] sm:$0xff]  ;;  %v10094_v50 = vld [vmem:[#allocation104_spill] sm:$0xff] }
 0x282   : > { %v6787_v42 = vmul.f32 %v6471_v41, %v6303_v39  ;;  %v6790_v47 = vmul.f32 %v6295_v9, %v2068_v54  ;;  %v6793_v53 = vmul.f32 %v6303_v39, %v2070_v5  ;;  %v2224_v38 = vadd.f32 %v10095_v0, %v1835_v36 }
 0x283   : > { %10089 = vst [vmem:[#allocation27_spill] sm:$0xff] %v6783_v62  ;;  %v2220_v18 = vadd.f32 %v10093_v48, %v1831_v61  ;;  %v2222_v28 = vadd.f32 %v10094_v50, %v1833_v27  ;;  %4265 = vmatprep.mubr.bf16.mxu0 %v4077_v32  ;;  %v2226_v4 = vadd.f32 %v6332_v1, %v1837_v60  ;;  %v2482_v61 = vsel %vm5644_vm2, %v1607_v8, 0.0  ;;  %v10151_v62 = vld [vmem:[#allocation60_spill] sm:$0xff] }
 0x284   : > { %10090 = vst [vmem:[#allocation28_spill] sm:$0xff] %v6787_v42  ;;  %10091 = vst [vmem:[#allocation96_spill] sm:$0xff] %v6790_v47  ;;  %v2334_v21 = vmul.f32 %v6306_v12, %v9985_v17  ;;  %v2336_v42 = vmul.f32 %v6309_v2, %v9987_v25  ;;  %v2338_v54 = vmul.f32 %v5955_v16, %v6306_v12  ;;  %v2484_v32 = vsel %vm5644_vm2, %v1609_v20, 0.0 }
 0x285   : > { %10092 = vst [vmem:[#allocation97_spill] sm:$0xff] %v6793_v53  ;;  %v2340_v5 = vmul.f32 %v5965_v63, %v6309_v2  ;;  %v2586_v1 = vmul.f32 %v6418_v24, %v6350_v14  ;;  %v2582_v48 = vmul.f32 %v6350_v14, %v2482_v61  ;;  %v2584_v0 = vmul.f32 %v6355_v55, %v2484_v32  ;;  %v10100_v61 = vld [vmem:[#allocation109_spill] sm:$0xff]  ;;  %v10116_v14 = vld [vmem:[#allocation115_spill] sm:$0xff] }
 0x286   : > { %v2398_v36 = vadd.f32 %v2334_v21, %v2220_v18  ;;  %v2400_v27 = vadd.f32 %v2336_v42, %v2222_v28  ;;  %v2402_v60 = vadd.f32 %v2338_v54, %v2224_v38  ;;  %v2588_v2 = vmul.f32 %v6425_v29, %v6355_v55  ;;  %v10137_v53 = vld [vmem:[#allocation81_spill] sm:$0xff] }
 0x287   : > { %v2404_v50 = vadd.f32 %v2340_v5, %v2226_v4  ;;  %v2734_v8 = vsel %vm5739_vm5, %v6461_v13, 0.0  ;;  %v2736_v24 = vsel %vm5739_vm5, %v6485_v10, 0.0  ;;  %v2830_v42 = vmul.f32 %v6466_v51, %v6376_v59 }
 0x288   : > { %v2646_v12 = vadd.f32 %v2582_v48, %v2398_v36  ;;  %v2650_v20 = vadd.f32 %v2586_v1, %v2402_v60  ;;  %v2648_v18 = vadd.f32 %v2584_v0, %v2400_v27  ;;  %v2832_v38 = vmul.f32 %v6471_v41, %v6379_v43  ;;  %v10101_v1 = vld [vmem:[#allocation73_spill] sm:$0xff] }
 0x289   : > { %v2652_v28 = vadd.f32 %v2588_v2, %v2404_v50  ;;  %v2834_v29 = vmul.f32 %v6376_v59, %v2734_v8  ;;  %v2836_v4 = vmul.f32 %v6379_v43, %v2736_v24  ;;  %v6830_v13 = vunpack.c.l.bf16 %v6595_v52 }
 0x28a   : > { %v2894_v21 = vadd.f32 %v2830_v42, %v2646_v12  ;;  %v6833_v54 = vunpack.c.l.bf16 %v6605_v40  ;;  %v2896_v10 = vadd.f32 %v2832_v38, %v2648_v18  ;;  %v6836_v51 = vunpack.c.l.bf16 %v6607_v49  ;;  %v10102_v12 = vld [vmem:[#allocation110_spill] sm:$0xff] }
 0x28b   : > { %10096 = vst [vmem:[#allocation102_spill] sm:$0xff] %v6830_v13  ;;  %v2898_v5 = vadd.f32 %v2834_v29, %v2650_v20  ;;  %v6839_v2 = vunpack.c.l.bf16 %v6609_v34  ;;  %v2900_v41 = vadd.f32 %v2836_v4, %v2652_v28  ;;  %v3092_v32 = vmul.f32 %v10100_v61, %v5969_v19 }
 0x28c   : > { %10097 = vst [vmem:[#allocation104_spill] sm:$0xff] %v6833_v54  ;;  %10098 = vst [vmem:[#allocation103_spill] sm:$0xff] %v6836_v51  ;;  %v3094_v36 = vmul.f32 %v10102_v12, %v10101_v1  ;;  %v3096_v52 = vmul.f32 %v10100_v61, %v6830_v13  ;;  %v3098_v40 = vmul.f32 %v10102_v12, %v6833_v54  ;;  %v3220_v27 = vrot.slane %v5969_v19, 7  ;;  %v10112_v12 = vld [vmem:[#allocation35_spill] sm:$0xff] }
 0x28d   : > { %10099 = vst [vmem:[#allocation123_spill] sm:$0xff] %v6839_v2  ;;  %v3222_v49 = vrot.slane %v10101_v1, 7  ;;  %v9555_v34 = vrot.slane %v6830_v13, 7  ;;  %v3156_v60 = vadd.f32 %v3092_v32, %v2894_v21  ;;  %v9554_v0 = vrot.slane %v6833_v54, 7  ;;  %v10105_v21 = vld [vmem:[#allocation111_spill] sm:$0xff] }
 0x28e   : > { %v3158_v48 = vadd.f32 %v3094_v36, %v2896_v10  ;;  %v3160_v50 = vadd.f32 %v3096_v52, %v2898_v5  ;;  %v3162_v8 = vadd.f32 %v3098_v40, %v2900_v41  ;;  %v10103_v24 = vrot.slane %v5955_v16, 7  ;;  %v10106_v41 = vld [vmem:[#allocation112_spill] sm:$0xff] }
 0x28f   : > { %v6857_v20 = vsel %vm1562_vm0, %v3220_v27, %v9555_v34  ;;  %v10104_v18 = vrot.slane %v5965_v63, 7  ;;  %v6875_v38 = vsel %vm1562_vm0, %v3222_v49, %v9554_v0  ;;  %v3580_v52 = vrot.slane %v6830_v13, 1 }
 0x290   : > { %v6863_v42 = vsel %vm1562_vm0, %v10103_v24, %v3220_v27  ;;  %v3452_v10 = vmul.f32 %v10105_v21, %v6857_v20  ;;  %v3454_v36 = vmul.f32 %v10106_v41, %v6875_v38  ;;  %v3582_v27 = vrot.slane %v6833_v54, 1 }
 0x291   : > { %v6869_v28 = vsel %vm1562_vm0, %v10104_v18, %v3222_v49  ;;  %v3348_v29 = vsel %vm5644_vm2, %v6863_v42, 0.0  ;;  %v9557_v49 = vrot.slane %v6836_v51, 1  ;;  %v9556_v46 = vrot.slane %v6839_v2, 1  ;;  %v10113_v2 = vld [vmem:[#allocation42_spill] sm:$0xff]  ;;  %v10114_v51 = vld [vmem:[#allocation37_spill] sm:$0xff] }
 0x292   : > { %v3350_v4 = vsel %vm5644_vm2, %v6869_v28, 0.0  ;;  %v3448_v5 = vmul.f32 %v10105_v21, %v3348_v29  ;;  %v3516_v40 = vadd.f32 %v3452_v10, %v3160_v50  ;;  %v3518_v0 = vadd.f32 %v3454_v36, %v3162_v8 }
 0x293   : > { %v3450_v32 = vmul.f32 %v10106_v41, %v3350_v4  ;;  %v10107_v34 = vrot.slane %v5969_v19, 1  ;;  %v6903_v50 = vsel %vm1951_vm3, %v3580_v52, %v9557_v49  ;;  %v6909_v4 = vsel %vm1951_vm3, %v3582_v27, %v9556_v46 }
 0x294   : > { %v3512_v24 = vadd.f32 %v3448_v5, %v3156_v60  ;;  %v10108_v60 = vrot.slane %v10101_v1, 1  ;;  %v3708_v10 = vsel %vm5739_vm5, %v6903_v50, 0.0  ;;  %v3710_v5 = vsel %vm5739_vm5, %v6909_v4, 0.0  ;;  %v10117_v1 = vld [vmem:[#allocation116_spill] sm:$0xff] }
 0x295   : > { %v3514_v18 = vadd.f32 %v3450_v32, %v3158_v48  ;;  %v6897_v29 = vsel %vm1951_vm3, %v10107_v34, %v3580_v52  ;;  %v10110_v34 = vld [vmem:[#allocation113_spill] sm:$0xff]  ;;  %v10111_v32 = vld [vmem:[#allocation114_spill] sm:$0xff]  ;;  %v1242_v52 = vadd.s32 48, %v5463_v44  ;;  %v1243_v49 = vadd.s32 56, %v5463_v44 }
 0x296   : > { %v6915_v48 = vsel %vm1951_vm3, %v10108_v60, %v3582_v27  ;;  %v3804_v8 = vmul.f32 %v10110_v34, %v6897_v29  ;;  %v3808_v46 = vmul.f32 %v10110_v34, %v3708_v10  ;;  %v3810_v27 = vmul.f32 %v10111_v32, %v3710_v5  ;;  %v10136_v34 = vld [vmem:[#allocation117_spill] sm:$0xff] }
 0x297   : > { %10109 = vst [vmem:[#allocation124_spill] sm:$0xff] %v6915_v48  ;;  %v3806_v36 = vmul.f32 %v10111_v32, %v6915_v48  ;;  %v1258_v21 = vand.u32 15, %v1242_v52  ;;  %v1451_v61 = vmul.f32 %v10113_v2, %v10112_v12  ;;  %v1453_v43 = vmul.f32 %v10115_v33, %v10114_v51  ;;  %v10126_v52 = vld [vmem:[#allocation47_spill] sm:$0xff] }
 0x298   : > { %v3868_v60 = vadd.f32 %v3804_v8, %v3512_v24  ;;  %v3872_v59 = vadd.f32 %v3808_v46, %v3516_v40  ;;  %v3874_v55 = vadd.f32 %v3810_v27, %v3518_v0  ;;  %v1259_v13 = vand.u32 15, %v1243_v49  ;;  %v10120_v24 = vld [vmem:[#allocation67_spill] sm:$0xff]  ;;  %v10121_v8 = vld [vmem:[#allocation70_spill] sm:$0xff]  ;;  %v10125_v49 = vld [vmem:[#allocation121_spill] sm:$0xff] }
 0x299   : > { %v3870_v41 = vadd.f32 %v3806_v36, %v3514_v18  ;;  %vm6937_vm8 = vcmp.ne.s32.totalorder %v1258_v21, 0  ;;  %v1455_v18 = vmul.f32 %v10120_v24, %v10113_v2  ;;  %v1457_v12 = vmul.f32 %v10121_v8, %v10115_v33  ;;  %v10127_v27 = vld [vmem:[#allocation64_spill] sm:$0xff]  ;;  %v10130_v24 = vld [vmem:[#allocation46_spill] sm:$0xff]  ;;  %v10135_v2 = vld [vmem:[#allocation119_spill] sm:$0xff] }
 0x29a   : > { %v3954_v54 = vadd.f32 %v10116_v14, %v3868_v60  ;;  %v3958_v36 = vadd.f32 %v10116_v14, %v3872_v59  ;;  %v3960_v51 = vadd.f32 %v10117_v1, %v3874_v55  ;;  %vm6947_vm9 = vcmp.ne.s32.totalorder %v1259_v13, 15  ;;  %v10129_v59 = vld [vmem:[#allocation48_spill] sm:$0xff]  ;;  %v10134_v14 = vld [vmem:[#allocation118_spill] sm:$0xff] }
 0x29b   : > { %v3956_v10 = vadd.f32 %v10117_v1, %v3870_v41  ;;  %v10124_v41 = vld [vmem:[#allocation120_spill] sm:$0xff]  ;;  %v1686_v46 = vsel %vm6937_vm8, %v10125_v49, 0.0  ;;  %v6959_v60 = vmul.f32 %v10127_v27, %v10126_v52  ;;  %v6963_v55 = vmul.f32 %v10130_v24, %v10129_v59 }
 0x29c   : > { %v4014_v0 = vmax.f32 %v3954_v54, 0.0  ;;  %v1684_v21 = vsel %vm6937_vm8, %v10124_v41, 0.0  ;;  %v4016_v13 = vmax.f32 %v3958_v36, 0.0  ;;  %v6969_v1 = vmul.f32 %v10129_v59, %v1686_v46  ;;  %v10150_v59 = vld [vmem:[#allocation72_spill] sm:$0xff] }
 0x29d   : > { %10128 = vst [vmem:[#allocation35_spill] sm:$0xff] %v6959_v60  ;;  %10131 = vst [vmem:[#allocation37_spill] sm:$0xff] %v6963_v55  ;;  %v6966_v8 = vmul.f32 %v10126_v52, %v1684_v21  ;;  %v1840_v33 = vadd.f32 %v10134_v14, %v1451_v61  ;;  %v1842_v32 = vadd.f32 %v10135_v2, %v1453_v43  ;;  %v2077_v36 = vsel %vm6947_vm9, %v6697_v7, 0.0  ;;  %v10140_v14 = vld [vmem:[#allocation54_spill] sm:$0xff] }
 0x29e   : > { %v4046_v54 = vmul.f32 %v4014_v0, %v3956_v10  ;;  %10133 = vst [vmem:[#allocation70_spill] sm:$0xff] %v6969_v1  ;;  %v1844_v19 = vadd.f32 %v10136_v34, %v1455_v18  ;;  %v1846_v60 = vadd.f32 %v10137_v53, %v1457_v12  ;;  %v4048_v47 = vmul.f32 %v4016_v13, %v3960_v51  ;;  %v10138_v0 = vld [vmem:[#allocation53_spill] sm:$0xff]  ;;  %v10141_v61 = vld [vmem:[#allocation122_spill] sm:$0xff]  ;;  %v10145_v34 = vld [vmem:[#allocation84_spill] sm:$0xff] }
 0x29f   : > { %10132 = vst [vmem:[#allocation67_spill] sm:$0xff] %v6966_v8  ;;  %v2079_v10 = vsel %vm6947_vm9, %v6703_v31, 0.0  ;;  %v6983_v21 = vmul.f32 %v6685_v26, %v10138_v0  ;;  %v6987_v43 = vmul.f32 %v10141_v61, %v10140_v14  ;;  %v6990_v2 = vmul.f32 %v10138_v0, %v2077_v36  ;;  %v10146_v51 = vld [vmem:[#allocation85_spill] sm:$0xff]  ;;  %v10147_v13 = vld [vmem:[#allocation86_spill] sm:$0xff]  ;;  %v10148_v1 = vld [vmem:[#allocation87_spill] sm:$0xff] }
 0x2a0   : > { %v6993_v53 = vmul.f32 %v10140_v14, %v2079_v10  ;;  %v2229_v18 = vadd.f32 %v10145_v34, %v1840_v33  ;;  %v4076_v12 = vpack.c.bf16 %v4048_v47, %v4046_v54  ;;  %v2231_v46 = vadd.f32 %v10146_v51, %v1842_v32  ;;  %v10153_v36 = vld [vmem:[#allocation29_spill] sm:$0xff]  ;;  %v10156_v33 = vld [vmem:[#allocation66_spill] sm:$0xff] }
 0x2a1   : > { %10139 = vst [vmem:[#allocation120_spill] sm:$0xff] %v6983_v21  ;;  %10142 = vst [vmem:[#allocation121_spill] sm:$0xff] %v6987_v43  ;;  %v2233_v55 = vadd.f32 %v10147_v13, %v1844_v19  ;;  %v2235_v8 = vadd.f32 %v10148_v1, %v1846_v60  ;;  %v10149_v21 = vld [vmem:[#allocation59_spill] sm:$0xff]  ;;  %v10152_v43 = vld [vmem:[#allocation74_spill] sm:$0xff]  ;;  %v2491_v47 = vsel %vm6519_vm6, %v10124_v41, 0.0  ;;  %v2493_v19 = vsel %vm6519_vm6, %v10125_v49, 0.0 }
 0x2a2   : > { %10143 = vst [vmem:[#allocation64_spill] sm:$0xff] %v6990_v2  ;;  %10144 = vst [vmem:[#allocation46_spill] sm:$0xff] %v6993_v53  ;;  %v2343_v52 = vmul.f32 %v10150_v59, %v10149_v21  ;;  %v2345_v48 = vmul.f32 %v10152_v43, %v10151_v62  ;;  %v2347_v2 = vmul.f32 %v10153_v36, %v10149_v21  ;;  %v10154_v10 = vld [vmem:[#allocation61_spill] sm:$0xff]  ;;  %4266 = vmatmul.mubr.bf16.gmra.mxu0 %v4076_v12  ;;  %v7027_v21 = vld [vmem:[#allocation2 + $0x98] sm:$0xff] }
 0x2a3   : > { %v2349_v53 = vmul.f32 %v10154_v10, %v10151_v62  ;;  %v10155_v1 = vld [vmem:[#allocation65_spill] sm:$0xff]  ;;  %v2597_v60 = vmul.f32 %v10130_v24, %v10156_v33  ;;  %v2593_v41 = vmul.f32 %v10156_v33, %v2493_v19  ;;  %v2743_v49 = vsel %vm6523_vm7, %v6697_v7, 0.0 }
 0x2a4   : > { %v2595_v32 = vmul.f32 %v10127_v27, %v10155_v1  ;;  %v2407_v54 = vadd.f32 %v2343_v52, %v2229_v18  ;;  %v2409_v34 = vadd.f32 %v2345_v48, %v2231_v46  ;;  %v2411_v51 = vadd.f32 %v2347_v2, %v2233_v55  ;;  %v7017_v62 = vld [vmem:[#allocation2 + $0x8] sm:$0xff]  ;;  %v7031_v48 = vld [vmem:[#allocation2 + $0x90] sm:$0xff] }
 0x2a5   : > { %v2413_v13 = vadd.f32 %v2349_v53, %v2235_v8  ;;  %v2591_v12 = vmul.f32 %v10155_v1, %v2491_v47  ;;  %v2745_v27 = vsel %vm6523_vm7, %v6703_v31, 0.0  ;;  %v7029_v52 = vld [vmem:[#allocation2 + $0xa8] sm:$0xff]  ;;  %v10157_v8 = vld [vmem:[#allocation68_spill] sm:$0xff]  ;;  %v7040_v19 = vunpack.c.h.bf16 %v7017_v62 }
 0x2a6   : > { %v2659_v24 = vadd.f32 %v2595_v32, %v2411_v51  ;;  %v2839_v2 = vmul.f32 %v6685_v26, %v10157_v8  ;;  %v10158_v53 = vld [vmem:[#allocation69_spill] sm:$0xff]  ;;  %v2657_v7 = vadd.f32 %v2593_v41, %v2409_v34  ;;  %v2843_v47 = vmul.f32 %v10157_v8, %v2743_v49  ;;  %v10159_v51 = vld [vmem:[#allocation62_spill] sm:$0xff]  ;;  %v10161_v41 = vld [vmem:[#allocation63_spill] sm:$0xff] }
 0x2a7   : > { %v2661_v55 = vadd.f32 %v2597_v60, %v2413_v13  ;;  %v2841_v18 = vmul.f32 %v10141_v61, %v10158_v53  ;;  %v2655_v46 = vadd.f32 %v2591_v12, %v2407_v54  ;;  %v2845_v31 = vmul.f32 %v10158_v53, %v2745_v27  ;;  %v10160_v13 = vld [vmem:[#allocation79_spill] sm:$0xff]  ;;  %v10162_v49 = vld [vmem:[#allocation80_spill] sm:$0xff] }
 0x2a8   : > { %v7043_v33 = vunpack.c.h.bf16 %v7027_v21  ;;  %v7046_v32 = vunpack.c.h.bf16 %v7029_v52  ;;  %v7049_v26 = vunpack.c.h.bf16 %v7031_v48  ;;  %v2907_v54 = vadd.f32 %v2843_v47, %v2659_v24 }
 0x2a9   : > { %v2903_v60 = vadd.f32 %v2839_v2, %v2655_v46  ;;  %v2905_v61 = vadd.f32 %v2841_v18, %v2657_v7  ;;  %v2909_v34 = vadd.f32 %v2845_v31, %v2661_v55  ;;  %v3101_v12 = vmul.f32 %v10160_v13, %v10159_v51 }
 0x2aa   : > { %v3103_v27 = vmul.f32 %v10162_v49, %v10161_v41  ;;  %v3105_v53 = vmul.f32 %v10160_v13, %v7040_v19  ;;  %v3107_v8 = vmul.f32 %v10162_v49, %v7043_v33  ;;  %v3229_v1 = vrot.slane %v10159_v51, 7 }
 0x2ab   : > { %v3231_v14 = vrot.slane %v10161_v41, 7  ;;  %v9600_v2 = vrot.slane %v7040_v19, 7  ;;  %v9599_v24 = vrot.slane %v7043_v33, 7  ;;  %v3165_v55 = vadd.f32 %v3101_v12, %v2903_v60 }
 0x2ac   : > { %v3167_v18 = vadd.f32 %v3103_v27, %v2905_v61  ;;  %v3169_v46 = vadd.f32 %v3105_v53, %v2907_v54  ;;  %v3171_v7 = vadd.f32 %v3107_v8, %v2909_v34  ;;  %v10165_v49 = vrot.slane %v10153_v36, 7  ;;  %v10169_v34 = vld [vmem:[#allocation82_spill] sm:$0xff] }
 0x2ad   : > { %v7067_v47 = vsel %vm1562_vm0, %v3229_v1, %v9600_v2  ;;  %v7073_v31 = vsel %vm1562_vm0, %v3231_v14, %v9599_v24  ;;  %v10167_v8 = vrot.slane %v10154_v10, 7  ;;  %v9613_v0 = vrot.slane %v7046_v32, 1 }
 0x2ae   : > { %10163 = vst [vmem:[#allocation118_spill] sm:$0xff] %v7067_v47  ;;  %10164 = vst [vmem:[#allocation119_spill] sm:$0xff] %v7073_v31  ;;  %v7079_v60 = vsel %vm1562_vm0, %v10165_v49, %v3229_v1  ;;  %v3461_v12 = vmul.f32 %v10169_v34, %v7067_v47  ;;  %v10170_v1 = vld [vmem:[#allocation83_spill] sm:$0xff]  ;;  %v10171_v47 = vrot.slane %v10159_v51, 1 }
 0x2af   : > { %10166 = vst [vmem:[#allocation117_spill] sm:$0xff] %v7079_v60  ;;  %v7085_v53 = vsel %vm1562_vm0, %v10167_v8, %v3231_v14  ;;  %v3357_v61 = vsel %vm6519_vm6, %v7079_v60, 0.0  ;;  %v3463_v49 = vmul.f32 %v10170_v1, %v7073_v31  ;;  %v3589_v14 = vrot.slane %v7040_v19, 1 }
 0x2b0   : > { %10168 = vst [vmem:[#allocation81_spill] sm:$0xff] %v7085_v53  ;;  %v3359_v54 = vsel %vm6519_vm6, %v7085_v53, 0.0  ;;  %v3457_v27 = vmul.f32 %v10169_v34, %v3357_v61  ;;  %v3591_v8 = vrot.slane %v7043_v33, 1  ;;  %v3525_v2 = vadd.f32 %v3461_v12, %v3169_v46 }
 0x2b1   : > { %v3459_v24 = vmul.f32 %v10170_v1, %v3359_v54  ;;  %v3527_v13 = vadd.f32 %v3463_v49, %v3171_v7  ;;  %v9612_v53 = vrot.slane %v7049_v26, 1  ;;  %v7107_v31 = vsel %vm1951_vm3, %v10171_v47, %v3589_v14 }
 0x2b2   : > { %v3521_v60 = vadd.f32 %v3457_v27, %v3165_v55  ;;  %v10172_v61 = vrot.slane %v10161_v41, 1  ;;  %v7119_v46 = vsel %vm1951_vm3, %v3589_v14, %v9613_v0  ;;  %v3813_v55 = vmul.f32 %v10071_v57, %v7107_v31 }
 0x2b3   : > { %v3523_v10 = vadd.f32 %v3459_v24, %v3167_v18  ;;  %v7125_v24 = vsel %vm1951_vm3, %v3591_v8, %v9612_v53  ;;  %v3717_v7 = vsel %vm6523_vm7, %v7119_v46, 0.0  ;;  %v1450_v12 = vmul.f32 %v10073_v58, %v9985_v17 }
 0x2b4   : > { %v7113_v54 = vsel %vm1951_vm3, %v10172_v61, %v3591_v8  ;;  %v3719_v47 = vsel %vm6523_vm7, %v7125_v24, 0.0  ;;  %v1452_v49 = vmul.f32 %v10074_v6, %v9987_v25  ;;  %v3817_v27 = vmul.f32 %v10071_v57, %v3717_v7 }
 0x2b5   : > { %v3815_v18 = vmul.f32 %v10072_v45, %v7113_v54  ;;  %v3819_v14 = vmul.f32 %v10072_v45, %v3719_v47  ;;  %v3877_v8 = vadd.f32 %v3813_v55, %v3521_v60  ;;  %v1454_v53 = vmul.f32 %v5955_v16, %v10073_v58 }
 0x2b6   : > { %v1456_v0 = vmul.f32 %v5965_v63, %v10074_v6  ;;  %v1683_v1 = vsel %vm6937_vm8, %v6863_v42, 0.0  ;;  %v1685_v25 = vsel %vm6937_vm8, %v6869_v28, 0.0  ;;  %v3881_v17 = vadd.f32 %v3817_v27, %v3525_v2 }
 0x2b7   : > { %v3879_v61 = vadd.f32 %v3815_v18, %v3523_v10  ;;  %v3883_v7 = vadd.f32 %v3819_v14, %v3527_v13  ;;  %v3963_v47 = vadd.f32 %v10075_v3, %v3877_v8  ;;  %v7156_v60 = vmul.f32 %v10084_v23, %v1683_v1  ;;  %v10177_v14 = vld [vmem:[#allocation30_spill] sm:$0xff] }
 0x2b8   : > { %v7159_v16 = vmul.f32 %v10085_v15, %v1685_v25  ;;  %v7163_v63 = vmul.f32 %v6857_v20, %v10084_v23  ;;  %v7167_v55 = vmul.f32 %v6875_v38, %v10085_v15  ;;  %v3967_v13 = vadd.f32 %v10075_v3, %v3881_v17  ;;  %v10189_v23 = vld [vmem:[#allocation101_spill] sm:$0xff] }
 0x2b9   : > { %v3965_v10 = vadd.f32 %v10076_v30, %v3879_v61  ;;  %10173 = vst [vmem:[#allocation122_spill] sm:$0xff] %v7156_v60  ;;  %v3969_v2 = vadd.f32 %v10076_v30, %v3883_v7  ;;  %v4019_v18 = vmax.f32 %v3963_v47, 0.0  ;;  %v1839_v27 = vadd.f32 %v6760_v37, %v1450_v12  ;;  %v10179_v37 = vld [vmem:[#allocation124_spill] sm:$0xff]  ;;  %v10188_v60 = vld [vmem:[#allocation71_spill] sm:$0xff] }
 0x2ba   : > { %10174 = vst [vmem:[#allocation84_spill] sm:$0xff] %v7159_v16  ;;  %10175 = vst [vmem:[#allocation85_spill] sm:$0xff] %v7163_v63  ;;  %v1841_v1 = vadd.f32 %v6763_v35, %v1452_v49  ;;  %v1843_v8 = vadd.f32 %v10177_v14, %v1454_v53  ;;  %v1845_v61 = vadd.f32 %v6771_v22, %v1456_v0  ;;  %v2076_v25 = vsel %vm6947_vm9, %v6903_v50, 0.0  ;;  %v10183_v53 = vld [vmem:[#allocation27_spill] sm:$0xff]  ;;  %v10184_v47 = vld [vmem:[#allocation28_spill] sm:$0xff] }
 0x2bb   : > { %10176 = vst [vmem:[#allocation86_spill] sm:$0xff] %v7167_v55  ;;  %v4021_v63 = vmax.f32 %v3967_v13, 0.0  ;;  %v4051_v16 = vmul.f32 %v4019_v18, %v3965_v10  ;;  %v2078_v17 = vsel %vm6947_vm9, %v6909_v4, 0.0  ;;  %v7183_v7 = vmul.f32 %v6897_v29, %v6295_v9  ;;  %v10185_v13 = vld [vmem:[#allocation96_spill] sm:$0xff]  ;;  %v10186_v14 = vld [vmem:[#allocation97_spill] sm:$0xff] }
 0x2bc   : > { %v7187_v35 = vmul.f32 %v10179_v37, %v6303_v39  ;;  %v7190_v22 = vmul.f32 %v6295_v9, %v2076_v25  ;;  %v7193_v0 = vmul.f32 %v6303_v39, %v2078_v17  ;;  %v2228_v12 = vadd.f32 %v10183_v53, %v1839_v27  ;;  %v10191_v25 = vld [vmem:[#allocation102_spill] sm:$0xff]  ;;  %v10192_v17 = vld [vmem:[#allocation104_spill] sm:$0xff] }
 0x2bd   : > { %10178 = vst [vmem:[#allocation87_spill] sm:$0xff] %v7183_v7  ;;  %v4053_v49 = vmul.f32 %v4021_v63, %v3969_v2  ;;  %v2230_v10 = vadd.f32 %v10184_v47, %v1841_v1  ;;  %v2232_v18 = vadd.f32 %v10185_v13, %v1843_v8  ;;  %v2234_v55 = vadd.f32 %v10186_v14, %v1845_v61  ;;  %v10187_v7 = vld [vmem:[#allocation100_spill] sm:$0xff]  ;;  %v10193_v1 = vld [vmem:[#allocation105_spill] sm:$0xff] }
 0x2be   : > { %10180 = vst [vmem:[#allocation72_spill] sm:$0xff] %v7187_v35  ;;  %10181 = vst [vmem:[#allocation74_spill] sm:$0xff] %v7190_v22  ;;  %v2342_v15 = vmul.f32 %v10188_v60, %v10187_v7  ;;  %v10190_v35 = vld [vmem:[#allocation73_spill] sm:$0xff]  ;;  %v2346_v22 = vmul.f32 %v10191_v25, %v10187_v7  ;;  %v2490_v63 = vsel %vm6519_vm6, %v6863_v42, 0.0  ;;  %v2492_v2 = vsel %vm6519_vm6, %v6869_v28, 0.0 }
 0x2bf   : > { %10182 = vst [vmem:[#allocation29_spill] sm:$0xff] %v7193_v0  ;;  %v2344_v30 = vmul.f32 %v10190_v35, %v10189_v23  ;;  %v2348_v0 = vmul.f32 %v10192_v17, %v10189_v23  ;;  %v4079_v27 = vpack.c.bf16 %v4053_v49, %v4051_v16  ;;  %v2594_v8 = vmul.f32 %v6857_v20, %v10193_v1  ;;  %v10194_v23 = vld [vmem:[#allocation106_spill] sm:$0xff]  ;;  %v10236_v7 = vld [vmem:[#allocation37_spill] sm:$0xff] }
 0x2c0   : > { %v2406_v61 = vadd.f32 %v2342_v15, %v2228_v12  ;;  %v2410_v47 = vadd.f32 %v2346_v22, %v2232_v18  ;;  %v2590_v14 = vmul.f32 %v10193_v1, %v2490_v63  ;;  %v2592_v16 = vmul.f32 %v10194_v23, %v2492_v2 }
 0x2c1   : > { %v2408_v53 = vadd.f32 %v2344_v30, %v2230_v10  ;;  %v2412_v13 = vadd.f32 %v2348_v0, %v2234_v55  ;;  %4273 = vmatprep.mubr.bf16.mxu0 %v4079_v27  ;;  %v2596_v49 = vmul.f32 %v6875_v38, %v10194_v23  ;;  %v2742_v42 = vsel %vm6523_vm7, %v6903_v50, 0.0  ;;  %v10195_v30 = vld [vmem:[#allocation107_spill] sm:$0xff]  ;;  %v10196_v55 = vld [vmem:[#allocation108_spill] sm:$0xff] }
 0x2c2   : > { %v2658_v28 = vadd.f32 %v2594_v8, %v2410_v47  ;;  %v2744_v15 = vsel %vm6523_vm7, %v6909_v4, 0.0  ;;  %v2838_v20 = vmul.f32 %v6897_v29, %v10195_v30  ;;  %v2840_v22 = vmul.f32 %v10179_v37, %v10196_v55 }
 0x2c3   : > { %v2654_v0 = vadd.f32 %v2590_v14, %v2406_v61  ;;  %v2656_v12 = vadd.f32 %v2592_v16, %v2408_v53  ;;  %v2660_v10 = vadd.f32 %v2596_v49, %v2412_v13  ;;  %v2842_v38 = vmul.f32 %v10195_v30, %v2742_v42  ;;  %v10201_v61 = vld [vmem:[#allocation103_spill] sm:$0xff]  ;;  %v10202_v53 = vld [vmem:[#allocation109_spill] sm:$0xff]  ;;  %v10204_v14 = vld [vmem:[#allocation110_spill] sm:$0xff] }
 0x2c4   : > { %v2844_v18 = vmul.f32 %v10196_v55, %v2744_v15  ;;  %v7232_v50 = vunpack.c.l.bf16 %v7017_v62  ;;  %v7235_v27 = vunpack.c.l.bf16 %v7027_v21  ;;  %v7238_v4 = vunpack.c.l.bf16 %v7029_v52  ;;  %v10203_v13 = vld [vmem:[#allocation123_spill] sm:$0xff] }
 0x2c5   : > { %v2902_v29 = vadd.f32 %v2838_v20, %v2654_v0  ;;  %v2904_v63 = vadd.f32 %v2840_v22, %v2656_v12  ;;  %v2906_v2 = vadd.f32 %v2842_v38, %v2658_v28  ;;  %v7241_v37 = vunpack.c.l.bf16 %v7031_v48  ;;  %v10215_v30 = vld [vmem:[#allocation43_spill] sm:$0xff] }
 0x2c6   : > { %10197 = vst [vmem:[#allocation62_spill] sm:$0xff] %v7232_v50  ;;  %10198 = vst [vmem:[#allocation63_spill] sm:$0xff] %v7235_v27  ;;  %v2908_v8 = vadd.f32 %v2844_v18, %v2660_v10  ;;  %v3100_v47 = vmul.f32 %v10202_v53, %v10201_v61  ;;  %v3102_v62 = vmul.f32 %v10204_v14, %v10203_v13  ;;  %v3228_v16 = vrot.slane %v10201_v61, 7 }
 0x2c7   : > { %10199 = vst [vmem:[#allocation30_spill] sm:$0xff] %v7238_v4  ;;  %10200 = vst [vmem:[#allocation124_spill] sm:$0xff] %v7241_v37  ;;  %v3104_v21 = vmul.f32 %v10202_v53, %v7232_v50  ;;  %v3106_v52 = vmul.f32 %v10204_v14, %v7235_v27  ;;  %v3230_v49 = vrot.slane %v10203_v13, 7  ;;  %v9620_v48 = vrot.slane %v7232_v50, 7 }
 0x2c8   : > { %v3164_v42 = vadd.f32 %v3100_v47, %v2902_v29  ;;  %v3166_v28 = vadd.f32 %v3102_v62, %v2904_v63  ;;  %v9619_v20 = vrot.slane %v7235_v27, 7  ;;  %v10205_v12 = vrot.slane %v10191_v25, 7 }
 0x2c9   : > { %v3168_v15 = vadd.f32 %v3104_v21, %v2906_v2  ;;  %v3170_v22 = vadd.f32 %v3106_v52, %v2908_v8  ;;  %v7259_v0 = vsel %vm1562_vm0, %v3228_v16, %v9620_v48  ;;  %v10206_v38 = vrot.slane %v10192_v17, 7  ;;  %v10207_v8 = vld [vmem:[#allocation111_spill] sm:$0xff]  ;;  %v10208_v21 = vld [vmem:[#allocation112_spill] sm:$0xff] }
 0x2ca   : > { %v7265_v10 = vsel %vm1562_vm0, %v10205_v12, %v3228_v16  ;;  %v7277_v29 = vsel %vm1562_vm0, %v3230_v49, %v9619_v20  ;;  %v3460_v47 = vmul.f32 %v10207_v8, %v7259_v0  ;;  %v9625_v20 = vrot.slane %v7238_v4, 1 }
 0x2cb   : > { %v7271_v18 = vsel %vm1562_vm0, %v10206_v38, %v3230_v49  ;;  %v3356_v63 = vsel %vm6519_vm6, %v7265_v10, 0.0  ;;  %v3462_v16 = vmul.f32 %v10208_v21, %v7277_v29  ;;  %v3588_v49 = vrot.slane %v7232_v50, 1 }
 0x2cc   : > { %v3358_v2 = vsel %vm6519_vm6, %v7271_v18, 0.0  ;;  %v3456_v62 = vmul.f32 %v10207_v8, %v3356_v63  ;;  %v3524_v12 = vadd.f32 %v3460_v47, %v3168_v15  ;;  %v3590_v38 = vrot.slane %v7235_v27, 1  ;;  %v10216_v27 = vld [vmem:[#allocation115_spill] sm:$0xff] }
 0x2cd   : > { %v3458_v52 = vmul.f32 %v10208_v21, %v3358_v2  ;;  %v9624_v56 = vrot.slane %v7241_v37, 1  ;;  %v3526_v53 = vadd.f32 %v3462_v16, %v3170_v22  ;;  %v10209_v55 = vrot.slane %v10201_v61, 1  ;;  %v10214_v37 = vld [vmem:[#allocation42_spill] sm:$0xff]  ;;  %v10217_v61 = vld [vmem:[#allocation116_spill] sm:$0xff] }
 0x2ce   : > { %v3520_v48 = vadd.f32 %v3456_v62, %v3164_v42  ;;  %v7305_v15 = vsel %vm1951_vm3, %v3588_v49, %v9625_v20  ;;  %v10210_v42 = vrot.slane %v10203_v13, 1  ;;  %v1245_v20 = vadd.s32 72, %v5463_v44 }
 0x2cf   : > { %v3522_v14 = vadd.f32 %v3458_v52, %v3166_v28  ;;  %v7299_v63 = vsel %vm1951_vm3, %v10209_v55, %v3588_v49  ;;  %v7311_v2 = vsel %vm1951_vm3, %v3590_v38, %v9624_v56  ;;  %v10212_v55 = vld [vmem:[#allocation113_spill] sm:$0xff]  ;;  %v3716_v47 = vsel %vm6523_vm7, %v7305_v15, 0.0  ;;  %v10213_v52 = vld [vmem:[#allocation114_spill] sm:$0xff] }
 0x2d0   : > { %v7317_v28 = vsel %vm1951_vm3, %v10210_v42, %v3590_v38  ;;  %v3812_v22 = vmul.f32 %v10212_v55, %v7299_v63  ;;  %v3718_v62 = vsel %vm6523_vm7, %v7311_v2, 0.0  ;;  %v1244_v49 = vadd.s32 64, %v5463_v44 }
 0x2d1   : > { %10211 = vst [vmem:[#allocation27_spill] sm:$0xff] %v7317_v28  ;;  %v3814_v16 = vmul.f32 %v10213_v52, %v7317_v28  ;;  %v3816_v56 = vmul.f32 %v10212_v55, %v3716_v47  ;;  %v3818_v38 = vmul.f32 %v10213_v52, %v3718_v62  ;;  %v1459_v4 = vmul.f32 %v10150_v59, %v10214_v37  ;;  %v10235_v52 = vld [vmem:[#allocation35_spill] sm:$0xff] }
 0x2d2   : > { %v3876_v42 = vadd.f32 %v3812_v22, %v3520_v48  ;;  %v1260_v8 = vand.u32 15, %v1244_v49  ;;  %v1461_v11 = vmul.f32 %v10152_v43, %v10215_v30  ;;  %v1261_v13 = vand.u32 15, %v1245_v20  ;;  %v10220_v48 = vld [vmem:[#allocation61_spill] sm:$0xff] }
 0x2d3   : > { %v3878_v21 = vadd.f32 %v3814_v16, %v3522_v14  ;;  %v3880_v23 = vadd.f32 %v3816_v56, %v3524_v12  ;;  %v3882_v1 = vadd.f32 %v3818_v38, %v3526_v53  ;;  %v1463_v14 = vmul.f32 %v10153_v36, %v10214_v37  ;;  %v10223_v20 = vld [vmem:[#allocation117_spill] sm:$0xff]  ;;  %v10225_v56 = vld [vmem:[#allocation47_spill] sm:$0xff]  ;;  %v10226_v16 = vld [vmem:[#allocation118_spill] sm:$0xff] }
 0x2d4   : > { %v3962_v50 = vadd.f32 %v10216_v27, %v3876_v42  ;;  %vm7339_vm10 = vcmp.ne.s32.totalorder %v1260_v8, 0  ;;  %v1465_v59 = vmul.f32 %v10220_v48, %v10215_v30  ;;  %vm7349_vm11 = vcmp.ne.s32.totalorder %v1261_v13, 15  ;;  %v10229_v38 = vld [vmem:[#allocation119_spill] sm:$0xff]  ;;  %v10234_v30 = vld [vmem:[#allocation70_spill] sm:$0xff] }
 0x2d5   : > { %v3964_v47 = vadd.f32 %v10217_v61, %v3878_v21  ;;  %v3966_v22 = vadd.f32 %v10216_v27, %v3880_v23  ;;  %v3968_v43 = vadd.f32 %v10217_v61, %v3882_v1  ;;  %v1692_v8 = vsel %vm7339_vm10, %v10223_v20, 0.0  ;;  %v10224_v21 = vld [vmem:[#allocation81_spill] sm:$0xff]  ;;  %v10228_v23 = vld [vmem:[#allocation48_spill] sm:$0xff]  ;;  %v10233_v61 = vld [vmem:[#allocation67_spill] sm:$0xff] }
 0x2d6   : > { %v4018_v53 = vmax.f32 %v3962_v50, 0.0  ;;  %v1694_v36 = vsel %vm7339_vm10, %v10224_v21, 0.0  ;;  %v7361_v49 = vmul.f32 %v10226_v16, %v10225_v56  ;;  %v7365_v1 = vmul.f32 %v10229_v38, %v10228_v23 }
 0x2d7   : > { %v4020_v50 = vmax.f32 %v3966_v22, 0.0  ;;  %v7368_v42 = vmul.f32 %v10225_v56, %v1692_v8  ;;  %v7371_v48 = vmul.f32 %v10228_v23, %v1694_v36  ;;  %v1848_v27 = vadd.f32 %v10233_v61, %v1459_v4  ;;  %v10239_v4 = vld [vmem:[#allocation54_spill] sm:$0xff]  ;;  %v10245_v36 = vld [vmem:[#allocation64_spill] sm:$0xff] }
 0x2d8   : > { %10227 = vst [vmem:[#allocation28_spill] sm:$0xff] %v7361_v49  ;;  %10230 = vst [vmem:[#allocation96_spill] sm:$0xff] %v7365_v1  ;;  %v4050_v13 = vmul.f32 %v4018_v53, %v3964_v47  ;;  %v1850_v37 = vadd.f32 %v10234_v30, %v1461_v11  ;;  %v1852_v55 = vadd.f32 %v10235_v52, %v1463_v14  ;;  %v2085_v22 = vsel %vm7349_vm11, %v7119_v46, 0.0  ;;  %v10237_v53 = vld [vmem:[#allocation53_spill] sm:$0xff]  ;;  %v10243_v52 = vld [vmem:[#allocation120_spill] sm:$0xff] }
 0x2d9   : > { %10231 = vst [vmem:[#allocation97_spill] sm:$0xff] %v7368_v42  ;;  %10232 = vst [vmem:[#allocation71_spill] sm:$0xff] %v7371_v48  ;;  %v1854_v49 = vadd.f32 %v10236_v7, %v1465_v59  ;;  %v4052_v28 = vmul.f32 %v4020_v50, %v3968_v43  ;;  %v2087_v47 = vsel %vm7349_vm11, %v7125_v24, 0.0  ;;  %v7385_v8 = vmul.f32 %v7107_v31, %v10237_v53  ;;  %v10244_v59 = vld [vmem:[#allocation121_spill] sm:$0xff]  ;;  %v10246_v1 = vld [vmem:[#allocation46_spill] sm:$0xff] }
 0x2da   : > { %v7389_v30 = vmul.f32 %v7113_v54, %v10239_v4  ;;  %v7392_v61 = vmul.f32 %v10237_v53, %v2085_v22  ;;  %v7395_v7 = vmul.f32 %v10239_v4, %v2087_v47  ;;  %v2237_v11 = vadd.f32 %v10243_v52, %v1848_v27  ;;  %v10248_v23 = vld [vmem:[#allocation60_spill] sm:$0xff] }
 0x2db   : > { %10238 = vst [vmem:[#allocation73_spill] sm:$0xff] %v7385_v8  ;;  %v4078_v14 = vpack.c.bf16 %v4052_v28, %v4050_v13  ;;  %v2239_v43 = vadd.f32 %v10244_v59, %v1850_v37  ;;  %v2241_v50 = vadd.f32 %v10245_v36, %v1852_v55  ;;  %v2243_v48 = vadd.f32 %v10246_v1, %v1854_v49  ;;  %v10247_v8 = vld [vmem:[#allocation59_spill] sm:$0xff]  ;;  %v10249_v28 = vld [vmem:[#allocation65_spill] sm:$0xff]  ;;  %v10250_v49 = vld [vmem:[#allocation66_spill] sm:$0xff] }
 0x2dc   : > { %10240 = vst [vmem:[#allocation102_spill] sm:$0xff] %v7389_v30  ;;  %10241 = vst [vmem:[#allocation104_spill] sm:$0xff] %v7392_v61  ;;  %v2351_v42 = vmul.f32 %v10159_v51, %v10247_v8  ;;  %v2353_v30 = vmul.f32 %v10161_v41, %v10248_v23  ;;  %v2355_v22 = vmul.f32 %v7040_v19, %v10247_v8  ;;  %v2499_v27 = vsel %vm6937_vm8, %v10223_v20, 0.0  ;;  %v7429_v8 = vld [vmem:[#allocation2 + $0x88] sm:$0xff] }
 0x2dd   : > { %10242 = vst [vmem:[#allocation61_spill] sm:$0xff] %v7395_v7  ;;  %v2357_v47 = vmul.f32 %v7043_v33, %v10248_v23  ;;  %4274 = vmatmul.mubr.bf16.gmra.mxu0 %v4078_v14  ;;  %v2501_v37 = vsel %vm6937_vm8, %v10224_v21, 0.0  ;;  %v2603_v55 = vmul.f32 %v10226_v16, %v10249_v28  ;;  %v2605_v1 = vmul.f32 %v10229_v38, %v10250_v49  ;;  %v7419_v23 = vld [vmem:[#allocation2 + $0xe0] sm:$0xff] }
 0x2de   : > { %v2415_v13 = vadd.f32 %v2351_v42, %v2237_v11  ;;  %v2417_v52 = vadd.f32 %v2353_v30, %v2239_v43  ;;  %v2419_v59 = vadd.f32 %v2355_v22, %v2241_v50  ;;  %v2599_v14 = vmul.f32 %v10249_v28, %v2499_v27  ;;  %v7431_v38 = vld [vmem:[#allocation2 + $0xc0] sm:$0xff]  ;;  %v7433_v42 = vld [vmem:[#allocation2 + $0x118] sm:$0xff] }
 0x2df   : > { %v2421_v36 = vadd.f32 %v2357_v47, %v2243_v48  ;;  %v2601_v20 = vmul.f32 %v10250_v49, %v2501_v37  ;;  %v2751_v21 = vsel %vm6947_vm9, %v7119_v46, 0.0  ;;  %v2753_v16 = vsel %vm6947_vm9, %v7125_v24, 0.0  ;;  %v10251_v11 = vld [vmem:[#allocation68_spill] sm:$0xff]  ;;  %v10252_v50 = vld [vmem:[#allocation69_spill] sm:$0xff] }
 0x2e0   : > { %v2667_v48 = vadd.f32 %v2603_v55, %v2419_v59  ;;  %v2847_v43 = vmul.f32 %v7107_v31, %v10251_v11  ;;  %v2849_v22 = vmul.f32 %v7113_v54, %v10252_v50  ;;  %v2663_v47 = vadd.f32 %v2599_v14, %v2415_v13  ;;  %v10253_v59 = vld [vmem:[#allocation79_spill] sm:$0xff]  ;;  %v10254_v14 = vld [vmem:[#allocation80_spill] sm:$0xff] }
 0x2e1   : > { %v2669_v30 = vadd.f32 %v2605_v1, %v2421_v36  ;;  %v2665_v46 = vadd.f32 %v2601_v20, %v2417_v52  ;;  %v2851_v27 = vmul.f32 %v10251_v11, %v2751_v21  ;;  %v2853_v24 = vmul.f32 %v10252_v50, %v2753_v16 }
 0x2e2   : > { %v7442_v37 = vunpack.c.h.bf16 %v7419_v23  ;;  %v7445_v49 = vunpack.c.h.bf16 %v7429_v8  ;;  %v7448_v55 = vunpack.c.h.bf16 %v7431_v38  ;;  %v7451_v31 = vunpack.c.h.bf16 %v7433_v42 }
 0x2e3   : > { %v2911_v1 = vadd.f32 %v2847_v43, %v2663_v47  ;;  %v2913_v54 = vadd.f32 %v2849_v22, %v2665_v46  ;;  %v2915_v13 = vadd.f32 %v2851_v27, %v2667_v48  ;;  %v2917_v52 = vadd.f32 %v2853_v24, %v2669_v30 }
 0x2e4   : > { %v3109_v36 = vmul.f32 %v10253_v59, %v7046_v32  ;;  %v3111_v20 = vmul.f32 %v10254_v14, %v7049_v26  ;;  %v3113_v21 = vmul.f32 %v10253_v59, %v7442_v37  ;;  %v3115_v16 = vmul.f32 %v10254_v14, %v7445_v49 }
 0x2e5   : > { %v3237_v50 = vrot.slane %v7046_v32, 7  ;;  %v3239_v11 = vrot.slane %v7049_v26, 7  ;;  %v9658_v43 = vrot.slane %v7442_v37, 7  ;;  %v9657_v48 = vrot.slane %v7445_v49, 7 }
 0x2e6   : > { %v3173_v30 = vadd.f32 %v3109_v36, %v2911_v1  ;;  %v3175_v22 = vadd.f32 %v3111_v20, %v2913_v54  ;;  %v3177_v47 = vadd.f32 %v3113_v21, %v2915_v13  ;;  %v3179_v46 = vadd.f32 %v3115_v16, %v2917_v52 }
 0x2e7   : > { %v7469_v27 = vsel %vm1562_vm0, %v3237_v50, %v9658_v43  ;;  %v7475_v24 = vsel %vm1562_vm0, %v3239_v11, %v9657_v48  ;;  %v10255_v14 = vrot.slane %v7040_v19, 7  ;;  %v10256_v54 = vrot.slane %v7043_v33, 7 }
 0x2e8   : > { %v3469_v20 = vmul.f32 %v10169_v34, %v7469_v27  ;;  %v9664_v59 = vrot.slane %v7448_v55, 1  ;;  %v9663_v28 = vrot.slane %v7451_v31, 1  ;;  %v10258_v4 = vrot.slane %v7046_v32, 1 }
 0x2e9   : > { %v7481_v1 = vsel %vm1562_vm0, %v10255_v14, %v3237_v50  ;;  %v7487_v13 = vsel %vm1562_vm0, %v10256_v54, %v3239_v11  ;;  %v10257_v50 = vld [vmem:[#allocation83_spill] sm:$0xff]  ;;  %v3597_v11 = vrot.slane %v7442_v37, 1  ;;  %v3599_v54 = vrot.slane %v7445_v49, 1 }
 0x2ea   : > { %v3365_v52 = vsel %vm6937_vm8, %v7481_v1, 0.0  ;;  %v3367_v36 = vsel %vm6937_vm8, %v7487_v13, 0.0  ;;  %v3471_v14 = vmul.f32 %v10257_v50, %v7475_v24  ;;  %v3533_v48 = vadd.f32 %v3469_v20, %v3177_v47 }
 0x2eb   : > { %v3465_v21 = vmul.f32 %v10169_v34, %v3365_v52  ;;  %v3467_v16 = vmul.f32 %v10257_v50, %v3367_v36  ;;  %v7509_v53 = vsel %vm1951_vm3, %v10258_v4, %v3597_v11  ;;  %v10259_v52 = vrot.slane %v7049_v26, 1 }
 0x2ec   : > { %v3535_v43 = vadd.f32 %v3471_v14, %v3179_v46  ;;  %v7521_v47 = vsel %vm1951_vm3, %v3597_v11, %v9664_v59  ;;  %v3821_v4 = vmul.f32 %v10071_v57, %v7509_v53  ;;  %v1458_v14 = vmul.f32 %v10188_v60, %v10073_v58 }
 0x2ed   : > { %v3529_v7 = vadd.f32 %v3465_v21, %v3173_v30  ;;  %v3531_v61 = vadd.f32 %v3467_v16, %v3175_v22  ;;  %v7515_v36 = vsel %vm1951_vm3, %v10259_v52, %v3599_v54  ;;  %v7527_v30 = vsel %vm1951_vm3, %v3599_v54, %v9663_v28 }
 0x2ee   : > { %v3823_v22 = vmul.f32 %v10072_v45, %v7515_v36  ;;  %v3725_v46 = vsel %vm6947_vm9, %v7521_v47, 0.0  ;;  %v3727_v20 = vsel %vm6947_vm9, %v7527_v30, 0.0  ;;  %v1460_v21 = vmul.f32 %v10190_v35, %v10074_v6 }
 0x2ef   : > { %v3825_v16 = vmul.f32 %v10071_v57, %v3725_v46  ;;  %v3827_v11 = vmul.f32 %v10072_v45, %v3727_v20  ;;  %v3885_v54 = vadd.f32 %v3821_v4, %v3529_v7  ;;  %v1462_v28 = vmul.f32 %v10191_v25, %v10073_v58  ;;  %v10260_v7 = vld [vmem:[#allocation89_spill] sm:$0xff]  ;;  %v10263_v25 = vld [vmem:[#allocation94_spill] sm:$0xff] }
 0x2f0   : > { %v3887_v52 = vadd.f32 %v3823_v22, %v3531_v61  ;;  %v1464_v59 = vmul.f32 %v10192_v17, %v10074_v6  ;;  %v1691_v50 = vsel %vm7339_vm10, %v7265_v10, 0.0  ;;  %v1693_v60 = vsel %vm7339_vm10, %v7271_v18, 0.0  ;;  %v10261_v4 = vld [vmem:[#allocation33_spill] sm:$0xff] }
 0x2f1   : > { %v3889_v35 = vadd.f32 %v3825_v16, %v3533_v48  ;;  %v3891_v46 = vadd.f32 %v3827_v11, %v3535_v43  ;;  %v3971_v20 = vadd.f32 %v10075_v3, %v3885_v54  ;;  %v7558_v22 = vmul.f32 %v10261_v4, %v1691_v50  ;;  %v10267_v11 = vld [vmem:[#allocation122_spill] sm:$0xff]  ;;  %v10268_v50 = vld [vmem:[#allocation84_spill] sm:$0xff]  ;;  %v10282_v57 = vld [vmem:[#allocation101_spill] sm:$0xff] }
 0x2f2   : > { %v3973_v61 = vadd.f32 %v10260_v7, %v3887_v52  ;;  %v7561_v58 = vmul.f32 %v10263_v25, %v1693_v60  ;;  %v7565_v17 = vmul.f32 %v7259_v0, %v10261_v4  ;;  %v7569_v6 = vmul.f32 %v7277_v29, %v10263_v25 }
 0x2f3   : > { %10262 = vst [vmem:[#allocation117_spill] sm:$0xff] %v7558_v22  ;;  %v3975_v43 = vadd.f32 %v10075_v3, %v3889_v35  ;;  %v3977_v48 = vadd.f32 %v10260_v7, %v3891_v46  ;;  %v4023_v16 = vmax.f32 %v3971_v20, 0.0  ;;  %v1847_v54 = vadd.f32 %v10267_v11, %v1458_v14  ;;  %v10269_v22 = vld [vmem:[#allocation85_spill] sm:$0xff]  ;;  %v10272_v14 = vld [vmem:[#allocation27_spill] sm:$0xff] }
 0x2f4   : > { %10264 = vst [vmem:[#allocation81_spill] sm:$0xff] %v7561_v58  ;;  %10265 = vst [vmem:[#allocation118_spill] sm:$0xff] %v7565_v17  ;;  %v1849_v52 = vadd.f32 %v10268_v50, %v1460_v21  ;;  %v1851_v60 = vadd.f32 %v10269_v22, %v1462_v28  ;;  %v10270_v58 = vld [vmem:[#allocation86_spill] sm:$0xff]  ;;  %v2084_v17 = vsel %vm7349_vm11, %v7305_v15, 0.0  ;;  %v2086_v35 = vsel %vm7349_vm11, %v7311_v2, 0.0  ;;  %v10277_v22 = vld [vmem:[#allocation72_spill] sm:$0xff] }
 0x2f5   : > { %10266 = vst [vmem:[#allocation119_spill] sm:$0xff] %v7569_v6  ;;  %v1853_v45 = vadd.f32 %v10270_v58, %v1464_v59  ;;  %v4025_v4 = vmax.f32 %v3975_v43, 0.0  ;;  %v4055_v25 = vmul.f32 %v4023_v16, %v3973_v61  ;;  %v7585_v46 = vmul.f32 %v7299_v63, %v6295_v9  ;;  %v10276_v59 = vld [vmem:[#allocation87_spill] sm:$0xff]  ;;  %v10278_v16 = vld [vmem:[#allocation74_spill] sm:$0xff]  ;;  %v10279_v50 = vld [vmem:[#allocation29_spill] sm:$0xff] }
 0x2f6   : > { %v7589_v21 = vmul.f32 %v10272_v14, %v6303_v39  ;;  %v7592_v58 = vmul.f32 %v6295_v9, %v2084_v17  ;;  %v7595_v28 = vmul.f32 %v6303_v39, %v2086_v35  ;;  %v2236_v20 = vadd.f32 %v10276_v59, %v1847_v54  ;;  %v10281_v7 = vld [vmem:[#allocation103_spill] sm:$0xff]  ;;  %v10284_v17 = vld [vmem:[#allocation62_spill] sm:$0xff] }
 0x2f7   : > { %10271 = vst [vmem:[#allocation67_spill] sm:$0xff] %v7585_v46  ;;  %v4057_v61 = vmul.f32 %v4025_v4, %v3977_v48  ;;  %v2238_v43 = vadd.f32 %v10277_v22, %v1849_v52  ;;  %v2240_v11 = vadd.f32 %v10278_v16, %v1851_v60  ;;  %v2242_v6 = vadd.f32 %v10279_v50, %v1853_v45  ;;  %v10280_v46 = vld [vmem:[#allocation100_spill] sm:$0xff]  ;;  %v10285_v35 = vld [vmem:[#allocation63_spill] sm:$0xff]  ;;  %v10286_v48 = vld [vmem:[#allocation105_spill] sm:$0xff] }
 0x2f8   : > { %10273 = vst [vmem:[#allocation70_spill] sm:$0xff] %v7589_v21  ;;  %10274 = vst [vmem:[#allocation35_spill] sm:$0xff] %v7592_v58  ;;  %v2350_v3 = vmul.f32 %v10281_v7, %v10280_v46  ;;  %v10283_v21 = vld [vmem:[#allocation123_spill] sm:$0xff]  ;;  %v2354_v58 = vmul.f32 %v10284_v17, %v10280_v46  ;;  %v2498_v4 = vsel %vm6937_vm8, %v7265_v10, 0.0  ;;  %v2500_v45 = vsel %vm6937_vm8, %v7271_v18, 0.0 }
 0x2f9   : > { %10275 = vst [vmem:[#allocation37_spill] sm:$0xff] %v7595_v28  ;;  %v2352_v34 = vmul.f32 %v10283_v21, %v10282_v57  ;;  %v2356_v28 = vmul.f32 %v10285_v35, %v10282_v57  ;;  %v4081_v54 = vpack.c.bf16 %v4057_v61, %v4055_v25  ;;  %v2602_v52 = vmul.f32 %v7259_v0, %v10286_v48  ;;  %v10287_v57 = vld [vmem:[#allocation106_spill] sm:$0xff]  ;;  %v10289_v0 = vld [vmem:[#allocation108_spill] sm:$0xff] }
 0x2fa   : > { %v2414_v60 = vadd.f32 %v2350_v3, %v2236_v20  ;;  %v2418_v22 = vadd.f32 %v2354_v58, %v2240_v11  ;;  %v2598_v50 = vmul.f32 %v10286_v48, %v2498_v4  ;;  %v2600_v25 = vmul.f32 %v10287_v57, %v2500_v45 }
 0x2fb   : > { %v2416_v59 = vadd.f32 %v2352_v34, %v2238_v43  ;;  %v2420_v16 = vadd.f32 %v2356_v28, %v2242_v6  ;;  %4281 = vmatprep.mubr.bf16.mxu0 %v4081_v54  ;;  %v2604_v61 = vmul.f32 %v7277_v29, %v10287_v57  ;;  %v2750_v10 = vsel %vm6947_vm9, %v7305_v15, 0.0  ;;  %v10288_v34 = vld [vmem:[#allocation107_spill] sm:$0xff] }
 0x2fc   : > { %v2666_v18 = vadd.f32 %v2602_v52, %v2418_v22  ;;  %v2752_v3 = vsel %vm6947_vm9, %v7311_v2, 0.0  ;;  %v2846_v6 = vmul.f32 %v7299_v63, %v10288_v34  ;;  %v2848_v58 = vmul.f32 %v10272_v14, %v10289_v0 }
 0x2fd   : > { %v2662_v28 = vadd.f32 %v2598_v50, %v2414_v60  ;;  %v2664_v20 = vadd.f32 %v2600_v25, %v2416_v59  ;;  %v2668_v43 = vadd.f32 %v2604_v61, %v2420_v16  ;;  %v2850_v29 = vmul.f32 %v10288_v34, %v2750_v10  ;;  %v10294_v60 = vld [vmem:[#allocation30_spill] sm:$0xff]  ;;  %v10295_v59 = vld [vmem:[#allocation109_spill] sm:$0xff]  ;;  %v10296_v16 = vld [vmem:[#allocation124_spill] sm:$0xff] }
 0x2fe   : > { %v2852_v11 = vmul.f32 %v10289_v0, %v2752_v3  ;;  %v7634_v15 = vunpack.c.l.bf16 %v7419_v23  ;;  %v7637_v54 = vunpack.c.l.bf16 %v7429_v8  ;;  %v7640_v2 = vunpack.c.l.bf16 %v7431_v38  ;;  %v10297_v50 = vld [vmem:[#allocation110_spill] sm:$0xff]  ;;  %v10307_v34 = vld [vmem:[#allocation43_spill] sm:$0xff] }
 0x2ff   : > { %v2910_v63 = vadd.f32 %v2846_v6, %v2662_v28  ;;  %v2912_v4 = vadd.f32 %v2848_v58, %v2664_v20  ;;  %v2914_v45 = vadd.f32 %v2850_v29, %v2666_v18  ;;  %v7643_v14 = vunpack.c.l.bf16 %v7433_v42 }
 0x300   : > { %10290 = vst [vmem:[#allocation120_spill] sm:$0xff] %v7634_v15  ;;  %10291 = vst [vmem:[#allocation121_spill] sm:$0xff] %v7637_v54  ;;  %v2916_v52 = vadd.f32 %v2852_v11, %v2668_v43  ;;  %v3108_v22 = vmul.f32 %v10295_v59, %v10294_v60  ;;  %v3110_v23 = vmul.f32 %v10297_v50, %v10296_v16  ;;  %v3236_v25 = vrot.slane %v10294_v60, 7 }
 0x301   : > { %10292 = vst [vmem:[#allocation64_spill] sm:$0xff] %v7640_v2  ;;  %10293 = vst [vmem:[#allocation46_spill] sm:$0xff] %v7643_v14  ;;  %v3112_v8 = vmul.f32 %v10295_v59, %v7634_v15  ;;  %v3114_v38 = vmul.f32 %v10297_v50, %v7637_v54  ;;  %v3238_v61 = vrot.slane %v10296_v16, 7  ;;  %v9677_v42 = vrot.slane %v7634_v15, 7 }
 0x302   : > { %v3172_v10 = vadd.f32 %v3108_v22, %v2910_v63  ;;  %v3174_v18 = vadd.f32 %v3110_v23, %v2912_v4  ;;  %v9676_v6 = vrot.slane %v7637_v54, 7  ;;  %v10298_v20 = vrot.slane %v10284_v17, 7 }
 0x303   : > { %v3176_v3 = vadd.f32 %v3112_v8, %v2914_v45  ;;  %v3178_v58 = vadd.f32 %v3114_v38, %v2916_v52  ;;  %v7661_v28 = vsel %vm1562_vm0, %v3236_v25, %v9677_v42  ;;  %v10299_v29 = vrot.slane %v10285_v35, 7  ;;  %v10300_v52 = vld [vmem:[#allocation111_spill] sm:$0xff]  ;;  %v10301_v8 = vld [vmem:[#allocation112_spill] sm:$0xff] }
 0x304   : > { %v7667_v43 = vsel %vm1562_vm0, %v10298_v20, %v3236_v25  ;;  %v7679_v63 = vsel %vm1562_vm0, %v3238_v61, %v9676_v6  ;;  %v3468_v22 = vmul.f32 %v10300_v52, %v7661_v28  ;;  %v9682_v6 = vrot.slane %v7640_v2, 1 }
 0x305   : > { %v7673_v11 = vsel %vm1562_vm0, %v10299_v29, %v3238_v61  ;;  %v3364_v4 = vsel %vm6937_vm8, %v7667_v43, 0.0  ;;  %v3470_v25 = vmul.f32 %v10301_v8, %v7679_v63  ;;  %v3596_v61 = vrot.slane %v7634_v15, 1 }
 0x306   : > { %v3366_v45 = vsel %vm6937_vm8, %v7673_v11, 0.0  ;;  %v3464_v23 = vmul.f32 %v10300_v52, %v3364_v4  ;;  %v3532_v20 = vadd.f32 %v3468_v22, %v3176_v3  ;;  %v3598_v29 = vrot.slane %v7637_v54, 1  ;;  %v10308_v54 = vld [vmem:[#allocation115_spill] sm:$0xff] }
 0x307   : > { %v3466_v38 = vmul.f32 %v10301_v8, %v3366_v45  ;;  %v9681_v5 = vrot.slane %v7643_v14, 1  ;;  %v3534_v59 = vadd.f32 %v3470_v25, %v3178_v58  ;;  %v10302_v0 = vrot.slane %v10294_v60, 1  ;;  %v10306_v14 = vld [vmem:[#allocation42_spill] sm:$0xff]  ;;  %v10309_v60 = vld [vmem:[#allocation116_spill] sm:$0xff] }
 0x308   : > { %v3528_v42 = vadd.f32 %v3464_v23, %v3172_v10  ;;  %v7707_v3 = vsel %vm1951_vm3, %v3596_v61, %v9682_v6  ;;  %v10303_v10 = vrot.slane %v10296_v16, 1  ;;  %v1247_v6 = vadd.s32 88, %v5463_v44 }
 0x309   : > { %v3530_v50 = vadd.f32 %v3466_v38, %v3174_v18  ;;  %v7701_v4 = vsel %vm1951_vm3, %v10302_v0, %v3596_v61  ;;  %v7713_v45 = vsel %vm1951_vm3, %v3598_v29, %v9681_v5  ;;  %v10304_v0 = vld [vmem:[#allocation113_spill] sm:$0xff]  ;;  %v3724_v22 = vsel %vm6947_vm9, %v7707_v3, 0.0  ;;  %v10305_v38 = vld [vmem:[#allocation114_spill] sm:$0xff] }
 0x30a   : > { %v7719_v18 = vsel %vm1951_vm3, %v10303_v10, %v3598_v29  ;;  %v3820_v58 = vmul.f32 %v10304_v0, %v7701_v4  ;;  %v3726_v23 = vsel %vm6947_vm9, %v7713_v45, 0.0  ;;  %v1246_v61 = vadd.s32 80, %v5463_v44 }
 0x30b   : > { %v3822_v25 = vmul.f32 %v10305_v38, %v7719_v18  ;;  %v3824_v5 = vmul.f32 %v10304_v0, %v3724_v22  ;;  %v3826_v29 = vmul.f32 %v10305_v38, %v3726_v23  ;;  %v1467_v2 = vmul.f32 %v10159_v51, %v10306_v14 }
 0x30c   : > { %v3884_v10 = vadd.f32 %v3820_v58, %v3528_v42  ;;  %v1262_v52 = vand.u32 15, %v1246_v61  ;;  %v1469_v40 = vmul.f32 %v10161_v41, %v10307_v34  ;;  %v1263_v16 = vand.u32 15, %v1247_v6 }
 0x30d   : > { %v3886_v8 = vadd.f32 %v3822_v25, %v3530_v50  ;;  %v3888_v57 = vadd.f32 %v3824_v5, %v3532_v20  ;;  %v3890_v48 = vadd.f32 %v3826_v29, %v3534_v59  ;;  %v1471_v50 = vmul.f32 %v7040_v19, %v10306_v14  ;;  %v10319_v5 = vld [vmem:[#allocation97_spill] sm:$0xff]  ;;  %v10320_v25 = vld [vmem:[#allocation71_spill] sm:$0xff]  ;;  %v10321_v29 = vld [vmem:[#allocation28_spill] sm:$0xff] }
 0x30e   : > { %v3970_v15 = vadd.f32 %v10308_v54, %v3884_v10  ;;  %vm7741_vm12 = vcmp.ne.s32.totalorder %v1262_v52, 0  ;;  %v1473_v51 = vmul.f32 %v7043_v33, %v10307_v34  ;;  %vm7751_vm13 = vcmp.ne.s32.totalorder %v1263_v16, 15 }
 0x30f   : > { %v3972_v22 = vadd.f32 %v10309_v60, %v3886_v8  ;;  %v3974_v42 = vadd.f32 %v10308_v54, %v3888_v57  ;;  %v3976_v41 = vadd.f32 %v10309_v60, %v3890_v48  ;;  %v1700_v6 = vsel %vm7741_vm12, %v7481_v1, 0.0  ;;  %v10315_v57 = vld [vmem:[#allocation48_spill] sm:$0xff] }
 0x310   : > { %v4022_v59 = vmax.f32 %v3970_v15, 0.0  ;;  %v1702_v19 = vsel %vm7741_vm12, %v7487_v13, 0.0  ;;  %v7763_v33 = vmul.f32 %v7469_v27, %v10225_v56  ;;  %v7767_v48 = vmul.f32 %v7475_v24, %v10315_v57  ;;  %v10322_v60 = vld [vmem:[#allocation96_spill] sm:$0xff] }
 0x311   : > { %v4024_v15 = vmax.f32 %v3974_v42, 0.0  ;;  %v7770_v52 = vmul.f32 %v10225_v56, %v1700_v6  ;;  %v7773_v8 = vmul.f32 %v10315_v57, %v1702_v19  ;;  %v1856_v58 = vadd.f32 %v10319_v5, %v1467_v2  ;;  %v10325_v2 = vld [vmem:[#allocation54_spill] sm:$0xff]  ;;  %v10334_v57 = vld [vmem:[#allocation60_spill] sm:$0xff] }
 0x312   : > { %10314 = vst [vmem:[#allocation122_spill] sm:$0xff] %v7763_v33  ;;  %10316 = vst [vmem:[#allocation84_spill] sm:$0xff] %v7767_v48  ;;  %v4054_v16 = vmul.f32 %v4022_v59, %v3972_v22  ;;  %v1858_v61 = vadd.f32 %v10320_v25, %v1469_v40  ;;  %v1860_v10 = vadd.f32 %v10321_v29, %v1471_v50  ;;  %v2093_v42 = vsel %vm7751_vm13, %v7521_v47, 0.0  ;;  %v10323_v59 = vld [vmem:[#allocation53_spill] sm:$0xff]  ;;  %v10331_v25 = vld [vmem:[#allocation104_spill] sm:$0xff] }
 0x313   : > { %10317 = vst [vmem:[#allocation85_spill] sm:$0xff] %v7770_v52  ;;  %10318 = vst [vmem:[#allocation86_spill] sm:$0xff] %v7773_v8  ;;  %v1862_v33 = vadd.f32 %v10322_v60, %v1473_v51  ;;  %v4056_v54 = vmul.f32 %v4024_v15, %v3976_v41  ;;  %v2095_v22 = vsel %vm7751_vm13, %v7527_v30, 0.0  ;;  %v7787_v6 = vmul.f32 %v7509_v53, %v10323_v59  ;;  %v10329_v51 = vld [vmem:[#allocation73_spill] sm:$0xff]  ;;  %v10330_v15 = vld [vmem:[#allocation102_spill] sm:$0xff] }
 0x314   : > { %v7791_v40 = vmul.f32 %v7515_v36, %v10325_v2  ;;  %v7794_v50 = vmul.f32 %v10323_v59, %v2093_v42  ;;  %v7797_v60 = vmul.f32 %v10325_v2, %v2095_v22  ;;  %v2245_v41 = vadd.f32 %v10329_v51, %v1856_v58  ;;  %v10332_v48 = vld [vmem:[#allocation61_spill] sm:$0xff]  ;;  %v10336_v58 = vld [vmem:[#allocation66_spill] sm:$0xff] }
 0x315   : > { %10324 = vst [vmem:[#allocation27_spill] sm:$0xff] %v7787_v6  ;;  %v4080_v19 = vpack.c.bf16 %v4056_v54, %v4054_v16  ;;  %v2247_v5 = vadd.f32 %v10330_v15, %v1858_v61  ;;  %v2249_v29 = vadd.f32 %v10331_v25, %v1860_v10  ;;  %v2251_v8 = vadd.f32 %v10332_v48, %v1862_v33  ;;  %v10333_v6 = vld [vmem:[#allocation59_spill] sm:$0xff]  ;;  %v10335_v48 = vld [vmem:[#allocation65_spill] sm:$0xff] }
 0x316   : > { %10326 = vst [vmem:[#allocation87_spill] sm:$0xff] %v7791_v40  ;;  %10327 = vst [vmem:[#allocation72_spill] sm:$0xff] %v7794_v50  ;;  %v2359_v52 = vmul.f32 %v7046_v32, %v10333_v6  ;;  %v2361_v40 = vmul.f32 %v7049_v26, %v10334_v57  ;;  %v2363_v42 = vmul.f32 %v7442_v37, %v10333_v6  ;;  %v2507_v54 = vsel %vm7339_vm10, %v7481_v1, 0.0  ;;  %v7831_v6 = vld [vmem:[#allocation2 + $0xa0] sm:$0xff] }
 0x317   : > { %10328 = vst [vmem:[#allocation74_spill] sm:$0xff] %v7797_v60  ;;  %v2365_v22 = vmul.f32 %v7445_v49, %v10334_v57  ;;  %4282 = vmatmul.mubr.bf16.gmra.mxu0 %v4080_v19  ;;  %v2509_v33 = vsel %vm7339_vm10, %v7487_v13, 0.0  ;;  %v2611_v16 = vmul.f32 %v7469_v27, %v10335_v48  ;;  %v2613_v61 = vmul.f32 %v7475_v24, %v10336_v58  ;;  %v7821_v57 = vld [vmem:[#allocation2 + $0xd8] sm:$0xff]  ;;  %v7833_v24 = vld [vmem:[#allocation2 + $0x68] sm:$0xff] }
 0x318   : > { %v2423_v10 = vadd.f32 %v2359_v52, %v2245_v41  ;;  %v2425_v51 = vadd.f32 %v2361_v40, %v2247_v5  ;;  %v2427_v15 = vadd.f32 %v2363_v42, %v2249_v29  ;;  %v2607_v19 = vmul.f32 %v10335_v48, %v2507_v54  ;;  %v7835_v52 = vld [vmem:[#allocation2 + $0x130] sm:$0xff]  ;;  %v10337_v41 = vld [vmem:[#allocation68_spill] sm:$0xff]  ;;  %v10338_v29 = vld [vmem:[#allocation69_spill] sm:$0xff] }
 0x319   : > { %v2429_v25 = vadd.f32 %v2365_v22, %v2251_v8  ;;  %v2609_v1 = vmul.f32 %v10336_v58, %v2509_v33  ;;  %v2759_v13 = vsel %vm7349_vm11, %v7521_v47, 0.0  ;;  %v2761_v27 = vsel %vm7349_vm11, %v7527_v30, 0.0 }
 0x31a   : > { %v2675_v8 = vadd.f32 %v2611_v16, %v2427_v15  ;;  %v2855_v5 = vmul.f32 %v7509_v53, %v10337_v41  ;;  %v2857_v42 = vmul.f32 %v7515_v36, %v10338_v29  ;;  %v2671_v22 = vadd.f32 %v2607_v19, %v2423_v10  ;;  %v10343_v15 = vld [vmem:[#allocation79_spill] sm:$0xff]  ;;  %v10344_v19 = vld [vmem:[#allocation80_spill] sm:$0xff] }
 0x31b   : > { %v2677_v40 = vadd.f32 %v2613_v61, %v2429_v25  ;;  %v2673_v47 = vadd.f32 %v2609_v1, %v2425_v51  ;;  %v2859_v54 = vmul.f32 %v10337_v41, %v2759_v13  ;;  %v2861_v30 = vmul.f32 %v10338_v29, %v2761_v27 }
 0x31c   : > { %v7844_v33 = vunpack.c.h.bf16 %v7821_v57  ;;  %v7847_v58 = vunpack.c.h.bf16 %v7831_v6  ;;  %v7850_v16 = vunpack.c.h.bf16 %v7833_v24  ;;  %v7853_v53 = vunpack.c.h.bf16 %v7835_v52 }
 0x31d   : > { %v2919_v61 = vadd.f32 %v2855_v5, %v2671_v22  ;;  %v2921_v36 = vadd.f32 %v2857_v42, %v2673_v47  ;;  %v2923_v10 = vadd.f32 %v2859_v54, %v2675_v8  ;;  %v2925_v51 = vadd.f32 %v2861_v30, %v2677_v40 }
 0x31e   : > { %10339 = vst [vmem:[#allocation29_spill] sm:$0xff] %v7844_v33  ;;  %10340 = vst [vmem:[#allocation100_spill] sm:$0xff] %v7847_v58  ;;  %v3117_v25 = vmul.f32 %v10343_v15, %v7448_v55  ;;  %v3119_v1 = vmul.f32 %v10344_v19, %v7451_v31  ;;  %v3121_v13 = vmul.f32 %v10343_v15, %v7844_v33  ;;  %v3245_v29 = vrot.slane %v7448_v55, 7 }
 0x31f   : > { %10341 = vst [vmem:[#allocation103_spill] sm:$0xff] %v7850_v16  ;;  %10342 = vst [vmem:[#allocation123_spill] sm:$0xff] %v7853_v53  ;;  %v3123_v27 = vmul.f32 %v10344_v19, %v7847_v58  ;;  %v3247_v41 = vrot.slane %v7451_v31, 7  ;;  %v9708_v5 = vrot.slane %v7844_v33, 7  ;;  %v9707_v8 = vrot.slane %v7847_v58, 7 }
 0x320   : > { %v3181_v40 = vadd.f32 %v3117_v25, %v2919_v61  ;;  %v3183_v42 = vadd.f32 %v3119_v1, %v2921_v36  ;;  %v3185_v22 = vadd.f32 %v3121_v13, %v2923_v10  ;;  %v10345_v19 = vrot.slane %v7442_v37, 7  ;;  %v10347_v1 = vld [vmem:[#allocation82_spill] sm:$0xff] }
 0x321   : > { %v3187_v47 = vadd.f32 %v3123_v27, %v2925_v51  ;;  %v7871_v54 = vsel %vm1562_vm0, %v3245_v29, %v9708_v5  ;;  %v7877_v30 = vsel %vm1562_vm0, %v3247_v41, %v9707_v8  ;;  %v10346_v36 = vrot.slane %v7445_v49, 7 }
 0x322   : > { %v7883_v61 = vsel %vm1562_vm0, %v10345_v19, %v3245_v29  ;;  %v3477_v13 = vmul.f32 %v10347_v1, %v7871_v54  ;;  %v10348_v29 = vld [vmem:[#allocation83_spill] sm:$0xff]  ;;  %v7906_v48 = vrot.slane %v7850_v16, 1  ;;  %v7909_v60 = vrot.slane %v7853_v53, 1 }
 0x323   : > { %v7889_v10 = vsel %vm1562_vm0, %v10346_v36, %v3247_v41  ;;  %v3373_v51 = vsel %vm7339_vm10, %v7883_v61, 0.0  ;;  %v3479_v19 = vmul.f32 %v10348_v29, %v7877_v30  ;;  %v3605_v41 = vrot.slane %v7844_v33, 1 }
 0x324   : > { %v3375_v25 = vsel %vm7339_vm10, %v7889_v10, 0.0  ;;  %v3473_v27 = vmul.f32 %v10347_v1, %v3373_v51  ;;  %v3607_v36 = vrot.slane %v7847_v58, 1  ;;  %v3541_v5 = vadd.f32 %v3477_v13, %v3185_v22  ;;  %10349 = vst [vmem:[#allocation62_spill] sm:$0xff] %v7906_v48  ;;  %10350 = vst [vmem:[#allocation63_spill] sm:$0xff] %v7909_v60 }
 0x325   : > { %v3475_v8 = vmul.f32 %v10348_v29, %v3375_v25  ;;  %v3543_v15 = vadd.f32 %v3479_v19, %v3187_v47  ;;  %v10351_v59 = vrot.slane %v7448_v55, 1  ;;  %v10352_v25 = vrot.slane %v7451_v31, 1 }
 0x326   : > { %v3537_v50 = vadd.f32 %v3473_v27, %v3181_v40  ;;  %v7926_v47 = vsel %vm1951_vm3, %v3605_v41, %v7906_v48  ;;  %v10353_v40 = vld [vmem:[#allocation90_spill] sm:$0xff]  ;;  %v10356_v48 = vld [vmem:[#allocation93_spill] sm:$0xff]  ;;  %v1699_v33 = vsel %vm7741_vm12, %v7667_v43, 0.0  ;;  %v1477_v12 = vmul.f32 %v7049_v26, %v10307_v34 }
 0x327   : > { %v3539_v2 = vadd.f32 %v3475_v8, %v3183_v42  ;;  %v7915_v51 = vsel %vm1951_vm3, %v10351_v59, %v3605_v41  ;;  %v7921_v22 = vsel %vm1951_vm3, %v10352_v25, %v3607_v36  ;;  %v7931_v8 = vsel %vm1951_vm3, %v3607_v36, %v7909_v60  ;;  %v10354_v42 = vld [vmem:[#allocation91_spill] sm:$0xff]  ;;  %v10355_v41 = vld [vmem:[#allocation92_spill] sm:$0xff] }
 0x328   : > { %v3829_v59 = vmul.f32 %v10353_v40, %v7915_v51  ;;  %v3831_v13 = vmul.f32 %v10354_v42, %v7921_v22  ;;  %v3733_v19 = vsel %vm7349_vm11, %v7926_v47, 0.0  ;;  %v3735_v27 = vsel %vm7349_vm11, %v7931_v8, 0.0 }
 0x329   : > { %v1466_v25 = vmul.f32 %v10281_v7, %v10355_v41  ;;  %v1468_v36 = vmul.f32 %v10283_v21, %v10356_v48  ;;  %v3833_v60 = vmul.f32 %v10353_v40, %v3733_v19  ;;  %v3835_v29 = vmul.f32 %v10354_v42, %v3735_v27  ;;  %v10357_v40 = vld [vmem:[#allocation88_spill] sm:$0xff] }
 0x32a   : > { %v3893_v1 = vadd.f32 %v3829_v59, %v3537_v50  ;;  %v3895_v53 = vadd.f32 %v3831_v13, %v3539_v2  ;;  %v1470_v16 = vmul.f32 %v10284_v17, %v10355_v41  ;;  %v1472_v58 = vmul.f32 %v10285_v35, %v10356_v48  ;;  %v10358_v50 = vld [vmem:[#allocation89_spill] sm:$0xff]  ;;  %v10361_v17 = vld [vmem:[#allocation94_spill] sm:$0xff] }
 0x32b   : > { %v1701_v7 = vsel %vm7741_vm12, %v7673_v11, 0.0  ;;  %v3897_v21 = vadd.f32 %v3833_v60, %v3541_v5  ;;  %v3899_v19 = vadd.f32 %v3835_v29, %v3543_v15  ;;  %v10359_v59 = vld [vmem:[#allocation33_spill] sm:$0xff]  ;;  %v7973_v48 = vmul.f32 %v7679_v63, %v10361_v17 }
 0x32c   : > { %v3979_v27 = vadd.f32 %v10357_v40, %v3893_v1  ;;  %v3981_v2 = vadd.f32 %v10358_v50, %v3895_v53  ;;  %v7962_v13 = vmul.f32 %v10359_v59, %v1699_v33  ;;  %v7965_v41 = vmul.f32 %v10361_v17, %v1701_v7  ;;  %v10365_v53 = vld [vmem:[#allocation117_spill] sm:$0xff] }
 0x32d   : > { %v7969_v35 = vmul.f32 %v7661_v28, %v10359_v59  ;;  %10364 = vst [vmem:[#allocation96_spill] sm:$0xff] %v7973_v48  ;;  %v3983_v60 = vadd.f32 %v10357_v40, %v3897_v21  ;;  %v3985_v15 = vadd.f32 %v10358_v50, %v3899_v19  ;;  %v1855_v1 = vadd.f32 %v10365_v53, %v1466_v25  ;;  %v10366_v33 = vld [vmem:[#allocation81_spill] sm:$0xff] }
 0x32e   : > { %10360 = vst [vmem:[#allocation97_spill] sm:$0xff] %v7962_v13  ;;  %10362 = vst [vmem:[#allocation71_spill] sm:$0xff] %v7965_v41  ;;  %v4027_v5 = vmax.f32 %v3979_v27, 0.0  ;;  %v1857_v29 = vadd.f32 %v10366_v33, %v1468_v36  ;;  %v10367_v13 = vld [vmem:[#allocation118_spill] sm:$0xff]  ;;  %v10368_v41 = vld [vmem:[#allocation119_spill] sm:$0xff]  ;;  %v2094_v21 = vsel %vm7751_vm13, %v7713_v45, 0.0  ;;  %v7989_v19 = vmul.f32 %v7701_v4, %v6295_v9 }
 0x32f   : > { %10363 = vst [vmem:[#allocation28_spill] sm:$0xff] %v7969_v35  ;;  %v1859_v7 = vadd.f32 %v10367_v13, %v1470_v16  ;;  %v1861_v42 = vadd.f32 %v10368_v41, %v1472_v58  ;;  %v2092_v35 = vsel %vm7751_vm13, %v7707_v3, 0.0  ;;  %v4029_v59 = vmax.f32 %v3983_v60, 0.0  ;;  %v10373_v41 = vld [vmem:[#allocation67_spill] sm:$0xff]  ;;  %v10376_v53 = vld [vmem:[#allocation37_spill] sm:$0xff] }
 0x330   : > { %v4059_v17 = vmul.f32 %v4027_v5, %v3981_v2  ;;  %10369 = vst [vmem:[#allocation73_spill] sm:$0xff] %v7989_v19  ;;  %v7993_v25 = vmul.f32 %v7719_v18, %v6303_v39  ;;  %v7996_v58 = vmul.f32 %v6295_v9, %v2092_v35  ;;  %v7999_v16 = vmul.f32 %v6303_v39, %v2094_v21  ;;  %v10374_v2 = vld [vmem:[#allocation70_spill] sm:$0xff]  ;;  %v10375_v60 = vld [vmem:[#allocation35_spill] sm:$0xff]  ;;  %v10378_v50 = vld [vmem:[#allocation101_spill] sm:$0xff] }
 0x331   : > { %v2244_v36 = vadd.f32 %v10373_v41, %v1855_v1  ;;  %v4061_v27 = vmul.f32 %v4029_v59, %v3985_v15  ;;  %v2246_v13 = vadd.f32 %v10374_v2, %v1857_v29  ;;  %v2248_v5 = vadd.f32 %v10375_v60, %v1859_v7  ;;  %v10377_v19 = vld [vmem:[#allocation30_spill] sm:$0xff]  ;;  %v10380_v35 = vld [vmem:[#allocation120_spill] sm:$0xff]  ;;  %v10381_v21 = vld [vmem:[#allocation121_spill] sm:$0xff] }
 0x332   : > { %10370 = vst [vmem:[#allocation102_spill] sm:$0xff] %v7993_v25  ;;  %10371 = vst [vmem:[#allocation104_spill] sm:$0xff] %v7996_v58  ;;  %v2250_v33 = vadd.f32 %v10376_v53, %v1861_v42  ;;  %v2358_v48 = vmul.f32 %v10377_v19, %v10280_v46  ;;  %v10379_v25 = vld [vmem:[#allocation124_spill] sm:$0xff]  ;;  %v2362_v58 = vmul.f32 %v10380_v35, %v10280_v46  ;;  %v2506_v59 = vsel %vm7339_vm10, %v7667_v43, 0.0  ;;  %v10382_v15 = vld [vmem:[#allocation105_spill] sm:$0xff] }
 0x333   : > { %10372 = vst [vmem:[#allocation61_spill] sm:$0xff] %v7999_v16  ;;  %v2360_v40 = vmul.f32 %v10379_v25, %v10378_v50  ;;  %v2364_v16 = vmul.f32 %v10381_v21, %v10378_v50  ;;  %v4083_v1 = vpack.c.bf16 %v4061_v27, %v4059_v17  ;;  %v2508_v42 = vsel %vm7339_vm10, %v7673_v11, 0.0  ;;  %v10383_v50 = vld [vmem:[#allocation106_spill] sm:$0xff] }
 0x334   : > { %v2610_v29 = vmul.f32 %v7661_v28, %v10382_v15  ;;  %v2422_v7 = vadd.f32 %v2358_v48, %v2244_v36  ;;  %v2426_v2 = vadd.f32 %v2362_v58, %v2248_v5  ;;  %v2606_v53 = vmul.f32 %v10382_v15, %v2506_v59  ;;  %v10384_v48 = vld [vmem:[#allocation107_spill] sm:$0xff]  ;;  %v10385_v58 = vld [vmem:[#allocation108_spill] sm:$0xff] }
 0x335   : > { %v2424_v41 = vadd.f32 %v2360_v40, %v2246_v13  ;;  %v2428_v60 = vadd.f32 %v2364_v16, %v2250_v33  ;;  %4289 = vmatprep.mubr.bf16.mxu0 %v4083_v1  ;;  %v2608_v17 = vmul.f32 %v10383_v50, %v2508_v42  ;;  %v2612_v27 = vmul.f32 %v7679_v63, %v10383_v50  ;;  %v10401_v15 = vld [vmem:[#allocation116_spill] sm:$0xff] }
 0x336   : > { %v2758_v43 = vsel %vm7349_vm11, %v7707_v3, 0.0  ;;  %v2674_v11 = vadd.f32 %v2610_v29, %v2426_v2  ;;  %v2760_v28 = vsel %vm7349_vm11, %v7713_v45, 0.0  ;;  %v2854_v40 = vmul.f32 %v7701_v4, %v10384_v48 }
 0x337   : > { %v2856_v16 = vmul.f32 %v7719_v18, %v10385_v58  ;;  %v2670_v36 = vadd.f32 %v2606_v53, %v2422_v7  ;;  %v2672_v13 = vadd.f32 %v2608_v17, %v2424_v41  ;;  %v2676_v5 = vadd.f32 %v2612_v27, %v2428_v60  ;;  %v10388_v7 = vld [vmem:[#allocation64_spill] sm:$0xff]  ;;  %v10389_v41 = vld [vmem:[#allocation109_spill] sm:$0xff]  ;;  %v10390_v60 = vld [vmem:[#allocation46_spill] sm:$0xff] }
 0x338   : > { %v2858_v63 = vmul.f32 %v10384_v48, %v2758_v43  ;;  %v2860_v33 = vmul.f32 %v10385_v58, %v2760_v28  ;;  %v8038_v3 = vunpack.c.l.bf16 %v7821_v57  ;;  %v8041_v1 = vunpack.c.l.bf16 %v7831_v6  ;;  %v10391_v53 = vld [vmem:[#allocation110_spill] sm:$0xff]  ;;  %v10400_v58 = vld [vmem:[#allocation115_spill] sm:$0xff] }
 0x339   : > { %v8044_v45 = vunpack.c.l.bf16 %v7833_v24  ;;  %v2918_v4 = vadd.f32 %v2854_v40, %v2670_v36  ;;  %v2920_v59 = vadd.f32 %v2856_v16, %v2672_v13  ;;  %v8047_v18 = vunpack.c.l.bf16 %v7835_v52 }
 0x33a   : > { %v2922_v42 = vadd.f32 %v2858_v63, %v2674_v11  ;;  %v2924_v29 = vadd.f32 %v2860_v33, %v2676_v5  ;;  %v3116_v2 = vmul.f32 %v10389_v41, %v10388_v7  ;;  %v3118_v57 = vmul.f32 %v10391_v53, %v10390_v60 }
 0x33b   : > { %10386 = vst [vmem:[#allocation117_spill] sm:$0xff] %v8044_v45  ;;  %10387 = vst [vmem:[#allocation81_spill] sm:$0xff] %v8047_v18  ;;  %v3120_v6 = vmul.f32 %v10389_v41, %v8038_v3  ;;  %v3122_v24 = vmul.f32 %v10391_v53, %v8041_v1  ;;  %v3244_v17 = vrot.slane %v10388_v7, 7  ;;  %v3246_v27 = vrot.slane %v10390_v60, 7 }
 0x33c   : > { %v9737_v52 = vrot.slane %v8038_v3, 7  ;;  %v3180_v43 = vadd.f32 %v3116_v2, %v2918_v4  ;;  %v3182_v11 = vadd.f32 %v3118_v57, %v2920_v59  ;;  %v9736_v40 = vrot.slane %v8041_v1, 7 }
 0x33d   : > { %v3184_v28 = vadd.f32 %v3120_v6, %v2922_v42  ;;  %v3186_v16 = vadd.f32 %v3122_v24, %v2924_v29  ;;  %v10392_v13 = vrot.slane %v10380_v35, 7  ;;  %v10393_v63 = vrot.slane %v10381_v21, 7  ;;  %v10394_v29 = vld [vmem:[#allocation111_spill] sm:$0xff]  ;;  %v10395_v6 = vld [vmem:[#allocation112_spill] sm:$0xff] }
 0x33e   : > { %v8065_v36 = vsel %vm1562_vm0, %v3244_v17, %v9737_v52  ;;  %v8083_v4 = vsel %vm1562_vm0, %v3246_v27, %v9736_v40  ;;  %v8100_v40 = vrot.slane %v8044_v45, 1  ;;  %v8103_v62 = vrot.slane %v8047_v18, 1 }
 0x33f   : > { %v8071_v5 = vsel %vm1562_vm0, %v10392_v13, %v3244_v17  ;;  %v8077_v33 = vsel %vm1562_vm0, %v10393_v63, %v3246_v27  ;;  %v3476_v2 = vmul.f32 %v10394_v29, %v8065_v36  ;;  %v3478_v17 = vmul.f32 %v10395_v6, %v8083_v4 }
 0x340   : > { %v3372_v59 = vsel %vm7339_vm10, %v8071_v5, 0.0  ;;  %v3374_v42 = vsel %vm7339_vm10, %v8077_v33, 0.0  ;;  %v3604_v27 = vrot.slane %v8038_v3, 1  ;;  %v3606_v63 = vrot.slane %v8041_v1, 1  ;;  %10396 = vst [vmem:[#allocation118_spill] sm:$0xff] %v8100_v40  ;;  %10397 = vst [vmem:[#allocation119_spill] sm:$0xff] %v8103_v62 }
 0x341   : > { %v3472_v57 = vmul.f32 %v10394_v29, %v3372_v59  ;;  %v3474_v24 = vmul.f32 %v10395_v6, %v3374_v42  ;;  %v3540_v13 = vadd.f32 %v3476_v2, %v3184_v28  ;;  %v3542_v41 = vadd.f32 %v3478_v17, %v3186_v16 }
 0x342   : > { %v10398_v59 = vrot.slane %v10388_v7, 1  ;;  %v8114_v28 = vsel %vm1951_vm3, %v3604_v27, %v8100_v40  ;;  %v8119_v2 = vsel %vm1951_vm3, %v3606_v63, %v8103_v62  ;;  %v1249_v62 = vadd.s32 104, %v5463_v44 }
 0x343   : > { %v3536_v52 = vadd.f32 %v3472_v57, %v3180_v43  ;;  %v3538_v53 = vadd.f32 %v3474_v24, %v3182_v11  ;;  %v10399_v43 = vrot.slane %v10390_v60, 1  ;;  %v3732_v57 = vsel %vm7349_vm11, %v8114_v28, 0.0 }
 0x344   : > { %v8109_v42 = vsel %vm1951_vm3, %v10398_v59, %v3604_v27  ;;  %v3734_v24 = vsel %vm7349_vm11, %v8119_v2, 0.0  ;;  %v1248_v27 = vadd.s32 96, %v5463_v44  ;;  %v3832_v59 = vmul.f32 %v10304_v0, %v3732_v57 }
 0x345   : > { %v8125_v11 = vsel %vm1951_vm3, %v10399_v43, %v3606_v63  ;;  %v3828_v16 = vmul.f32 %v10304_v0, %v8109_v42  ;;  %v3834_v63 = vmul.f32 %v10305_v38, %v3734_v24  ;;  %v1475_v29 = vmul.f32 %v7046_v32, %v10306_v14 }
 0x346   : > { %v3830_v17 = vmul.f32 %v10305_v38, %v8125_v11  ;;  %v1264_v6 = vand.u32 15, %v1248_v27  ;;  %v3896_v18 = vadd.f32 %v3832_v59, %v3540_v13  ;;  %v1265_v50 = vand.u32 15, %v1249_v62  ;;  %v10412_v27 = vld [vmem:[#allocation86_spill] sm:$0xff] }
 0x347   : > { %v3892_v43 = vadd.f32 %v3828_v16, %v3536_v52  ;;  %v3898_v45 = vadd.f32 %v3834_v63, %v3542_v41  ;;  %v1481_v32 = vmul.f32 %v7445_v49, %v10307_v34  ;;  %v8169_v49 = vmul.f32 %v7871_v54, %v10225_v56  ;;  %v10411_v16 = vld [vmem:[#allocation85_spill] sm:$0xff]  ;;  %v10413_v63 = vld [vmem:[#allocation122_spill] sm:$0xff] }
 0x348   : > { %v3894_v40 = vadd.f32 %v3830_v17, %v3538_v53  ;;  %vm8147_vm14 = vcmp.ne.s32.totalorder %v1264_v6, 0  ;;  %v1479_v53 = vmul.f32 %v7442_v37, %v10306_v14  ;;  %v3982_v52 = vadd.f32 %v10400_v58, %v3896_v18  ;;  %v10407_v18 = vld [vmem:[#allocation48_spill] sm:$0xff] }
 0x349   : > { %v3978_v48 = vadd.f32 %v10400_v58, %v3892_v43  ;;  %v3984_v26 = vadd.f32 %v10401_v15, %v3898_v45  ;;  %vm8157_vm15 = vcmp.ne.s32.totalorder %v1265_v50, 15  ;;  %v1710_v37 = vsel %vm8147_vm14, %v7889_v10, 0.0  ;;  %10406 = vst [vmem:[#allocation67_spill] sm:$0xff] %v8169_v49 }
 0x34a   : > { %v3980_v57 = vadd.f32 %v10401_v15, %v3894_v40  ;;  %v1708_v40 = vsel %vm8147_vm14, %v7883_v61, 0.0  ;;  %v8173_v45 = vmul.f32 %v7877_v30, %v10407_v18  ;;  %v4028_v50 = vmax.f32 %v3982_v52, 0.0  ;;  %v10414_v15 = vld [vmem:[#allocation84_spill] sm:$0xff] }
 0x34b   : > { %v4026_v41 = vmax.f32 %v3978_v48, 0.0  ;;  %v8176_v6 = vmul.f32 %v10225_v56, %v1708_v40  ;;  %v8179_v62 = vmul.f32 %v10407_v18, %v1710_v37  ;;  %v1864_v17 = vadd.f32 %v10411_v16, %v1475_v29  ;;  %v10417_v29 = vld [vmem:[#allocation54_spill] sm:$0xff]  ;;  %v10426_v18 = vld [vmem:[#allocation60_spill] sm:$0xff] }
 0x34c   : > { %10408 = vst [vmem:[#allocation70_spill] sm:$0xff] %v8173_v45  ;;  %v1866_v59 = vadd.f32 %v10412_v27, %v1477_v12  ;;  %v1868_v43 = vadd.f32 %v10413_v63, %v1479_v53  ;;  %v1870_v49 = vadd.f32 %v10414_v15, %v1481_v32  ;;  %v4060_v58 = vmul.f32 %v4028_v50, %v3984_v26  ;;  %v10421_v32 = vld [vmem:[#allocation27_spill] sm:$0xff]  ;;  %v10423_v27 = vld [vmem:[#allocation72_spill] sm:$0xff]  ;;  %v10424_v45 = vld [vmem:[#allocation74_spill] sm:$0xff] }
 0x34d   : > { %v4058_v48 = vmul.f32 %v4026_v41, %v3980_v57  ;;  %10409 = vst [vmem:[#allocation35_spill] sm:$0xff] %v8176_v6  ;;  %10410 = vst [vmem:[#allocation37_spill] sm:$0xff] %v8179_v62  ;;  %v2101_v52 = vsel %vm8157_vm15, %v7926_v47, 0.0  ;;  %v2103_v57 = vsel %vm8157_vm15, %v7931_v8, 0.0  ;;  %v10415_v41 = vld [vmem:[#allocation53_spill] sm:$0xff]  ;;  %v8197_v12 = vmul.f32 %v7921_v22, %v10417_v29  ;;  %v10422_v50 = vld [vmem:[#allocation87_spill] sm:$0xff] }
 0x34e   : > { %v8193_v40 = vmul.f32 %v7915_v51, %v10415_v41  ;;  %v8200_v53 = vmul.f32 %v10415_v41, %v2101_v52  ;;  %v8203_v15 = vmul.f32 %v10417_v29, %v2103_v57  ;;  %v2253_v26 = vadd.f32 %v10421_v32, %v1864_v17  ;;  %v10427_v52 = vld [vmem:[#allocation29_spill] sm:$0xff]  ;;  %v10428_v57 = vld [vmem:[#allocation100_spill] sm:$0xff]  ;;  %v10430_v17 = vld [vmem:[#allocation66_spill] sm:$0xff] }
 0x34f   : > { %10418 = vst [vmem:[#allocation124_spill] sm:$0xff] %v8197_v12  ;;  %v4082_v37 = vpack.c.bf16 %v4060_v58, %v4058_v48  ;;  %v2255_v16 = vadd.f32 %v10422_v50, %v1866_v59  ;;  %v2257_v63 = vadd.f32 %v10423_v27, %v1868_v43  ;;  %v2259_v62 = vadd.f32 %v10424_v45, %v1870_v49  ;;  %v10429_v45 = vld [vmem:[#allocation65_spill] sm:$0xff] }
 0x350   : > { %10416 = vst [vmem:[#allocation30_spill] sm:$0xff] %v8193_v40  ;;  %10419 = vst [vmem:[#allocation120_spill] sm:$0xff] %v8200_v53  ;;  %v10425_v40 = vld [vmem:[#allocation59_spill] sm:$0xff]  ;;  %v2369_v12 = vmul.f32 %v7451_v31, %v10426_v18  ;;  %v2373_v29 = vmul.f32 %v10428_v57, %v10426_v18  ;;  %v2515_v58 = vsel %vm7741_vm12, %v7883_v61, 0.0  ;;  %v2517_v49 = vsel %vm7741_vm12, %v7889_v10, 0.0 }
 0x351   : > { %10420 = vst [vmem:[#allocation121_spill] sm:$0xff] %v8203_v15  ;;  %v2367_v6 = vmul.f32 %v7448_v55, %v10425_v40  ;;  %v2371_v41 = vmul.f32 %v10427_v52, %v10425_v40  ;;  %4290 = vmatmul.mubr.bf16.gmra.mxu0 %v4082_v37  ;;  %v2619_v48 = vmul.f32 %v7871_v54, %v10429_v45  ;;  %v8227_v18 = vld [vmem:[#allocation2 + $0x50] sm:$0xff]  ;;  %v2767_v10 = vsel %vm7751_vm13, %v7926_v47, 0.0  ;;  %v8237_v15 = vld [vmem:[#allocation2 + $0xe8] sm:$0xff] }
 0x352   : > { %v2621_v59 = vmul.f32 %v7877_v30, %v10430_v17  ;;  %v2433_v32 = vadd.f32 %v2369_v12, %v2255_v16  ;;  %v2437_v27 = vadd.f32 %v2373_v29, %v2259_v62  ;;  %v2615_v37 = vmul.f32 %v10429_v45, %v2515_v58  ;;  %v8239_v30 = vld [vmem:[#allocation2 + $0x58] sm:$0xff] }
 0x353   : > { %v2431_v43 = vadd.f32 %v2367_v6, %v2253_v26  ;;  %v2435_v50 = vadd.f32 %v2371_v41, %v2257_v63  ;;  %v2617_v61 = vmul.f32 %v10430_v17, %v2517_v49  ;;  %v2769_v54 = vsel %vm7751_vm13, %v7931_v8, 0.0  ;;  %v8241_v6 = vld [vmem:[#allocation2 + $0x78] sm:$0xff]  ;;  %v10432_v26 = vld [vmem:[#allocation69_spill] sm:$0xff] }
 0x354   : > { %v2685_v41 = vadd.f32 %v2621_v59, %v2437_v27  ;;  %v10431_v29 = vld [vmem:[#allocation68_spill] sm:$0xff]  ;;  %v2865_v16 = vmul.f32 %v7921_v22, %v10432_v26  ;;  %v2869_v8 = vmul.f32 %v10432_v26, %v2769_v54  ;;  %v8250_v49 = vunpack.c.h.bf16 %v8227_v18  ;;  %v10438_v27 = vld [vmem:[#allocation79_spill] sm:$0xff] }
 0x355   : > { %v2683_v62 = vadd.f32 %v2619_v48, %v2435_v50  ;;  %v2863_v12 = vmul.f32 %v7915_v51, %v10431_v29  ;;  %v2679_v63 = vadd.f32 %v2615_v37, %v2431_v43  ;;  %v2681_v47 = vadd.f32 %v2617_v61, %v2433_v32  ;;  %v10437_v50 = vld [vmem:[#allocation103_spill] sm:$0xff] }
 0x356   : > { %v2867_v58 = vmul.f32 %v10431_v29, %v2767_v10  ;;  %10433 = vst [vmem:[#allocation64_spill] sm:$0xff] %v8250_v49  ;;  %v8253_v17 = vunpack.c.h.bf16 %v8237_v15  ;;  %v8256_v48 = vunpack.c.h.bf16 %v8239_v30  ;;  %v8259_v51 = vunpack.c.h.bf16 %v8241_v6  ;;  %v10439_v61 = vld [vmem:[#allocation123_spill] sm:$0xff]  ;;  %v10440_v10 = vld [vmem:[#allocation80_spill] sm:$0xff] }
 0x357   : > { %v2927_v59 = vadd.f32 %v2863_v12, %v2679_v63  ;;  %v2929_v22 = vadd.f32 %v2865_v16, %v2681_v47  ;;  %v2933_v32 = vadd.f32 %v2869_v8, %v2685_v41  ;;  %v3125_v37 = vmul.f32 %v10438_v27, %v10437_v50 }
 0x358   : > { %10434 = vst [vmem:[#allocation46_spill] sm:$0xff] %v8253_v17  ;;  %10435 = vst [vmem:[#allocation85_spill] sm:$0xff] %v8256_v48  ;;  %v2931_v43 = vadd.f32 %v2867_v58, %v2683_v62  ;;  %v3127_v54 = vmul.f32 %v10440_v10, %v10439_v61  ;;  %v3129_v26 = vmul.f32 %v10438_v27, %v8250_v49  ;;  %v8270_v45 = vrot.slane %v10437_v50, 7 }
 0x359   : > { %10436 = vst [vmem:[#allocation86_spill] sm:$0xff] %v8259_v51  ;;  %v3131_v29 = vmul.f32 %v10440_v10, %v8253_v17  ;;  %v8273_v12 = vrot.slane %v10439_v61, 7  ;;  %v9767_v62 = vrot.slane %v8250_v49, 7  ;;  %v9766_v41 = vrot.slane %v8253_v17, 7 }
 0x35a   : > { %v3189_v16 = vadd.f32 %v3125_v37, %v2927_v59  ;;  %v3191_v63 = vadd.f32 %v3127_v54, %v2929_v22  ;;  %v3193_v47 = vadd.f32 %v3129_v26, %v2931_v43  ;;  %v10441_v27 = vrot.slane %v10427_v52, 7  ;;  %v10446_v54 = vld [vmem:[#allocation83_spill] sm:$0xff] }
 0x35b   : > { %v3195_v58 = vadd.f32 %v3131_v29, %v2933_v32  ;;  %v3293_v8 = vsel %vm1562_vm0, %v8270_v45, %v9767_v62  ;;  %v3295_v10 = vsel %vm1562_vm0, %v8273_v12, %v9766_v41  ;;  %v10443_v29 = vrot.slane %v10428_v57, 7  ;;  %v10445_v32 = vld [vmem:[#allocation82_spill] sm:$0xff] }
 0x35c   : > { %v8292_v59 = vsel %vm1562_vm0, %v10441_v27, %v8270_v45  ;;  %v3485_v37 = vmul.f32 %v10445_v32, %v3293_v8  ;;  %v3487_v27 = vmul.f32 %v10446_v54, %v3295_v10  ;;  %v3613_v61 = vrot.slane %v8250_v49, 1 }
 0x35d   : > { %10442 = vst [vmem:[#allocation122_spill] sm:$0xff] %v8292_v59  ;;  %v8299_v26 = vsel %vm1562_vm0, %v10443_v29, %v8273_v12  ;;  %v3381_v22 = vsel %vm7741_vm12, %v8292_v59, 0.0  ;;  %v3615_v29 = vrot.slane %v8253_v17, 1  ;;  %v8314_v40 = vrot.slane %v8256_v48, 1  ;;  %v10447_v59 = vld [vmem:[#allocation62_spill] sm:$0xff]  ;;  %v10452_v17 = vld [vmem:[#allocation93_spill] sm:$0xff] }
 0x35e   : > { %10444 = vst [vmem:[#allocation84_spill] sm:$0xff] %v8299_v26  ;;  %v3383_v43 = vsel %vm7741_vm12, %v8299_v26, 0.0  ;;  %v3481_v41 = vmul.f32 %v10445_v32, %v3381_v22  ;;  %v3549_v53 = vadd.f32 %v3485_v37, %v3193_v47  ;;  %v3551_v50 = vadd.f32 %v3487_v27, %v3195_v58  ;;  %v10448_v22 = vld [vmem:[#allocation63_spill] sm:$0xff]  ;;  %v10449_v37 = vld [vmem:[#allocation90_spill] sm:$0xff] }
 0x35f   : > { %v3483_v62 = vmul.f32 %v10446_v54, %v3383_v43  ;;  %v8317_v56 = vrot.slane %v8259_v51, 1  ;;  %v3649_v10 = vsel %vm1951_vm3, %v10447_v59, %v3613_v61  ;;  %v3651_v43 = vsel %vm1951_vm3, %v10448_v22, %v3615_v29  ;;  %v10451_v54 = vld [vmem:[#allocation92_spill] sm:$0xff] }
 0x360   : > { %v3545_v26 = vadd.f32 %v3481_v41, %v3189_v16  ;;  %v3645_v47 = vsel %vm1951_vm3, %v3613_v61, %v8314_v40  ;;  %v3837_v27 = vmul.f32 %v10449_v37, %v3649_v10  ;;  %v10450_v41 = vld [vmem:[#allocation91_spill] sm:$0xff]  ;;  %v1474_v32 = vmul.f32 %v10377_v19, %v10451_v54 }
 0x361   : > { %v3547_v8 = vadd.f32 %v3483_v62, %v3191_v63  ;;  %v3647_v58 = vsel %vm1951_vm3, %v3615_v29, %v8317_v56  ;;  %v3839_v62 = vmul.f32 %v10450_v41, %v3651_v43  ;;  %v3741_v16 = vsel %vm7751_vm13, %v3645_v47, 0.0 }
 0x362   : > { %v3743_v63 = vsel %vm7751_vm13, %v3647_v58, 0.0  ;;  %v1476_v61 = vmul.f32 %v10379_v25, %v10452_v17  ;;  %v3841_v49 = vmul.f32 %v10449_v37, %v3741_v16  ;;  %v3901_v51 = vadd.f32 %v3837_v27, %v3545_v26  ;;  %v10453_v37 = vld [vmem:[#allocation88_spill] sm:$0xff]  ;;  %v10454_v26 = vld [vmem:[#allocation89_spill] sm:$0xff] }
 0x363   : > { %v3843_v29 = vmul.f32 %v10450_v41, %v3743_v63  ;;  %v3903_v10 = vadd.f32 %v3839_v62, %v3547_v8  ;;  %v1478_v43 = vmul.f32 %v10380_v35, %v10451_v54  ;;  %v1480_v47 = vmul.f32 %v10381_v21, %v10452_v17  ;;  %v10455_v27 = vld [vmem:[#allocation33_spill] sm:$0xff]  ;;  %v10457_v35 = vld [vmem:[#allocation94_spill] sm:$0xff] }
 0x364   : > { %v1707_v58 = vsel %vm8147_vm14, %v8071_v5, 0.0  ;;  %v1709_v19 = vsel %vm8147_vm14, %v8077_v33, 0.0  ;;  %v3905_v25 = vadd.f32 %v3841_v49, %v3549_v53  ;;  %v3987_v63 = vadd.f32 %v10453_v37, %v3901_v51 }
 0x365   : > { %v3907_v16 = vadd.f32 %v3843_v29, %v3551_v50  ;;  %v3989_v8 = vadd.f32 %v10454_v26, %v3903_v10  ;;  %v8356_v62 = vmul.f32 %v10455_v27, %v1707_v58  ;;  %v8359_v54 = vmul.f32 %v10457_v35, %v1709_v19  ;;  %v10461_v50 = vld [vmem:[#allocation97_spill] sm:$0xff]  ;;  %v10462_v10 = vld [vmem:[#allocation71_spill] sm:$0xff] }
 0x366   : > { %v8363_v21 = vmul.f32 %v8065_v36, %v10455_v27  ;;  %v8367_v17 = vmul.f32 %v8083_v4, %v10457_v35  ;;  %v3991_v53 = vadd.f32 %v10453_v37, %v3905_v25  ;;  %v4031_v51 = vmax.f32 %v3987_v63, 0.0 }
 0x367   : > { %10456 = vst [vmem:[#allocation27_spill] sm:$0xff] %v8356_v62  ;;  %10458 = vst [vmem:[#allocation87_spill] sm:$0xff] %v8359_v54  ;;  %v3993_v49 = vadd.f32 %v10454_v26, %v3907_v16  ;;  %v1863_v29 = vadd.f32 %v10461_v50, %v1474_v32  ;;  %v1865_v58 = vadd.f32 %v10462_v10, %v1476_v61  ;;  %v10463_v62 = vld [vmem:[#allocation28_spill] sm:$0xff]  ;;  %v2102_v25 = vsel %vm8157_vm15, %v8119_v2, 0.0  ;;  %v10470_v50 = vld [vmem:[#allocation61_spill] sm:$0xff] }
 0x368   : > { %10459 = vst [vmem:[#allocation72_spill] sm:$0xff] %v8363_v21  ;;  %10460 = vst [vmem:[#allocation74_spill] sm:$0xff] %v8367_v17  ;;  %v1867_v19 = vadd.f32 %v10463_v62, %v1478_v43  ;;  %v10464_v54 = vld [vmem:[#allocation96_spill] sm:$0xff]  ;;  %v2100_v21 = vsel %vm8157_vm15, %v8114_v28, 0.0  ;;  %v4033_v27 = vmax.f32 %v3991_v53, 0.0  ;;  %v4063_v35 = vmul.f32 %v4031_v51, %v3989_v8  ;;  %v10467_v43 = vld [vmem:[#allocation73_spill] sm:$0xff] }
 0x369   : > { %v1869_v41 = vadd.f32 %v10464_v54, %v1480_v47  ;;  %v8383_v16 = vmul.f32 %v8109_v42, %v6295_v9  ;;  %v8387_v32 = vmul.f32 %v8125_v11, %v6303_v39  ;;  %v8390_v54 = vmul.f32 %v6295_v9, %v2100_v21  ;;  %v10468_v8 = vld [vmem:[#allocation102_spill] sm:$0xff]  ;;  %v10469_v53 = vld [vmem:[#allocation104_spill] sm:$0xff]  ;;  %v10471_v17 = vld [vmem:[#allocation101_spill] sm:$0xff] }
 0x36a   : > { %v8393_v61 = vmul.f32 %v6303_v39, %v2102_v25  ;;  %v2252_v47 = vadd.f32 %v10467_v43, %v1863_v29  ;;  %v4065_v63 = vmul.f32 %v4033_v27, %v3993_v49  ;;  %v2254_v62 = vadd.f32 %v10468_v8, %v1865_v58  ;;  %v10472_v49 = vld [vmem:[#allocation105_spill] sm:$0xff]  ;;  %v10473_v39 = vld [vmem:[#allocation106_spill] sm:$0xff] }
 0x36b   : > { %10465 = vst [vmem:[#allocation29_spill] sm:$0xff] %v8383_v16  ;;  %10466 = vst [vmem:[#allocation100_spill] sm:$0xff] %v8387_v32  ;;  %v2256_v51 = vadd.f32 %v10469_v53, %v1867_v19  ;;  %v2258_v10 = vadd.f32 %v10470_v50, %v1869_v41  ;;  %v2366_v16 = vmul.f32 %v10388_v7, %v10280_v46  ;;  %v2514_v27 = vsel %vm7741_vm12, %v8071_v5, 0.0 }
 0x36c   : > { %v2368_v32 = vmul.f32 %v10390_v60, %v10471_v17  ;;  %v2370_v21 = vmul.f32 %v8038_v3, %v10280_v46  ;;  %v2372_v25 = vmul.f32 %v8041_v1, %v10471_v17  ;;  %v4085_v29 = vpack.c.bf16 %v4065_v63, %v4063_v35 }
 0x36d   : > { %v2516_v41 = vsel %vm7741_vm12, %v8077_v33, 0.0  ;;  %v2618_v58 = vmul.f32 %v8065_v36, %v10472_v49  ;;  %v2430_v19 = vadd.f32 %v2366_v16, %v2252_v47  ;;  %v2614_v50 = vmul.f32 %v10472_v49, %v2514_v27  ;;  %v10474_v16 = vld [vmem:[#allocation107_spill] sm:$0xff]  ;;  %v10475_v47 = vld [vmem:[#allocation108_spill] sm:$0xff] }
 0x36e   : > { %v2432_v43 = vadd.f32 %v2368_v32, %v2254_v62  ;;  %v2434_v8 = vadd.f32 %v2370_v21, %v2256_v51  ;;  %v2436_v53 = vadd.f32 %v2372_v25, %v2258_v10  ;;  %4297 = vmatprep.mubr.bf16.mxu0 %v4085_v29  ;;  %v2616_v35 = vmul.f32 %v10473_v39, %v2516_v41 }
 0x36f   : > { %v2620_v63 = vmul.f32 %v8083_v4, %v10473_v39  ;;  %v2766_v5 = vsel %vm7751_vm13, %v8114_v28, 0.0  ;;  %v2768_v36 = vsel %vm7751_vm13, %v8119_v2, 0.0  ;;  %v2862_v32 = vmul.f32 %v8109_v42, %v10474_v16 }
 0x370   : > { %v2682_v33 = vadd.f32 %v2618_v58, %v2434_v8  ;;  %v2864_v62 = vmul.f32 %v8125_v11, %v10475_v47  ;;  %v2678_v51 = vadd.f32 %v2614_v50, %v2430_v19  ;;  %v2680_v10 = vadd.f32 %v2616_v35, %v2432_v43  ;;  %v10479_v19 = vld [vmem:[#allocation117_spill] sm:$0xff]  ;;  %v10482_v50 = vld [vmem:[#allocation110_spill] sm:$0xff] }
 0x371   : > { %v2684_v21 = vadd.f32 %v2620_v63, %v2436_v53  ;;  %v2866_v4 = vmul.f32 %v10474_v16, %v2766_v5  ;;  %v2868_v25 = vmul.f32 %v10475_v47, %v2768_v36  ;;  %v8432_v28 = vunpack.c.l.bf16 %v8227_v18  ;;  %v10480_v43 = vld [vmem:[#allocation109_spill] sm:$0xff]  ;;  %v10487_v16 = vld [vmem:[#allocation118_spill] sm:$0xff] }
 0x372   : > { %v8435_v29 = vunpack.c.l.bf16 %v8237_v15  ;;  %v8438_v2 = vunpack.c.l.bf16 %v8239_v30  ;;  %v2926_v42 = vadd.f32 %v2862_v32, %v2678_v51  ;;  %v2928_v27 = vadd.f32 %v2864_v62, %v2680_v10  ;;  %v10481_v53 = vld [vmem:[#allocation81_spill] sm:$0xff] }
 0x373   : > { %10476 = vst [vmem:[#allocation62_spill] sm:$0xff] %v8432_v28  ;;  %v2930_v41 = vadd.f32 %v2866_v4, %v2682_v33  ;;  %v8441_v11 = vunpack.c.l.bf16 %v8241_v6  ;;  %v2932_v58 = vadd.f32 %v2868_v25, %v2684_v21  ;;  %v3124_v8 = vmul.f32 %v10480_v43, %v10479_v19 }
 0x374   : > { %10477 = vst [vmem:[#allocation63_spill] sm:$0xff] %v8435_v29  ;;  %v3126_v18 = vmul.f32 %v10482_v50, %v10481_v53  ;;  %v3128_v15 = vmul.f32 %v10480_v43, %v8432_v28  ;;  %v3130_v30 = vmul.f32 %v10482_v50, %v8435_v29  ;;  %v8452_v35 = vrot.slane %v10479_v19, 7 }
 0x375   : > { %10478 = vst [vmem:[#allocation97_spill] sm:$0xff] %v8441_v11  ;;  %v8455_v63 = vrot.slane %v10481_v53, 7  ;;  %v9790_v6 = vrot.slane %v8432_v28, 7  ;;  %v3188_v5 = vadd.f32 %v3124_v8, %v2926_v42  ;;  %v9791_v32 = vrot.slane %v8435_v29, 7 }
 0x376   : > { %v3190_v33 = vadd.f32 %v3126_v18, %v2928_v27  ;;  %v3192_v36 = vadd.f32 %v3128_v15, %v2930_v41  ;;  %v3194_v62 = vadd.f32 %v3130_v30, %v2932_v58  ;;  %v10483_v10 = vrot.slane %v8038_v3, 7  ;;  %v10485_v58 = vld [vmem:[#allocation111_spill] sm:$0xff]  ;;  %v10486_v15 = vld [vmem:[#allocation112_spill] sm:$0xff] }
 0x377   : > { %v3292_v51 = vsel %vm1562_vm0, %v8452_v35, %v9790_v6  ;;  %v10484_v4 = vrot.slane %v8041_v1, 7  ;;  %v3294_v42 = vsel %vm1562_vm0, %v8455_v63, %v9791_v32  ;;  %v3614_v32 = vrot.slane %v8435_v29, 1  ;;  %v10489_v29 = vld [vmem:[#allocation115_spill] sm:$0xff] }
 0x378   : > { %v8469_v21 = vsel %vm1562_vm0, %v10483_v10, %v8452_v35  ;;  %v3484_v8 = vmul.f32 %v10485_v58, %v3292_v51  ;;  %v3486_v10 = vmul.f32 %v10486_v15, %v3294_v42  ;;  %v8496_v50 = vrot.slane %v8438_v2, 1 }
 0x379   : > { %v8476_v25 = vsel %vm1562_vm0, %v10484_v4, %v8455_v63  ;;  %v3380_v27 = vsel %vm7741_vm12, %v8469_v21, 0.0  ;;  %v3612_v4 = vrot.slane %v8432_v28, 1  ;;  %v8499_v43 = vrot.slane %v8441_v11, 1 }
 0x37a   : > { %v3382_v41 = vsel %vm7741_vm12, %v8476_v25, 0.0  ;;  %v3480_v18 = vmul.f32 %v10485_v58, %v3380_v27  ;;  %v3548_v6 = vadd.f32 %v3484_v8, %v3192_v36  ;;  %v3550_v51 = vadd.f32 %v3486_v10, %v3194_v62 }
 0x37b   : > { %v3482_v30 = vmul.f32 %v10486_v15, %v3382_v41  ;;  %v3648_v27 = vsel %vm1951_vm3, %v10487_v16, %v3612_v4  ;;  %v3644_v42 = vsel %vm1951_vm3, %v3612_v4, %v8496_v50  ;;  %v3646_v36 = vsel %vm1951_vm3, %v3614_v32, %v8499_v43  ;;  %v10488_v41 = vld [vmem:[#allocation119_spill] sm:$0xff] }
 0x37c   : > { %v3544_v23 = vadd.f32 %v3480_v18, %v3188_v5  ;;  %v3650_v8 = vsel %vm1951_vm3, %v10488_v41, %v3614_v32  ;;  %v3836_v5 = vmul.f32 %v10304_v0, %v3648_v27  ;;  %v3742_v62 = vsel %vm7751_vm13, %v3646_v36, 0.0 }
 0x37d   : > { %v3546_v47 = vadd.f32 %v3482_v30, %v3190_v33  ;;  %v3740_v33 = vsel %vm7751_vm13, %v3644_v42, 0.0  ;;  %v3838_v18 = vmul.f32 %v10305_v38, %v3650_v8  ;;  %v1250_v30 = vadd.s32 112, %v5463_v44 }
 0x37e   : > { %v3840_v10 = vmul.f32 %v10304_v0, %v3740_v33  ;;  %v3842_v4 = vmul.f32 %v10305_v38, %v3742_v62  ;;  %v3900_v15 = vadd.f32 %v3836_v5, %v3544_v23  ;;  %v1483_v32 = vmul.f32 %v7448_v55, %v10306_v14  ;;  %v10490_v62 = vld [vmem:[#allocation116_spill] sm:$0xff]  ;;  %v10506_v38 = vld [vmem:[#allocation70_spill] sm:$0xff] }
 0x37f   : > { %v3902_v58 = vadd.f32 %v3838_v18, %v3546_v47  ;;  %v1266_v27 = vand.u32 15, %v1250_v30  ;;  %v1485_v42 = vmul.f32 %v7451_v31, %v10307_v34  ;;  %v1487_v20 = vmul.f32 %v10427_v52, %v10306_v14  ;;  %v10493_v55 = vld [vmem:[#allocation44_spill] sm:$0xff]  ;;  %v10494_v47 = vld [vmem:[#allocation45_spill] sm:$0xff]  ;;  %v10664_v5 = vld [vmem:[#allocation34_spill] sm:$0xff] }
 0x380   : > { %v3904_v36 = vadd.f32 %v3840_v10, %v3548_v6  ;;  %v3906_v8 = vadd.f32 %v3842_v4, %v3550_v51  ;;  %v3986_v28 = vadd.f32 %v10489_v29, %v3900_v15  ;;  %v1489_v33 = vmul.f32 %v10428_v57, %v10307_v34  ;;  %v10496_v18 = vld [vmem:[#allocation84_spill] sm:$0xff]  ;;  %v10497_v10 = vld [vmem:[#allocation47_spill] sm:$0xff] }
 0x381   : > { %v3988_v23 = vadd.f32 %v10490_v62, %v3902_v58  ;;  %vm8532_vm1 = vcmp.ne.s32.totalorder %v1266_v27, 0  ;;  %v1564_v31 = vsel %vm1562_vm0, %v8270_v45, %v10493_v55  ;;  %v1566_v52 = vsel %vm1562_vm0, %v8273_v12, %v10494_v47  ;;  %v10495_v58 = vld [vmem:[#allocation122_spill] sm:$0xff]  ;;  %v10500_v12 = vld [vmem:[#allocation48_spill] sm:$0xff]  ;;  %v10503_v47 = vld [vmem:[#allocation35_spill] sm:$0xff] }
 0x382   : > { %v3990_v6 = vadd.f32 %v10489_v29, %v3904_v36  ;;  %v3992_v57 = vadd.f32 %v10490_v62, %v3906_v8  ;;  %v4030_v15 = vmax.f32 %v3986_v28, 0.0  ;;  %v1716_v51 = vsel %vm8532_vm1, %v10495_v58, 0.0  ;;  %v10504_v62 = vld [vmem:[#allocation37_spill] sm:$0xff]  ;;  %v10505_v34 = vld [vmem:[#allocation67_spill] sm:$0xff] }
 0x383   : > { %v1718_v30 = vsel %vm8532_vm1, %v10496_v18, 0.0  ;;  %v8553_v45 = vmul.f32 %v10497_v10, %v1716_v51  ;;  %v8556_v4 = vmul.f32 %v10497_v10, %v1564_v31  ;;  %v8559_v27 = vmul.f32 %v10500_v12, %v1566_v52 }
 0x384   : > { %v4032_v36 = vmax.f32 %v3990_v6, 0.0  ;;  %v4062_v8 = vmul.f32 %v4030_v15, %v3988_v23  ;;  %v8562_v28 = vmul.f32 %v10500_v12, %v1718_v30  ;;  %v1872_v55 = vadd.f32 %v10503_v47, %v1483_v32  ;;  %v10510_v6 = vld [vmem:[#allocation30_spill] sm:$0xff]  ;;  %v10511_v15 = vld [vmem:[#allocation59_spill] sm:$0xff] }
 0x385   : > { %10498 = vst [vmem:[#allocation71_spill] sm:$0xff] %v8553_v45  ;;  %10499 = vst [vmem:[#allocation28_spill] sm:$0xff] %v8556_v4  ;;  %v1874_v29 = vadd.f32 %v10504_v62, %v1485_v42  ;;  %v1876_v14 = vadd.f32 %v10505_v34, %v1487_v20  ;;  %v1878_v51 = vadd.f32 %v10506_v38, %v1489_v33  ;;  %v10507_v45 = vld [vmem:[#allocation39_spill] sm:$0xff]  ;;  %v10508_v4 = vld [vmem:[#allocation41_spill] sm:$0xff] }
 0x386   : > { %10501 = vst [vmem:[#allocation96_spill] sm:$0xff] %v8559_v27  ;;  %10502 = vst [vmem:[#allocation73_spill] sm:$0xff] %v8562_v28  ;;  %v8569_v0 = vrot.slane %v10507_v45, 1  ;;  %v4064_v10 = vmul.f32 %v4032_v36, %v3992_v57  ;;  %v8572_v11 = vrot.slane %v10508_v4, 1  ;;  %v2261_v23 = vadd.f32 %v10510_v6, %v1872_v55  ;;  %v10512_v30 = vld [vmem:[#allocation103_spill] sm:$0xff]  ;;  %v10513_v34 = vld [vmem:[#allocation124_spill] sm:$0xff] }
 0x387   : > { %v2375_v12 = vmul.f32 %v10512_v30, %v10511_v15  ;;  %v2263_v42 = vadd.f32 %v10513_v34, %v1874_v29  ;;  %v10514_v38 = vld [vmem:[#allocation120_spill] sm:$0xff]  ;;  %v10515_v33 = vld [vmem:[#allocation121_spill] sm:$0xff]  ;;  %v10519_v27 = vld [vmem:[#allocation123_spill] sm:$0xff] }
 0x388   : > { %10509 = vst [vmem:[#allocation102_spill] sm:$0xff] %v8572_v11  ;;  %v1953_v32 = vsel %vm1951_vm3, %v10447_v59, %v8569_v0  ;;  %v2265_v20 = vadd.f32 %v10514_v38, %v1876_v14  ;;  %v2267_v62 = vadd.f32 %v10515_v33, %v1878_v51  ;;  %v4084_v47 = vpack.c.bf16 %v4064_v10, %v4062_v8  ;;  %v10516_v57 = vld [vmem:[#allocation53_spill] sm:$0xff]  ;;  %v10518_v6 = vld [vmem:[#allocation60_spill] sm:$0xff]  ;;  %v10520_v30 = vld [vmem:[#allocation54_spill] sm:$0xff] }
 0x389   : > { %v1955_v55 = vsel %vm1951_vm3, %v10448_v22, %v8572_v11  ;;  %v8589_v36 = vmul.f32 %v10516_v57, %v1953_v32  ;;  %v2377_v28 = vmul.f32 %v10519_v27, %v10518_v6  ;;  %v2379_v14 = vmul.f32 %v10511_v15, %v10507_v45  ;;  %v10522_v34 = vld [vmem:[#allocation65_spill] sm:$0xff] }
 0x38a   : > { %v8594_v59 = vmul.f32 %v10520_v30, %v1955_v55  ;;  %v2381_v29 = vmul.f32 %v10518_v6, %v10508_v4  ;;  %v2439_v8 = vadd.f32 %v2375_v12, %v2261_v23  ;;  %4298 = vmatmul.mubr.bf16.gmra.mxu0 %v4084_v47  ;;  %v2523_v22 = vsel %vm8147_vm14, %v10495_v58, 0.0  ;;  %v10523_v30 = vld [vmem:[#allocation66_spill] sm:$0xff] }
 0x38b   : > { %10517 = vst [vmem:[#allocation104_spill] sm:$0xff] %v8589_v36  ;;  %v2441_v51 = vadd.f32 %v2377_v28, %v2263_v42  ;;  %v2525_v10 = vsel %vm8147_vm14, %v10496_v18, 0.0  ;;  %v2627_v38 = vmul.f32 %v10522_v34, %v1564_v31  ;;  %v2443_v33 = vadd.f32 %v2379_v14, %v2265_v20  ;;  %v10524_v18 = vld [vmem:[#allocation68_spill] sm:$0xff]  ;;  %v8619_v12 = vld [vmem:[#allocation2 + $0x30] sm:$0xff]  ;;  %v8625_v14 = vld [vmem:[#allocation2 + $0x28] sm:$0xff] }
 0x38c   : > { %10521 = vst [vmem:[#allocation61_spill] sm:$0xff] %v8594_v59  ;;  %v2445_v59 = vadd.f32 %v2381_v29, %v2267_v62  ;;  %v2623_v15 = vmul.f32 %v10522_v34, %v2523_v22  ;;  %v2625_v57 = vmul.f32 %v10523_v30, %v2525_v10  ;;  %v2629_v23 = vmul.f32 %v10523_v30, %v1566_v52  ;;  %v8621_v42 = vld [vmem:[#allocation2 + $0x40] sm:$0xff]  ;;  %v10533_v36 = vld [vmem:[#allocation46_spill] sm:$0xff] }
 0x38d   : > { %v2715_v28 = vsel %vm1951_vm3, %v8569_v0, %v8314_v40  ;;  %v2717_v58 = vsel %vm1951_vm3, %v8572_v11, %v8317_v56  ;;  %v2871_v31 = vmul.f32 %v10524_v18, %v1953_v32  ;;  %v2691_v47 = vadd.f32 %v2627_v38, %v2443_v33  ;;  %v8627_v29 = vld [vmem:[#allocation2] sm:$0xff] }
 0x38e   : > { %v2687_v20 = vadd.f32 %v2623_v15, %v2439_v8  ;;  %v2689_v62 = vadd.f32 %v2625_v57, %v2441_v51  ;;  %v2775_v52 = vsel %vm8157_vm15, %v2715_v28, 0.0  ;;  %v2693_v22 = vadd.f32 %v2629_v23, %v2445_v59  ;;  %v10525_v30 = vld [vmem:[#allocation69_spill] sm:$0xff]  ;;  %v10526_v23 = vld [vmem:[#allocation79_spill] sm:$0xff] }
 0x38f   : > { %v2777_v10 = vsel %vm8157_vm15, %v2717_v58, 0.0  ;;  %v2873_v32 = vmul.f32 %v10525_v30, %v1955_v55  ;;  %v2875_v34 = vmul.f32 %v10524_v18, %v2775_v52  ;;  %v8635_v57 = vunpack.c.h.bf16 %v8619_v12  ;;  %v10527_v58 = vld [vmem:[#allocation86_spill] sm:$0xff] }
 0x390   : > { %v2877_v6 = vmul.f32 %v10525_v30, %v2777_v10  ;;  %v2935_v15 = vadd.f32 %v2871_v31, %v2687_v20  ;;  %v8638_v8 = vunpack.c.h.bf16 %v8621_v42  ;;  %v8641_v59 = vunpack.c.h.bf16 %v8625_v14  ;;  %v10528_v31 = vld [vmem:[#allocation80_spill] sm:$0xff] }
 0x391   : > { %v2937_v51 = vadd.f32 %v2873_v32, %v2689_v62  ;;  %v2939_v38 = vadd.f32 %v2875_v34, %v2691_v47  ;;  %v8644_v33 = vunpack.c.h.bf16 %v8627_v29  ;;  %v3133_v28 = vmul.f32 %v10526_v23, %v8256_v48 }
 0x392   : > { %v2941_v55 = vadd.f32 %v2877_v6, %v2693_v22  ;;  %v3135_v20 = vmul.f32 %v10528_v31, %v10527_v58  ;;  %v3137_v52 = vmul.f32 %v10526_v23, %v8635_v57  ;;  %v3139_v62 = vmul.f32 %v10528_v31, %v8638_v8  ;;  %v10531_v23 = vld [vmem:[#allocation64_spill] sm:$0xff] }
 0x393   : > { %v8655_v34 = vrot.slane %v8256_v48, 7  ;;  %v8658_v47 = vrot.slane %v10527_v58, 7  ;;  %v9818_v6 = vrot.slane %v8635_v57, 7  ;;  %v3197_v22 = vadd.f32 %v3133_v28, %v2935_v15  ;;  %v10535_v28 = vld [vmem:[#allocation82_spill] sm:$0xff] }
 0x394   : > { %v3199_v10 = vadd.f32 %v3135_v20, %v2937_v51  ;;  %v3201_v32 = vadd.f32 %v3137_v52, %v2939_v38  ;;  %v9821_v30 = vrot.slane %v8638_v8, 7  ;;  %v3203_v18 = vadd.f32 %v3139_v62, %v2941_v55 }
 0x395   : > { %10529 = vst [vmem:[#allocation101_spill] sm:$0xff] %v8655_v34  ;;  %10530 = vst [vmem:[#allocation105_spill] sm:$0xff] %v8658_v47  ;;  %v3285_v31 = vsel %vm1562_vm0, %v8655_v34, %v9818_v6  ;;  %v10532_v48 = vrot.slane %v10531_v23, 7  ;;  %v10534_v15 = vrot.slane %v10533_v36, 7  ;;  %v10536_v36 = vld [vmem:[#allocation83_spill] sm:$0xff] }
 0x396   : > { %v3287_v38 = vsel %vm1562_vm0, %v8658_v47, %v9821_v30  ;;  %v9826_v30 = vrot.slane %v8641_v59, 1 }
 0x397   : > { %v3289_v58 = vsel %vm1562_vm0, %v10532_v48, %v8655_v34  ;;  %v3291_v51 = vsel %vm1562_vm0, %v10534_v15, %v8658_v47  ;;  %v3493_v48 = vmul.f32 %v10535_v28, %v3285_v31  ;;  %v3495_v62 = vmul.f32 %v10536_v36, %v3287_v38 }
 0x398   : > { %v3389_v55 = vsel %vm8147_vm14, %v3289_v58, 0.0  ;;  %v3391_v23 = vsel %vm8147_vm14, %v3291_v51, 0.0  ;;  %v3621_v15 = vrot.slane %v8635_v57, 1  ;;  %v3623_v34 = vrot.slane %v8638_v8, 1 }
 0x399   : > { %v3489_v20 = vmul.f32 %v10535_v28, %v3389_v55  ;;  %v3491_v52 = vmul.f32 %v10536_v36, %v3391_v23  ;;  %v3557_v6 = vadd.f32 %v3493_v48, %v3201_v32  ;;  %v9825_v58 = vrot.slane %v8644_v33, 1  ;;  %v10538_v48 = vld [vmem:[#allocation91_spill] sm:$0xff]  ;;  %v10540_v36 = vld [vmem:[#allocation93_spill] sm:$0xff] }
 0x39a   : > { %v3559_v51 = vadd.f32 %v3495_v62, %v3203_v18  ;;  %v3641_v31 = vsel %vm1951_vm3, %v8314_v40, %v3621_v15  ;;  %v3637_v38 = vsel %vm1951_vm3, %v3621_v15, %v9826_v30  ;;  %v10541_v28 = vld [vmem:[#allocation31_spill] sm:$0xff] }
 0x39b   : > { %v3553_v47 = vadd.f32 %v3489_v20, %v3197_v22  ;;  %v3555_v11 = vadd.f32 %v3491_v52, %v3199_v10  ;;  %v3639_v32 = vsel %vm1951_vm3, %v3623_v34, %v9825_v58  ;;  %v3643_v22 = vsel %vm1951_vm3, %v8317_v56, %v3623_v34  ;;  %v10537_v10 = vld [vmem:[#allocation90_spill] sm:$0xff]  ;;  %v10539_v52 = vld [vmem:[#allocation92_spill] sm:$0xff] }
 0x39c   : > { %v3845_v18 = vmul.f32 %v10537_v10, %v3641_v31  ;;  %v3749_v55 = vsel %vm8157_vm15, %v3637_v38, 0.0  ;;  %v3751_v23 = vsel %vm8157_vm15, %v3639_v32, 0.0  ;;  %v3847_v20 = vmul.f32 %v10538_v48, %v3643_v22 }
 0x39d   : > { %v1482_v62 = vmul.f32 %v10388_v7, %v10539_v52  ;;  %v3849_v15 = vmul.f32 %v10537_v10, %v3749_v55  ;;  %v3851_v58 = vmul.f32 %v10538_v48, %v3751_v23  ;;  %v1484_v34 = vmul.f32 %v10390_v60, %v10540_v36  ;;  %v10551_v48 = vld [vmem:[#allocation72_spill] sm:$0xff] }
 0x39e   : > { %v3909_v30 = vadd.f32 %v3845_v18, %v3553_v47  ;;  %v3911_v31 = vadd.f32 %v3847_v20, %v3555_v11  ;;  %v1486_v38 = vmul.f32 %v8038_v3, %v10539_v52  ;;  %v1488_v32 = vmul.f32 %v8041_v1, %v10540_v36  ;;  %v10542_v47 = vld [vmem:[#allocation32_spill] sm:$0xff]  ;;  %v10546_v18 = vld [vmem:[#allocation94_spill] sm:$0xff] }
 0x39f   : > { %v1563_v7 = vsel %vm1562_vm0, %v8452_v35, %v10541_v28  ;;  %v3913_v22 = vadd.f32 %v3849_v15, %v3557_v6  ;;  %v3915_v55 = vadd.f32 %v3851_v58, %v3559_v51  ;;  %v1565_v60 = vsel %vm1562_vm0, %v8455_v63, %v10542_v47  ;;  %v10543_v35 = vld [vmem:[#allocation33_spill] sm:$0xff]  ;;  %v10550_v28 = vld [vmem:[#allocation87_spill] sm:$0xff] }
 0x3a0   : > { %v3995_v23 = vadd.f32 %v10453_v37, %v3909_v30  ;;  %v3997_v11 = vadd.f32 %v10454_v26, %v3911_v31  ;;  %v1715_v3 = vsel %vm8532_vm1, %v8469_v21, 0.0  ;;  %v1717_v1 = vsel %vm8532_vm1, %v8476_v25, 0.0  ;;  %v10549_v31 = vld [vmem:[#allocation27_spill] sm:$0xff] }
 0x3a1   : > { %v8741_v6 = vmul.f32 %v10543_v35, %v1563_v7  ;;  %v3999_v30 = vadd.f32 %v10453_v37, %v3913_v22  ;;  %v4001_v58 = vadd.f32 %v10454_v26, %v3915_v55  ;;  %v8746_v63 = vmul.f32 %v10543_v35, %v1715_v3  ;;  %v10552_v37 = vld [vmem:[#allocation74_spill] sm:$0xff]  ;;  %v10554_v3 = vld [vmem:[#allocation40_spill] sm:$0xff] }
 0x3a2   : > { %v4035_v51 = vmax.f32 %v3995_v23, 0.0  ;;  %v8749_v20 = vmul.f32 %v10546_v18, %v1717_v1  ;;  %v8752_v15 = vmul.f32 %v10546_v18, %v1565_v60  ;;  %v1871_v47 = vadd.f32 %v10549_v31, %v1482_v62  ;;  %v10553_v23 = vld [vmem:[#allocation38_spill] sm:$0xff]  ;;  %v10555_v1 = vld [vmem:[#allocation29_spill] sm:$0xff]  ;;  %v10556_v18 = vld [vmem:[#allocation100_spill] sm:$0xff] }
 0x3a3   : > { %10544 = vst [vmem:[#allocation106_spill] sm:$0xff] %v8741_v6  ;;  %10545 = vst [vmem:[#allocation117_spill] sm:$0xff] %v8746_v63  ;;  %v1873_v36 = vadd.f32 %v10550_v28, %v1484_v34  ;;  %v4037_v52 = vmax.f32 %v3999_v30, 0.0  ;;  %v1875_v22 = vadd.f32 %v10551_v48, %v1486_v38  ;;  %v1877_v55 = vadd.f32 %v10552_v37, %v1488_v32  ;;  %v10557_v38 = vld [vmem:[#allocation99_spill] sm:$0xff] }
 0x3a4   : > { %10547 = vst [vmem:[#allocation81_spill] sm:$0xff] %v8749_v20  ;;  %10548 = vst [vmem:[#allocation118_spill] sm:$0xff] %v8752_v15  ;;  %v4067_v6 = vmul.f32 %v4035_v51, %v3997_v11  ;;  %v8759_v26 = vrot.slane %v10553_v23, 1  ;;  %v8762_v35 = vrot.slane %v10554_v3, 1  ;;  %v2260_v20 = vadd.f32 %v10555_v1, %v1871_v47 }
 0x3a5   : > { %v2262_v15 = vadd.f32 %v10556_v18, %v1873_v36  ;;  %v4069_v63 = vmul.f32 %v4037_v52, %v4001_v58  ;;  %v2264_v62 = vadd.f32 %v8390_v54, %v1875_v22  ;;  %v2266_v28 = vadd.f32 %v8393_v61, %v1877_v55  ;;  %v10558_v18 = vld [vmem:[#allocation107_spill] sm:$0xff] }
 0x3a6   : > { %v2374_v48 = vmul.f32 %v10479_v19, %v10280_v46  ;;  %v1952_v37 = vsel %vm1951_vm3, %v10487_v16, %v8759_v26  ;;  %v1954_v34 = vsel %vm1951_vm3, %v10488_v41, %v8762_v35  ;;  %v2376_v36 = vmul.f32 %v10481_v53, %v10471_v17 }
 0x3a7   : > { %v2378_v54 = vmul.f32 %v10280_v46, %v10553_v23  ;;  %v4087_v61 = vpack.c.bf16 %v4069_v63, %v4067_v6  ;;  %v8783_v52 = vmul.f32 %v6295_v9, %v1952_v37  ;;  %v8786_v32 = vmul.f32 %v10557_v38, %v1954_v34 }
 0x3a8   : > { %v2380_v16 = vmul.f32 %v10471_v17, %v10554_v3  ;;  %v2438_v47 = vadd.f32 %v2374_v48, %v2260_v20  ;;  %v2440_v11 = vadd.f32 %v2376_v36, %v2262_v15  ;;  %v2522_v41 = vsel %vm8147_vm14, %v8469_v21, 0.0 }
 0x3a9   : > { %v2442_v30 = vadd.f32 %v2378_v54, %v2264_v62  ;;  %4305 = vmatprep.mubr.bf16.mxu0 %v4087_v61  ;;  %v2524_v6 = vsel %vm8147_vm14, %v8476_v25, 0.0  ;;  %v2622_v51 = vmul.f32 %v10472_v49, %v2522_v41  ;;  %v2626_v63 = vmul.f32 %v10472_v49, %v1563_v7 }
 0x3aa   : > { %v2444_v58 = vadd.f32 %v2380_v16, %v2266_v28  ;;  %v2624_v31 = vmul.f32 %v10473_v39, %v2524_v6  ;;  %v2628_v20 = vmul.f32 %v10473_v39, %v1565_v60  ;;  %v2714_v15 = vsel %vm1951_vm3, %v8759_v26, %v8496_v50  ;;  %v10559_v28 = vld [vmem:[#allocation108_spill] sm:$0xff] }
 0x3ab   : > { %v2716_v21 = vsel %vm1951_vm3, %v8762_v35, %v8499_v43  ;;  %v2686_v22 = vadd.f32 %v2622_v51, %v2438_v47  ;;  %v2690_v25 = vadd.f32 %v2626_v63, %v2442_v30  ;;  %v2774_v55 = vsel %vm8157_vm15, %v2714_v15, 0.0  ;;  %v10563_v51 = vld [vmem:[#allocation97_spill] sm:$0xff]  ;;  %v10564_v63 = vld [vmem:[#allocation110_spill] sm:$0xff] }
 0x3ac   : > { %v2776_v7 = vsel %vm8157_vm15, %v2716_v21, 0.0  ;;  %v2688_v1 = vadd.f32 %v2624_v31, %v2440_v11  ;;  %v2692_v60 = vadd.f32 %v2628_v20, %v2444_v58  ;;  %v2870_v62 = vmul.f32 %v10558_v18, %v1952_v37  ;;  %v10562_v58 = vld [vmem:[#allocation109_spill] sm:$0xff] }
 0x3ad   : > { %v2872_v48 = vmul.f32 %v10559_v28, %v1954_v34  ;;  %v2874_v36 = vmul.f32 %v10558_v18, %v2774_v55  ;;  %v2876_v54 = vmul.f32 %v10559_v28, %v2776_v7  ;;  %v8817_v61 = vunpack.c.l.bf16 %v8619_v12  ;;  %v10565_v7 = vld [vmem:[#allocation62_spill] sm:$0xff] }
 0x3ae   : > { %v8820_v16 = vunpack.c.l.bf16 %v8621_v42  ;;  %v2934_v47 = vadd.f32 %v2870_v62, %v2686_v22  ;;  %v8823_v41 = vunpack.c.l.bf16 %v8625_v14  ;;  %v8826_v11 = vunpack.c.l.bf16 %v8627_v29  ;;  %v10567_v62 = vld [vmem:[#allocation63_spill] sm:$0xff] }
 0x3af   : > { %10560 = vst [vmem:[#allocation119_spill] sm:$0xff] %v8817_v61  ;;  %v2936_v30 = vadd.f32 %v2872_v48, %v2688_v1  ;;  %v2938_v37 = vadd.f32 %v2874_v36, %v2690_v25  ;;  %v2940_v34 = vadd.f32 %v2876_v54, %v2692_v60  ;;  %v3132_v6 = vmul.f32 %v10562_v58, %v8438_v2 }
 0x3b0   : > { %10561 = vst [vmem:[#allocation122_spill] sm:$0xff] %v8820_v16  ;;  %v3134_v12 = vmul.f32 %v10564_v63, %v10563_v51  ;;  %v3136_v42 = vmul.f32 %v10562_v58, %v8817_v61  ;;  %v3138_v31 = vmul.f32 %v10564_v63, %v8820_v16  ;;  %v8837_v14 = vrot.slane %v8438_v2, 7  ;;  %v10580_v63 = vld [vmem:[#allocation71_spill] sm:$0xff] }
 0x3b1   : > { %v8840_v29 = vrot.slane %v10563_v51, 7  ;;  %v3196_v20 = vadd.f32 %v3132_v6, %v2934_v47  ;;  %v9835_v21 = vrot.slane %v8817_v61, 7  ;;  %v9834_v22 = vrot.slane %v8820_v16, 7 }
 0x3b2   : > { %v3198_v15 = vadd.f32 %v3134_v12, %v2936_v30  ;;  %v3200_v25 = vadd.f32 %v3136_v42, %v2938_v37  ;;  %v3202_v55 = vadd.f32 %v3138_v31, %v2940_v34  ;;  %v10566_v1 = vrot.slane %v10565_v7, 7  ;;  %v10569_v34 = vld [vmem:[#allocation111_spill] sm:$0xff]  ;;  %v10570_v12 = vld [vmem:[#allocation112_spill] sm:$0xff] }
 0x3b3   : > { %v10568_v48 = vrot.slane %v10567_v62, 7  ;;  %v3284_v54 = vsel %vm1562_vm0, %v8837_v14, %v9835_v21  ;;  %v3286_v47 = vsel %vm1562_vm0, %v8840_v29, %v9834_v22  ;;  %v3622_v62 = vrot.slane %v8820_v16, 1  ;;  %v10577_v16 = vld [vmem:[#allocation43_spill] sm:$0xff] }
 0x3b4   : > { %v3288_v60 = vsel %vm1562_vm0, %v10566_v1, %v8837_v14  ;;  %v3492_v31 = vmul.f32 %v10569_v34, %v3284_v54  ;;  %v3494_v7 = vmul.f32 %v10570_v12, %v3286_v47  ;;  %v3620_v1 = vrot.slane %v8817_v61, 1  ;;  %v10579_v61 = vld [vmem:[#allocation116_spill] sm:$0xff] }
 0x3b5   : > { %v3290_v36 = vsel %vm1562_vm0, %v10568_v48, %v8840_v29  ;;  %v3388_v30 = vsel %vm8147_vm14, %v3288_v60, 0.0  ;;  %v9837_v48 = vrot.slane %v8823_v41, 1  ;;  %v9836_v22 = vrot.slane %v8826_v11, 1  ;;  %v8876_v60 = vpop.f32.mrf.mxu0 }
 0x3b6   : > { %v3390_v37 = vsel %vm8147_vm14, %v3290_v36, 0.0  ;;  %v3488_v6 = vmul.f32 %v10569_v34, %v3388_v30  ;;  %10571 = vst [vmem:[#allocation84_spill] sm:$0xff] %v8876_v60  ;;  %v3556_v21 = vadd.f32 %v3492_v31, %v3200_v25  ;;  %v3558_v30 = vadd.f32 %v3494_v7, %v3202_v55  ;;  %v10572_v55 = vld [vmem:[#allocation113_spill] sm:$0xff]  ;;  %v10575_v60 = vld [vmem:[#allocation103_spill] sm:$0xff] }
 0x3b7   : > { %v3490_v42 = vmul.f32 %v10570_v12, %v3390_v37  ;;  %v3636_v54 = vsel %vm1951_vm3, %v3620_v1, %v9837_v48  ;;  %v3638_v47 = vsel %vm1951_vm3, %v3622_v62, %v9836_v22  ;;  %v3640_v37 = vsel %vm1951_vm3, %v8496_v50, %v3620_v1  ;;  %v10574_v48 = vld [vmem:[#allocation42_spill] sm:$0xff] }
 0x3b8   : > { %v3552_v24 = vadd.f32 %v3488_v6, %v3196_v20  ;;  %v3642_v20 = vsel %vm1951_vm3, %v8499_v43, %v3622_v62  ;;  %v3750_v25 = vsel %vm8157_vm15, %v3638_v47, 0.0  ;;  %v3844_v6 = vmul.f32 %v10572_v55, %v3640_v37  ;;  %v8903_v62 = vpop.f32.mrf.mxu0 }
 0x3b9   : > { %v3554_v36 = vadd.f32 %v3490_v42, %v3198_v15  ;;  %v3748_v15 = vsel %vm8157_vm15, %v3636_v54, 0.0  ;;  %v10573_v42 = vld [vmem:[#allocation114_spill] sm:$0xff]  ;;  %v1251_v1 = vadd.s32 120, %v5463_v44  ;;  %v1491_v12 = vmul.f32 %v10575_v60, %v10574_v48  ;;  %10576 = vst [vmem:[#allocation47_spill] sm:$0xff] %v8903_v62 }
 0x3ba   : > { %v3846_v31 = vmul.f32 %v10573_v42, %v3642_v20  ;;  %v3848_v7 = vmul.f32 %v10572_v55, %v3748_v15  ;;  %v3850_v22 = vmul.f32 %v10573_v42, %v3750_v25  ;;  %v3908_v34 = vadd.f32 %v3844_v6, %v3552_v24  ;;  %v10578_v42 = vld [vmem:[#allocation115_spill] sm:$0xff]  ;;  %v10581_v24 = vld [vmem:[#allocation73_spill] sm:$0xff] }
 0x3bb   : > { %v1493_v13 = vmul.f32 %v10519_v27, %v10577_v16  ;;  %v1495_v47 = vmul.f32 %v10574_v48, %v10507_v45  ;;  %v1267_v15 = vand.u32 15, %v1251_v1  ;;  %v1497_v25 = vmul.f32 %v10577_v16, %v10508_v4  ;;  %v8922_v48 = vpop.f32.mrf.mxu0  ;;  %v10586_v16 = vld [vmem:[#allocation96_spill] sm:$0xff]  ;;  %v10591_v1 = vld [vmem:[#allocation102_spill] sm:$0xff] }
 0x3bc   : > { %v3910_v54 = vadd.f32 %v3846_v31, %v3554_v36  ;;  %v3912_v37 = vadd.f32 %v3848_v7, %v3556_v21  ;;  %v3914_v20 = vadd.f32 %v3850_v22, %v3558_v30  ;;  %v3994_v55 = vadd.f32 %v10578_v42, %v3908_v34  ;;  %v10584_v21 = vld [vmem:[#allocation28_spill] sm:$0xff]  ;;  %10585 = vst [vmem:[#allocation48_spill] sm:$0xff] %v8922_v48 }
 0x3bd   : > { %v1880_v62 = vadd.f32 %v10580_v63, %v1491_v12  ;;  %v1882_v36 = vadd.f32 %v10581_v24, %v1493_v13  ;;  %vm8917_vm2 = vcmp.ne.s32.totalorder %v1267_v15, 15  ;;  %v1884_v22 = vadd.f32 %v10584_v21, %v1495_v47  ;;  %v10587_v30 = vld [vmem:[#allocation24_spill] sm:$0xff]  ;;  %v10589_v12 = vld [vmem:[#allocation26_spill] sm:$0xff] }
 0x3be   : > { %v3996_v60 = vadd.f32 %v10579_v61, %v3910_v54  ;;  %v3998_v6 = vadd.f32 %v10578_v42, %v3912_v37  ;;  %v4000_v27 = vadd.f32 %v10579_v61, %v3914_v20  ;;  %v4034_v4 = vmax.f32 %v3994_v55, 0.0  ;;  %v10592_v37 = vld [vmem:[#allocation104_spill] sm:$0xff]  ;;  %v10594_v21 = vld [vmem:[#allocation54_spill] sm:$0xff]  ;;  %v10597_v61 = vld [vmem:[#allocation85_spill] sm:$0xff] }
 0x3bf   : > { %v1886_v34 = vadd.f32 %v10586_v16, %v1497_v25  ;;  %v10588_v31 = vrot.slane %v10587_v30, 1  ;;  %v10590_v7 = vrot.slane %v10589_v12, 1  ;;  %v2269_v20 = vadd.f32 %v10592_v37, %v1880_v62  ;;  %v10593_v25 = vld [vmem:[#allocation53_spill] sm:$0xff]  ;;  %v10596_v12 = vld [vmem:[#allocation59_spill] sm:$0xff] }
 0x3c0   : > { %v4036_v13 = vmax.f32 %v3998_v6, 0.0  ;;  %v4066_v15 = vmul.f32 %v4034_v4, %v3996_v60  ;;  %v10595_v16 = vld [vmem:[#allocation61_spill] sm:$0xff]  ;;  %v10598_v6 = vld [vmem:[#allocation60_spill] sm:$0xff]  ;;  %v10601_v4 = vld [vmem:[#allocation58_spill] sm:$0xff] }
 0x3c1   : > { %v2013_v63 = vsel %vm1951_vm3, %v8569_v0, %v10588_v31  ;;  %v2015_v54 = vsel %vm1951_vm3, %v10591_v1, %v10590_v7  ;;  %v2271_v30 = vadd.f32 %v10595_v16, %v1882_v36  ;;  %v2383_v7 = vmul.f32 %v10597_v61, %v10596_v12  ;;  %v10599_v1 = vld [vmem:[#allocation86_spill] sm:$0xff]  ;;  %v10603_v36 = vld [vmem:[#allocation101_spill] sm:$0xff] }
 0x3c2   : > { %v2109_v47 = vsel %vm8917_vm2, %v2013_v63, 0.0  ;;  %v2111_v55 = vsel %vm8917_vm2, %v2015_v54, 0.0  ;;  %v4068_v31 = vmul.f32 %v4036_v13, %v4000_v27  ;;  %v2385_v42 = vmul.f32 %v10599_v1, %v10598_v6  ;;  %v10600_v63 = vld [vmem:[#allocation56_spill] sm:$0xff]  ;;  %v8949_v54 = vpop.f32.mrf.mxu0 }
 0x3c3   : > { %v2209_v24 = vmul.f32 %v10593_v25, %v2109_v47  ;;  %v2211_v0 = vmul.f32 %v10594_v21, %v2111_v55  ;;  %v2387_v48 = vmul.f32 %v10596_v12, %v10600_v63  ;;  %v2389_v47 = vmul.f32 %v10598_v6, %v10601_v4  ;;  %v10605_v21 = vld [vmem:[#allocation105_spill] sm:$0xff] }
 0x3c4   : > { %v10602_v55 = vrot.slane %v10600_v63, 7  ;;  %v4086_v61 = vpack.c.bf16 %v4068_v31, %v4066_v15  ;;  %v2447_v13 = vadd.f32 %v2383_v7, %v2269_v20  ;;  %v2449_v37 = vadd.f32 %v2385_v42, %v2271_v30  ;;  %v10607_v12 = vld [vmem:[#allocation45_spill] sm:$0xff]  ;;  %v10609_v31 = vld [vmem:[#allocation66_spill] sm:$0xff]  ;;  %v8977_v6 = vpop.f32.mrf.mxu0 }
 0x3c5   : > { %v2273_v62 = vadd.f32 %v2209_v24, %v1884_v22  ;;  %v2275_v60 = vadd.f32 %v2211_v0, %v1886_v34  ;;  %v10604_v25 = vrot.slane %v10601_v4, 7  ;;  %v10606_v24 = vld [vmem:[#allocation44_spill] sm:$0xff]  ;;  %v2469_v15 = vsel %vm1562_vm0, %v10607_v12, %v10605_v21  ;;  %v10608_v30 = vld [vmem:[#allocation65_spill] sm:$0xff]  ;;  %10610 = vst [vmem:[#allocation35_spill] sm:$0xff] %v8977_v6 }
 0x3c6   : > { %v2463_v27 = vsel %vm1562_vm0, %v10603_v36, %v10602_v55  ;;  %v2467_v0 = vsel %vm1562_vm0, %v10606_v24, %v10603_v36  ;;  %4306 = vmatmul.mubr.bf16.gmra.mxu0 %v4086_v61  ;;  %v2533_v20 = vsel %vm8532_vm1, %v2469_v15, 0.0  ;;  %v10611_v61 = vld [vmem:[#allocation79_spill] sm:$0xff]  ;;  %v10613_v12 = vld [vmem:[#allocation49_spill] sm:$0xff]  ;;  %v10615_v15 = vld [vmem:[#allocation68_spill] sm:$0xff] }
 0x3c7   : > { %v2465_v16 = vsel %vm1562_vm0, %v10605_v21, %v10604_v25  ;;  %v2451_v22 = vadd.f32 %v2387_v48, %v2273_v62  ;;  %v2453_v34 = vadd.f32 %v2389_v47, %v2275_v60  ;;  %v2531_v42 = vsel %vm8532_vm1, %v2467_v0, 0.0  ;;  %v10612_v21 = vld [vmem:[#allocation80_spill] sm:$0xff] }
 0x3c8   : > { %v2635_v48 = vmul.f32 %v10608_v30, %v2463_v27  ;;  %v2637_v7 = vmul.f32 %v10609_v31, %v2465_v16  ;;  %v2631_v1 = vmul.f32 %v10608_v30, %v2531_v42  ;;  %v2633_v62 = vmul.f32 %v10609_v31, %v2533_v20  ;;  %v9001_v20 = vpop.f32.mrf.mxu0  ;;  %v10618_v30 = vld [vmem:[#allocation76_spill] sm:$0xff]  ;;  %v10619_v31 = vld [vmem:[#allocation78_spill] sm:$0xff] }
 0x3c9   : > { %v2707_v60 = vrot.slane %v10600_v63, 1  ;;  %v2709_v47 = vrot.slane %v10601_v4, 1  ;;  %v3141_v25 = vmul.f32 %v10611_v61, %v8641_v59  ;;  %v3143_v27 = vmul.f32 %v10612_v21, %v8644_v33  ;;  %10617 = vst [vmem:[#allocation37_spill] sm:$0xff] %v9001_v20 }
 0x3ca   : > { %v2699_v55 = vadd.f32 %v2635_v48, %v2451_v22  ;;  %v2701_v36 = vadd.f32 %v2637_v7, %v2453_v34  ;;  %v2695_v24 = vadd.f32 %v2631_v1, %v2447_v13  ;;  %v2697_v16 = vadd.f32 %v2633_v62, %v2449_v37  ;;  %v10614_v22 = vld [vmem:[#allocation50_spill] sm:$0xff]  ;;  %v10616_v13 = vld [vmem:[#allocation69_spill] sm:$0xff]  ;;  %v9017_v6 = vpop.f32.mrf.mxu0 }
 0x3cb   : > { %v2711_v0 = vsel %vm1951_vm3, %v8314_v40, %v2707_v60  ;;  %v2713_v63 = vsel %vm1951_vm3, %v8317_v56, %v2709_v47  ;;  %v2719_v4 = vsel %vm1951_vm3, %v2707_v60, %v10613_v12  ;;  %v2721_v34 = vsel %vm1951_vm3, %v2709_v47, %v10614_v22 }
 0x3cc   : > { %v2879_v42 = vmul.f32 %v10615_v15, %v2711_v0  ;;  %v2881_v37 = vmul.f32 %v10616_v13, %v2713_v63  ;;  %v2783_v40 = vsel %vm8917_vm2, %v2719_v4, 0.0  ;;  %v2785_v56 = vsel %vm8917_vm2, %v2721_v34, 0.0 }
 0x3cd   : > { %v3145_v48 = vmul.f32 %v10611_v61, %v10618_v30  ;;  %v3147_v7 = vmul.f32 %v10612_v21, %v10619_v31  ;;  %v2883_v1 = vmul.f32 %v10615_v15, %v2783_v40  ;;  %v2885_v62 = vmul.f32 %v10616_v13, %v2785_v56  ;;  %v10624_v56 = vld [vmem:[#allocation82_spill] sm:$0xff] }
 0x3ce   : > { %v2943_v60 = vadd.f32 %v2879_v42, %v2695_v24  ;;  %v2945_v47 = vadd.f32 %v2881_v37, %v2697_v16  ;;  %v3269_v0 = vrot.slane %v8641_v59, 7  ;;  %v3271_v63 = vrot.slane %v8644_v33, 7 }
 0x3cf   : > { %v3629_v12 = vrot.slane %v10618_v30, 1  ;;  %v3631_v4 = vrot.slane %v10619_v31, 1  ;;  %v2947_v22 = vadd.f32 %v2883_v1, %v2699_v55  ;;  %v2949_v34 = vadd.f32 %v2885_v62, %v2701_v36 }
 0x3d0   : > { %v3205_v61 = vadd.f32 %v3141_v25, %v2943_v60  ;;  %v3207_v20 = vadd.f32 %v3143_v27, %v2945_v47  ;;  %v10620_v21 = vrot.slane %v10618_v30, 7  ;;  %v10621_v16 = vrot.slane %v10619_v31, 7  ;;  %v10625_v31 = vld [vmem:[#allocation83_spill] sm:$0xff] }
 0x3d1   : > { %v10622_v42 = vrot.slane %v8635_v57, 7  ;;  %v10623_v36 = vrot.slane %v8638_v8, 7  ;;  %v3209_v27 = vadd.f32 %v3145_v48, %v2947_v22  ;;  %v3211_v13 = vadd.f32 %v3147_v7, %v2949_v34  ;;  %v10628_v47 = vld [vmem:[#allocation51_spill] sm:$0xff]  ;;  %v9057_v34 = vpop.f32.mrf.mxu0 }
 0x3d2   : > { %v3277_v24 = vsel %vm1562_vm0, %v3269_v0, %v10620_v21  ;;  %v3279_v15 = vsel %vm1562_vm0, %v3271_v63, %v10621_v16  ;;  %v10626_v8 = vrot.slane %v8641_v59, 1  ;;  %v10627_v7 = vrot.slane %v8644_v33, 1 }
 0x3d3   : > { %v3281_v55 = vsel %vm1562_vm0, %v10622_v42, %v3269_v0  ;;  %v3283_v25 = vsel %vm1562_vm0, %v10623_v36, %v3271_v63  ;;  %v3501_v1 = vmul.f32 %v10624_v56, %v3277_v24  ;;  %v3503_v62 = vmul.f32 %v10625_v31, %v3279_v15  ;;  %v10629_v63 = vld [vmem:[#allocation52_spill] sm:$0xff] }
 0x3d4   : > { %v3397_v37 = vsel %vm8532_vm1, %v3281_v55, 0.0  ;;  %v3399_v40 = vsel %vm8532_vm1, %v3283_v25, 0.0  ;;  %v3633_v48 = vsel %vm1951_vm3, %v10626_v8, %v3629_v12  ;;  %v3635_v60 = vsel %vm1951_vm3, %v10627_v7, %v3631_v4  ;;  %v10630_v55 = vld [vmem:[#allocation91_spill] sm:$0xff]  ;;  %v10631_v25 = vld [vmem:[#allocation92_spill] sm:$0xff]  ;;  %v10636_v7 = vld [vmem:[#allocation89_spill] sm:$0xff] }
 0x3d5   : > { %v3497_v30 = vmul.f32 %v10624_v56, %v3397_v37  ;;  %v3499_v57 = vmul.f32 %v10625_v31, %v3399_v40  ;;  %v3693_v0 = vsel %vm1951_vm3, %v3629_v12, %v10628_v47  ;;  %v3695_v22 = vsel %vm1951_vm3, %v3631_v4, %v10629_v63 }
 0x3d6   : > { %v3565_v24 = vadd.f32 %v3501_v1, %v3209_v27  ;;  %v3567_v16 = vadd.f32 %v3503_v62, %v3211_v13  ;;  %v3757_v33 = vsel %vm8917_vm2, %v3693_v0, 0.0  ;;  %v3759_v15 = vsel %vm8917_vm2, %v3695_v22, 0.0  ;;  %v10634_v62 = vld [vmem:[#allocation81_spill] sm:$0xff]  ;;  %v10638_v0 = vld [vmem:[#allocation118_spill] sm:$0xff]  ;;  %v10639_v22 = vld [vmem:[#allocation23_spill] sm:$0xff] }
 0x3d7   : > { %v3561_v21 = vadd.f32 %v3497_v30, %v3205_v61  ;;  %v3563_v59 = vadd.f32 %v3499_v57, %v3207_v20  ;;  %v3853_v42 = vmul.f32 %v10537_v10, %v3633_v48  ;;  %v3855_v12 = vmul.f32 %v10630_v55, %v3635_v60  ;;  %v10632_v20 = vld [vmem:[#allocation93_spill] sm:$0xff]  ;;  %v9075_v30 = vpop.f32.mrf.mxu0  ;;  %v10637_v60 = vld [vmem:[#allocation106_spill] sm:$0xff] }
 0x3d8   : > { %v3857_v36 = vmul.f32 %v10537_v10, %v3757_v33  ;;  %v3859_v4 = vmul.f32 %v10630_v55, %v3759_v15  ;;  %v1490_v61 = vmul.f32 %v10479_v19, %v10631_v25  ;;  %v1492_v27 = vmul.f32 %v10481_v53, %v10632_v20  ;;  %v10633_v57 = vld [vmem:[#allocation117_spill] sm:$0xff]  ;;  %v10635_v19 = vld [vmem:[#allocation88_spill] sm:$0xff] }
 0x3d9   : > { %v3917_v13 = vadd.f32 %v3853_v42, %v3561_v21  ;;  %v3919_v37 = vadd.f32 %v3855_v12, %v3563_v59  ;;  %v1494_v40 = vmul.f32 %v10631_v25, %v10553_v23  ;;  %v1496_v56 = vmul.f32 %v10632_v20, %v10554_v3 }
 0x3da   : > { %v3921_v31 = vadd.f32 %v3857_v36, %v3565_v24  ;;  %v3923_v10 = vadd.f32 %v3859_v4, %v3567_v16  ;;  %v1879_v1 = vadd.f32 %v10633_v57, %v1490_v61  ;;  %v1881_v8 = vadd.f32 %v10634_v62, %v1492_v27  ;;  %v10641_v24 = vld [vmem:[#allocation25_spill] sm:$0xff]  ;;  %v9100_v36 = vpop.f32.mrf.mxu0 }
 0x3db   : > { %v4003_v48 = vadd.f32 %v10635_v19, %v3917_v13  ;;  %v4005_v53 = vadd.f32 %v10636_v7, %v3919_v37  ;;  %v1883_v47 = vadd.f32 %v10637_v60, %v1494_v40  ;;  %v1885_v63 = vadd.f32 %v10638_v0, %v1496_v56  ;;  %v10643_v13 = vld [vmem:[#allocation55_spill] sm:$0xff] }
 0x3dc   : > { %v4007_v23 = vadd.f32 %v10635_v19, %v3921_v31  ;;  %v4009_v3 = vadd.f32 %v10636_v7, %v3923_v10  ;;  %v10640_v21 = vrot.slane %v10639_v22, 1  ;;  %v10642_v16 = vrot.slane %v10641_v24, 1  ;;  %v10644_v31 = vld [vmem:[#allocation57_spill] sm:$0xff] }
 0x3dd   : > { %v4039_v15 = vmax.f32 %v4003_v48, 0.0  ;;  %v2268_v12 = vadd.f32 %v8783_v52, %v1879_v1  ;;  %v2270_v61 = vadd.f32 %v8786_v32, %v1881_v8  ;;  %v2384_v27 = vmul.f32 %v10563_v51, %v10471_v17  ;;  %v9123_v51 = vpop.f32.mrf.mxu0  ;;  %v10648_v48 = vld [vmem:[#allocation32_spill] sm:$0xff] }
 0x3de   : > { %v2012_v59 = vsel %vm1951_vm3, %v8759_v26, %v10640_v21  ;;  %v2014_v33 = vsel %vm1951_vm3, %v8762_v35, %v10642_v16  ;;  %v4041_v4 = vmax.f32 %v4007_v23, 0.0  ;;  %v2382_v35 = vmul.f32 %v8438_v2, %v10280_v46 }
 0x3df   : > { %v2108_v42 = vsel %vm8917_vm2, %v2012_v59, 0.0  ;;  %v2110_v55 = vsel %vm8917_vm2, %v2014_v33, 0.0  ;;  %v4071_v20 = vmul.f32 %v4039_v15, %v4005_v53  ;;  %v2386_v37 = vmul.f32 %v10280_v46, %v10643_v13  ;;  %v9145_v59 = vpop.f32.mrf.mxu0  ;;  %v10649_v33 = vld [vmem:[#allocation95_spill] sm:$0xff] }
 0x3e0   : > { %v2208_v26 = vmul.f32 %v6295_v9, %v2108_v42  ;;  %v2210_v25 = vmul.f32 %v10557_v38, %v2110_v55  ;;  %v4073_v52 = vmul.f32 %v4041_v4, %v4009_v3  ;;  %v2388_v9 = vmul.f32 %v10471_v17, %v10644_v31  ;;  %v10647_v17 = vld [vmem:[#allocation31_spill] sm:$0xff]  ;;  %v10650_v42 = vld [vmem:[#allocation98_spill] sm:$0xff] }
 0x3e1   : > { %v2446_v10 = vadd.f32 %v2382_v35, %v2268_v12  ;;  %v2448_v38 = vadd.f32 %v2384_v27, %v2270_v61  ;;  %v10645_v32 = vrot.slane %v10643_v13, 7  ;;  %v10646_v57 = vrot.slane %v10644_v31, 7  ;;  %v10652_v27 = vld [vmem:[#allocation75_spill] sm:$0xff] }
 0x3e2   : > { %v2272_v40 = vadd.f32 %v2208_v26, %v1883_v47  ;;  %v2274_v56 = vadd.f32 %v2210_v25, %v1885_v63  ;;  %v4089_v1 = vpack.c.bf16 %v4073_v52, %v4071_v20  ;;  %v2466_v19 = vsel %vm1562_vm0, %v10647_v17, %v8837_v14  ;;  %v10651_v25 = vld [vmem:[#allocation110_spill] sm:$0xff]  ;;  %v10656_v17 = vld [vmem:[#allocation119_spill] sm:$0xff] }
 0x3e3   : > { %v2462_v2 = vsel %vm1562_vm0, %v8837_v14, %v10645_v32  ;;  %v2464_v46 = vsel %vm1562_vm0, %v8840_v29, %v10646_v57  ;;  %v2468_v7 = vsel %vm1562_vm0, %v10648_v48, %v8840_v29  ;;  %v2530_v53 = vsel %vm8532_vm1, %v2466_v19, 0.0 }
 0x3e4   : > { %v2450_v62 = vadd.f32 %v2386_v37, %v2272_v40  ;;  %v2452_v8 = vadd.f32 %v2388_v9, %v2274_v56  ;;  %v2634_v60 = vmul.f32 %v10472_v49, %v2462_v2  ;;  %v2636_v47 = vmul.f32 %v10473_v39, %v2464_v46  ;;  %4313 = vmatprep.mubr.bf16.mxu0 %v4089_v1  ;;  %v10653_v37 = vld [vmem:[#allocation77_spill] sm:$0xff]  ;;  %v4701_v40 = vpop.f32.mrf.mxu0 }
 0x3e5   : > { %v2532_v0 = vsel %vm8532_vm1, %v2468_v7, 0.0  ;;  %v2630_v63 = vmul.f32 %v10472_v49, %v2530_v53  ;;  %v2706_v14 = vrot.slane %v10643_v13, 1  ;;  %v2708_v23 = vrot.slane %v10644_v31, 1  ;;  %v10658_v7 = vld [vmem:[#allocation122_spill] sm:$0xff] }
 0x3e6   : > { %v2632_v3 = vmul.f32 %v10473_v39, %v2532_v0  ;;  %v2698_v29 = vadd.f32 %v2634_v60, %v2450_v62  ;;  %v2700_v22 = vadd.f32 %v2636_v47, %v2452_v8  ;;  %v3140_v21 = vmul.f32 %v10562_v58, %v8823_v41  ;;  %v10660_v47 = vld [vmem:[#allocation111_spill] sm:$0xff] }
 0x3e7   : > { %v2694_v24 = vadd.f32 %v2630_v63, %v2446_v10  ;;  %v2710_v16 = vsel %vm1951_vm3, %v8496_v50, %v2706_v14  ;;  %v2712_v49 = vsel %vm1951_vm3, %v8499_v43, %v2708_v23  ;;  %v2718_v39 = vsel %vm1951_vm3, %v2706_v14, %v10649_v33  ;;  %v4702_v63 = vpop.f32.mrf.mxu0 }
 0x3e8   : > { %v2696_v15 = vadd.f32 %v2632_v3, %v2448_v38  ;;  %v2720_v55 = vsel %vm1951_vm3, %v2708_v23, %v10650_v42  ;;  %v2782_v12 = vsel %vm8917_vm2, %v2718_v39, 0.0  ;;  %v2878_v4 = vmul.f32 %v10558_v18, %v2710_v16  ;;  %v10661_v3 = vld [vmem:[#allocation112_spill] sm:$0xff] }
 0x3e9   : > { %v2784_v50 = vsel %vm8917_vm2, %v2720_v55, 0.0  ;;  %v2880_v26 = vmul.f32 %v10559_v28, %v2712_v49  ;;  %v2882_v43 = vmul.f32 %v10558_v18, %v2782_v12  ;;  %v3142_v61 = vmul.f32 %v10651_v25, %v8826_v11  ;;  %v10665_v55 = vld [vmem:[#allocation36_spill] sm:$0xff]  ;;  %v10666_v12 = vld [vmem:[#allocation113_spill] sm:$0xff] }
 0x3ea   : > { %v2884_v20 = vmul.f32 %v10559_v28, %v2784_v50  ;;  %v2942_v35 = vadd.f32 %v2878_v4, %v2694_v24  ;;  %v3144_v13 = vmul.f32 %v10562_v58, %v10652_v27  ;;  %v3146_v52 = vmul.f32 %v10651_v25, %v10653_v37  ;;  %v9223_v25 = vld [vmem:[%s9331_s6] ss:$0 sm:$0xff] }
 0x3eb   : > { %v2944_v56 = vadd.f32 %v2880_v26, %v2696_v15  ;;  %v2946_v31 = vadd.f32 %v2882_v43, %v2698_v29  ;;  %v3268_v9 = vrot.slane %v8823_v41, 7  ;;  %v3270_v10 = vrot.slane %v8826_v11, 7 }
 0x3ec   : > { %v2948_v18 = vadd.f32 %v2884_v20, %v2700_v22  ;;  %v3204_v38 = vadd.f32 %v3140_v21, %v2942_v35  ;;  %v3628_v32 = vrot.slane %v10652_v27, 1  ;;  %v3630_v28 = vrot.slane %v10653_v37, 1  ;;  %v10667_v20 = vld [vmem:[#allocation114_spill] sm:$0xff] }
 0x3ed   : > { %v3206_v2 = vadd.f32 %v3142_v61, %v2944_v56  ;;  %v3208_v57 = vadd.f32 %v3144_v13, %v2946_v31  ;;  %v10654_v58 = vrot.slane %v10652_v27, 7  ;;  %v10655_v1 = vrot.slane %v10653_v37, 7  ;;  %v4704_v61 = vpop.f32.mrf.mxu0  ;;  %v10668_v13 = vld [vmem:[#allocation84_spill] sm:$0xff]  ;;  %v10669_v37 = vld [vmem:[#allocation47_spill] sm:$0xff] }
 0x3ee   : > { %v3210_v8 = vadd.f32 %v3146_v52, %v2948_v18  ;;  %v10657_v19 = vrot.slane %v10656_v17, 7  ;;  %v10659_v53 = vrot.slane %v10658_v7, 7  ;;  %v10662_v22 = vrot.slane %v8823_v41, 1  ;;  %v10670_v31 = vld [vmem:[#allocation48_spill] sm:$0xff] }
 0x3ef   : > { %v3276_v46 = vsel %vm1562_vm0, %v3268_v9, %v10654_v58  ;;  %v3278_v62 = vsel %vm1562_vm0, %v3270_v10, %v10655_v1  ;;  %v10663_v33 = vrot.slane %v8826_v11, 1  ;;  %v3692_v42 = vsel %vm1951_vm3, %v3628_v32, %v10664_v5  ;;  %v10673_v58 = vld [vmem:[#allocation115_spill] sm:$0xff]  ;;  %v10674_v17 = vld [vmem:[#allocation116_spill] sm:$0xff] }
 0x3f0   : > { %v3280_v48 = vsel %vm1562_vm0, %v10657_v19, %v3268_v9  ;;  %v3282_v60 = vsel %vm1562_vm0, %v10659_v53, %v3270_v10  ;;  %v3500_v0 = vmul.f32 %v10660_v47, %v3276_v46  ;;  %v3502_v29 = vmul.f32 %v10661_v3, %v3278_v62  ;;  %v10671_v9 = vld [vmem:[#allocation35_spill] sm:$0xff]  ;;  %v10672_v10 = vld [vmem:[#allocation37_spill] sm:$0xff] }
 0x3f1   : > { %v3396_v14 = vsel %vm8532_vm1, %v3280_v48, 0.0  ;;  %v3398_v23 = vsel %vm8532_vm1, %v3282_v60, 0.0  ;;  %v3632_v21 = vsel %vm1951_vm3, %v10662_v22, %v3628_v32  ;;  %v3634_v39 = vsel %vm1951_vm3, %v10663_v33, %v3630_v28 }
 0x3f2   : > { %v3496_v24 = vmul.f32 %v10660_v47, %v3396_v14  ;;  %v3498_v16 = vmul.f32 %v10661_v3, %v3398_v23  ;;  %v3564_v49 = vadd.f32 %v3500_v0, %v3208_v57  ;;  %v3566_v15 = vadd.f32 %v3502_v29, %v3210_v8 }
 0x3f3   : > { %v3694_v41 = vsel %vm1951_vm3, %v3630_v28, %v10665_v55  ;;  %v3852_v4 = vmul.f32 %v10666_v12, %v3632_v21  ;;  %v3756_v43 = vsel %vm8917_vm2, %v3692_v42, 0.0  ;;  %v3854_v35 = vmul.f32 %v10667_v20, %v3634_v39 }
 0x3f4   : > { %v3560_v50 = vadd.f32 %v3496_v24, %v3204_v38  ;;  %v3562_v26 = vadd.f32 %v3498_v16, %v3206_v2  ;;  %v3758_v11 = vsel %vm8917_vm2, %v3694_v41, 0.0  ;;  %v3856_v44 = vmul.f32 %v10666_v12, %v3756_v43 }
 0x3f5   : > { %v3858_v27 = vmul.f32 %v10667_v20, %v3758_v11  ;;  %v4685_v52 = vadd.f32 %v10669_v37, %v10668_v13  ;;  %v4688_v45 = vadd.f32 %v8949_v54, %v10670_v31  ;;  %v4691_v18 = vadd.f32 %v10672_v10, %v10671_v9  ;;  %v4705_v54 = vpop.f32.mrf.mxu0 }
 0x3f6   : > { %v3916_v56 = vadd.f32 %v3852_v4, %v3560_v50  ;;  %v4694_v38 = vadd.f32 %v9057_v34, %v9017_v6  ;;  %v3918_v32 = vadd.f32 %v3854_v35, %v3562_v26  ;;  %v3920_v28 = vadd.f32 %v3856_v44, %v3564_v49 }
 0x3f7   : > { %v3922_v2 = vadd.f32 %v3858_v27, %v3566_v15  ;;  %v4260_v57 = vadd.f32 %v4685_v52, %v9223_v25  ;;  %v4263_v1 = vadd.f32 %v4688_v45, %v9223_v25  ;;  %v4268_v62 = vadd.f32 %v4691_v18, %v9223_v25 }
 0x3f8   : > { %v4002_v46 = vadd.f32 %v10673_v58, %v3916_v56  ;;  %v4271_v8 = vadd.f32 %v4694_v38, %v9223_v25  ;;  %v4004_v19 = vadd.f32 %v10674_v17, %v3918_v32  ;;  %v4006_v48 = vadd.f32 %v10673_v58, %v3920_v28 }
 0x3f9   : > { %v4008_v6 = vadd.f32 %v10674_v17, %v3922_v2  ;;  %v4697_v34 = vadd.f32 %v9100_v36, %v9075_v30  ;;  %v4322_v53 = vmax.f32 %v4260_v57, %v4268_v62  ;;  %v4700_v47 = vadd.f32 %v9145_v59, %v9123_v51 }
 0x3fa   : > { %v4038_v7 = vmax.f32 %v4002_v46, 0.0  ;;  %v4323_v60 = vmax.f32 %v4263_v1, %v4271_v8  ;;  %v4040_v0 = vmax.f32 %v4006_v48, 0.0  ;;  %v4703_v14 = vadd.f32 %v4702_v63, %v4701_v40 }
 0x3fb   : > { %v4706_v23 = vadd.f32 %v4705_v54, %v4704_v61  ;;  %4330 = vst [vmem:[#allocation3] sm:$0xff] %v4322_v53  ;;  %v4276_v29 = vadd.f32 %v4697_v34, %v9223_v25  ;;  %v4279_v21 = vadd.f32 %v4700_v47, %v9223_v25 }
 0x3fc   : > { %v4070_v3 = vmul.f32 %v4038_v7, %v4004_v19  ;;  %4331 = vst [vmem:[#allocation3 + $0x8] sm:$0xff] %v4323_v60  ;;  %v4072_v22 = vmul.f32 %v4040_v0, %v4008_v6  ;;  %v4284_v30 = vadd.f32 %v4703_v14, %v9223_v25 }
 0x3fd   : > { %v4287_v36 = vadd.f32 %v4706_v23, %v9223_v25 }
 0x3fe   : > { %v4088_v24 = vpack.c.bf16 %v4072_v22, %v4070_v3  ;;  %v4324_v16 = vmax.f32 %v4276_v29, %v4284_v30 }
 0x3ff   : > { %v4325_v51 = vmax.f32 %v4279_v21, %v4287_v36 }
 0x400   : > { %4314 = vmatmul.mubr.bf16.gmra.mxu0 %v4088_v24  ;;  %4332 = vst [vmem:[#allocation3 + $0x10] sm:$0xff] %v4324_v16 }
 0x401   : > { %4333 = vst [vmem:[#allocation3 + $0x18] sm:$0xff] %v4325_v51 }
 0x403   : > { %v4338_v59 = vld [vmem:[#allocation3] ss:$2 sm:$0xff]  ;;  %v4346_v40 = vld [vmem:[#allocation3 + $0x1] ss:$2 sm:$0xff] }
 0x404   : > { %v4353_v63 = vmax.f32 %v4338_v59, %v4346_v40 }
 0x406   : > { %4357 = vst [vmem:[%s5576_s11] sm:$0xff] %v4353_v63 }
 0x408   : > { %v4340_v49 = vld [vmem:[#allocation3 + $0x10] ss:$2 sm:$0xff]  ;;  %v4348_v33 = vld [vmem:[#allocation3 + $0x11] ss:$2 sm:$0xff] }
 0x409   : > { %v4354_v39 = vmax.f32 %v4340_v49, %v4348_v33 }
 0x40b   : > { %4358 = vst [vmem:[%s5576_s11 + $0x8] sm:$0xff] %v4354_v39 }
 0x411   : > { %v4707_v15 = vpop.f32.mrf.mxu0 }
 0x413   : > { %v4708_v5 = vpop.f32.mrf.mxu0 }
 0x414   : > { %v4709_v12 = vadd.f32 %v4708_v5, %v4707_v15 }
 0x415   : > { %v4710_v42 = vpop.f32.mrf.mxu0 }
 0x416   : > { %v4292_v43 = vadd.f32 %v4709_v12, %v9223_v25 }
 0x417   : > { %v4711_v55 = vpop.f32.mrf.mxu0 }
 0x418   : > { %v4712_v11 = vadd.f32 %v4711_v55, %v4710_v42 }
 0x41a   : > { %v4295_v27 = vadd.f32 %v4712_v11, %v9223_v25 }
 0x44a   : > { %v4713_v41 = vpop.f32.mrf.mxu0 }
 0x44c   : > { %v4714_v4 = vpop.f32.mrf.mxu0 }
 0x44d   : > { %v4715_v50 = vadd.f32 %v4714_v4, %v4713_v41 }
 0x44e   : > { %v4716_v26 = vpop.f32.mrf.mxu0 }
 0x44f   : > { %v4300_v61 = vadd.f32 %v4715_v50, %v9223_v25 }
 0x450   : > { %v4717_v20 = vpop.f32.mrf.mxu0 }
 0x451   : > { %v4326_v35 = vmax.f32 %v4292_v43, %v4300_v61  ;;  %v4718_v44 = vadd.f32 %v4717_v20, %v4716_v26 }
 0x453   : > { %4334 = vst [vmem:[#allocation3 + $0x20] sm:$0xff] %v4326_v35  ;;  %v4303_v13 = vadd.f32 %v4718_v44, %v9223_v25 }
 0x455   : > { %v4327_v37 = vmax.f32 %v4295_v27, %v4303_v13 }
 0x457   : > { %4335 = vst [vmem:[#allocation3 + $0x28] sm:$0xff] %v4327_v37 }
 0x45e   : > { %v4342_v52 = vld [vmem:[#allocation3 + $0x20] ss:$2 sm:$0xff]  ;;  %v4350_v56 = vld [vmem:[#allocation3 + $0x21] ss:$2 sm:$0xff] }
 0x45f   : > { %v4355_v31 = vmax.f32 %v4342_v52, %v4350_v56 }
 0x461   : > { %4359 = vst [vmem:[%s5576_s11 + $0x10] sm:$0xff] %v4355_v31 }
 0x486   : > { %v4719_v45 = vpop.f32.mrf.mxu0 }
 0x488   : > { %v4720_v9 = vpop.f32.mrf.mxu0 }
 0x489   : > { %v4721_v32 = vadd.f32 %v4720_v9, %v4719_v45 }
 0x48a   : > { %v4722_v10 = vpop.f32.mrf.mxu0 }
 0x48b   : > { %v4308_v58 = vadd.f32 %v4721_v32, %v9223_v25 }
 0x48c   : > { %v4723_v18 = vpop.f32.mrf.mxu0 }
 0x48d   : > { %v4724_v46 = vadd.f32 %v4723_v18, %v4722_v10 }
 0x48f   : > { %v4311_v17 = vadd.f32 %v4724_v46, %v9223_v25 }
 0x4c0   : > { %v4725_v38 = vpop.f32.mrf.mxu0 }
 0x4c2   : > { %v4726_v28 = vpop.f32.mrf.mxu0 }
 0x4c3   : > { %v4727_v2 = vadd.f32 %v4726_v28, %v4725_v38 }
 0x4c4   : > { %v4728_v57 = vpop.f32.mrf.mxu0 }
 0x4c5   : > { %v4316_v1 = vadd.f32 %v4727_v2, %v9223_v25 }
 0x4c6   : > { %v4729_v62 = vpop.f32.mrf.mxu0 }
 0x4c7   : > { %v4328_v8 = vmax.f32 %v4308_v58, %v4316_v1  ;;  %v4730_v54 = vadd.f32 %v4729_v62, %v4728_v57 }
 0x4c9   : > { %4336 = vst [vmem:[#allocation3 + $0x30] sm:$0xff] %v4328_v8  ;;  %v4319_v19 = vadd.f32 %v4730_v54, %v9223_v25 }
 0x4cb   : > { %v4329_v48 = vmax.f32 %v4311_v17, %v4319_v19 }
 0x4cd   : > { %4337 = vst [vmem:[#allocation3 + $0x38] sm:$0xff] %v4329_v48 }
 0x4d4   : > { %v4344_v6 = vld [vmem:[#allocation3 + $0x30] ss:$2 sm:$0xff]  ;;  %v4352_v34 = vld [vmem:[#allocation3 + $0x31] ss:$2 sm:$0xff] }
 0x4d5   : > { %v4356_v25 = vmax.f32 %v4344_v6, %v4352_v34 }
 0x4d7   : > { %4360 = vst [vmem:[%s5576_s11 + $0x18] sm:$0xff] %v4356_v25 }
 0x4d8   : > { %5098 = shalt.err (!%p5095_p6)
}
 0x4d9   : > { %s5099_s17 = scalar_lea.hbm %s9269_s1, 512  ;;  %s5103_s13 = scalar_lea.hbm %s10675_s21, 2048 }
 0x4da   : > { %p5100_p9 = scmp.ne.s32.totalorder %s9269_s1, %s5099_s17  ;;  %p5104_p4 = scmp.lt.s32.totalorder %s9269_s1, %s10675_s21 }
 0x4db   : > { %p5105_p13 = scmp.lt.s32.totalorder %s5103_s13, %s5099_s17 }
 0x4dc   : > { %p5101_p12 = pnand %p5100_p9, %p5376_p1 }
 0x4dd   : > { %p5106_p3 = por %p5105_p13, %p5104_p4 }
 0x4de   : > { %p5102_p10 = pneg %p5101_p12 }
 0x4e0   : > { %p5107_p2 = pnand %p5106_p3, %p5102_p10 }
 0x4e2   : > { %5110 = shalt.err (!%p5107_p2)
}
 0x4e3   : > { %s5204_s19 = smov 128   ;;  %s5205_s9 = smov 8  }
 0x4e4   : > { %4769 = dma.vmem_to_hbm [thread:$0]  (%p5376_p1), %s9271_s22, 512, %s9269_s1, %s4362_s27, %s5204_s19, %s5204_s19, %s5205_s9  }
 0x4e5 PF: > { %s10676_s23 = sld [smem:[#allocation19_spill]] }
 0x4e6   : > { %s10677_s12 = sld [smem:[#allocation18_spill]] }
 0x4e7   : > { %s10678_s18 = sld [smem:[#allocation20_spill]] }
 0x4eb   : > { %p4801_p0 = scmp.ge.s32.totalorder %s10676_s23, 2 }
 0x4ec   : > { %s4392_s2 = sand.u32 1, %s10677_s12  }
 0x4ed   : > { %p10679_p5 = scmp.ne.s32.totalorder %s10678_s18, 0  ;;  %s4393_s14 = scalar_lea.sflag [#allocation6], %s4392_s2 }
 0x4ef   : > { %p4789_p8 = pnand %p4801_p0, %p10679_p5 }
 0x4f1   : > { %p4790_p7 = pneg %p4789_p8 }
 0x4f3   : > { %5156 = dma.done.wait (%p4790_p7), %s4393_s14, 512  }
 0x4f4   : > { %5158 = vsyncadd (%p4790_p7), %s4393_s14, 4294966784  ;;  %s25_s8 = sadd.s32 1, %s10676_s23   ;;  %s10680_s20 = sld [smem:[#allocation21_spill]] }
 0x4f5   : > { %p22_p11 = scmp.ge.s32.totalorder %s25_s8, 6   ;;  %s10681_s22 = sld [smem:[#allocation22_spill]] }
 0x4f6   : > { %s10682_s24 = smov %s5165_s25  ;;  %s10683_s25 = smov %s5169_s26 }
 0x4f7   : > { %s10684_s26 = smov %s5395_s5  ;;  %s10685_s27 = smov %s5181_s29 }
 0x4f8   : > { %s10686_s28 = smov %s5185_s30  ;;  %24 = sbr.rel (!%p22_p11) target bundleno = 15 (0xf), region = 124 }
 0x4fa   : > { %s10687_s29 = smov %s10680_s20 }
 0x4fb   : > { %s10688_s30 = smov %s10681_s22 }
 0x4fd   :  { %4398 = vsyncpa [#allocation5], 1 }
 0x4fe   :  { %4400 = vsyncpa [#allocation5 + $0x1], 1 }
 0x4ff   :  { %4401 = vsyncpa [#allocation8], 1 }
 0x500   :  { %4402 = vsyncpa [#allocation11], 1 }
 0x501   :  { %4403 = vsyncpa [#allocation6], 1 }
 0x502   :  { %4405 = vsyncpa [#allocation6 + $0x1], 1 }

// kernel: tpu_custom_call.1
= control target key start
LH: loop header
LB: loop body
LE: loop exit
PB: predicated region body
PF: predicated region fallthrough
CT: control target
= control target key end

     0   :  { %s9325_s0 = inlined_call_operand.hbm [shape: bf16[2,2,160,128], index: 0, kind: input, shape index: {}]   ;;  %s9326_s1 = inlined_call_operand.hbm [shape: bf16[128,512], index: 1, kind: input, shape index: {}]   ;;  %s9327_s2 = inlined_call_operand.hbm [shape: f32[1,512], index: 2, kind: input, shape index: {}]   ;;  %s9328_s3 = inlined_call_operand.hbm [shape: f32[3,3,512], index: 3, kind: input, shape index: {}]   ;;  %s9329_s4 = inlined_call_operand.vmem [shape: f32[1,512], index: 4, kind: input, shape index: {}]   ;;  %s9330_s5 = inlined_call_operand.hbm [shape: bf16[256,128], index: 5, kind: input, shape index: {}]   ;;  %s9331_s6 = inlined_call_operand.vmem [shape: f32[1,128], index: 6, kind: input, shape index: {}]   ;;  %s9332_s7 = inlined_call_operand.hbm [shape: f32[2,8,8,128], index: 7, kind: output, shape index: {}]  }
   0x1   :  { %9847 = sst [smem:[#allocation125_spill]] %s9326_s1 }
   0x2   :  { %9848 = sst [smem:[#allocation126_spill]] %s9327_s2 }
   0x3   :  { %9849 = sst [smem:[#allocation127_spill]] %s9328_s3 }
   0x4   :  { %9850 = sst [smem:[#allocation128_spill]] %s9330_s5 }
   0x5   :  { %9851 = sst [smem:[#allocation129_spill]] %s9332_s7 }
   0x6   :  { %12 = vsyncpa [#allocation5], 0 }
   0x7   :  { %14 = vsyncpa [#allocation5 + $0x1], 0 }
   0x8   :  { %15 = vsyncpa [#allocation8], 0 }
   0x9   :  { %16 = vsyncpa [#allocation11], 0 }
   0xa   :  { %17 = vsyncpa [#allocation6], 0 }
   0xb   :  { %19 = vsyncpa [#allocation6 + $0x1], 0  ;;  %s5246_s24 = smov 0   ;;  %s5248_s25 = smov 0  }
   0xc   :  { %s5250_s26 = smov 0   ;;  %s5252_s27 = smov 0  }
   0xd   :  { %s5254_s28 = smov 0   ;;  %s5256_s29 = smov 0  }
   0xe   :  { %s5258_s30 = smov 0   ;;  %s5260_s8 = smov 0  }
   0xf LB: > { %9852 = sst [smem:[#allocation18_spill]] %s5161_s24  ;;  %s4505_s9 = sadd.s32 4294967295, %s5189_s8   ;;  %s5189_s8 = sphi %s5260_s8, %s25_s8   ;;  %s5185_s30 = sphi %s5258_s30, %s10688_s30   ;;  %s5181_s29 = sphi %s5256_s29, %s10687_s29   ;;  %s5177_s28 = sphi %s5254_s28, %s10686_s28   ;;  %s5173_s27 = sphi %s5252_s27, %s10685_s27   ;;  %s5169_s26 = sphi %s5250_s26, %s10684_s26   ;;  %s5165_s25 = sphi %s5248_s25, %s10683_s25   ;;  %s5161_s24 = sphi %s5246_s24, %s10682_s24  }
  0x10   : > { %9853 = sst [smem:[#allocation19_spill]] %s5189_s8  ;;  %s4506_s10 = sadd.s32 4294967294, %s5189_s8  }
  0x11   : > { %p59_p0 = scmp.ne.s32.totalorder %s5165_s25, %s5161_s24  ;;  %p5290_p1 = scmp.eq.s32.totalorder %s4505_s9, 0 }
  0x12   : > { %p5294_p2 = scmp.eq.s32.totalorder %s4505_s9, 3  ;;  %p217_p3 = scmp.eq.s32.totalorder %s4506_s10, 3 }
  0x13   : > { %s9854_s11 = scalar_select %p5290_p1, 1, 0 }
  0x14   : > { %p5300_p4 = por %p5290_p1, %p59_p0  ;;  %p4507_p5 = scmp.ge.s32.totalorder %s5189_s8, 1 }
  0x15   : > { %p5305_p6 = por %p217_p3, %p59_p0  ;;  %p224_p7 = scmp.lt.s32.totalorder %s5189_s8, 5 }
  0x16   : > { %s9856_s13 = scalar_select %p5300_p4, 1, 0 }
  0x17   : > { %s9857_s14 = scalar_select %p5305_p6, 1, 0 }
  0x18   : > { %p5310_p8 = pnand %p4507_p5, %p224_p7  ;;  %s5191_s16 = smov [#allocation7]  }
  0x19   : > { %9858 = sst [smem:[#allocation20_spill]] %s9857_s14  ;;  %s236_s17 = sshll.u32 %s5191_s16, 4  ;;  %s237_s17 = int_to_ptr.vmem [resolvable:$true] %s236_s17 }
  0x1a   : > { %s9859_s15 = scalar_select %p5310_p8, 1, 0 }
  0x1b   : > { %p4771_p9 = pneg %p5310_p8  ;;  %s5192_s19 = smov [#allocation10]  }
  0x1c   : > { %s260_s20 = sshll.u32 %s5192_s19, 4  ;;  %s5193_s21 = smov [#allocation9]   ;;  %s261_s20 = int_to_ptr.vmem [resolvable:$true] %s260_s20 }
  0x1d   : > { %p5318_p10 = pnand %p4771_p9, %p5290_p1  ;;  %s250_s22 = sshll.u32 %s5193_s21, 4  ;;  %s251_s22 = int_to_ptr.vmem [resolvable:$true] %s250_s22 }
  0x1e   : > { %s4964_s23 = scalar_lea.vmem %s237_s17, 4096  ;;  %p4972_p3 = scmp.lt.s32.totalorder %s237_s17, %s237_s17 }
  0x1f   : > { %p4955_p11 = pneg %p5318_p10  ;;  %p4965_p12 = scmp.ne.s32.totalorder %s237_s17, %s4964_s23 }
  0x20   : > { %p4973_p5 = scmp.lt.s32.totalorder %s4964_s23, %s4964_s23 }
  0x21   : > { %p4967_p13 = pnand %p4965_p12, %p4955_p11 }
  0x22   : > { %p4974_p7 = por %p4973_p5, %p4972_p3 }
  0x23   : > { %p4968_p0 = pneg %p4967_p13 }
  0x25   : > { %p4975_p9 = pnand %p4974_p7, %p4968_p0 }
  0x27   : > { %4978 = shalt.err (!%p4975_p9)
}
  0x28   : > { %s5194_s9 = smov 256   ;;  %s5195_s10 = smov 16  }
  0x29   : > { %s9861_s1 = sld [smem:[#allocation125_spill]]  ;;  %s4990_s21 = scalar_lea.vmem %s261_s20, 768 }
  0x2a   : > { %p4991_p6 = scmp.ne.s32.totalorder %s261_s20, %s4990_s21  ;;  %p4998_p1 = scmp.lt.s32.totalorder %s261_s20, %s261_s20 }
  0x2b   : > { %p4999_p4 = scmp.lt.s32.totalorder %s4990_s21, %s4990_s21 }
  0x2c   : > { %p4993_p12 = pnand %p4991_p6, %p4955_p11 }
  0x2d   : > { %p5000_p3 = por %p4999_p4, %p4998_p1 }
  0x2e   : > { %p4994_p13 = pneg %p4993_p12 }
  0x2f   : > { %4774 = dma.hbm_to_vmem [thread:$0]  (!%p5318_p10), %s9861_s1, 4096, %s237_s17, [#allocation8], %s5194_s9, %s5194_s9, %s5195_s10  }
  0x30   : > { %p5001_p0 = pnand %p5000_p3, %p4994_p13 }
  0x32   : > { %5004 = shalt.err (!%p5001_p0)
}
  0x33   : > { %s9862_s3 = sld [smem:[#allocation127_spill]]  ;;  %s5016_s17 = scalar_lea.vmem %s251_s22, 64 }
  0x34   : > { %p5017_p5 = scmp.ne.s32.totalorder %s251_s22, %s5016_s17  ;;  %p5024_p9 = scmp.lt.s32.totalorder %s251_s22, %s251_s22 }
  0x35   : > { %p5025_p12 = scmp.lt.s32.totalorder %s5016_s17, %s5016_s17 }
  0x36   : > { %p5019_p7 = pnand %p5017_p5, %p4955_p11 }
  0x37   : > { %p5026_p8 = por %p5025_p12, %p5024_p9 }
  0x38   : > { %p5020_p6 = pneg %p5019_p7 }
  0x39   : > { %4780 = dma.hbm_to_vmem [thread:$0]  (!%p5318_p10), %s9862_s3, 768, %s261_s20, [#allocation11], %s5194_s9, %s5194_s9, %s5195_s10  }
  0x3a   : > { %p5027_p1 = pnand %p5026_p8, %p5020_p6 }
  0x3c   : > { %5030 = shalt.err (!%p5027_p1)
}
  0x3d   : > { %s9863_s2 = sld [smem:[#allocation126_spill]]  ;;  %s5196_s14 = smov [#allocation12]  }
  0x3e   : > { %s276_s20 = sshll.u32 %s5196_s14, 4  ;;  %s277_s20 = int_to_ptr.vmem [resolvable:$true] %s276_s20 }
  0x3f   : > { %s5042_s9 = scalar_lea.vmem %s277_s20, 2048  ;;  %p5050_p0 = scmp.lt.s32.totalorder %s277_s20, %s277_s20 }
  0x40   : > { %p5043_p4 = scmp.ne.s32.totalorder %s277_s20, %s5042_s9  ;;  %p5051_p5 = scmp.lt.s32.totalorder %s5042_s9, %s5042_s9 }
  0x42   : > { %p5045_p13 = pnand %p5043_p4, %p4955_p11  ;;  %p5052_p8 = por %p5051_p5, %p5050_p0 }
  0x43   : > { %4777 = dma.hbm_to_vmem [thread:$0]  (!%p5318_p10), %s9863_s2, 64, %s251_s22, [#allocation8]  }
  0x44   : > { %p5046_p3 = pneg %p5045_p13 }
  0x46   : > { %p5053_p7 = pnand %p5052_p8, %p5046_p3 }
  0x48   : > { %5056 = shalt.err (!%p5053_p7)
}
  0x49   : > { %s9338_s10 = smov 64   ;;  %s9339_s22 = smov 4  }
  0x4a   : > { %s9864_s5 = sld [smem:[#allocation128_spill]]  ;;  %s34_s17 = sadd.s32 1, %s5181_s29 }
  0x4b   : > { %s37_s16 = sadd.s32 1, %s5185_s30  ;;  %p35_p11 = scmp.ge.s32.totalorder %s34_s17, 2 }
  0x4c   : > { %s46_s19 = sadd.s32 1, %s5169_s26  ;;  %p53_p6 = scmp.ne.s32.totalorder %s5169_s26, %s5165_s25 }
  0x4d   : > { %p54_p9 = scmp.eq.s32.totalorder %s5189_s8, 0  ;;  %s10690_s17 = smov (%p35_p11, %s34_s17), 0 }
  0x4e   : > { %9865 = sst [smem:[#allocation21_spill]] %s10690_s17  ;;  %s10692_s16 = smov (!%p35_p11, %s37_s16), %s5185_s30 }
  0x4f   : > { %s42_s18 = ssub.s32 %s5181_s29, %s10690_s17  ;;  %p5370_p12 = por %p54_p9, %p53_p6 }
  0x50   : > { %4783 = dma.hbm_to_vmem [thread:$0]  (!%p5318_p10), %s9864_s5, 2048, %s277_s20, [#allocation11], %s9338_s10, %s9338_s10, %s9339_s22  }
  0x51   : > { %p39_p10 = scmp.ge.s32.totalorder %s10692_s16, 2  ;;  %p5376_p1 = por %p5294_p2, %p53_p6 }
  0x52   : > { %p4796_p4 = scmp.lt.s32.totalorder %s5189_s8, 4  ;;  %s293_s9 = sand.u32 1, %s5169_s26  }
  0x53   : > { %s10694_s16 = smov (%p39_p10, %s10692_s16), 0  ;;  %s4747_s21 = smul.u32 80, %s293_s9 }
  0x54   : > { %9868 = sst [smem:[#allocation22_spill]] %s10694_s16  ;;  %s41_s23 = ssub.s32 %s5185_s30, %s10694_s16 }
  0x55   : > { %s4748_s10 = smul.u32 20, %s5181_s29  ;;  %s43_s22 = sor.u32 %s42_s18, %s41_s23 }
  0x56   : > { %p44_p13 = scmp.eq.s32.totalorder %s43_s22, 0  ;;  %s4749_s1 = smul.u32 40, %s5185_s30 }
  0x57   : > { %s297_s2 = scalar_lea.vmem [#allocation4], %s4747_s21  ;;  %p5390_p3 = pnand %p4796_p4, %p5370_p12 }
  0x58   : > { %s306_s3 = sshll.u32 %s297_s2, 4  ;;  %s303_s17 = sadd.s32 %s4749_s1, %s4748_s10  ;;  %s307_s3 = int_to_ptr.vmem [resolvable:$true] %s306_s3 }
  0x59   : > { %s5395_s5 = scalar_select %p44_p13, %s5169_s26, %s46_s19  }
  0x5a   : > { %s4513_s24 = sshll.u32 %s303_s17, 6  ;;  %s294_s18 = scalar_lea.sflag [#allocation5], %s293_s9 }
  0x5b   : > { %s305_s16 = scalar_lea.hbm %s9325_s0, %s4513_s24  ;;  %p5059_p2 = pneg %p5390_p3 }
  0x5c   : > { %s5070_s22 = scalar_lea.vmem %s307_s3, 1280  ;;  %s5199_s2 = smov [#allocation4]  }
  0x5d   : > { %p5071_p0 = scmp.ne.s32.totalorder %s307_s3, %s5070_s22  ;;  %s5075_s14 = sshll.u32 %s5199_s2, 4  ;;  %s5076_s14 = int_to_ptr.vmem [resolvable:$false] %s5075_s14 }
  0x5e   : > { %s5077_s21 = scalar_lea.vmem %s5076_s14, 2560  ;;  %p5078_p7 = scmp.lt.s32.totalorder %s307_s3, %s5076_s14 }
  0x5f   : > { %p5073_p5 = pnand %p5071_p0, %p5059_p2  ;;  %p5079_p11 = scmp.lt.s32.totalorder %s5077_s21, %s5070_s22 }
  0x61   : > { %p5074_p8 = pneg %p5073_p5  ;;  %p5080_p6 = por %p5079_p11, %p5078_p7 }
  0x63   : > { %p5081_p9 = pnand %p5080_p6, %p5074_p8 }
  0x65   : > { %5084 = shalt.err (!%p5081_p9)
}
  0x66   : > { %s9870_s1 = smov 4   ;;  %s9871_s7 = smov 64  }
  0x67   : > { %4787 = dma.hbm_to_vmem [thread:$0]  (!%p5390_p3), %s305_s16, 1280, %s307_s3, %s294_s18, %s9871_s7, %s9871_s7, %s9870_s1  }
  0x68   : > { %p9872_p12 = scmp.ne.s32.totalorder %s9859_s15, 0 }
  0x6a   : > { %318 = sbr.rel (%p9872_p12) target bundleno = 1253 (0x4e5), region = 48 }
  0x6f   : > { %s5410_s24 = sand.u32 1, %s5165_s25   ;;  %p9873_p10 = scmp.ne.s32.totalorder %s9856_s13, 0 }
  0x70   : > { %s4750_s8 = smul.u32 80, %s5410_s24  ;;  %s321_s10 = scalar_lea.sflag [#allocation5], %s5410_s24 }
  0x72   : > { %s5414_s17 = scalar_lea.vmem [#allocation4], %s4750_s8 }
  0x73   : > { %5144 = dma.done.wait (%p9873_p10), %s321_s10, 1280  }
  0x74   : > { %5146 = vsyncadd (%p9873_p10), %s321_s10, 4294966016  ;;  %p9874_p4 = scmp.ne.s32.totalorder %s9854_s11, 0 }
  0x76   : > { %5148 = dma.done.wait (%p9874_p4), [#allocation8], 4160  }
  0x77   : > { %5150 = vsyncadd (%p9874_p4), [#allocation8], 4294963136 }
  0x78   : > { %5152 = dma.done.wait (%p9874_p4), [#allocation11], 2816  }
  0x79   : > { %5154 = vsyncadd (%p9874_p4), [#allocation11], 4294964480  ;;  %s4519_s3 = sshll.u32 %s5410_s24, 5  ;;  %v5200_v0 = vmov 0   ;;  %v4879_v1 = vld [vmem:[#allocation7 + $0xe4] ss:$16 sps:$4 sm:$0xff]   ;;  %v427_v43 = vlaneseq }
  0x7a   : > { %759 = vmatprep.mubr.bf16.mxu1 %v5200_v0  ;;  %699 = vmatprep.mubr.bf16.mxu0 %v5200_v0  ;;  %v4881_v2 = vld [vmem:[#allocation7 + $0xe0] ss:$16 sps:$4 sm:$0xff]   ;;  %v4882_v3 = vld [vmem:[#allocation7 + $0xc4] ss:$16 sps:$4 sm:$0xff]   ;;  %v4906_v17 = vld [vmem:[#allocation7 + $0xec] ss:$16 sps:$4 sm:$0xff]  }
  0x7b   : > { %4731 = vmatprep.subr.bf16.mxu1 %v4879_v1  ;;  %667 = vmatprep.subr.bf16.mxu0 %v4879_v1  ;;  %v4884_v4 = vld [vmem:[#allocation7 + $0xc0] ss:$16 sps:$4 sm:$0xff]   ;;  %v4885_v5 = vld [vmem:[#allocation7 + $0xa4] ss:$16 sps:$4 sm:$0xff]   ;;  %v4904_v19 = vld [vmem:[#allocation7 + $0xe8] ss:$16 sps:$4 sm:$0xff]  }
  0x7c   : > { %4739 = vmatpush1.bf16.msra.mxu1 %v4881_v2  ;;  %668 = vmatpush1.bf16.msra.mxu0 %v4881_v2  ;;  %v4887_v6 = vld [vmem:[#allocation7 + $0xa0] ss:$16 sps:$4 sm:$0xff]   ;;  %v4888_v7 = vld [vmem:[#allocation7 + $0x84] ss:$16 sps:$4 sm:$0xff]   ;;  %v4909_v20 = vld [vmem:[#allocation7 + $0xcc] ss:$16 sps:$4 sm:$0xff]  }
  0x7d   : > { %4732 = vmatprep.subr.bf16.mxu1 %v4882_v3  ;;  %669 = vmatprep.subr.bf16.mxu0 %v4882_v3  ;;  %v4890_v8 = vld [vmem:[#allocation7 + $0x80] ss:$16 sps:$4 sm:$0xff]   ;;  %v4891_v9 = vld [vmem:[#allocation7 + $0x64] ss:$16 sps:$4 sm:$0xff]   ;;  %v4907_v22 = vld [vmem:[#allocation7 + $0xc8] ss:$16 sps:$4 sm:$0xff]  }
  0x7e   : > { %v4893_v10 = vld [vmem:[#allocation7 + $0x60] ss:$16 sps:$4 sm:$0xff]   ;;  %v4894_v11 = vld [vmem:[#allocation7 + $0x44] ss:$16 sps:$4 sm:$0xff]   ;;  %v4913_v23 = vld [vmem:[#allocation7 + $0xac] ss:$16 sps:$4 sm:$0xff]  }
  0x7f   : > { %v4896_v12 = vld [vmem:[#allocation7 + $0x40] ss:$16 sps:$4 sm:$0xff]   ;;  %v4897_v13 = vld [vmem:[#allocation7 + $0x24] ss:$16 sps:$4 sm:$0xff]   ;;  %v4910_v24 = vld [vmem:[%s5414_s17 + $0x38] sm:$0xff]   ;;  %v5463_v44 = vshrl.u32 %v427_v43, 7 }
  0x80   : > { %4740 = vmatpush1.bf16.msra.mxu1 %v4884_v4  ;;  %670 = vmatpush1.bf16.msra.mxu0 %v4884_v4  ;;  %v4899_v14 = vld [vmem:[#allocation7 + $0x20] ss:$16 sps:$4 sm:$0xff]   ;;  %v4900_v15 = vld [vmem:[#allocation7 + $0x4] ss:$16 sps:$4 sm:$0xff]   ;;  %v4911_v25 = vld [vmem:[#allocation7 + $0xa8] ss:$16 sps:$4 sm:$0xff]  }
  0x81   : > { %4733 = vmatprep.subr.bf16.mxu1 %v4885_v5  ;;  %671 = vmatprep.subr.bf16.mxu0 %v4885_v5  ;;  %v4902_v16 = vld [vmem:[#allocation7] ss:$16 sps:$4 sm:$0xff]   ;;  %v4916_v26 = vld [vmem:[#allocation7 + $0x8c] ss:$16 sps:$4 sm:$0xff]   ;;  %v4914_v28 = vld [vmem:[#allocation7 + $0x88] ss:$16 sps:$4 sm:$0xff]  }
  0x82   : > { %v5432_v18 = vld [vmem:[%s5414_s17 + $0x30] sm:$0xff]   ;;  %v4931_v21 = vld [vmem:[%s5414_s17] sm:$0xff]   ;;  %v4932_v27 = vld [vmem:[%s5414_s17 + $0x8] sm:$0xff]   ;;  %v5466_v45 = vsub.s32 0, %v5463_v44  ;;  %v5469_v46 = vsub.s32 1, %v5463_v44  ;;  %s5576_s11 = scalar_lea.vmem [#allocation13], %s4519_s3 }
  0x83   : > { %v4920_v29 = vld [vmem:[#allocation7 + $0x6c] ss:$16 sps:$4 sm:$0xff]   ;;  %v4917_v30 = vld [vmem:[%s5414_s17 + $0x40] sm:$0xff]   ;;  %v4918_v31 = vld [vmem:[#allocation7 + $0x68] ss:$16 sps:$4 sm:$0xff]   ;;  %p4602_p13 = scmp.ne.s32.totalorder %s5173_s27, 0 }
  0x84   : > { %4741 = vmatpush1.bf16.msra.mxu1 %v4887_v6  ;;  %672 = vmatpush1.bf16.msra.mxu0 %v4887_v6  ;;  %v4923_v32 = vld [vmem:[#allocation7 + $0x4c] ss:$16 sps:$4 sm:$0xff]   ;;  %v4933_v33 = vld [vmem:[%s5414_s17 + $0x10] sm:$0xff]   ;;  %v4921_v34 = vld [vmem:[#allocation7 + $0x48] ss:$16 sps:$4 sm:$0xff]  }
  0x85   : > { %4734 = vmatprep.subr.bf16.mxu1 %v4888_v7  ;;  %673 = vmatprep.subr.bf16.mxu0 %v4888_v7  ;;  %v4927_v35 = vld [vmem:[#allocation7 + $0x2c] ss:$16 sps:$4 sm:$0xff]   ;;  %v4925_v37 = vld [vmem:[#allocation7 + $0x28] ss:$16 sps:$4 sm:$0xff]   ;;  %v4935_v41 = vld [vmem:[%s5414_s17 + $0x20] sm:$0xff]  }
  0x86   : > { %v4924_v36 = vld [vmem:[%s5414_s17 + $0x48] sm:$0xff]   ;;  %v4934_v39 = vld [vmem:[%s5414_s17 + $0x18] sm:$0xff]   ;;  %v5471_v47 = vld [vmem:[#allocation9] sm:$0xf] }
  0x87   : > { %v4930_v38 = vld [vmem:[#allocation7 + $0xc] ss:$16 sps:$4 sm:$0xff]   ;;  %v4928_v40 = vld [vmem:[#allocation7 + $0x8] ss:$16 sps:$4 sm:$0xff]   ;;  %v5475_v48 = vrot.slane %v5471_v47, %v5466_v45  ;;  %v5479_v49 = vrot.slane %v5471_v47, %v5469_v46 }
  0x88   : > { %4742 = vmatpush1.bf16.msra.mxu1 %v4890_v8  ;;  %674 = vmatpush1.bf16.msra.mxu0 %v4890_v8  ;;  %v4936_v42 = vld [vmem:[%s5414_s17 + $0x28] sm:$0xff]  }
  0x89   : > { %4735 = vmatprep.subr.bf16.mxu1 %v4891_v9  ;;  %675 = vmatprep.subr.bf16.mxu0 %v4891_v9 }
  0x8c   : > { %4743 = vmatpush1.bf16.msra.mxu1 %v4893_v10  ;;  %676 = vmatpush1.bf16.msra.mxu0 %v4893_v10 }
  0x8d   : > { %4736 = vmatprep.subr.bf16.mxu1 %v4894_v11  ;;  %677 = vmatprep.subr.bf16.mxu0 %v4894_v11 }
  0x90   : > { %4744 = vmatpush1.bf16.msra.mxu1 %v4896_v12  ;;  %678 = vmatpush1.bf16.msra.mxu0 %v4896_v12 }
  0x91   : > { %4737 = vmatprep.subr.bf16.mxu1 %v4897_v13  ;;  %679 = vmatprep.subr.bf16.mxu0 %v4897_v13 }
  0x94   : > { %4745 = vmatpush1.bf16.msra.mxu1 %v4899_v14  ;;  %680 = vmatpush1.bf16.msra.mxu0 %v4899_v14 }
  0x95   : > { %4738 = vmatprep.subr.bf16.mxu1 %v4900_v15  ;;  %681 = vmatprep.subr.bf16.mxu0 %v4900_v15 }
  0x98   : > { %4746 = vmatpush1.bf16.msra.mxu1 %v4902_v16  ;;  %682 = vmatpush1.bf16.msra.mxu0 %v4902_v16 }
  0x99   : > { %800 = vmatprep.subr.bf16.mxu1 %v4906_v17 }
  0x9b   : > { %760 = vmatmul.mubr.bf16.vlgmr.msra.gmra.mxu1 %v5432_v18  ;;  %700 = vmatmul.mubr.bf16.vlgmr.msra.gmra.mxu0 %v4931_v21 }
  0x9c   : > { %801 = vmatpush1.bf16.msra.mxu1 %v4904_v19  ;;  %769 = vmatprep.mubr.bf16.mxu1 %v5200_v0 }
  0x9d   : > { %802 = vmatprep.subr.bf16.mxu1 %v4909_v20  ;;  %709 = vmatprep.mubr.bf16.mxu0 %v5200_v0 }
  0xa0   : > { %803 = vmatpush1.bf16.msra.mxu1 %v4907_v22 }
  0xa1   : > { %804 = vmatprep.subr.bf16.mxu1 %v4913_v23 }
  0xa3   : > { %770 = vmatmul.mubr.bf16.gmra.mxu1 %v4910_v24  ;;  %710 = vmatmul.mubr.bf16.gmra.mxu0 %v4932_v27 }
  0xa4   : > { %805 = vmatpush1.bf16.msra.mxu1 %v4911_v25  ;;  %779 = vmatprep.mubr.bf16.mxu1 %v5200_v0 }
  0xa5   : > { %806 = vmatprep.subr.bf16.mxu1 %v4916_v26  ;;  %719 = vmatprep.mubr.bf16.mxu0 %v5200_v0 }
  0xa8   : > { %807 = vmatpush1.bf16.msra.mxu1 %v4914_v28 }
  0xa9   : > { %808 = vmatprep.subr.bf16.mxu1 %v4920_v29 }
  0xab   : > { %780 = vmatmul.mubr.bf16.gmra.mxu1 %v4917_v30  ;;  %720 = vmatmul.mubr.bf16.gmra.mxu0 %v4933_v33 }
  0xac   : > { %809 = vmatpush1.bf16.msra.mxu1 %v4918_v31  ;;  %789 = vmatprep.mubr.bf16.mxu1 %v5200_v0 }
  0xad   : > { %810 = vmatprep.subr.bf16.mxu1 %v4923_v32  ;;  %729 = vmatprep.mubr.bf16.mxu0 %v5200_v0 }
  0xb0   : > { %811 = vmatpush1.bf16.msra.mxu1 %v4921_v34 }
  0xb1   : > { %812 = vmatprep.subr.bf16.mxu1 %v4927_v35 }
  0xb3   : > { %790 = vmatmul.mubr.bf16.gmra.mxu1 %v4924_v36  ;;  %730 = vmatmul.mubr.bf16.gmra.mxu0 %v4934_v39 }
  0xb4   : > { %813 = vmatpush1.bf16.msra.mxu1 %v4925_v37  ;;  %832 = vmatprep.mubr.bf16.mxu1 %v5200_v0 }
  0xb5   : > { %814 = vmatprep.subr.bf16.mxu1 %v4930_v38  ;;  %739 = vmatprep.mubr.bf16.mxu0 %v5200_v0 }
  0xb8   : > { %815 = vmatpush1.bf16.msra.mxu1 %v4928_v40 }
  0xbb   : > { %833 = vmatmul.mubr.bf16.vlgmr.msra.gmra.mxu1 %v4931_v21  ;;  %740 = vmatmul.mubr.bf16.gmra.mxu0 %v4935_v41 }
  0xbc   : > { %842 = vmatprep.mubr.bf16.mxu1 %v5200_v0  ;;  %749 = vmatprep.mubr.bf16.mxu0 %v5200_v0 }
  0xc3   : > { %843 = vmatmul.mubr.bf16.gmra.mxu1 %v4932_v27  ;;  %750 = vmatmul.mubr.bf16.gmra.mxu0 %v4936_v42 }
  0xc4   : > { %852 = vmatprep.mubr.bf16.mxu1 %v5200_v0 }
  0xcb   : > { %853 = vmatmul.mubr.bf16.gmra.mxu1 %v4933_v33 }
  0xcc   : > { %862 = vmatprep.mubr.bf16.mxu1 %v5200_v0 }
  0xd3   : > { %863 = vmatmul.mubr.bf16.gmra.mxu1 %v4934_v39 }
  0xd4   : > { %872 = vmatprep.mubr.bf16.mxu1 %v5200_v0 }
  0xdb   : > { %873 = vmatmul.mubr.bf16.gmra.mxu1 %v4935_v41 }
  0xdc   : > { %882 = vmatprep.mubr.bf16.mxu1 %v5200_v0 }
  0xe3   : > { %883 = vmatmul.mubr.bf16.gmra.mxu1 %v4936_v42 }
  0xe4   : > { %892 = vmatprep.mubr.bf16.mxu1 %v5200_v0 }
  0xeb   : > { %893 = vmatmul.mubr.bf16.gmra.mxu1 %v5432_v18 }
  0xec   : > { %902 = vmatprep.mubr.bf16.mxu1 %v5200_v0 }
  0xf3   : > { %903 = vmatmul.mubr.bf16.gmra.mxu1 %v4910_v24 }
  0xf4   : > { %912 = vmatprep.mubr.bf16.mxu1 %v5200_v0 }
  0xfb   : > { %913 = vmatmul.mubr.bf16.gmra.mxu1 %v4917_v30 }
  0xfc   : > { %922 = vmatprep.mubr.bf16.mxu1 %v5200_v0 }
 0x103   : > { %923 = vmatmul.mubr.bf16.gmra.mxu1 %v4924_v36 }
 0x15b   : > { %v761_v50 = vpop.f32.mrf.mxu1  ;;  %v701_v51 = vpop.f32.mrf.mxu0 }
 0x15c   : > { %v702_v52 = vadd.f32 %v701_v51, %v5475_v48  ;;  %v762_v55 = vadd.f32 %v761_v50, %v5475_v48 }
 0x15d   : > { %v763_v53 = vpop.f32.mrf.mxu1  ;;  %v703_v54 = vpop.f32.mrf.mxu0 }
 0x15e   : > { %v764_v56 = vadd.f32 %v763_v53, %v5479_v49  ;;  %v704_v57 = vadd.f32 %v703_v54, %v5479_v49 }
 0x15f   : > { %v765_v58 = vpop.f32.mrf.mxu1  ;;  %v705_v59 = vpop.f32.mrf.mxu0 }
 0x160   : > { %v4651_v60 = vpack.c.bf16 %v764_v56, %v762_v55  ;;  %v4627_v61 = vpack.c.bf16 %v704_v57, %v702_v52  ;;  %v706_v62 = vadd.f32 %v705_v59, %v5475_v48  ;;  %v766_v1 = vadd.f32 %v765_v58, %v5475_v48 }
 0x161   : > { %v767_v63 = vpop.f32.mrf.mxu1  ;;  %v707_v0 = vpop.f32.mrf.mxu0  ;;  %v5507_v56 = vsub.s32 2, %v5463_v44 }
 0x162   : > { %1197 = vst [vmem:[#allocation2 + $0xc0] sm:$0xff] %v4651_v60  ;;  %v768_v2 = vadd.f32 %v767_v63, %v5479_v49  ;;  %1173 = vst [vmem:[#allocation2 + $0xb0] sm:$0xff] %v4627_v61  ;;  %v708_v3 = vadd.f32 %v707_v0, %v5479_v49  ;;  %v9346_v60 = vsub.s32 3, %v5463_v44 }
 0x163   : > { %v771_v4 = vpop.f32.mrf.mxu1  ;;  %v711_v5 = vpop.f32.mrf.mxu0 }
 0x164   : > { %v4653_v6 = vpack.c.bf16 %v768_v2, %v766_v1  ;;  %v4629_v7 = vpack.c.bf16 %v708_v3, %v706_v62  ;;  %v712_v8 = vadd.f32 %v711_v5, %v5475_v48  ;;  %v772_v11 = vadd.f32 %v771_v4, %v5475_v48 }
 0x165   : > { %v773_v9 = vpop.f32.mrf.mxu1  ;;  %v713_v10 = vpop.f32.mrf.mxu0  ;;  %v5516_v4 = vrot.slane %v5471_v47, %v5507_v56 }
 0x166   : > { %1199 = vst [vmem:[#allocation2 + $0xd8] sm:$0xff] %v4653_v6  ;;  %v774_v12 = vadd.f32 %v773_v9, %v5479_v49  ;;  %1175 = vst [vmem:[#allocation2 + $0x10] sm:$0xff] %v4629_v7  ;;  %v714_v13 = vadd.f32 %v713_v10, %v5479_v49 }
 0x167   : > { %v775_v14 = vpop.f32.mrf.mxu1  ;;  %v715_v15 = vpop.f32.mrf.mxu0 }
 0x168   : > { %v4655_v16 = vpack.c.bf16 %v774_v12, %v772_v11  ;;  %v4631_v17 = vpack.c.bf16 %v714_v13, %v712_v8  ;;  %v716_v18 = vadd.f32 %v715_v15, %v5475_v48  ;;  %v776_v21 = vadd.f32 %v775_v14, %v5475_v48 }
 0x169   : > { %v777_v19 = vpop.f32.mrf.mxu1  ;;  %v717_v20 = vpop.f32.mrf.mxu0  ;;  %v5523_v8 = vrot.slane %v5471_v47, %v9346_v60 }
 0x16a   : > { %1201 = vst [vmem:[#allocation2 + $0x68] sm:$0xff] %v4655_v16  ;;  %v778_v22 = vadd.f32 %v777_v19, %v5479_v49  ;;  %1177 = vst [vmem:[#allocation2 + $0x120] sm:$0xff] %v4631_v17  ;;  %v718_v23 = vadd.f32 %v717_v20, %v5479_v49 }
 0x16b   : > { %v781_v24 = vpop.f32.mrf.mxu1  ;;  %v721_v25 = vpop.f32.mrf.mxu0 }
 0x16c   : > { %v4657_v26 = vpack.c.bf16 %v778_v22, %v776_v21  ;;  %v4633_v27 = vpack.c.bf16 %v718_v23, %v716_v18  ;;  %v722_v28 = vadd.f32 %v721_v25, %v5475_v48  ;;  %v782_v31 = vadd.f32 %v781_v24, %v5475_v48 }
 0x16d   : > { %v783_v29 = vpop.f32.mrf.mxu1  ;;  %v723_v30 = vpop.f32.mrf.mxu0 }
 0x16e   : > { %1203 = vst [vmem:[#allocation2 + $0x50] sm:$0xff] %v4657_v26  ;;  %v784_v32 = vadd.f32 %v783_v29, %v5479_v49  ;;  %1179 = vst [vmem:[#allocation2 + $0xf8] sm:$0xff] %v4633_v27  ;;  %v724_v33 = vadd.f32 %v723_v30, %v5479_v49 }
 0x16f   : > { %v785_v34 = vpop.f32.mrf.mxu1  ;;  %v725_v35 = vpop.f32.mrf.mxu0 }
 0x170   : > { %v4659_v36 = vpack.c.bf16 %v784_v32, %v782_v31  ;;  %v4635_v37 = vpack.c.bf16 %v724_v33, %v722_v28  ;;  %v726_v38 = vadd.f32 %v725_v35, %v5475_v48  ;;  %v786_v41 = vadd.f32 %v785_v34, %v5475_v48 }
 0x171   : > { %v787_v39 = vpop.f32.mrf.mxu1  ;;  %v727_v40 = vpop.f32.mrf.mxu0 }
 0x172   : > { %1205 = vst [vmem:[#allocation2 + $0x58] sm:$0xff] %v4659_v36  ;;  %v788_v42 = vadd.f32 %v787_v39, %v5479_v49  ;;  %1181 = vst [vmem:[#allocation2 + $0x80] sm:$0xff] %v4635_v37  ;;  %v728_v43 = vadd.f32 %v727_v40, %v5479_v49 }
 0x173   : > { %v791_v50 = vpop.f32.mrf.mxu1  ;;  %v731_v51 = vpop.f32.mrf.mxu0 }
 0x174   : > { %v4661_v52 = vpack.c.bf16 %v788_v42, %v786_v41  ;;  %v4637_v53 = vpack.c.bf16 %v728_v43, %v726_v38  ;;  %v732_v54 = vadd.f32 %v731_v51, %v5475_v48  ;;  %v792_v58 = vadd.f32 %v791_v50, %v5475_v48 }
 0x175   : > { %v793_v55 = vpop.f32.mrf.mxu1  ;;  %v733_v57 = vpop.f32.mrf.mxu0 }
 0x176   : > { %1207 = vst [vmem:[#allocation2 + $0x30] sm:$0xff] %v4661_v52  ;;  %v794_v59 = vadd.f32 %v793_v55, %v5479_v49  ;;  %1183 = vst [vmem:[#allocation2 + $0x138] sm:$0xff] %v4637_v53  ;;  %v734_v61 = vadd.f32 %v733_v57, %v5479_v49 }
 0x177   : > { %v795_v62 = vpop.f32.mrf.mxu1  ;;  %v735_v63 = vpop.f32.mrf.mxu0 }
 0x178   : > { %v4663_v0 = vpack.c.bf16 %v794_v59, %v792_v58  ;;  %v4639_v1 = vpack.c.bf16 %v734_v61, %v732_v54  ;;  %v736_v2 = vadd.f32 %v735_v63, %v5475_v48  ;;  %v796_v6 = vadd.f32 %v795_v62, %v5475_v48 }
 0x179   : > { %v797_v3 = vpop.f32.mrf.mxu1  ;;  %v737_v5 = vpop.f32.mrf.mxu0 }
 0x17a   : > { %1209 = vst [vmem:[#allocation2 + $0x28] sm:$0xff] %v4663_v0  ;;  %v798_v7 = vadd.f32 %v797_v3, %v5479_v49  ;;  %1185 = vst [vmem:[#allocation2 + $0x18] sm:$0xff] %v4639_v1  ;;  %v738_v9 = vadd.f32 %v737_v5, %v5479_v49 }
 0x17b   : > { %v834_v10 = vpop.f32.mrf.mxu1  ;;  %v741_v11 = vpop.f32.mrf.mxu0 }
 0x17c   : > { %v4665_v12 = vpack.c.bf16 %v798_v7, %v796_v6  ;;  %v4641_v13 = vpack.c.bf16 %v738_v9, %v736_v2  ;;  %v742_v14 = vadd.f32 %v741_v11, %v5475_v48  ;;  %v835_v17 = vadd.f32 %v834_v10, %v5516_v4 }
 0x17d   : > { %v836_v15 = vpop.f32.mrf.mxu1  ;;  %v743_v16 = vpop.f32.mrf.mxu0 }
 0x17e   : > { %1211 = vst [vmem:[#allocation2 + $0xb8] sm:$0xff] %v4665_v12  ;;  %v837_v18 = vadd.f32 %v836_v15, %v5523_v8  ;;  %1187 = vst [vmem:[#allocation2 + $0x70] sm:$0xff] %v4641_v13  ;;  %v744_v47 = vadd.f32 %v743_v16, %v5479_v49 }
 0x17f   : > { %v838_v19 = vpop.f32.mrf.mxu1  ;;  %v745_v20 = vpop.f32.mrf.mxu0 }
 0x180   : > { %v4628_v21 = vpack.c.bf16 %v837_v18, %v835_v17  ;;  %v4643_v22 = vpack.c.bf16 %v744_v47, %v742_v14  ;;  %v746_v23 = vadd.f32 %v745_v20, %v5475_v48  ;;  %v839_v26 = vadd.f32 %v838_v19, %v5516_v4 }
 0x181   : > { %v840_v24 = vpop.f32.mrf.mxu1  ;;  %v747_v25 = vpop.f32.mrf.mxu0 }
 0x182   : > { %1174 = vst [vmem:[#allocation2 + $0xd0] sm:$0xff] %v4628_v21  ;;  %v841_v27 = vadd.f32 %v840_v24, %v5523_v8  ;;  %1189 = vst [vmem:[#allocation2 + $0x128] sm:$0xff] %v4643_v22  ;;  %v748_v28 = vadd.f32 %v747_v25, %v5479_v49 }
 0x183   : > { %v844_v29 = vpop.f32.mrf.mxu1  ;;  %v751_v30 = vpop.f32.mrf.mxu0 }
 0x184   : > { %v4630_v31 = vpack.c.bf16 %v841_v27, %v839_v26  ;;  %v4645_v32 = vpack.c.bf16 %v748_v28, %v746_v23  ;;  %v752_v33 = vadd.f32 %v751_v30, %v5475_v48  ;;  %v845_v36 = vadd.f32 %v844_v29, %v5516_v4 }
 0x185   : > { %v846_v34 = vpop.f32.mrf.mxu1  ;;  %v753_v35 = vpop.f32.mrf.mxu0 }
 0x186   : > { %1176 = vst [vmem:[#allocation2 + $0x48] sm:$0xff] %v4630_v31  ;;  %v847_v37 = vadd.f32 %v846_v34, %v5523_v8  ;;  %1191 = vst [vmem:[#allocation2 + $0x8] sm:$0xff] %v4645_v32  ;;  %v754_v38 = vadd.f32 %v753_v35, %v5479_v49 }
 0x187   : > { %v848_v39 = vpop.f32.mrf.mxu1  ;;  %v755_v40 = vpop.f32.mrf.mxu0 }
 0x188   : > { %v4632_v41 = vpack.c.bf16 %v847_v37, %v845_v36  ;;  %v4647_v42 = vpack.c.bf16 %v754_v38, %v752_v33  ;;  %v756_v43 = vadd.f32 %v755_v40, %v5475_v48  ;;  %v849_v52 = vadd.f32 %v848_v39, %v5516_v4 }
 0x189   : > { %v850_v50 = vpop.f32.mrf.mxu1  ;;  %v757_v51 = vpop.f32.mrf.mxu0 }
 0x18a   : > { %1178 = vst [vmem:[#allocation2 + $0x38] sm:$0xff] %v4632_v41  ;;  %v851_v53 = vadd.f32 %v850_v50, %v5523_v8  ;;  %1193 = vst [vmem:[#allocation2 + $0xa8] sm:$0xff] %v4647_v42  ;;  %v758_v54 = vadd.f32 %v757_v51, %v5479_v49 }
 0x18b   : > { %v854_v55 = vpop.f32.mrf.mxu1 }
 0x18c   : > { %v4634_v57 = vpack.c.bf16 %v851_v53, %v849_v52  ;;  %v4649_v58 = vpack.c.bf16 %v758_v54, %v756_v43  ;;  %v855_v61 = vadd.f32 %v854_v55, %v5516_v4 }
 0x18d   : > { %v856_v59 = vpop.f32.mrf.mxu1 }
 0x18e   : > { %1180 = vst [vmem:[#allocation2 + $0x100] sm:$0xff] %v4634_v57  ;;  %v857_v62 = vadd.f32 %v856_v59, %v5523_v8  ;;  %1195 = vst [vmem:[#allocation2 + $0xe0] sm:$0xff] %v4649_v58 }
 0x18f   : > { %v858_v48 = vpop.f32.mrf.mxu1 }
 0x190   : > { %v4636_v63 = vpack.c.bf16 %v857_v62, %v855_v61  ;;  %v859_v1 = vadd.f32 %v858_v48, %v5516_v4 }
 0x191   : > { %v860_v0 = vpop.f32.mrf.mxu1 }
 0x192   : > { %1182 = vst [vmem:[#allocation2 + $0x108] sm:$0xff] %v4636_v63  ;;  %v861_v2 = vadd.f32 %v860_v0, %v5523_v8 }
 0x193   : > { %v864_v3 = vpop.f32.mrf.mxu1 }
 0x194   : > { %v4638_v49 = vpack.c.bf16 %v861_v2, %v859_v1  ;;  %v865_v6 = vadd.f32 %v864_v3, %v5516_v4 }
 0x195   : > { %v866_v5 = vpop.f32.mrf.mxu1 }
 0x196   : > { %1184 = vst [vmem:[#allocation2 + $0xf0] sm:$0xff] %v4638_v49  ;;  %v867_v7 = vadd.f32 %v866_v5, %v5523_v8 }
 0x197   : > { %v868_v9 = vpop.f32.mrf.mxu1 }
 0x198   : > { %v4640_v10 = vpack.c.bf16 %v867_v7, %v865_v6  ;;  %v869_v12 = vadd.f32 %v868_v9, %v5516_v4 }
 0x199   : > { %v870_v11 = vpop.f32.mrf.mxu1 }
 0x19a   : > { %1186 = vst [vmem:[#allocation2 + $0xc8] sm:$0xff] %v4640_v10  ;;  %v871_v13 = vadd.f32 %v870_v11, %v5523_v8 }
 0x19b   : > { %v874_v14 = vpop.f32.mrf.mxu1 }
 0x19c   : > { %v4642_v15 = vpack.c.bf16 %v871_v13, %v869_v12  ;;  %v875_v17 = vadd.f32 %v874_v14, %v5516_v4 }
 0x19d   : > { %v876_v16 = vpop.f32.mrf.mxu1 }
 0x19e   : > { %1188 = vst [vmem:[#allocation2 + $0x20] sm:$0xff] %v4642_v15  ;;  %v877_v18 = vadd.f32 %v876_v16, %v5523_v8 }
 0x19f   : > { %v878_v47 = vpop.f32.mrf.mxu1 }
 0x1a0   : > { %v4644_v19 = vpack.c.bf16 %v877_v18, %v875_v17  ;;  %v879_v21 = vadd.f32 %v878_v47, %v5516_v4 }
 0x1a1   : > { %v880_v20 = vpop.f32.mrf.mxu1 }
 0x1a2   : > { %1190 = vst [vmem:[#allocation2 + $0x110] sm:$0xff] %v4644_v19  ;;  %v881_v22 = vadd.f32 %v880_v20, %v5523_v8 }
 0x1a3   : > { %v884_v23 = vpop.f32.mrf.mxu1 }
 0x1a4   : > { %v4646_v24 = vpack.c.bf16 %v881_v22, %v879_v21  ;;  %v885_v26 = vadd.f32 %v884_v23, %v5516_v4 }
 0x1a5   : > { %v886_v25 = vpop.f32.mrf.mxu1 }
 0x1a6   : > { %1192 = vst [vmem:[#allocation2 + $0x98] sm:$0xff] %v4646_v24  ;;  %v887_v27 = vadd.f32 %v886_v25, %v5523_v8 }
 0x1a7   : > { %v888_v28 = vpop.f32.mrf.mxu1 }
 0x1a8   : > { %v4648_v29 = vpack.c.bf16 %v887_v27, %v885_v26  ;;  %v889_v31 = vadd.f32 %v888_v28, %v5516_v4 }
 0x1a9   : > { %v890_v30 = vpop.f32.mrf.mxu1 }
 0x1aa   : > { %1194 = vst [vmem:[#allocation2 + $0x90] sm:$0xff] %v4648_v29  ;;  %v891_v32 = vadd.f32 %v890_v30, %v5523_v8 }
 0x1ab   : > { %v894_v33 = vpop.f32.mrf.mxu1 }
 0x1ac   : > { %v4650_v34 = vpack.c.bf16 %v891_v32, %v889_v31  ;;  %v895_v36 = vadd.f32 %v894_v33, %v5516_v4 }
 0x1ad   : > { %v896_v35 = vpop.f32.mrf.mxu1 }
 0x1ae   : > { %1196 = vst [vmem:[#allocation2 + $0x88] sm:$0xff] %v4650_v34  ;;  %v897_v37 = vadd.f32 %v896_v35, %v5523_v8 }
 0x1af   : > { %v898_v38 = vpop.f32.mrf.mxu1 }
 0x1b0   : > { %v4652_v39 = vpack.c.bf16 %v897_v37, %v895_v36  ;;  %v899_v41 = vadd.f32 %v898_v38, %v5516_v4 }
 0x1b1   : > { %v900_v40 = vpop.f32.mrf.mxu1 }
 0x1b2   : > { %1198 = vst [vmem:[#allocation2 + $0x118] sm:$0xff] %v4652_v39  ;;  %v901_v42 = vadd.f32 %v900_v40, %v5523_v8 }
 0x1b3   : > { %v904_v43 = vpop.f32.mrf.mxu1 }
 0x1b4   : > { %v4654_v50 = vpack.c.bf16 %v901_v42, %v899_v41  ;;  %v905_v52 = vadd.f32 %v904_v43, %v5516_v4 }
 0x1b5   : > { %v906_v51 = vpop.f32.mrf.mxu1 }
 0x1b6   : > { %1200 = vst [vmem:[#allocation2 + $0xa0] sm:$0xff] %v4654_v50  ;;  %v907_v53 = vadd.f32 %v906_v51, %v5523_v8 }
 0x1b7   : > { %v908_v54 = vpop.f32.mrf.mxu1 }
 0x1b8   : > { %v4656_v55 = vpack.c.bf16 %v907_v53, %v905_v52  ;;  %v909_v58 = vadd.f32 %v908_v54, %v5516_v4 }
 0x1b9   : > { %v910_v57 = vpop.f32.mrf.mxu1 }
 0x1ba   : > { %1202 = vst [vmem:[#allocation2 + $0x130] sm:$0xff] %v4656_v55  ;;  %v911_v59 = vadd.f32 %v910_v57, %v5523_v8 }
 0x1bb   : > { %v914_v61 = vpop.f32.mrf.mxu1 }
 0x1bc   : > { %v4658_v62 = vpack.c.bf16 %v911_v59, %v909_v58  ;;  %v915_v63 = vadd.f32 %v914_v61, %v5516_v4 }
 0x1bd   : > { %v916_v48 = vpop.f32.mrf.mxu1 }
 0x1be   : > { %1204 = vst [vmem:[#allocation2 + $0xe8] sm:$0xff] %v4658_v62  ;;  %v917_v0 = vadd.f32 %v916_v48, %v5523_v8 }
 0x1bf   : > { %v918_v1 = vpop.f32.mrf.mxu1 }
 0x1c0   : > { %v4660_v2 = vpack.c.bf16 %v917_v0, %v915_v63  ;;  %v919_v49 = vadd.f32 %v918_v1, %v5516_v4 }
 0x1c1   : > { %v920_v3 = vpop.f32.mrf.mxu1 }
 0x1c2   : > { %1206 = vst [vmem:[#allocation2 + $0x78] sm:$0xff] %v4660_v2  ;;  %v921_v5 = vadd.f32 %v920_v3, %v5523_v8 }
 0x1c3   : > { %v924_v6 = vpop.f32.mrf.mxu1 }
 0x1c4   : > { %v4662_v7 = vpack.c.bf16 %v921_v5, %v919_v49  ;;  %v925_v10 = vadd.f32 %v924_v6, %v5516_v4 }
 0x1c5   : > { %v926_v9 = vpop.f32.mrf.mxu1 }
 0x1c6   : > { %1208 = vst [vmem:[#allocation2 + $0x40] sm:$0xff] %v4662_v7  ;;  %v927_v11 = vadd.f32 %v926_v9, %v5523_v8 }
 0x1c7   : > { %v928_v12 = vpop.f32.mrf.mxu1 }
 0x1c8   : > { %v4664_v13 = vpack.c.bf16 %v927_v11, %v925_v10  ;;  %v929_v15 = vadd.f32 %v928_v12, %v5516_v4 }
 0x1c9   : > { %v930_v14 = vpop.f32.mrf.mxu1 }
 0x1ca   : > { %1210 = vst [vmem:[#allocation2] sm:$0xff] %v4664_v13  ;;  %v931_v16 = vadd.f32 %v930_v14, %v5523_v8  ;;  %1216 = sbr.rel (%p4602_p13) target bundleno = 466 (0x1d2), region = 72 }
 0x1cc   : > { %v4666_v17 = vpack.c.bf16 %v931_v16, %v929_v15 }
 0x1ce   : > { %1212 = vst [vmem:[#allocation2 + $0x60] sm:$0xff] %v4666_v17 }
 0x1cf   : > { %v5201_v18 = vmov 0  }
 0x1d0   : > { %1217 = vst [vmem:[#allocation2 + $0xb0] sm:$0xff] %v5201_v18  ;;  %1218 = vst [vmem:[#allocation2 + $0xd0] sm:$0xff] %v5201_v18 }
 0x1d1   : > { %1219 = vst [vmem:[#allocation2 + $0x10] sm:$0xff] %v5201_v18  ;;  %1220 = vst [vmem:[#allocation2 + $0x48] sm:$0xff] %v5201_v18 }
 0x1d2 PF: > { %p4603_p3 = scmp.ne.s32.totalorder %s5173_s27, 1 }
 0x1d4   : > { %1224 = sbr.rel (%p4603_p3) target bundleno = 476 (0x1dc), region = 76 }
 0x1d9   : > { %v5202_v4 = vmov 0  }
 0x1da   : > { %1225 = vst [vmem:[#allocation2 + $0x28] sm:$0xff] %v5202_v4  ;;  %1226 = vst [vmem:[#allocation2] sm:$0xff] %v5202_v4 }
 0x1db   : > { %1227 = vst [vmem:[#allocation2 + $0xb8] sm:$0xff] %v5202_v4  ;;  %1228 = vst [vmem:[#allocation2 + $0x60] sm:$0xff] %v5202_v4 }
 0x1dc PF: > { %v4937_v8 = vld [vmem:[#allocation12 + $0x78] sm:$0xff]   ;;  %v4939_v19 = vld [vmem:[#allocation12 + $0x70] sm:$0xff]   ;;  %v4941_v21 = vld [vmem:[#allocation12 + $0x68] sm:$0xff]   ;;  %v5581_v23 = vadd.s32 8, %v5463_v44  ;;  %v1238_v25 = vadd.s32 16, %v5463_v44  ;;  %v5585_v26 = vadd.s32 24, %v5463_v44 }
 0x1dd   : > { %v4938_v47 = vld [vmem:[#allocation12 + $0x38] sm:$0xff]   ;;  %4667 = vmatprep.subr.bf16.mxu0 %v4937_v8  ;;  %v4940_v20 = vld [vmem:[#allocation12 + $0x30] sm:$0xff]   ;;  %v4942_v22 = vld [vmem:[#allocation12 + $0x28] sm:$0xff]   ;;  %v1252_v27 = vand.u32 15, %v5463_v44  ;;  %v5590_v32 = vsub.s32 5, %v5463_v44  ;;  %v5593_v33 = vsub.s32 4, %v5463_v44 }
 0x1de   : > { %4668 = vmatpush3.bf16.msra.mxu0 %v4938_v47  ;;  %v4943_v24 = vld [vmem:[#allocation12 + $0x60] sm:$0xff]   ;;  %v1253_v29 = vand.u32 15, %v5581_v23  ;;  %v4945_v30 = vld [vmem:[#allocation12 + $0x58] sm:$0xff]   ;;  %v1254_v31 = vand.u32 15, %v1238_v25  ;;  %v4947_v36 = vld [vmem:[#allocation12 + $0x50] sm:$0xff]   ;;  %v5597_v37 = vsub.s32 6, %v5463_v44 }
 0x1df   : > { %4669 = vmatprep.subr.bf16.mxu0 %v4939_v19  ;;  %v4944_v28 = vld [vmem:[#allocation12 + $0x20] sm:$0xff]   ;;  %v4946_v34 = vld [vmem:[#allocation12 + $0x18] sm:$0xff]   ;;  %v5599_v38 = vld [vmem:[#allocation10] sm:$0x77]  ;;  %vm1562_vm0 = vcmp.lt.s32.totalorder %v5463_v44, 1  ;;  %vm5640_vm1 = vcmp.ne.s32.totalorder %v1252_v27, 0 }
 0x1e0   : > { %v5601_v39 = vld [vmem:[#allocation10 + $0x8] sm:$0x77]  ;;  %v5603_v40 = vld [vmem:[#allocation10 + $0x10] sm:$0x77]  ;;  %v4948_v41 = vld [vmem:[#allocation12 + $0x10] sm:$0xff]   ;;  %v1405_v43 = vrot.slane %v5599_v38, %v5590_v32  ;;  %vm5644_vm2 = vcmp.ne.s32.totalorder %v1254_v31, 0 }
 0x1e1   : > { %v5605_v42 = vld [vmem:[#allocation10 + $0x18] sm:$0x77]  ;;  %v1413_v50 = vrot.slane %v5601_v39, %v5590_v32  ;;  %v1300_v54 = vld [vmem:[#allocation2 + $0xb0] sm:$0xff]  ;;  %v1303_v48 = vld [vmem:[#allocation2 + $0x48] sm:$0xff]  ;;  %v9883_v14 = vmov 0  ;;  %vm1951_vm3 = vcmp.lt.s32.totalorder %v5463_v44, 7 }
 0x1e2   : > { %4670 = vmatpush3.bf16.msra.mxu0 %v4940_v20  ;;  %v4949_v53 = vld [vmem:[#allocation12 + $0x48] sm:$0xff]   ;;  %v1301_v55 = vld [vmem:[#allocation2 + $0xd0] sm:$0xff]  ;;  %v5623_v1 = vunpack.c.l.bf16 %v1300_v54  ;;  %v5625_v2 = vunpack.c.h.bf16 %v1300_v54  ;;  %v5636_v11 = vunpack.c.l.bf16 %v1303_v48  ;;  %v5638_v12 = vunpack.c.h.bf16 %v1303_v48  ;;  %v1309_v15 = vld [vmem:[#allocation2 + $0x108] sm:$0xff]  ;;  %s4622_s9 = sshll.u32 %s5173_s27, 2  ;;  %s4623_s23 = sshll.u32 %s5177_s28, 3 }
 0x1e3   : > { %4671 = vmatprep.subr.bf16.mxu0 %v4941_v21  ;;  %v1302_v57 = vld [vmem:[#allocation2 + $0x10] sm:$0xff]  ;;  %v1304_v63 = vld [vmem:[#allocation2 + $0x120] sm:$0xff]  ;;  %v1305_v0 = vld [vmem:[#allocation2 + $0x38] sm:$0xff]  ;;  %v5627_v3 = vunpack.c.l.bf16 %v1301_v55  ;;  %v5629_v49 = vunpack.c.h.bf16 %v1301_v55  ;;  %v9884_v14 = vsel %vm5644_vm2, 4294967295, %v9883_v14  ;;  %vm5733_vm4 = vcmp.ne.s32.totalorder %v1253_v29, 15  ;;  %s4374_s12 = sadd.s32 %s4623_s23, %s4622_s9  ;;  %s4377_s22 = sshll.u32 %s5576_s11, 4  ;;  %s9271_s22 = int_to_ptr.vmem [resolvable:$true] %s4377_s22 }
 0x1e4   : > { %9875 = vst [vmem:[#allocation23_spill] sm:$0xff] %v5623_v1  ;;  %9876 = vst [vmem:[#allocation24_spill] sm:$0xff] %v5625_v2  ;;  %v1306_v5 = vld [vmem:[#allocation2 + $0xf8] sm:$0xff]  ;;  %v1307_v6 = vld [vmem:[#allocation2 + $0x100] sm:$0xff]  ;;  %v5632_v9 = vunpack.c.l.bf16 %v1302_v57  ;;  %v5634_v10 = vunpack.c.h.bf16 %v1302_v57  ;;  %v5648_v18 = vunpack.c.l.bf16 %v1304_v63  ;;  %v5650_v4 = vunpack.c.h.bf16 %v1304_v63  ;;  %s4624_s18 = sshll.u32 %s4374_s12, 7  ;;  %s10675_s21 = sld [smem:[#allocation129_spill]] }
 0x1e5   : > { %9877 = vst [vmem:[#allocation25_spill] sm:$0xff] %v5627_v3  ;;  %9878 = vst [vmem:[#allocation26_spill] sm:$0xff] %v5629_v49  ;;  %v1308_v7 = vld [vmem:[#allocation2 + $0x80] sm:$0xff]  ;;  %v1330_v16 = vld [vmem:[#allocation2 + $0x50] sm:$0xff]  ;;  %v5652_v8 = vunpack.c.l.bf16 %v1305_v0  ;;  %v5654_v47 = vunpack.c.h.bf16 %v1305_v0  ;;  %v5656_v19 = vunpack.c.l.bf16 %v1306_v5  ;;  %v5658_v20 = vunpack.c.h.bf16 %v1306_v5  ;;  %s4362_s27 = scalar_lea.sflag [#allocation6], %s5410_s24  ;;  %s5085_s28 = scalar_lea.vmem %s9271_s22, 512 }
 0x1e6   : > { %4672 = vmatpush3.bf16.msra.mxu0 %v4942_v22  ;;  %9879 = vst [vmem:[#allocation27_spill] sm:$0xff] %v5632_v9  ;;  %9880 = vst [vmem:[#allocation28_spill] sm:$0xff] %v5636_v11  ;;  %v1331_v17 = vld [vmem:[#allocation2 + $0xe8] sm:$0xff]  ;;  %v5660_v21 = vunpack.c.l.bf16 %v1307_v6  ;;  %v5662_v22 = vunpack.c.h.bf16 %v1307_v6  ;;  %v5664_v25 = vunpack.c.l.bf16 %v1308_v7  ;;  %v5666_v27 = vunpack.c.h.bf16 %v1308_v7  ;;  %v4951_v31 = vld [vmem:[#allocation12 + $0x40] sm:$0xff]   ;;  %p5086_p2 = scmp.ne.s32.totalorder %s9271_s22, %s5085_s28  ;;  %s5203_s7 = smov [#allocation13]  }
 0x1e7   : > { %4673 = vmatprep.subr.bf16.mxu0 %v4943_v24  ;;  %9885 = vst [vmem:[#allocation29_spill] sm:$0xff] %v9884_v14  ;;  %9886 = vst [vmem:[#allocation30_spill] sm:$0xff] %v5648_v18  ;;  %v4950_v24 = vld [vmem:[#allocation12 + $0x8] sm:$0xff]   ;;  %v5676_v54 = vunpack.c.l.bf16 %v1331_v17  ;;  %v5678_v55 = vunpack.c.h.bf16 %v1331_v17  ;;  %v5684_v57 = vrot.slane %v1413_v50, %v5469_v46  ;;  %v1499_v48 = vrot.slane %v5625_v2, 7  ;;  %s5089_s8 = sshll.u32 %s5203_s7, 4  ;;  %s5090_s8 = int_to_ptr.vmem [resolvable:$false] %s5089_s8 }
 0x1e8   : > { %9887 = vst [vmem:[#allocation31_spill] sm:$0xff] %v5652_v8  ;;  %9888 = vst [vmem:[#allocation32_spill] sm:$0xff] %v5656_v19  ;;  %v1501_v63 = vrot.slane %v5629_v49, 7  ;;  %v1505_v0 = vrot.slane %v5638_v12, 7  ;;  %v5691_v5 = vrot.slane %v5650_v4, 7  ;;  %v5694_v6 = vrot.slane %v5654_v47, 7  ;;  %p5087_p0 = pnand %p5086_p2, %p5376_p1  ;;  %p5092_p8 = scmp.lt.s32.totalorder %s9271_s22, %s5090_s8 }
 0x1e9   : > { %9889 = vst [vmem:[#allocation33_spill] sm:$0xff] %v5660_v21  ;;  %9890 = vst [vmem:[#allocation34_spill] sm:$0xff] %v5664_v25  ;;  %v1437_v7 = vmul.f32 %v5684_v57, %v5629_v49  ;;  %v1449_v62 = vmul.f32 %v5684_v57, %v5662_v22  ;;  %v1240_v35 = vadd.s32 32, %v5463_v44  ;;  %s5091_s10 = scalar_lea.vmem %s5090_s8, 1024 }
 0x1ea   : > { %4674 = vmatpush3.bf16.msra.mxu0 %v4944_v28  ;;  %9891 = vst [vmem:[#allocation35_spill] sm:$0xff] %v5666_v27  ;;  %v5668_v28 = vunpack.c.l.bf16 %v1309_v15  ;;  %9896 = vst [vmem:[#allocation40_spill] sm:$0xff] %v5676_v54  ;;  %v1618_v51 = vsel %vm1562_vm0, %v1505_v0, %v5694_v6  ;;  %v1622_v59 = vsel %vm1562_vm0, %v1501_v63, %v1505_v0  ;;  %v9909_v0 = vrot.slane %v5662_v22, 7  ;;  %s9269_s1 = scalar_lea.hbm %s10675_s21, %s4624_s18  ;;  %p5088_p5 = pneg %p5087_p0 }
 0x1eb   : > { %4675 = vmatprep.subr.bf16.mxu0 %v4945_v30  ;;  %v5670_v30 = vunpack.c.h.bf16 %v1309_v15  ;;  %9897 = vst [vmem:[#allocation41_spill] sm:$0xff] %v5678_v55  ;;  %9899 = vst [vmem:[#allocation43_spill] sm:$0xff] %v5684_v57  ;;  %p5093_p7 = scmp.lt.s32.totalorder %s5091_s10, %s5085_s28 }
 0x1ec   : > { %9892 = vst [vmem:[#allocation36_spill] sm:$0xff] %v5668_v28  ;;  %v5755_v23 = vsel %vm1562_vm0, %v5694_v6, %v9909_v0  ;;  %v1670_v0 = vsel %vm5644_vm2, %v1618_v51, 0.0  ;;  %v1894_v51 = vrot.slane %v5638_v12, 1 }
 0x1ed   : > { %9893 = vst [vmem:[#allocation37_spill] sm:$0xff] %v5670_v30  ;;  %p5094_p11 = por %p5093_p7, %p5092_p8 }
 0x1ee   : > { %4676 = vmatpush3.bf16.msra.mxu0 %v4946_v34  ;;  %v5672_v34 = vunpack.c.l.bf16 %v1330_v16 }
 0x1ef   : > { %4677 = vmatprep.subr.bf16.mxu0 %v4947_v36  ;;  %v5674_v36 = vunpack.c.h.bf16 %v1330_v16  ;;  %v1441_v16 = vmul.f32 %v5684_v57, %v5638_v12  ;;  %p5095_p6 = pnand %p5094_p11, %p5088_p5 }
 0x1f0   : > { %9894 = vst [vmem:[#allocation38_spill] sm:$0xff] %v5672_v34 }
 0x1f1   : > { %9895 = vst [vmem:[#allocation39_spill] sm:$0xff] %v5674_v36  ;;  %v5715_v58 = vrot.slane %v5674_v36, 7  ;;  %v9905_v36 = vmov 0 }
 0x1f2   : > { %4678 = vmatpush3.bf16.msra.mxu0 %v4948_v41  ;;  %v5681_v41 = vrot.slane %v1405_v43, %v5469_v46  ;;  %v4952_v43 = vld [vmem:[#allocation12] sm:$0xff]  }
 0x1f3   : > { %4679 = vmatprep.subr.bf16.mxu0 %v4949_v53  ;;  %v1503_v53 = vrot.slane %v5634_v10, 7  ;;  %9900 = vst [vmem:[#allocation44_spill] sm:$0xff] %v5715_v58 }
 0x1f4   : > { %9898 = vst [vmem:[#allocation42_spill] sm:$0xff] %v5681_v41  ;;  %v1435_v50 = vmul.f32 %v5681_v41, %v5625_v2  ;;  %v1439_v15 = vmul.f32 %v5681_v41, %v5634_v10  ;;  %v1443_v17 = vmul.f32 %v5681_v41, %v5650_v4  ;;  %v1447_v60 = vmul.f32 %v5681_v41, %v5658_v20 }
 0x1f5   : > { %v1616_v52 = vsel %vm1562_vm0, %v1503_v53, %v5691_v5  ;;  %v1620_v61 = vsel %vm1562_vm0, %v1499_v48, %v1503_v53  ;;  %v5788_v41 = vrot.slane %v5650_v4, 1 }
 0x1f6   : > { %4680 = vmatpush3.bf16.msra.mxu0 %v4950_v24  ;;  %v1445_v24 = vmul.f32 %v5684_v57, %v5654_v47  ;;  %v9908_v57 = vrot.slane %v5658_v20, 7 }
 0x1f7   : > { %4681 = vmatprep.subr.bf16.mxu0 %v4951_v31  ;;  %v5718_v31 = vrot.slane %v5678_v55, 7  ;;  %v9904_v55 = vand.u32 15, %v5585_v26  ;;  %v1624_v26 = vsel %vm1562_vm0, %v5715_v58, %v1499_v48  ;;  %v9910_v48 = vrot.slane %v5599_v38, %v5593_v33  ;;  %9914 = vst [vmem:[#allocation49_spill] sm:$0xff] %v5788_v41 }
 0x1f8   : > { %v5748_v53 = vsel %vm1562_vm0, %v5691_v5, %v9908_v57 }
 0x1f9   : > { %9901 = vst [vmem:[#allocation45_spill] sm:$0xff] %v5718_v31  ;;  %vm5739_vm5 = vcmp.ne.s32.totalorder %v9904_v55, 15  ;;  %v1626_v29 = vsel %vm1562_vm0, %v5718_v31, %v1501_v63  ;;  %v1660_v55 = vsel %vm5640_vm1, %v1624_v26, 0.0  ;;  %v5775_v58 = vrot.slane %v9910_v48, %v5466_v45 }
 0x1fa   : > { %4682 = vmatpush3.bf16.msra.mxu0 %v4952_v43  ;;  %v9906_v36 = vsel %vm5739_vm5, 4294967295, %v9905_v36  ;;  %v1662_v57 = vsel %vm5640_vm1, %v1626_v29, 0.0  ;;  %v1668_v43 = vsel %vm5644_vm2, %v1616_v52, 0.0  ;;  %v9912_v63 = vrot.slane %v5601_v39, %v5593_v33 }
 0x1fb   : > { %9907 = vst [vmem:[#allocation46_spill] sm:$0xff] %v9906_v36  ;;  %9911 = vst [vmem:[#allocation47_spill] sm:$0xff] %v5775_v58  ;;  %v1892_v52 = vrot.slane %v5634_v10, 1  ;;  %v5791_v48 = vrot.slane %v5654_v47, 1  ;;  %v1760_v14 = vmul.f32 %v5775_v58, %v1660_v55  ;;  %v1768_v31 = vmul.f32 %v5775_v58, %v1668_v43 }
 0x1fc   : > { %v5781_v26 = vrot.slane %v9912_v63, %v5466_v45  ;;  %v1764_v63 = vmul.f32 %v5775_v58, %v1620_v61  ;;  %v1772_v12 = vmul.f32 %v5775_v58, %v5748_v53  ;;  %v1902_v43 = vrot.slane %v5662_v22, 1 }
 0x1fd   : > { %9915 = vst [vmem:[#allocation50_spill] sm:$0xff] %v5791_v48  ;;  %v1824_v54 = vadd.f32 %v1760_v14, %v1435_v50  ;;  %v1832_v19 = vadd.f32 %v1768_v31, %v1443_v17  ;;  %v5809_v58 = vrot.slane %v5670_v30, 1  ;;  %v2005_v14 = vsel %vm1951_vm3, %v1892_v52, %v5788_v41  ;;  %v2279_v31 = vld [vmem:[#allocation2 + $0x40] sm:$0xff] }
 0x1fe   : > { %9913 = vst [vmem:[#allocation48_spill] sm:$0xff] %v5781_v26  ;;  %v1762_v28 = vmul.f32 %v5781_v26, %v1662_v57  ;;  %v1766_v29 = vmul.f32 %v5781_v26, %v1622_v59  ;;  %v1770_v10 = vmul.f32 %v5781_v26, %v1670_v0  ;;  %v1774_v25 = vmul.f32 %v5781_v26, %v5755_v23 }
 0x1ff   : > { %v1828_v21 = vadd.f32 %v1764_v63, %v1439_v15  ;;  %v1836_v8 = vadd.f32 %v1772_v12, %v1447_v60  ;;  %v1900_v59 = vrot.slane %v5658_v20, 1  ;;  %v5806_v0 = vrot.slane %v5666_v27, 1  ;;  %9917 = vst [vmem:[#allocation52_spill] sm:$0xff] %v5809_v58 }
 0x200   : > { %v1826_v34 = vadd.f32 %v1762_v28, %v1437_v7  ;;  %v1830_v55 = vadd.f32 %v1766_v29, %v1441_v16  ;;  %v1834_v57 = vadd.f32 %v1770_v10, %v1445_v24  ;;  %v1838_v61 = vadd.f32 %v1774_v25, %v1449_v62  ;;  %v2278_v7 = vld [vmem:[#allocation2 + $0x30] sm:$0xff] }
 0x201   : > { %9916 = vst [vmem:[#allocation51_spill] sm:$0xff] %v5806_v0  ;;  %v2007_v28 = vsel %vm1951_vm3, %v1894_v51, %v5791_v48  ;;  %v9918_v60 = vrot.slane %v5625_v2, 1  ;;  %v9919_v25 = vrot.slane %v5629_v49, 1  ;;  %v5828_v15 = vsel %vm1951_vm3, %v1900_v59, %v5806_v0 }
 0x202   : > { %v5833_v16 = vsel %vm1951_vm3, %v1902_v43, %v5809_v58  ;;  %v5838_v17 = vsel %vm1951_vm3, %v5788_v41, %v1900_v59  ;;  %v5843_v24 = vsel %vm1951_vm3, %v5791_v48, %v1902_v43  ;;  %v2053_v29 = vsel %vm5733_vm4, %v2005_v14, 0.0 }
 0x203   : > { %v2009_v62 = vsel %vm1951_vm3, %v9918_v60, %v1892_v52  ;;  %v2011_v50 = vsel %vm1951_vm3, %v9919_v25, %v1894_v51  ;;  %v2055_v52 = vsel %vm5733_vm4, %v2007_v28, 0.0  ;;  %v2061_v51 = vsel %vm5739_vm5, %v5828_v15, 0.0 }
 0x204   : > { %v2063_v63 = vsel %vm5739_vm5, %v5833_v16, 0.0  ;;  %v9920_v10 = vrot.slane %v5599_v38, %v5597_v37  ;;  %v9922_v59 = vrot.slane %v5601_v39, %v5597_v37  ;;  %v5867_v14 = vunpack.c.l.bf16 %v2278_v7 }
 0x205   : > { %v5869_v28 = vunpack.c.h.bf16 %v2278_v7  ;;  %v5871_v60 = vunpack.c.l.bf16 %v2279_v31  ;;  %v5873_v25 = vunpack.c.h.bf16 %v2279_v31  ;;  %v9928_v48 = vrot.slane %v5603_v40, %v5590_v32 }
 0x206   : > { %v5859_v12 = vrot.slane %v9920_v10, %v5507_v56  ;;  %v5865_v43 = vrot.slane %v9922_v59, %v5507_v56  ;;  %9924 = vst [vmem:[#allocation55_spill] sm:$0xff] %v5867_v14  ;;  %v9930_v41 = vrot.slane %v5605_v42, %v5590_v32 }
 0x207   : > { %9925 = vst [vmem:[#allocation56_spill] sm:$0xff] %v5869_v28  ;;  %9926 = vst [vmem:[#allocation57_spill] sm:$0xff] %v5871_v60  ;;  %v5879_v10 = vrot.slane %v9928_v48, %v5469_v46 }
 0x208   : > { %9921 = vst [vmem:[#allocation53_spill] sm:$0xff] %v5859_v12  ;;  %9923 = vst [vmem:[#allocation54_spill] sm:$0xff] %v5865_v43  ;;  %v5885_v59 = vrot.slane %v9930_v41, %v5469_v46  ;;  %v2149_v49 = vmul.f32 %v5859_v12, %v2009_v62  ;;  %v2151_v7 = vmul.f32 %v5865_v43, %v2011_v50 }
 0x209   : > { %9927 = vst [vmem:[#allocation58_spill] sm:$0xff] %v5873_v25  ;;  %9929 = vst [vmem:[#allocation59_spill] sm:$0xff] %v5879_v10  ;;  %v2153_v2 = vmul.f32 %v5859_v12, %v2053_v29  ;;  %v2155_v31 = vmul.f32 %v5865_v43, %v2055_v52  ;;  %v2157_v26 = vmul.f32 %v5859_v12, %v5838_v17 }
 0x20a   : > { %9931 = vst [vmem:[#allocation60_spill] sm:$0xff] %v5885_v59  ;;  %v2159_v48 = vmul.f32 %v5865_v43, %v5843_v24  ;;  %v2161_v60 = vmul.f32 %v5859_v12, %v2061_v51  ;;  %v2163_v14 = vmul.f32 %v5865_v43, %v2063_v63  ;;  %v2213_v41 = vadd.f32 %v2149_v49, %v1824_v54 }
 0x20b   : > { %v2215_v36 = vadd.f32 %v2151_v7, %v1826_v34  ;;  %v2217_v18 = vadd.f32 %v2153_v2, %v1828_v21  ;;  %v2219_v62 = vadd.f32 %v2155_v31, %v1830_v55  ;;  %v5897_v11 = vadd.f32 %v2157_v26, %v1832_v19 }
 0x20c   : > { %v5899_v50 = vadd.f32 %v2159_v48, %v1834_v57  ;;  %v5901_v29 = vadd.f32 %v2161_v60, %v1836_v8  ;;  %v5903_v52 = vadd.f32 %v2163_v14, %v1838_v61  ;;  %v2327_v9 = vmul.f32 %v5879_v10, %v5650_v4  ;;  %v2953_v48 = vld [vmem:[#allocation2 + $0xf0] sm:$0xff] }
 0x20d   : > { %9932 = vst [vmem:[#allocation61_spill] sm:$0xff] %v5897_v11  ;;  %v2329_v51 = vmul.f32 %v5885_v59, %v5654_v47  ;;  %v2331_v49 = vmul.f32 %v5879_v10, %v5658_v20  ;;  %v2333_v2 = vmul.f32 %v5885_v59, %v5662_v22  ;;  %v9384_v19 = vrot.slane %v5869_v28, 7 }
 0x20e   : > { %9933 = vst [vmem:[#allocation62_spill] sm:$0xff] %v5899_v50  ;;  %9934 = vst [vmem:[#allocation63_spill] sm:$0xff] %v5901_v29  ;;  %v9383_v21 = vrot.slane %v5873_v25, 7  ;;  %v2545_v8 = vrot.slane %v5603_v40, %v5593_v33  ;;  %v2553_v34 = vrot.slane %v5605_v42, %v5593_v33  ;;  %v2391_v4 = vadd.f32 %v2327_v9, %v2213_v41 }
 0x20f   : > { %9935 = vst [vmem:[#allocation64_spill] sm:$0xff] %v5903_v52  ;;  %v2393_v54 = vadd.f32 %v2329_v51, %v2215_v36  ;;  %v2395_v26 = vadd.f32 %v2331_v49, %v2217_v18  ;;  %v2397_v47 = vadd.f32 %v2333_v2, %v2219_v62  ;;  %v2471_v55 = vsel %vm1562_vm0, %v9384_v19, %v5691_v5  ;;  %v2952_v18 = vld [vmem:[#allocation2 + $0x138] sm:$0xff]  ;;  %v2955_v51 = vld [vmem:[#allocation2 + $0xc8] sm:$0xff] }
 0x210   : > { %v2473_v57 = vsel %vm1562_vm0, %v9383_v21, %v5694_v6  ;;  %v5930_v61 = vrot.slane %v2545_v8, %v5466_v45  ;;  %v5933_v9 = vrot.slane %v2553_v34, %v5466_v45  ;;  %v2475_v36 = vsel %vm5640_vm1, %v2471_v55, 0.0  ;;  %v2954_v62 = vld [vmem:[#allocation2 + $0x18] sm:$0xff] }
 0x211   : > { %v2477_v63 = vsel %vm5640_vm1, %v2473_v57, 0.0  ;;  %v2727_v5 = vsel %vm5733_vm4, %v5828_v15, 0.0  ;;  %v2729_v6 = vsel %vm5733_vm4, %v5833_v16, 0.0  ;;  %v2793_v41 = vrot.slane %v5603_v40, %v5597_v37  ;;  %v2980_v57 = vld [vmem:[#allocation2 + $0xb8] sm:$0xff] }
 0x212   : > { %9936 = vst [vmem:[#allocation65_spill] sm:$0xff] %v5930_v61  ;;  %9937 = vst [vmem:[#allocation66_spill] sm:$0xff] %v5933_v9  ;;  %v2575_v14 = vmul.f32 %v5930_v61, %v2475_v36  ;;  %v2577_v60 = vmul.f32 %v5933_v9, %v2477_v63  ;;  %v2579_v7 = vmul.f32 %v5930_v61, %v5748_v53  ;;  %v5955_v16 = vunpack.c.l.bf16 %v2952_v18  ;;  %v2981_v36 = vld [vmem:[#allocation2 + $0x60] sm:$0xff] }
 0x213   : > { %v2581_v31 = vmul.f32 %v5933_v9, %v5755_v23  ;;  %v2801_v15 = vrot.slane %v5605_v42, %v5597_v37  ;;  %v5957_v49 = vunpack.c.h.bf16 %v2952_v18  ;;  %v5960_v55 = vrot.slane %v2793_v41, %v5507_v56 }
 0x214   : > { %v2639_v2 = vadd.f32 %v2575_v14, %v2391_v4  ;;  %v2641_v8 = vadd.f32 %v2577_v60, %v2393_v54  ;;  %v2643_v34 = vadd.f32 %v2579_v7, %v2395_v26  ;;  %v5965_v63 = vunpack.c.l.bf16 %v2953_v48  ;;  %v5977_v26 = vld [vmem:[#allocation10 + $0x20] sm:$0x77] }
 0x215   : > { %9938 = vst [vmem:[#allocation67_spill] sm:$0xff] %v5957_v49  ;;  %v2645_v53 = vadd.f32 %v2581_v31, %v2397_v47  ;;  %9939 = vst [vmem:[#allocation68_spill] sm:$0xff] %v5960_v55  ;;  %v5963_v23 = vrot.slane %v2801_v15, %v5507_v56  ;;  %v5967_v21 = vunpack.c.h.bf16 %v2953_v48  ;;  %v5969_v19 = vunpack.c.l.bf16 %v2954_v62  ;;  %v5979_v47 = vld [vmem:[#allocation10 + $0x28] sm:$0x77] }
 0x216   : > { %v5971_v18 = vunpack.c.h.bf16 %v2954_v62  ;;  %v5973_v4 = vunpack.c.l.bf16 %v2955_v51  ;;  %v5975_v54 = vunpack.c.h.bf16 %v2955_v51  ;;  %v2823_v14 = vmul.f32 %v5960_v55, %v5838_v17 }
 0x217   : > { %9940 = vst [vmem:[#allocation69_spill] sm:$0xff] %v5963_v23  ;;  %9941 = vst [vmem:[#allocation70_spill] sm:$0xff] %v5967_v21  ;;  %v2825_v60 = vmul.f32 %v5963_v23, %v5843_v24  ;;  %v2827_v7 = vmul.f32 %v5960_v55, %v2727_v5  ;;  %v2829_v31 = vmul.f32 %v5963_v23, %v2729_v6  ;;  %v5987_v48 = vunpack.c.l.bf16 %v2980_v57 }
 0x218   : > { %9942 = vst [vmem:[#allocation71_spill] sm:$0xff] %v5969_v19  ;;  %9943 = vst [vmem:[#allocation72_spill] sm:$0xff] %v5971_v18  ;;  %v5989_v41 = vunpack.c.h.bf16 %v2980_v57  ;;  %v5991_v15 = vunpack.c.l.bf16 %v2981_v36  ;;  %v5993_v62 = vunpack.c.h.bf16 %v2981_v36  ;;  %v2887_v51 = vadd.f32 %v2823_v14, %v2639_v2 }
 0x219   : > { %9944 = vst [vmem:[#allocation73_spill] sm:$0xff] %v5973_v4  ;;  %9945 = vst [vmem:[#allocation74_spill] sm:$0xff] %v5975_v54  ;;  %v2889_v25 = vadd.f32 %v2825_v60, %v2641_v8  ;;  %v2891_v28 = vadd.f32 %v2827_v7, %v2643_v34  ;;  %v2893_v52 = vadd.f32 %v2829_v31, %v2645_v53  ;;  %v6000_v5 = vrot.slane %v5666_v27, 7 }
 0x21a   : > { %9946 = vst [vmem:[#allocation75_spill] sm:$0xff] %v5987_v48  ;;  %9947 = vst [vmem:[#allocation76_spill] sm:$0xff] %v5989_v41  ;;  %v3055_v17 = vrot.slane %v5977_v26, %v5590_v32  ;;  %v3063_v24 = vrot.slane %v5979_v47, %v5590_v32  ;;  %v6003_v6 = vrot.slane %v5670_v30, 7  ;;  %v9390_v57 = vrot.slane %v5957_v49, 7 }
 0x21b   : > { %9948 = vst [vmem:[#allocation77_spill] sm:$0xff] %v5991_v15  ;;  %9949 = vst [vmem:[#allocation78_spill] sm:$0xff] %v5993_v62  ;;  %v9389_v36 = vrot.slane %v5967_v21, 7  ;;  %v9391_v2 = vrot.slane %v5989_v41, 7  ;;  %v9394_v8 = vrot.slane %v5993_v62, 7  ;;  %v3411_v32 = vrot.slane %v5977_v26, %v5593_v33 }
 0x21c   : > { %v6010_v34 = vrot.slane %v3055_v17, %v5469_v46  ;;  %v6013_v53 = vrot.slane %v3063_v24, %v5469_v46  ;;  %v3419_v14 = vrot.slane %v5979_v47, %v5593_v33  ;;  %v6024_v60 = vsel %vm1562_vm0, %v6000_v5, %v9390_v57 }
 0x21d   : > { %v6031_v7 = vsel %vm1562_vm0, %v6003_v6, %v9389_v36  ;;  %v3337_v33 = vsel %vm1562_vm0, %v9391_v2, %v6000_v5  ;;  %v3339_v31 = vsel %vm1562_vm0, %v9394_v8, %v6003_v6  ;;  %v6056_v8 = vrot.slane %v3411_v32, %v5466_v45 }
 0x21e   : > { %9950 = vst [vmem:[#allocation79_spill] sm:$0xff] %v6010_v34  ;;  %9951 = vst [vmem:[#allocation80_spill] sm:$0xff] %v6013_v53  ;;  %v3085_v17 = vmul.f32 %v6010_v34, %v5666_v27  ;;  %v3087_v24 = vmul.f32 %v6013_v53, %v5670_v30  ;;  %v3089_v36 = vmul.f32 %v6010_v34, %v5957_v49  ;;  %v3341_v2 = vsel %vm5640_vm1, %v3337_v33, 0.0  ;;  %v9968_v30 = vld [vmem:[#allocation30_spill] sm:$0xff]  ;;  %v9972_v27 = vld [vmem:[#allocation33_spill] sm:$0xff] }
 0x21f   : > { %9952 = vst [vmem:[#allocation81_spill] sm:$0xff] %v6031_v7  ;;  %v3091_v57 = vmul.f32 %v6013_v53, %v5967_v21  ;;  %v3343_v62 = vsel %vm5640_vm1, %v3339_v31, 0.0  ;;  %9953 = vst [vmem:[#allocation82_spill] sm:$0xff] %v6056_v8  ;;  %v6059_v41 = vrot.slane %v3419_v14, %v5466_v45  ;;  %v3441_v34 = vmul.f32 %v6056_v8, %v3341_v2 }
 0x220   : > { %v3149_v23 = vadd.f32 %v3085_v17, %v2887_v51  ;;  %v3151_v55 = vadd.f32 %v3087_v24, %v2889_v25  ;;  %v3153_v29 = vadd.f32 %v3089_v36, %v2891_v28  ;;  %v3445_v33 = vmul.f32 %v6056_v8, %v6024_v60  ;;  %v9967_v8 = vld [vmem:[#allocation28_spill] sm:$0xff] }
 0x221   : > { %9954 = vst [vmem:[#allocation83_spill] sm:$0xff] %v6059_v41  ;;  %v3155_v50 = vadd.f32 %v3091_v57, %v2893_v52  ;;  %v3443_v53 = vmul.f32 %v6059_v41, %v3343_v62  ;;  %v3447_v31 = vmul.f32 %v6059_v41, %v6031_v7  ;;  %v3573_v32 = vrot.slane %v5957_v49, 1  ;;  %v6074_v62 = vld [vmem:[%s9329_s4] sm:$0xf] }
 0x222   : > { %v3575_v11 = vrot.slane %v5967_v21, 1  ;;  %v9406_v14 = vrot.slane %v5971_v18, 1  ;;  %v9405_v25 = vrot.slane %v5975_v54, 1  ;;  %v3505_v28 = vadd.f32 %v3441_v34, %v3149_v23 }
 0x223   : > { %v3507_v52 = vadd.f32 %v3443_v53, %v3151_v55  ;;  %v3509_v51 = vadd.f32 %v3445_v33, %v3153_v29  ;;  %v3511_v57 = vadd.f32 %v3447_v31, %v3155_v50  ;;  %v6091_v50 = vsel %vm1951_vm3, %v5806_v0, %v3573_v32  ;;  %v9966_v0 = vld [vmem:[#allocation27_spill] sm:$0xff] }
 0x224   : > { %v6080_v36 = vsel %vm1951_vm3, %v3573_v32, %v9406_v14  ;;  %v6086_v2 = vsel %vm1951_vm3, %v3575_v11, %v9405_v25  ;;  %9957 = vst [vmem:[#allocation86_spill] sm:$0xff] %v6091_v50  ;;  %v6096_v29 = vsel %vm1951_vm3, %v5809_v58, %v3575_v11  ;;  %v3767_v34 = vrot.slane %v5977_v26, %v5597_v37 }
 0x225   : > { %9955 = vst [vmem:[#allocation84_spill] sm:$0xff] %v6080_v36  ;;  %9956 = vst [vmem:[#allocation85_spill] sm:$0xff] %v6086_v2  ;;  %v3701_v55 = vsel %vm5733_vm4, %v6080_v36, 0.0  ;;  %v3703_v23 = vsel %vm5733_vm4, %v6086_v2, 0.0  ;;  %v3775_v53 = vrot.slane %v5979_v47, %v5597_v37  ;;  %v6110_v17 = vrot.slane %v6074_v62, %v5469_v46 }
 0x226   : > { %9958 = vst [vmem:[#allocation87_spill] sm:$0xff] %v6096_v29  ;;  %v9960_v11 = vsub.s32 3, %v5463_v44  ;;  %v1401_v33 = vrot.slane %v5599_v38, %v5469_v46  ;;  %v1409_v31 = vrot.slane %v5601_v39, %v5469_v46  ;;  %v6122_v32 = vrot.slane %v3767_v34, %v5507_v56 }
 0x227   : > { %9959 = vst [vmem:[#allocation88_spill] sm:$0xff] %v6110_v17  ;;  %v6125_v37 = vrot.slane %v3775_v53, %v5507_v56  ;;  %v1498_v25 = vrot.slane %v5623_v1, 7  ;;  %v1500_v14 = vrot.slane %v5627_v3, 7 }
 0x228   : > { %v6115_v24 = vrot.slane %v6074_v62, %v9960_v11  ;;  %9962 = vst [vmem:[#allocation90_spill] sm:$0xff] %v6122_v32  ;;  %v6130_v58 = vrot.slane %v1401_v33, %v5469_v46  ;;  %v6133_v11 = vrot.slane %v1409_v31, %v5469_v46  ;;  %v3797_v34 = vmul.f32 %v6122_v32, %v6091_v50 }
 0x229   : > { %9963 = vst [vmem:[#allocation91_spill] sm:$0xff] %v6125_v37  ;;  %v3799_v53 = vmul.f32 %v6125_v37, %v6096_v29  ;;  %v3801_v18 = vmul.f32 %v6122_v32, %v3701_v55  ;;  %v3803_v9 = vmul.f32 %v6125_v37, %v3703_v23  ;;  %v6152_v55 = vrot.slane %v9968_v30, 7  ;;  %v9970_v23 = vld [vmem:[#allocation31_spill] sm:$0xff]  ;;  %v9971_v32 = vld [vmem:[#allocation32_spill] sm:$0xff] }
 0x22a   : > { %9961 = vst [vmem:[#allocation89_spill] sm:$0xff] %v6115_v24  ;;  %9964 = vst [vmem:[#allocation92_spill] sm:$0xff] %v6130_v58  ;;  %v1434_v33 = vmul.f32 %v6130_v58, %v5623_v1  ;;  %v1436_v31 = vmul.f32 %v6133_v11, %v5627_v3  ;;  %v1438_v41 = vmul.f32 %v6130_v58, %v9966_v0  ;;  %v6155_v37 = vrot.slane %v9970_v23, 7 }
 0x22b   : > { %9965 = vst [vmem:[#allocation93_spill] sm:$0xff] %v6133_v11  ;;  %v1440_v54 = vmul.f32 %v6133_v11, %v9967_v8  ;;  %v3861_v61 = vadd.f32 %v3797_v34, %v3505_v28  ;;  %v3863_v21 = vadd.f32 %v3799_v53, %v3507_v52  ;;  %v3865_v49 = vadd.f32 %v3801_v18, %v3509_v51  ;;  %v9973_v18 = vld [vmem:[#allocation38_spill] sm:$0xff]  ;;  %v9975_v52 = vld [vmem:[#allocation40_spill] sm:$0xff] }
 0x22c   : > { %v3867_v59 = vadd.f32 %v3803_v9, %v3511_v57  ;;  %9969 = vst [vmem:[#allocation30_spill] sm:$0xff] %v6152_v55  ;;  %v9445_v10 = vrot.slane %v9971_v32, 7  ;;  %v9446_v29 = vrot.slane %v9972_v27, 7  ;;  %v6164_v9 = vrot.slane %v9973_v18, 7 }
 0x22d   : > { %v3947_v43 = vadd.f32 %v6110_v17, %v3861_v61  ;;  %v3949_v58 = vadd.f32 %v6115_v24, %v3863_v21  ;;  %v3951_v11 = vadd.f32 %v6110_v17, %v3865_v49  ;;  %v6167_v51 = vrot.slane %v9975_v52, 7 }
 0x22e   : > { %v3953_v28 = vadd.f32 %v6115_v24, %v3867_v59  ;;  %9974 = vst [vmem:[#allocation31_spill] sm:$0xff] %v6164_v9  ;;  %v6174_v57 = vsel %vm1562_vm0, %v6152_v55, %v9445_v10  ;;  %v6181_v21 = vsel %vm1562_vm0, %v6155_v37, %v9446_v29  ;;  %v9977_v49 = vrot.slane %v9966_v0, 7 }
 0x22f   : > { %9976 = vst [vmem:[#allocation32_spill] sm:$0xff] %v6167_v51  ;;  %v4011_v59 = vmax.f32 %v3947_v43, 0.0  ;;  %v4013_v61 = vmax.f32 %v3951_v11, 0.0  ;;  %v9978_v53 = vrot.slane %v9967_v8, 7  ;;  %v1623_v52 = vsel %vm1562_vm0, %v6164_v9, %v1498_v25 }
 0x230   : > { %v1619_v34 = vsel %vm1562_vm0, %v1498_v25, %v9977_v49  ;;  %v1625_v29 = vsel %vm1562_vm0, %v6167_v51, %v1500_v14  ;;  %v1726_v43 = vrot.slane %v5599_v38, %v5466_v45  ;;  %v1734_v11 = vrot.slane %v5601_v39, %v5466_v45 }
 0x231   : > { %v1621_v10 = vsel %vm1562_vm0, %v1500_v14, %v9978_v53  ;;  %v4043_v49 = vmul.f32 %v4011_v59, %v3949_v58  ;;  %v4045_v18 = vmul.f32 %v4013_v61, %v3953_v28  ;;  %v1659_v24 = vsel %vm5640_vm1, %v1623_v52, 0.0 }
 0x232   : > { %v1661_v53 = vsel %vm5640_vm1, %v1625_v29, 0.0  ;;  %v6206_v25 = vrot.slane %v1726_v43, %v5466_v45  ;;  %v6209_v9 = vrot.slane %v1734_v11, %v5466_v45  ;;  %v1891_v58 = vrot.slane %v9966_v0, 1  ;;  %v9993_v0 = vld [vmem:[#allocation57_spill] sm:$0xff] }
 0x233   : > { %v4075_v17 = vpack.c.bf16 %v4045_v18, %v4043_v49  ;;  %v1893_v28 = vrot.slane %v9967_v8, 1  ;;  %v6216_v52 = vrot.slane %v9968_v30, 1  ;;  %v6231_v49 = vrot.slane %v9970_v23, 1 }
 0x234   : > { %9979 = vst [vmem:[#allocation33_spill] sm:$0xff] %v6206_v25  ;;  %9980 = vst [vmem:[#allocation94_spill] sm:$0xff] %v6209_v9  ;;  %v1759_v29 = vmul.f32 %v6206_v25, %v1659_v24  ;;  %v1761_v59 = vmul.f32 %v6209_v9, %v1661_v53  ;;  %v1763_v61 = vmul.f32 %v6206_v25, %v1619_v34  ;;  %v1899_v24 = vrot.slane %v9971_v32, 1 }
 0x235   : > { %9981 = vst [vmem:[#allocation95_spill] sm:$0xff] %v6216_v52  ;;  %v1765_v43 = vmul.f32 %v6209_v9, %v1621_v10  ;;  %4257 = vmatprep.mubr.bf16.mxu0 %v4075_v17  ;;  %v6224_v11 = vmul.f32 %v6206_v25, %v6174_v57  ;;  %v6228_v18 = vmul.f32 %v6209_v9, %v6181_v21  ;;  %9984 = vst [vmem:[#allocation98_spill] sm:$0xff] %v6231_v49  ;;  %v9985_v17 = vld [vmem:[#allocation34_spill] sm:$0xff]  ;;  %v9987_v25 = vld [vmem:[#allocation36_spill] sm:$0xff] }
 0x236   : > { %v1823_v51 = vadd.f32 %v1759_v29, %v1434_v33  ;;  %v1825_v53 = vadd.f32 %v1761_v59, %v1436_v31  ;;  %v1827_v14 = vadd.f32 %v1763_v61, %v1438_v41  ;;  %v1901_v10 = vrot.slane %v9972_v27, 1 }
 0x237   : > { %9982 = vst [vmem:[#allocation96_spill] sm:$0xff] %v6224_v11  ;;  %9983 = vst [vmem:[#allocation97_spill] sm:$0xff] %v6228_v18  ;;  %v1829_v34 = vadd.f32 %v1765_v43, %v1440_v54  ;;  %v6236_v8 = vrot.slane %v9985_v17, 1  ;;  %v6239_v11 = vrot.slane %v9987_v25, 1  ;;  %v6244_v18 = vsel %vm1951_vm3, %v6216_v52, %v1899_v24 }
 0x238   : > { %v2004_v33 = vsel %vm1951_vm3, %v1891_v58, %v6216_v52  ;;  %v2006_v54 = vsel %vm1951_vm3, %v1893_v28, %v6231_v49  ;;  %v9989_v41 = vrot.slane %v5623_v1, 1  ;;  %v9990_v29 = vrot.slane %v5627_v3, 1 }
 0x239   : > { %9986 = vst [vmem:[#allocation34_spill] sm:$0xff] %v6236_v8  ;;  %9988 = vst [vmem:[#allocation36_spill] sm:$0xff] %v6239_v11  ;;  %v6263_v61 = vsel %vm1951_vm3, %v1899_v24, %v6236_v8  ;;  %v6268_v43 = vsel %vm1951_vm3, %v1901_v10, %v6239_v11  ;;  %v6273_v52 = vsel %vm1951_vm3, %v6231_v49, %v1901_v10  ;;  %v9992_v49 = vld [vmem:[#allocation55_spill] sm:$0xff] }
 0x23a   : > { %v2008_v31 = vsel %vm1951_vm3, %v9989_v41, %v1891_v58  ;;  %v2010_v59 = vsel %vm1951_vm3, %v9990_v29, %v1893_v28  ;;  %v2052_v58 = vsel %vm5733_vm4, %v2004_v33, 0.0  ;;  %v2054_v28 = vsel %vm5733_vm4, %v2006_v54, 0.0 }
 0x23b   : > { %v2060_v24 = vsel %vm5739_vm5, %v6263_v61, 0.0  ;;  %v2062_v29 = vsel %vm5739_vm5, %v6268_v43, 0.0  ;;  %v2115_v3 = vrot.slane %v5599_v38, %v5507_v56  ;;  %v2123_v10 = vrot.slane %v5601_v39, %v5507_v56 }
 0x23c   : > { %v2293_v33 = vrot.slane %v5603_v40, %v5469_v46  ;;  %v2301_v54 = vrot.slane %v5605_v42, %v5469_v46  ;;  %v9477_v1 = vrot.slane %v9992_v49, 7  ;;  %v2541_v50 = vrot.slane %v5603_v40, %v5466_v45 }
 0x23d   : > { %v6295_v9 = vrot.slane %v2115_v3, %v5507_v56  ;;  %v2549_v38 = vrot.slane %v5605_v42, %v5466_v45  ;;  %v6303_v39 = vrot.slane %v2123_v10, %v5507_v56 }
 0x23e   : > { %v6306_v12 = vrot.slane %v2293_v33, %v5469_v46  ;;  %v6309_v2 = vrot.slane %v2301_v54, %v5469_v46  ;;  %v2470_v3 = vsel %vm1562_vm0, %v9477_v1, %v6152_v55 }
 0x23f   : > { %9994 = vst [vmem:[#allocation99_spill] sm:$0xff] %v6303_v39  ;;  %v2148_v41 = vmul.f32 %v6295_v9, %v2008_v31  ;;  %v2152_v36 = vmul.f32 %v6295_v9, %v2052_v58  ;;  %v6320_v10 = vmul.f32 %v6295_v9, %v6244_v18  ;;  %v6323_v33 = vmul.f32 %v6295_v9, %v2060_v24 }
 0x240   : > { %9995 = vst [vmem:[#allocation100_spill] sm:$0xff] %v6306_v12  ;;  %9996 = vst [vmem:[#allocation101_spill] sm:$0xff] %v6309_v2  ;;  %v2150_v54 = vmul.f32 %v6303_v39, %v2010_v59  ;;  %v2154_v7 = vmul.f32 %v6303_v39, %v2054_v28  ;;  %v6329_v49 = vmul.f32 %v6303_v39, %v6273_v52 }
 0x241   : > { %9997 = vst [vmem:[#allocation102_spill] sm:$0xff] %v6320_v10  ;;  %9998 = vst [vmem:[#allocation103_spill] sm:$0xff] %v6323_v33  ;;  %v6332_v1 = vmul.f32 %v6303_v39, %v2062_v29  ;;  %v2212_v31 = vadd.f32 %v2148_v41, %v1823_v51  ;;  %v2216_v58 = vadd.f32 %v2152_v36, %v1827_v14  ;;  %v10000_v29 = vrot.slane %v9993_v0, 7 }
 0x242   : > { %9999 = vst [vmem:[#allocation104_spill] sm:$0xff] %v6329_v49  ;;  %v2326_v55 = vmul.f32 %v6306_v12, %v9968_v30  ;;  %v2328_v24 = vmul.f32 %v6309_v2, %v9970_v23  ;;  %v2214_v33 = vadd.f32 %v2150_v54, %v1825_v53  ;;  %v2218_v10 = vadd.f32 %v2154_v7, %v1829_v34 }
 0x243   : > { %v2330_v59 = vmul.f32 %v6306_v12, %v9971_v32  ;;  %v2332_v28 = vmul.f32 %v6309_v2, %v9972_v27  ;;  %v2472_v36 = vsel %vm1562_vm0, %v10000_v29, %v6155_v37  ;;  %v2474_v51 = vsel %vm5640_vm1, %v2470_v3, 0.0 }
 0x244   : > { %v2390_v49 = vadd.f32 %v2326_v55, %v2212_v31  ;;  %v6350_v14 = vrot.slane %v2541_v50, %v5466_v45  ;;  %v2392_v7 = vadd.f32 %v2328_v24, %v2214_v33  ;;  %v2476_v41 = vsel %vm5640_vm1, %v2472_v36, 0.0 }
 0x245   : > { %v2394_v53 = vadd.f32 %v2330_v59, %v2216_v58  ;;  %v2396_v34 = vadd.f32 %v2332_v28, %v2218_v10  ;;  %v6355_v55 = vrot.slane %v2549_v38, %v5466_v45  ;;  %v2726_v3 = vsel %vm5733_vm4, %v6263_v61, 0.0 }
 0x246   : > { %10001 = vst [vmem:[#allocation105_spill] sm:$0xff] %v6350_v14  ;;  %v2574_v54 = vmul.f32 %v6350_v14, %v2474_v51  ;;  %v2578_v31 = vmul.f32 %v6350_v14, %v6174_v57  ;;  %v2728_v50 = vsel %vm5733_vm4, %v6268_v43, 0.0  ;;  %v2789_v10 = vrot.slane %v5603_v40, %v5507_v56 }
 0x247   : > { %10002 = vst [vmem:[#allocation106_spill] sm:$0xff] %v6355_v55  ;;  %v2797_v38 = vrot.slane %v5605_v42, %v5507_v56  ;;  %v3051_v33 = vrot.slane %v5977_v26, %v5469_v46  ;;  %v2576_v58 = vmul.f32 %v6355_v55, %v2476_v41  ;;  %v2580_v57 = vmul.f32 %v6355_v55, %v6181_v21 }
 0x248   : > { %v2638_v24 = vadd.f32 %v2574_v54, %v2390_v49  ;;  %v2642_v61 = vadd.f32 %v2578_v31, %v2394_v53  ;;  %v6376_v59 = vrot.slane %v2789_v10, %v5507_v56  ;;  %v3059_v40 = vrot.slane %v5979_v47, %v5469_v46 }
 0x249   : > { %v6379_v43 = vrot.slane %v2797_v38, %v5507_v56  ;;  %v6384_v42 = vrot.slane %v3051_v33, %v5469_v46  ;;  %v2640_v28 = vadd.f32 %v2576_v58, %v2392_v7  ;;  %v2644_v29 = vadd.f32 %v2580_v57, %v2396_v34 }
 0x24a   : > { %10003 = vst [vmem:[#allocation107_spill] sm:$0xff] %v6376_v59  ;;  %v6387_v36 = vrot.slane %v9985_v17, 7  ;;  %v6390_v21 = vrot.slane %v9987_v25, 7  ;;  %v2822_v49 = vmul.f32 %v6376_v59, %v6244_v18  ;;  %v2826_v53 = vmul.f32 %v6376_v59, %v2726_v3 }
 0x24b   : > { %10004 = vst [vmem:[#allocation108_spill] sm:$0xff] %v6379_v43  ;;  %10005 = vst [vmem:[#allocation109_spill] sm:$0xff] %v6384_v42  ;;  %v2824_v51 = vmul.f32 %v6379_v43, %v6273_v52  ;;  %v2828_v41 = vmul.f32 %v6379_v43, %v2728_v50  ;;  %v6399_v54 = vrot.slane %v3059_v40, %v5469_v46  ;;  %v9483_v31 = vrot.slane %v5955_v16, 7 }
 0x24c   : > { %v3084_v7 = vmul.f32 %v6384_v42, %v9985_v17  ;;  %v3088_v34 = vmul.f32 %v6384_v42, %v5955_v16  ;;  %v2886_v10 = vadd.f32 %v2822_v49, %v2638_v24  ;;  %v2890_v38 = vadd.f32 %v2826_v53, %v2642_v61 }
 0x24d   : > { %10006 = vst [vmem:[#allocation110_spill] sm:$0xff] %v6399_v54  ;;  %v2888_v18 = vadd.f32 %v2824_v51, %v2640_v28  ;;  %v2892_v33 = vadd.f32 %v2828_v41, %v2644_v29  ;;  %v3086_v52 = vmul.f32 %v6399_v54, %v9987_v25  ;;  %v3090_v3 = vmul.f32 %v6399_v54, %v5965_v63 }
 0x24e   : > { %v9482_v46 = vrot.slane %v5965_v63, 7  ;;  %v9480_v50 = vrot.slane %v5987_v48, 7  ;;  %v3148_v58 = vadd.f32 %v3084_v7, %v2886_v10  ;;  %v3152_v57 = vadd.f32 %v3088_v34, %v2890_v38 }
 0x24f   : > { %v9479_v40 = vrot.slane %v5991_v15, 7  ;;  %v6418_v24 = vsel %vm1562_vm0, %v6387_v36, %v9483_v31  ;;  %v3150_v61 = vadd.f32 %v3086_v52, %v2888_v18  ;;  %v3154_v28 = vadd.f32 %v3090_v3, %v2892_v33 }
 0x250   : > { %v6425_v29 = vsel %vm1562_vm0, %v6390_v21, %v9482_v46  ;;  %v3336_v49 = vsel %vm1562_vm0, %v9480_v50, %v6387_v36  ;;  %v3407_v41 = vrot.slane %v5977_v26, %v5466_v45  ;;  %v3415_v7 = vrot.slane %v5979_v47, %v5466_v45 }
 0x251   : > { %v3338_v51 = vsel %vm1562_vm0, %v9479_v40, %v6390_v21  ;;  %v3340_v53 = vsel %vm5640_vm1, %v3336_v49, 0.0  ;;  %v3572_v10 = vrot.slane %v5955_v16, 1  ;;  %v3574_v18 = vrot.slane %v5965_v63, 1 }
 0x252   : > { %v3342_v34 = vsel %vm5640_vm1, %v3338_v51, 0.0  ;;  %v9481_v38 = vrot.slane %v5969_v19, 1  ;;  %v6449_v33 = vrot.slane %v3407_v41, %v5466_v45  ;;  %v6452_v52 = vrot.slane %v3415_v7, %v5466_v45 }
 0x253   : > { %v9488_v3 = vrot.slane %v5973_v4, 1  ;;  %v3763_v49 = vrot.slane %v5977_v26, %v5507_v56  ;;  %v6466_v51 = vsel %vm1951_vm3, %v6236_v8, %v3572_v10  ;;  %v6471_v41 = vsel %vm1951_vm3, %v6239_v11, %v3574_v18 }
 0x254   : > { %10007 = vst [vmem:[#allocation111_spill] sm:$0xff] %v6449_v33  ;;  %10008 = vst [vmem:[#allocation112_spill] sm:$0xff] %v6452_v52  ;;  %v6461_v13 = vsel %vm1951_vm3, %v3572_v10, %v9481_v38  ;;  %v3771_v7 = vrot.slane %v5979_v47, %v5507_v56  ;;  %v3440_v26 = vmul.f32 %v6449_v33, %v3340_v53 }
 0x255   : > { %v3442_v40 = vmul.f32 %v6452_v52, %v3342_v34  ;;  %v3444_v50 = vmul.f32 %v6449_v33, %v6418_v24  ;;  %v3446_v38 = vmul.f32 %v6452_v52, %v6425_v29  ;;  %v6485_v10 = vsel %vm1951_vm3, %v3574_v18, %v9488_v3  ;;  %v6595_v52 = vld [vmem:[#allocation2 + $0x70] sm:$0xff] }
 0x256   : > { %v3700_v47 = vsel %vm5733_vm4, %v6461_v13, 0.0  ;;  %v6491_v53 = vrot.slane %v3763_v49, %v5507_v56  ;;  %v6494_v34 = vrot.slane %v3771_v7, %v5507_v56  ;;  %v3504_v46 = vadd.f32 %v3440_v26, %v3148_v58  ;;  %v10115_v33 = vld [vmem:[#allocation43_spill] sm:$0xff] }
 0x257   : > { %v3506_v31 = vadd.f32 %v3442_v40, %v3150_v61  ;;  %v3508_v11 = vadd.f32 %v3444_v50, %v3152_v57  ;;  %v3510_v8 = vadd.f32 %v3446_v38, %v3154_v28  ;;  %v3702_v15 = vsel %vm5733_vm4, %v6485_v10, 0.0 }
 0x258   : > { %10009 = vst [vmem:[#allocation113_spill] sm:$0xff] %v6491_v53  ;;  %10010 = vst [vmem:[#allocation114_spill] sm:$0xff] %v6494_v34  ;;  %v3796_v18 = vmul.f32 %v6491_v53, %v6466_v51  ;;  %v3798_v3 = vmul.f32 %v6494_v34, %v6471_v41  ;;  %v3800_v49 = vmul.f32 %v6491_v53, %v3700_v47  ;;  %v1241_v28 = vadd.s32 40, %v5463_v44 }
 0x259   : > { %v3802_v48 = vmul.f32 %v6494_v34, %v3702_v15  ;;  %v6507_v58 = vrot.slane %v6074_v62, %v5466_v45  ;;  %v6511_v50 = vrot.slane %v6074_v62, %v5507_v56  ;;  %v1256_v7 = vand.u32 15, %v1240_v35  ;;  %v10047_v34 = vld [vmem:[#allocation63_spill] sm:$0xff] }
 0x25a   : > { %v3860_v57 = vadd.f32 %v3796_v18, %v3504_v46  ;;  %v3862_v40 = vadd.f32 %v3798_v3, %v3506_v31  ;;  %v3864_v61 = vadd.f32 %v3800_v49, %v3508_v11  ;;  %v1257_v47 = vand.u32 15, %v1241_v28  ;;  %v10019_v49 = vld [vmem:[#allocation47_spill] sm:$0xff] }
 0x25b   : > { %10011 = vst [vmem:[#allocation115_spill] sm:$0xff] %v6507_v58  ;;  %10012 = vst [vmem:[#allocation116_spill] sm:$0xff] %v6511_v50  ;;  %v3866_v38 = vadd.f32 %v3802_v48, %v3510_v8  ;;  %vm6519_vm6 = vcmp.ne.s32.totalorder %v1256_v7, 0  ;;  %v10017_v48 = vrot.slane %v5658_v20, 7  ;;  %v10018_v46 = vrot.slane %v5662_v22, 7 }
 0x25c   : > { %v3946_v26 = vadd.f32 %v6507_v58, %v3860_v57  ;;  %v3948_v15 = vadd.f32 %v6511_v50, %v3862_v40  ;;  %v3950_v45 = vadd.f32 %v6507_v58, %v3864_v61  ;;  %vm6523_vm7 = vcmp.ne.s32.totalorder %v1257_v47, 15  ;;  %v10021_v57 = vld [vmem:[#allocation48_spill] sm:$0xff]  ;;  %v10022_v40 = vld [vmem:[#allocation81_spill] sm:$0xff] }
 0x25d   : > { %v3952_v0 = vadd.f32 %v6511_v50, %v3866_v38  ;;  %v1608_v8 = vsel %vm1562_vm0, %v10017_v48, %v6000_v5  ;;  %v1610_v3 = vsel %vm1562_vm0, %v10018_v46, %v6003_v6  ;;  %v6541_v35 = vmul.f32 %v6024_v60, %v10019_v49  ;;  %v10026_v38 = vld [vmem:[#allocation84_spill] sm:$0xff]  ;;  %v10028_v47 = vld [vmem:[#allocation53_spill] sm:$0xff]  ;;  %v10032_v48 = vld [vmem:[#allocation87_spill] sm:$0xff] }
 0x25e   : > { %v4010_v62 = vmax.f32 %v3946_v26, 0.0  ;;  %v4012_v31 = vmax.f32 %v3950_v45, 0.0  ;;  %v1676_v18 = vsel %vm6519_vm6, %v1608_v8, 0.0  ;;  %v6545_v61 = vmul.f32 %v10022_v40, %v10021_v57  ;;  %v10027_v26 = vld [vmem:[#allocation85_spill] sm:$0xff]  ;;  %v10040_v50 = vld [vmem:[#allocation67_spill] sm:$0xff] }
 0x25f   : > { %10020 = vst [vmem:[#allocation117_spill] sm:$0xff] %v6541_v35  ;;  %v1678_v5 = vsel %vm6519_vm6, %v1610_v3, 0.0  ;;  %v6550_v22 = vmul.f32 %v10019_v49, %v1676_v18  ;;  %v2069_v7 = vsel %vm6523_vm7, %v10026_v38, 0.0  ;;  %v2071_v45 = vsel %vm6523_vm7, %v10027_v26, 0.0  ;;  %v10037_v35 = vld [vmem:[#allocation59_spill] sm:$0xff]  ;;  %v10045_v58 = vld [vmem:[#allocation61_spill] sm:$0xff] }
 0x260   : > { %10023 = vst [vmem:[#allocation81_spill] sm:$0xff] %v6545_v61  ;;  %v4042_v20 = vmul.f32 %v4010_v62, %v3948_v15  ;;  %v4044_v28 = vmul.f32 %v4012_v31, %v3952_v0  ;;  %v6553_v6 = vmul.f32 %v10021_v57, %v1678_v5  ;;  %v10029_v15 = vld [vmem:[#allocation86_spill] sm:$0xff]  ;;  %v6570_v18 = vmul.f32 %v10028_v47, %v2069_v7  ;;  %v10036_v61 = vld [vmem:[#allocation35_spill] sm:$0xff]  ;;  %v10039_v57 = vld [vmem:[#allocation60_spill] sm:$0xff] }
 0x261   : > { %10024 = vst [vmem:[#allocation118_spill] sm:$0xff] %v6550_v22  ;;  %v6563_v0 = vmul.f32 %v10029_v15, %v10028_v47  ;;  %v10031_v31 = vld [vmem:[#allocation54_spill] sm:$0xff]  ;;  %v10038_v22 = vld [vmem:[#allocation37_spill] sm:$0xff]  ;;  %v2483_v7 = vsel %vm5644_vm2, %v1608_v8, 0.0 }
 0x262   : > { %10025 = vst [vmem:[#allocation119_spill] sm:$0xff] %v6553_v6  ;;  %v4074_v62 = vpack.c.bf16 %v4044_v28, %v4042_v20  ;;  %v6567_v46 = vmul.f32 %v10032_v48, %v10031_v31  ;;  %10034 = vst [vmem:[#allocation86_spill] sm:$0xff] %v6570_v18  ;;  %v6573_v5 = vmul.f32 %v10031_v31, %v2071_v45  ;;  %v10041_v20 = vld [vmem:[#allocation70_spill] sm:$0xff]  ;;  %v2485_v45 = vsel %vm5644_vm2, %v1610_v3, 0.0 }
 0x263   : > { %10030 = vst [vmem:[#allocation84_spill] sm:$0xff] %v6563_v0  ;;  %v2335_v6 = vmul.f32 %v10037_v35, %v10036_v61  ;;  %v2337_v49 = vmul.f32 %v10039_v57, %v10038_v22  ;;  %v2339_v0 = vmul.f32 %v10040_v50, %v10037_v35  ;;  %v2341_v28 = vmul.f32 %v10041_v20, %v10039_v57  ;;  %v10044_v31 = vld [vmem:[#allocation66_spill] sm:$0xff]  ;;  %v10048_v57 = vld [vmem:[#allocation64_spill] sm:$0xff] }
 0x264   : > { %10033 = vst [vmem:[#allocation85_spill] sm:$0xff] %v6567_v46  ;;  %10035 = vst [vmem:[#allocation87_spill] sm:$0xff] %v6573_v5  ;;  %4258 = vmatmul.mubr.bf16.vlgmr.msra.gmra.mxu0 %v4074_v62  ;;  %v10043_v5 = vld [vmem:[#allocation65_spill] sm:$0xff]  ;;  %v2589_v47 = vmul.f32 %v10022_v40, %v10044_v31  ;;  %v10046_v61 = vld [vmem:[#allocation62_spill] sm:$0xff]  ;;  %v2585_v3 = vmul.f32 %v10044_v31, %v2485_v45 }
 0x265   : > { %v2587_v18 = vmul.f32 %v6024_v60, %v10043_v5  ;;  %v2399_v22 = vadd.f32 %v2335_v6, %v10045_v58  ;;  %v2401_v35 = vadd.f32 %v2337_v49, %v10046_v61  ;;  %v2403_v53 = vadd.f32 %v2339_v0, %v10047_v34  ;;  %v6605_v40 = vld [vmem:[#allocation2 + $0x20] sm:$0xff]  ;;  %v6607_v49 = vld [vmem:[#allocation2 + $0x128] sm:$0xff]  ;;  %v6609_v34 = vld [vmem:[#allocation2 + $0x110] sm:$0xff] }
 0x266   : > { %v2405_v62 = vadd.f32 %v2341_v28, %v10048_v57  ;;  %v2583_v8 = vmul.f32 %v10043_v5, %v2483_v7  ;;  %v2735_v60 = vsel %vm5739_vm5, %v10026_v38, 0.0  ;;  %v2737_v58 = vsel %vm5739_vm5, %v10027_v26, 0.0  ;;  %v10050_v6 = vld [vmem:[#allocation68_spill] sm:$0xff]  ;;  %v10051_v28 = vld [vmem:[#allocation69_spill] sm:$0xff] }
 0x267   : > { %v2651_v57 = vadd.f32 %v2587_v18, %v2403_v53  ;;  %v2831_v0 = vmul.f32 %v10029_v15, %v10050_v6  ;;  %v2833_v7 = vmul.f32 %v10032_v48, %v10051_v28  ;;  %v2649_v38 = vadd.f32 %v2585_v3, %v2401_v35  ;;  %v10056_v18 = vld [vmem:[#allocation72_spill] sm:$0xff]  ;;  %v10058_v3 = vld [vmem:[#allocation74_spill] sm:$0xff] }
 0x268   : > { %v2653_v61 = vadd.f32 %v2589_v47, %v2405_v62  ;;  %v2647_v45 = vadd.f32 %v2583_v8, %v2399_v22  ;;  %v2835_v31 = vmul.f32 %v10050_v6, %v2735_v60  ;;  %v2837_v26 = vmul.f32 %v10051_v28, %v2737_v58  ;;  %v10057_v62 = vld [vmem:[#allocation79_spill] sm:$0xff]  ;;  %v10059_v60 = vld [vmem:[#allocation80_spill] sm:$0xff] }
 0x269   : > { %v6618_v5 = vunpack.c.h.bf16 %v6595_v52  ;;  %v6621_v54 = vunpack.c.h.bf16 %v6605_v40  ;;  %v6624_v53 = vunpack.c.h.bf16 %v6607_v49  ;;  %v6627_v47 = vunpack.c.h.bf16 %v6609_v34 }
 0x26a   : > { %v2895_v15 = vadd.f32 %v2831_v0, %v2647_v45  ;;  %v2897_v48 = vadd.f32 %v2833_v7, %v2649_v38  ;;  %v2899_v22 = vadd.f32 %v2835_v31, %v2651_v57  ;;  %v2901_v35 = vadd.f32 %v2837_v26, %v2653_v61 }
 0x26b   : > { %10052 = vst [vmem:[#allocation29_spill] sm:$0xff] %v6618_v5  ;;  %10053 = vst [vmem:[#allocation61_spill] sm:$0xff] %v6621_v54  ;;  %v3093_v8 = vmul.f32 %v10057_v62, %v10056_v18  ;;  %v3095_v58 = vmul.f32 %v10059_v60, %v10058_v3  ;;  %v3097_v28 = vmul.f32 %v10057_v62, %v6618_v5  ;;  %v3221_v4 = vrot.slane %v10056_v18, 7 }
 0x26c   : > { %10054 = vst [vmem:[#allocation62_spill] sm:$0xff] %v6624_v53  ;;  %10055 = vst [vmem:[#allocation63_spill] sm:$0xff] %v6627_v47  ;;  %v3099_v6 = vmul.f32 %v10059_v60, %v6621_v54  ;;  %v3223_v42 = vrot.slane %v10058_v3, 7  ;;  %v9522_v0 = vrot.slane %v6618_v5, 7  ;;  %v9521_v31 = vrot.slane %v6621_v54, 7 }
 0x26d   : > { %v3157_v57 = vadd.f32 %v3093_v8, %v2895_v15  ;;  %v3159_v61 = vadd.f32 %v3095_v58, %v2897_v48  ;;  %v3161_v7 = vadd.f32 %v3097_v28, %v2899_v22  ;;  %v10062_v60 = vrot.slane %v10040_v50, 7 }
 0x26e   : > { %v3163_v45 = vadd.f32 %v3099_v6, %v2901_v35  ;;  %v6645_v38 = vsel %vm1562_vm0, %v3221_v4, %v9522_v0  ;;  %v6651_v26 = vsel %vm1562_vm0, %v3223_v42, %v9521_v31  ;;  %v10064_v6 = vrot.slane %v10041_v20, 7  ;;  %v10066_v35 = vld [vmem:[#allocation82_spill] sm:$0xff] }
 0x26f   : > { %10060 = vst [vmem:[#allocation64_spill] sm:$0xff] %v6645_v38  ;;  %10061 = vst [vmem:[#allocation46_spill] sm:$0xff] %v6651_v26  ;;  %v6657_v15 = vsel %vm1562_vm0, %v10062_v60, %v3221_v4  ;;  %v3453_v8 = vmul.f32 %v10066_v35, %v6645_v38  ;;  %v10067_v4 = vld [vmem:[#allocation83_spill] sm:$0xff]  ;;  %v10068_v38 = vrot.slane %v10056_v18, 1 }
 0x270   : > { %10063 = vst [vmem:[#allocation120_spill] sm:$0xff] %v6657_v15  ;;  %v6663_v28 = vsel %vm1562_vm0, %v10064_v6, %v3223_v42  ;;  %v3349_v48 = vsel %vm5644_vm2, %v6657_v15, 0.0  ;;  %v3455_v60 = vmul.f32 %v10067_v4, %v6651_v26  ;;  %v3581_v42 = vrot.slane %v6618_v5, 1 }
 0x271   : > { %10065 = vst [vmem:[#allocation121_spill] sm:$0xff] %v6663_v28  ;;  %v3351_v22 = vsel %vm5644_vm2, %v6663_v28, 0.0  ;;  %v3449_v58 = vmul.f32 %v10066_v35, %v3349_v48  ;;  %v3583_v6 = vrot.slane %v6621_v54, 1  ;;  %v3517_v0 = vadd.f32 %v3453_v8, %v3161_v7 }
 0x272   : > { %v3451_v31 = vmul.f32 %v10067_v4, %v3351_v22  ;;  %v3519_v62 = vadd.f32 %v3455_v60, %v3163_v45  ;;  %v9535_v15 = vrot.slane %v6624_v53, 1  ;;  %v9534_v28 = vrot.slane %v6627_v47, 1  ;;  %v10072_v45 = vld [vmem:[#allocation91_spill] sm:$0xff] }
 0x273   : > { %v3513_v20 = vadd.f32 %v3449_v58, %v3157_v57  ;;  %v6685_v26 = vsel %vm1951_vm3, %v10068_v38, %v3581_v42  ;;  %v10069_v48 = vrot.slane %v10058_v3, 1  ;;  %v10071_v57 = vld [vmem:[#allocation90_spill] sm:$0xff]  ;;  %v10073_v58 = vld [vmem:[#allocation92_spill] sm:$0xff] }
 0x274   : > { %v3515_v50 = vadd.f32 %v3451_v31, %v3159_v61  ;;  %v6697_v7 = vsel %vm1951_vm3, %v3581_v42, %v9535_v15  ;;  %v6703_v31 = vsel %vm1951_vm3, %v3583_v6, %v9534_v28  ;;  %v3805_v61 = vmul.f32 %v10071_v57, %v6685_v26  ;;  %v10075_v3 = vld [vmem:[#allocation88_spill] sm:$0xff] }
 0x275   : > { %v6691_v22 = vsel %vm1951_vm3, %v10069_v48, %v3583_v6  ;;  %v3709_v8 = vsel %vm5739_vm5, %v6697_v7, 0.0  ;;  %v3711_v60 = vsel %vm5739_vm5, %v6703_v31, 0.0  ;;  %v1442_v42 = vmul.f32 %v10073_v58, %v9968_v30  ;;  %v10074_v6 = vld [vmem:[#allocation93_spill] sm:$0xff] }
 0x276   : > { %10070 = vst [vmem:[#allocation122_spill] sm:$0xff] %v6691_v22  ;;  %v3807_v38 = vmul.f32 %v10072_v45, %v6691_v22  ;;  %v1444_v48 = vmul.f32 %v10074_v6, %v9970_v23  ;;  %v3809_v28 = vmul.f32 %v10071_v57, %v3709_v8  ;;  %v3811_v15 = vmul.f32 %v10072_v45, %v3711_v60  ;;  %v10076_v30 = vld [vmem:[#allocation89_spill] sm:$0xff] }
 0x277   : > { %v3869_v4 = vadd.f32 %v3805_v61, %v3513_v20  ;;  %v1446_v47 = vmul.f32 %v10073_v58, %v9971_v32  ;;  %v1448_v53 = vmul.f32 %v10074_v6, %v9972_v27  ;;  %v10077_v23 = vrot.slane %v9971_v32, 7 }
 0x278   : > { %v3871_v35 = vadd.f32 %v3807_v38, %v3515_v50  ;;  %v3873_v54 = vadd.f32 %v3809_v28, %v3517_v0  ;;  %v3875_v5 = vadd.f32 %v3811_v15, %v3519_v62  ;;  %v10078_v50 = vrot.slane %v9972_v27, 7  ;;  %v10079_v15 = vld [vmem:[#allocation30_spill] sm:$0xff]  ;;  %v10080_v28 = vld [vmem:[#allocation27_spill] sm:$0xff] }
 0x279   : > { %v3955_v18 = vadd.f32 %v10075_v3, %v3869_v4  ;;  %v1607_v8 = vsel %vm1562_vm0, %v10077_v23, %v6387_v36  ;;  %v10082_v4 = vld [vmem:[#allocation28_spill] sm:$0xff]  ;;  %v10084_v23 = vld [vmem:[#allocation33_spill] sm:$0xff] }
 0x27a   : > { %v3957_v22 = vadd.f32 %v10076_v30, %v3871_v35  ;;  %v1609_v20 = vsel %vm1562_vm0, %v10078_v50, %v6390_v21  ;;  %v3959_v61 = vadd.f32 %v10075_v3, %v3873_v54  ;;  %v3961_v62 = vadd.f32 %v10076_v30, %v3875_v5 }
 0x27b   : > { %v4015_v0 = vmax.f32 %v3955_v18, 0.0  ;;  %v10081_v35 = vrot.slane %v10080_v28, 7  ;;  %v10083_v36 = vrot.slane %v10082_v4, 7  ;;  %v1675_v54 = vsel %vm6519_vm6, %v1607_v8, 0.0 }
 0x27c   : > { %v1677_v5 = vsel %vm6519_vm6, %v1609_v20, 0.0  ;;  %v4017_v18 = vmax.f32 %v3959_v61, 0.0 }
 0x27d   : > { %v1615_v32 = vsel %vm1562_vm0, %v10081_v35, %v10079_v15  ;;  %v1617_v27 = vsel %vm1562_vm0, %v10083_v36, %v6155_v37  ;;  %v4047_v38 = vmul.f32 %v4015_v0, %v3957_v22  ;;  %v10085_v15 = vld [vmem:[#allocation94_spill] sm:$0xff]  ;;  %v6760_v37 = vmul.f32 %v10084_v23, %v1675_v54  ;;  %v10087_v0 = vld [vmem:[#allocation96_spill] sm:$0xff] }
 0x27e   : > { %v1667_v21 = vsel %vm5644_vm2, %v1615_v32, 0.0  ;;  %v1669_v60 = vsel %vm5644_vm2, %v1617_v27, 0.0  ;;  %v6763_v35 = vmul.f32 %v10085_v15, %v1677_v5  ;;  %v6767_v32 = vmul.f32 %v6418_v24, %v10084_v23 }
 0x27f   : > { %v1767_v50 = vmul.f32 %v10084_v23, %v1667_v21  ;;  %v1769_v28 = vmul.f32 %v10085_v15, %v1669_v60  ;;  %v4049_v4 = vmul.f32 %v4017_v18, %v3961_v62  ;;  %v6771_v22 = vmul.f32 %v6425_v29, %v10085_v15  ;;  %v10088_v21 = vld [vmem:[#allocation97_spill] sm:$0xff] }
 0x280   : > { %10086 = vst [vmem:[#allocation30_spill] sm:$0xff] %v6767_v32  ;;  %v1835_v36 = vadd.f32 %v10087_v0, %v1446_v47  ;;  %v1837_v60 = vadd.f32 %v10088_v21, %v1448_v53  ;;  %v2068_v54 = vsel %vm6523_vm7, %v6461_v13, 0.0  ;;  %v2070_v5 = vsel %vm6523_vm7, %v6485_v10, 0.0  ;;  %v10095_v0 = vld [vmem:[#allocation103_spill] sm:$0xff] }
 0x281   : > { %v1831_v61 = vadd.f32 %v1767_v50, %v1442_v42  ;;  %v1833_v27 = vadd.f32 %v1769_v28, %v1444_v48  ;;  %v4077_v32 = vpack.c.bf16 %v4049_v4, %v4047_v38  ;;  %v6783_v62 = vmul.f32 %v6466_v51, %v6295_v9  ;;  %v10093_v48 = vld [vmem:[#allocation102_spill] sm:$0xff]  ;;  %v10094_v50 = vld [vmem:[#allocation104_spill] sm:$0xff] }
 0x282   : > { %v6787_v42 = vmul.f32 %v6471_v41, %v6303_v39  ;;  %v6790_v47 = vmul.f32 %v6295_v9, %v2068_v54  ;;  %v6793_v53 = vmul.f32 %v6303_v39, %v2070_v5  ;;  %v2224_v38 = vadd.f32 %v10095_v0, %v1835_v36 }
 0x283   : > { %10089 = vst [vmem:[#allocation27_spill] sm:$0xff] %v6783_v62  ;;  %v2220_v18 = vadd.f32 %v10093_v48, %v1831_v61  ;;  %v2222_v28 = vadd.f32 %v10094_v50, %v1833_v27  ;;  %4265 = vmatprep.mubr.bf16.mxu0 %v4077_v32  ;;  %v2226_v4 = vadd.f32 %v6332_v1, %v1837_v60  ;;  %v2482_v61 = vsel %vm5644_vm2, %v1607_v8, 0.0  ;;  %v10151_v62 = vld [vmem:[#allocation60_spill] sm:$0xff] }
 0x284   : > { %10090 = vst [vmem:[#allocation28_spill] sm:$0xff] %v6787_v42  ;;  %10091 = vst [vmem:[#allocation96_spill] sm:$0xff] %v6790_v47  ;;  %v2334_v21 = vmul.f32 %v6306_v12, %v9985_v17  ;;  %v2336_v42 = vmul.f32 %v6309_v2, %v9987_v25  ;;  %v2338_v54 = vmul.f32 %v5955_v16, %v6306_v12  ;;  %v2484_v32 = vsel %vm5644_vm2, %v1609_v20, 0.0 }
 0x285   : > { %10092 = vst [vmem:[#allocation97_spill] sm:$0xff] %v6793_v53  ;;  %v2340_v5 = vmul.f32 %v5965_v63, %v6309_v2  ;;  %v2586_v1 = vmul.f32 %v6418_v24, %v6350_v14  ;;  %v2582_v48 = vmul.f32 %v6350_v14, %v2482_v61  ;;  %v2584_v0 = vmul.f32 %v6355_v55, %v2484_v32  ;;  %v10100_v61 = vld [vmem:[#allocation109_spill] sm:$0xff]  ;;  %v10116_v14 = vld [vmem:[#allocation115_spill] sm:$0xff] }
 0x286   : > { %v2398_v36 = vadd.f32 %v2334_v21, %v2220_v18  ;;  %v2400_v27 = vadd.f32 %v2336_v42, %v2222_v28  ;;  %v2402_v60 = vadd.f32 %v2338_v54, %v2224_v38  ;;  %v2588_v2 = vmul.f32 %v6425_v29, %v6355_v55  ;;  %v10137_v53 = vld [vmem:[#allocation81_spill] sm:$0xff] }
 0x287   : > { %v2404_v50 = vadd.f32 %v2340_v5, %v2226_v4  ;;  %v2734_v8 = vsel %vm5739_vm5, %v6461_v13, 0.0  ;;  %v2736_v24 = vsel %vm5739_vm5, %v6485_v10, 0.0  ;;  %v2830_v42 = vmul.f32 %v6466_v51, %v6376_v59 }
 0x288   : > { %v2646_v12 = vadd.f32 %v2582_v48, %v2398_v36  ;;  %v2650_v20 = vadd.f32 %v2586_v1, %v2402_v60  ;;  %v2648_v18 = vadd.f32 %v2584_v0, %v2400_v27  ;;  %v2832_v38 = vmul.f32 %v6471_v41, %v6379_v43  ;;  %v10101_v1 = vld [vmem:[#allocation73_spill] sm:$0xff] }
 0x289   : > { %v2652_v28 = vadd.f32 %v2588_v2, %v2404_v50  ;;  %v2834_v29 = vmul.f32 %v6376_v59, %v2734_v8  ;;  %v2836_v4 = vmul.f32 %v6379_v43, %v2736_v24  ;;  %v6830_v13 = vunpack.c.l.bf16 %v6595_v52 }
 0x28a   : > { %v2894_v21 = vadd.f32 %v2830_v42, %v2646_v12  ;;  %v6833_v54 = vunpack.c.l.bf16 %v6605_v40  ;;  %v2896_v10 = vadd.f32 %v2832_v38, %v2648_v18  ;;  %v6836_v51 = vunpack.c.l.bf16 %v6607_v49  ;;  %v10102_v12 = vld [vmem:[#allocation110_spill] sm:$0xff] }
 0x28b   : > { %10096 = vst [vmem:[#allocation102_spill] sm:$0xff] %v6830_v13  ;;  %v2898_v5 = vadd.f32 %v2834_v29, %v2650_v20  ;;  %v6839_v2 = vunpack.c.l.bf16 %v6609_v34  ;;  %v2900_v41 = vadd.f32 %v2836_v4, %v2652_v28  ;;  %v3092_v32 = vmul.f32 %v10100_v61, %v5969_v19 }
 0x28c   : > { %10097 = vst [vmem:[#allocation104_spill] sm:$0xff] %v6833_v54  ;;  %10098 = vst [vmem:[#allocation103_spill] sm:$0xff] %v6836_v51  ;;  %v3094_v36 = vmul.f32 %v10102_v12, %v10101_v1  ;;  %v3096_v52 = vmul.f32 %v10100_v61, %v6830_v13  ;;  %v3098_v40 = vmul.f32 %v10102_v12, %v6833_v54  ;;  %v3220_v27 = vrot.slane %v5969_v19, 7  ;;  %v10112_v12 = vld [vmem:[#allocation35_spill] sm:$0xff] }
 0x28d   : > { %10099 = vst [vmem:[#allocation123_spill] sm:$0xff] %v6839_v2  ;;  %v3222_v49 = vrot.slane %v10101_v1, 7  ;;  %v9555_v34 = vrot.slane %v6830_v13, 7  ;;  %v3156_v60 = vadd.f32 %v3092_v32, %v2894_v21  ;;  %v9554_v0 = vrot.slane %v6833_v54, 7  ;;  %v10105_v21 = vld [vmem:[#allocation111_spill] sm:$0xff] }
 0x28e   : > { %v3158_v48 = vadd.f32 %v3094_v36, %v2896_v10  ;;  %v3160_v50 = vadd.f32 %v3096_v52, %v2898_v5  ;;  %v3162_v8 = vadd.f32 %v3098_v40, %v2900_v41  ;;  %v10103_v24 = vrot.slane %v5955_v16, 7  ;;  %v10106_v41 = vld [vmem:[#allocation112_spill] sm:$0xff] }
 0x28f   : > { %v6857_v20 = vsel %vm1562_vm0, %v3220_v27, %v9555_v34  ;;  %v10104_v18 = vrot.slane %v5965_v63, 7  ;;  %v6875_v38 = vsel %vm1562_vm0, %v3222_v49, %v9554_v0  ;;  %v3580_v52 = vrot.slane %v6830_v13, 1 }
 0x290   : > { %v6863_v42 = vsel %vm1562_vm0, %v10103_v24, %v3220_v27  ;;  %v3452_v10 = vmul.f32 %v10105_v21, %v6857_v20  ;;  %v3454_v36 = vmul.f32 %v10106_v41, %v6875_v38  ;;  %v3582_v27 = vrot.slane %v6833_v54, 1 }
 0x291   : > { %v6869_v28 = vsel %vm1562_vm0, %v10104_v18, %v3222_v49  ;;  %v3348_v29 = vsel %vm5644_vm2, %v6863_v42, 0.0  ;;  %v9557_v49 = vrot.slane %v6836_v51, 1  ;;  %v9556_v46 = vrot.slane %v6839_v2, 1  ;;  %v10113_v2 = vld [vmem:[#allocation42_spill] sm:$0xff]  ;;  %v10114_v51 = vld [vmem:[#allocation37_spill] sm:$0xff] }
 0x292   : > { %v3350_v4 = vsel %vm5644_vm2, %v6869_v28, 0.0  ;;  %v3448_v5 = vmul.f32 %v10105_v21, %v3348_v29  ;;  %v3516_v40 = vadd.f32 %v3452_v10, %v3160_v50  ;;  %v3518_v0 = vadd.f32 %v3454_v36, %v3162_v8 }
 0x293   : > { %v3450_v32 = vmul.f32 %v10106_v41, %v3350_v4  ;;  %v10107_v34 = vrot.slane %v5969_v19, 1  ;;  %v6903_v50 = vsel %vm1951_vm3, %v3580_v52, %v9557_v49  ;;  %v6909_v4 = vsel %vm1951_vm3, %v3582_v27, %v9556_v46 }
 0x294   : > { %v3512_v24 = vadd.f32 %v3448_v5, %v3156_v60  ;;  %v10108_v60 = vrot.slane %v10101_v1, 1  ;;  %v3708_v10 = vsel %vm5739_vm5, %v6903_v50, 0.0  ;;  %v3710_v5 = vsel %vm5739_vm5, %v6909_v4, 0.0  ;;  %v10117_v1 = vld [vmem:[#allocation116_spill] sm:$0xff] }
 0x295   : > { %v3514_v18 = vadd.f32 %v3450_v32, %v3158_v48  ;;  %v6897_v29 = vsel %vm1951_vm3, %v10107_v34, %v3580_v52  ;;  %v10110_v34 = vld [vmem:[#allocation113_spill] sm:$0xff]  ;;  %v10111_v32 = vld [vmem:[#allocation114_spill] sm:$0xff]  ;;  %v1242_v52 = vadd.s32 48, %v5463_v44  ;;  %v1243_v49 = vadd.s32 56, %v5463_v44 }
 0x296   : > { %v6915_v48 = vsel %vm1951_vm3, %v10108_v60, %v3582_v27  ;;  %v3804_v8 = vmul.f32 %v10110_v34, %v6897_v29  ;;  %v3808_v46 = vmul.f32 %v10110_v34, %v3708_v10  ;;  %v3810_v27 = vmul.f32 %v10111_v32, %v3710_v5  ;;  %v10136_v34 = vld [vmem:[#allocation117_spill] sm:$0xff] }
 0x297   : > { %10109 = vst [vmem:[#allocation124_spill] sm:$0xff] %v6915_v48  ;;  %v3806_v36 = vmul.f32 %v10111_v32, %v6915_v48  ;;  %v1258_v21 = vand.u32 15, %v1242_v52  ;;  %v1451_v61 = vmul.f32 %v10113_v2, %v10112_v12  ;;  %v1453_v43 = vmul.f32 %v10115_v33, %v10114_v51  ;;  %v10126_v52 = vld [vmem:[#allocation47_spill] sm:$0xff] }
 0x298   : > { %v3868_v60 = vadd.f32 %v3804_v8, %v3512_v24  ;;  %v3872_v59 = vadd.f32 %v3808_v46, %v3516_v40  ;;  %v3874_v55 = vadd.f32 %v3810_v27, %v3518_v0  ;;  %v1259_v13 = vand.u32 15, %v1243_v49  ;;  %v10120_v24 = vld [vmem:[#allocation67_spill] sm:$0xff]  ;;  %v10121_v8 = vld [vmem:[#allocation70_spill] sm:$0xff]  ;;  %v10125_v49 = vld [vmem:[#allocation121_spill] sm:$0xff] }
 0x299   : > { %v3870_v41 = vadd.f32 %v3806_v36, %v3514_v18  ;;  %vm6937_vm8 = vcmp.ne.s32.totalorder %v1258_v21, 0  ;;  %v1455_v18 = vmul.f32 %v10120_v24, %v10113_v2  ;;  %v1457_v12 = vmul.f32 %v10121_v8, %v10115_v33  ;;  %v10127_v27 = vld [vmem:[#allocation64_spill] sm:$0xff]  ;;  %v10130_v24 = vld [vmem:[#allocation46_spill] sm:$0xff]  ;;  %v10135_v2 = vld [vmem:[#allocation119_spill] sm:$0xff] }
 0x29a   : > { %v3954_v54 = vadd.f32 %v10116_v14, %v3868_v60  ;;  %v3958_v36 = vadd.f32 %v10116_v14, %v3872_v59  ;;  %v3960_v51 = vadd.f32 %v10117_v1, %v3874_v55  ;;  %vm6947_vm9 = vcmp.ne.s32.totalorder %v1259_v13, 15  ;;  %v10129_v59 = vld [vmem:[#allocation48_spill] sm:$0xff]  ;;  %v10134_v14 = vld [vmem:[#allocation118_spill] sm:$0xff] }
 0x29b   : > { %v3956_v10 = vadd.f32 %v10117_v1, %v3870_v41  ;;  %v10124_v41 = vld [vmem:[#allocation120_spill] sm:$0xff]  ;;  %v1686_v46 = vsel %vm6937_vm8, %v10125_v49, 0.0  ;;  %v6959_v60 = vmul.f32 %v10127_v27, %v10126_v52  ;;  %v6963_v55 = vmul.f32 %v10130_v24, %v10129_v59 }
 0x29c   : > { %v4014_v0 = vmax.f32 %v3954_v54, 0.0  ;;  %v1684_v21 = vsel %vm6937_vm8, %v10124_v41, 0.0  ;;  %v4016_v13 = vmax.f32 %v3958_v36, 0.0  ;;  %v6969_v1 = vmul.f32 %v10129_v59, %v1686_v46  ;;  %v10150_v59 = vld [vmem:[#allocation72_spill] sm:$0xff] }
 0x29d   : > { %10128 = vst [vmem:[#allocation35_spill] sm:$0xff] %v6959_v60  ;;  %10131 = vst [vmem:[#allocation37_spill] sm:$0xff] %v6963_v55  ;;  %v6966_v8 = vmul.f32 %v10126_v52, %v1684_v21  ;;  %v1840_v33 = vadd.f32 %v10134_v14, %v1451_v61  ;;  %v1842_v32 = vadd.f32 %v10135_v2, %v1453_v43  ;;  %v2077_v36 = vsel %vm6947_vm9, %v6697_v7, 0.0  ;;  %v10140_v14 = vld [vmem:[#allocation54_spill] sm:$0xff] }
 0x29e   : > { %v4046_v54 = vmul.f32 %v4014_v0, %v3956_v10  ;;  %10133 = vst [vmem:[#allocation70_spill] sm:$0xff] %v6969_v1  ;;  %v1844_v19 = vadd.f32 %v10136_v34, %v1455_v18  ;;  %v1846_v60 = vadd.f32 %v10137_v53, %v1457_v12  ;;  %v4048_v47 = vmul.f32 %v4016_v13, %v3960_v51  ;;  %v10138_v0 = vld [vmem:[#allocation53_spill] sm:$0xff]  ;;  %v10141_v61 = vld [vmem:[#allocation122_spill] sm:$0xff]  ;;  %v10145_v34 = vld [vmem:[#allocation84_spill] sm:$0xff] }
 0x29f   : > { %10132 = vst [vmem:[#allocation67_spill] sm:$0xff] %v6966_v8  ;;  %v2079_v10 = vsel %vm6947_vm9, %v6703_v31, 0.0  ;;  %v6983_v21 = vmul.f32 %v6685_v26, %v10138_v0  ;;  %v6987_v43 = vmul.f32 %v10141_v61, %v10140_v14  ;;  %v6990_v2 = vmul.f32 %v10138_v0, %v2077_v36  ;;  %v10146_v51 = vld [vmem:[#allocation85_spill] sm:$0xff]  ;;  %v10147_v13 = vld [vmem:[#allocation86_spill] sm:$0xff]  ;;  %v10148_v1 = vld [vmem:[#allocation87_spill] sm:$0xff] }
 0x2a0   : > { %v6993_v53 = vmul.f32 %v10140_v14, %v2079_v10  ;;  %v2229_v18 = vadd.f32 %v10145_v34, %v1840_v33  ;;  %v4076_v12 = vpack.c.bf16 %v4048_v47, %v4046_v54  ;;  %v2231_v46 = vadd.f32 %v10146_v51, %v1842_v32  ;;  %v10153_v36 = vld [vmem:[#allocation29_spill] sm:$0xff]  ;;  %v10156_v33 = vld [vmem:[#allocation66_spill] sm:$0xff] }
 0x2a1   : > { %10139 = vst [vmem:[#allocation120_spill] sm:$0xff] %v6983_v21  ;;  %10142 = vst [vmem:[#allocation121_spill] sm:$0xff] %v6987_v43  ;;  %v2233_v55 = vadd.f32 %v10147_v13, %v1844_v19  ;;  %v2235_v8 = vadd.f32 %v10148_v1, %v1846_v60  ;;  %v10149_v21 = vld [vmem:[#allocation59_spill] sm:$0xff]  ;;  %v10152_v43 = vld [vmem:[#allocation74_spill] sm:$0xff]  ;;  %v2491_v47 = vsel %vm6519_vm6, %v10124_v41, 0.0  ;;  %v2493_v19 = vsel %vm6519_vm6, %v10125_v49, 0.0 }
 0x2a2   : > { %10143 = vst [vmem:[#allocation64_spill] sm:$0xff] %v6990_v2  ;;  %10144 = vst [vmem:[#allocation46_spill] sm:$0xff] %v6993_v53  ;;  %v2343_v52 = vmul.f32 %v10150_v59, %v10149_v21  ;;  %v2345_v48 = vmul.f32 %v10152_v43, %v10151_v62  ;;  %v2347_v2 = vmul.f32 %v10153_v36, %v10149_v21  ;;  %v10154_v10 = vld [vmem:[#allocation61_spill] sm:$0xff]  ;;  %4266 = vmatmul.mubr.bf16.gmra.mxu0 %v4076_v12  ;;  %v7027_v21 = vld [vmem:[#allocation2 + $0x98] sm:$0xff] }
 0x2a3   : > { %v2349_v53 = vmul.f32 %v10154_v10, %v10151_v62  ;;  %v10155_v1 = vld [vmem:[#allocation65_spill] sm:$0xff]  ;;  %v2597_v60 = vmul.f32 %v10130_v24, %v10156_v33  ;;  %v2593_v41 = vmul.f32 %v10156_v33, %v2493_v19  ;;  %v2743_v49 = vsel %vm6523_vm7, %v6697_v7, 0.0 }
 0x2a4   : > { %v2595_v32 = vmul.f32 %v10127_v27, %v10155_v1  ;;  %v2407_v54 = vadd.f32 %v2343_v52, %v2229_v18  ;;  %v2409_v34 = vadd.f32 %v2345_v48, %v2231_v46  ;;  %v2411_v51 = vadd.f32 %v2347_v2, %v2233_v55  ;;  %v7017_v62 = vld [vmem:[#allocation2 + $0x8] sm:$0xff]  ;;  %v7031_v48 = vld [vmem:[#allocation2 + $0x90] sm:$0xff] }
 0x2a5   : > { %v2413_v13 = vadd.f32 %v2349_v53, %v2235_v8  ;;  %v2591_v12 = vmul.f32 %v10155_v1, %v2491_v47  ;;  %v2745_v27 = vsel %vm6523_vm7, %v6703_v31, 0.0  ;;  %v7029_v52 = vld [vmem:[#allocation2 + $0xa8] sm:$0xff]  ;;  %v10157_v8 = vld [vmem:[#allocation68_spill] sm:$0xff]  ;;  %v7040_v19 = vunpack.c.h.bf16 %v7017_v62 }
 0x2a6   : > { %v2659_v24 = vadd.f32 %v2595_v32, %v2411_v51  ;;  %v2839_v2 = vmul.f32 %v6685_v26, %v10157_v8  ;;  %v10158_v53 = vld [vmem:[#allocation69_spill] sm:$0xff]  ;;  %v2657_v7 = vadd.f32 %v2593_v41, %v2409_v34  ;;  %v2843_v47 = vmul.f32 %v10157_v8, %v2743_v49  ;;  %v10159_v51 = vld [vmem:[#allocation62_spill] sm:$0xff]  ;;  %v10161_v41 = vld [vmem:[#allocation63_spill] sm:$0xff] }
 0x2a7   : > { %v2661_v55 = vadd.f32 %v2597_v60, %v2413_v13  ;;  %v2841_v18 = vmul.f32 %v10141_v61, %v10158_v53  ;;  %v2655_v46 = vadd.f32 %v2591_v12, %v2407_v54  ;;  %v2845_v31 = vmul.f32 %v10158_v53, %v2745_v27  ;;  %v10160_v13 = vld [vmem:[#allocation79_spill] sm:$0xff]  ;;  %v10162_v49 = vld [vmem:[#allocation80_spill] sm:$0xff] }
 0x2a8   : > { %v7043_v33 = vunpack.c.h.bf16 %v7027_v21  ;;  %v7046_v32 = vunpack.c.h.bf16 %v7029_v52  ;;  %v7049_v26 = vunpack.c.h.bf16 %v7031_v48  ;;  %v2907_v54 = vadd.f32 %v2843_v47, %v2659_v24 }
 0x2a9   : > { %v2903_v60 = vadd.f32 %v2839_v2, %v2655_v46  ;;  %v2905_v61 = vadd.f32 %v2841_v18, %v2657_v7  ;;  %v2909_v34 = vadd.f32 %v2845_v31, %v2661_v55  ;;  %v3101_v12 = vmul.f32 %v10160_v13, %v10159_v51 }
 0x2aa   : > { %v3103_v27 = vmul.f32 %v10162_v49, %v10161_v41  ;;  %v3105_v53 = vmul.f32 %v10160_v13, %v7040_v19  ;;  %v3107_v8 = vmul.f32 %v10162_v49, %v7043_v33  ;;  %v3229_v1 = vrot.slane %v10159_v51, 7 }
 0x2ab   : > { %v3231_v14 = vrot.slane %v10161_v41, 7  ;;  %v9600_v2 = vrot.slane %v7040_v19, 7  ;;  %v9599_v24 = vrot.slane %v7043_v33, 7  ;;  %v3165_v55 = vadd.f32 %v3101_v12, %v2903_v60 }
 0x2ac   : > { %v3167_v18 = vadd.f32 %v3103_v27, %v2905_v61  ;;  %v3169_v46 = vadd.f32 %v3105_v53, %v2907_v54  ;;  %v3171_v7 = vadd.f32 %v3107_v8, %v2909_v34  ;;  %v10165_v49 = vrot.slane %v10153_v36, 7  ;;  %v10169_v34 = vld [vmem:[#allocation82_spill] sm:$0xff] }
 0x2ad   : > { %v7067_v47 = vsel %vm1562_vm0, %v3229_v1, %v9600_v2  ;;  %v7073_v31 = vsel %vm1562_vm0, %v3231_v14, %v9599_v24  ;;  %v10167_v8 = vrot.slane %v10154_v10, 7  ;;  %v9613_v0 = vrot.slane %v7046_v32, 1 }
 0x2ae   : > { %10163 = vst [vmem:[#allocation118_spill] sm:$0xff] %v7067_v47  ;;  %10164 = vst [vmem:[#allocation119_spill] sm:$0xff] %v7073_v31  ;;  %v7079_v60 = vsel %vm1562_vm0, %v10165_v49, %v3229_v1  ;;  %v3461_v12 = vmul.f32 %v10169_v34, %v7067_v47  ;;  %v10170_v1 = vld [vmem:[#allocation83_spill] sm:$0xff]  ;;  %v10171_v47 = vrot.slane %v10159_v51, 1 }
 0x2af   : > { %10166 = vst [vmem:[#allocation117_spill] sm:$0xff] %v7079_v60  ;;  %v7085_v53 = vsel %vm1562_vm0, %v10167_v8, %v3231_v14  ;;  %v3357_v61 = vsel %vm6519_vm6, %v7079_v60, 0.0  ;;  %v3463_v49 = vmul.f32 %v10170_v1, %v7073_v31  ;;  %v3589_v14 = vrot.slane %v7040_v19, 1 }
 0x2b0   : > { %10168 = vst [vmem:[#allocation81_spill] sm:$0xff] %v7085_v53  ;;  %v3359_v54 = vsel %vm6519_vm6, %v7085_v53, 0.0  ;;  %v3457_v27 = vmul.f32 %v10169_v34, %v3357_v61  ;;  %v3591_v8 = vrot.slane %v7043_v33, 1  ;;  %v3525_v2 = vadd.f32 %v3461_v12, %v3169_v46 }
 0x2b1   : > { %v3459_v24 = vmul.f32 %v10170_v1, %v3359_v54  ;;  %v3527_v13 = vadd.f32 %v3463_v49, %v3171_v7  ;;  %v9612_v53 = vrot.slane %v7049_v26, 1  ;;  %v7107_v31 = vsel %vm1951_vm3, %v10171_v47, %v3589_v14 }
 0x2b2   : > { %v3521_v60 = vadd.f32 %v3457_v27, %v3165_v55  ;;  %v10172_v61 = vrot.slane %v10161_v41, 1  ;;  %v7119_v46 = vsel %vm1951_vm3, %v3589_v14, %v9613_v0  ;;  %v3813_v55 = vmul.f32 %v10071_v57, %v7107_v31 }
 0x2b3   : > { %v3523_v10 = vadd.f32 %v3459_v24, %v3167_v18  ;;  %v7125_v24 = vsel %vm1951_vm3, %v3591_v8, %v9612_v53  ;;  %v3717_v7 = vsel %vm6523_vm7, %v7119_v46, 0.0  ;;  %v1450_v12 = vmul.f32 %v10073_v58, %v9985_v17 }
 0x2b4   : > { %v7113_v54 = vsel %vm1951_vm3, %v10172_v61, %v3591_v8  ;;  %v3719_v47 = vsel %vm6523_vm7, %v7125_v24, 0.0  ;;  %v1452_v49 = vmul.f32 %v10074_v6, %v9987_v25  ;;  %v3817_v27 = vmul.f32 %v10071_v57, %v3717_v7 }
 0x2b5   : > { %v3815_v18 = vmul.f32 %v10072_v45, %v7113_v54  ;;  %v3819_v14 = vmul.f32 %v10072_v45, %v3719_v47  ;;  %v3877_v8 = vadd.f32 %v3813_v55, %v3521_v60  ;;  %v1454_v53 = vmul.f32 %v5955_v16, %v10073_v58 }
 0x2b6   : > { %v1456_v0 = vmul.f32 %v5965_v63, %v10074_v6  ;;  %v1683_v1 = vsel %vm6937_vm8, %v6863_v42, 0.0  ;;  %v1685_v25 = vsel %vm6937_vm8, %v6869_v28, 0.0  ;;  %v3881_v17 = vadd.f32 %v3817_v27, %v3525_v2 }
 0x2b7   : > { %v3879_v61 = vadd.f32 %v3815_v18, %v3523_v10  ;;  %v3883_v7 = vadd.f32 %v3819_v14, %v3527_v13  ;;  %v3963_v47 = vadd.f32 %v10075_v3, %v3877_v8  ;;  %v7156_v60 = vmul.f32 %v10084_v23, %v1683_v1  ;;  %v10177_v14 = vld [vmem:[#allocation30_spill] sm:$0xff] }
 0x2b8   : > { %v7159_v16 = vmul.f32 %v10085_v15, %v1685_v25  ;;  %v7163_v63 = vmul.f32 %v6857_v20, %v10084_v23  ;;  %v7167_v55 = vmul.f32 %v6875_v38, %v10085_v15  ;;  %v3967_v13 = vadd.f32 %v10075_v3, %v3881_v17  ;;  %v10189_v23 = vld [vmem:[#allocation101_spill] sm:$0xff] }
 0x2b9   : > { %v3965_v10 = vadd.f32 %v10076_v30, %v3879_v61  ;;  %10173 = vst [vmem:[#allocation122_spill] sm:$0xff] %v7156_v60  ;;  %v3969_v2 = vadd.f32 %v10076_v30, %v3883_v7  ;;  %v4019_v18 = vmax.f32 %v3963_v47, 0.0  ;;  %v1839_v27 = vadd.f32 %v6760_v37, %v1450_v12  ;;  %v10179_v37 = vld [vmem:[#allocation124_spill] sm:$0xff]  ;;  %v10188_v60 = vld [vmem:[#allocation71_spill] sm:$0xff] }
 0x2ba   : > { %10174 = vst [vmem:[#allocation84_spill] sm:$0xff] %v7159_v16  ;;  %10175 = vst [vmem:[#allocation85_spill] sm:$0xff] %v7163_v63  ;;  %v1841_v1 = vadd.f32 %v6763_v35, %v1452_v49  ;;  %v1843_v8 = vadd.f32 %v10177_v14, %v1454_v53  ;;  %v1845_v61 = vadd.f32 %v6771_v22, %v1456_v0  ;;  %v2076_v25 = vsel %vm6947_vm9, %v6903_v50, 0.0  ;;  %v10183_v53 = vld [vmem:[#allocation27_spill] sm:$0xff]  ;;  %v10184_v47 = vld [vmem:[#allocation28_spill] sm:$0xff] }
 0x2bb   : > { %10176 = vst [vmem:[#allocation86_spill] sm:$0xff] %v7167_v55  ;;  %v4021_v63 = vmax.f32 %v3967_v13, 0.0  ;;  %v4051_v16 = vmul.f32 %v4019_v18, %v3965_v10  ;;  %v2078_v17 = vsel %vm6947_vm9, %v6909_v4, 0.0  ;;  %v7183_v7 = vmul.f32 %v6897_v29, %v6295_v9  ;;  %v10185_v13 = vld [vmem:[#allocation96_spill] sm:$0xff]  ;;  %v10186_v14 = vld [vmem:[#allocation97_spill] sm:$0xff] }
 0x2bc   : > { %v7187_v35 = vmul.f32 %v10179_v37, %v6303_v39  ;;  %v7190_v22 = vmul.f32 %v6295_v9, %v2076_v25  ;;  %v7193_v0 = vmul.f32 %v6303_v39, %v2078_v17  ;;  %v2228_v12 = vadd.f32 %v10183_v53, %v1839_v27  ;;  %v10191_v25 = vld [vmem:[#allocation102_spill] sm:$0xff]  ;;  %v10192_v17 = vld [vmem:[#allocation104_spill] sm:$0xff] }
 0x2bd   : > { %10178 = vst [vmem:[#allocation87_spill] sm:$0xff] %v7183_v7  ;;  %v4053_v49 = vmul.f32 %v4021_v63, %v3969_v2  ;;  %v2230_v10 = vadd.f32 %v10184_v47, %v1841_v1  ;;  %v2232_v18 = vadd.f32 %v10185_v13, %v1843_v8  ;;  %v2234_v55 = vadd.f32 %v10186_v14, %v1845_v61  ;;  %v10187_v7 = vld [vmem:[#allocation100_spill] sm:$0xff]  ;;  %v10193_v1 = vld [vmem:[#allocation105_spill] sm:$0xff] }
 0x2be   : > { %10180 = vst [vmem:[#allocation72_spill] sm:$0xff] %v7187_v35  ;;  %10181 = vst [vmem:[#allocation74_spill] sm:$0xff] %v7190_v22  ;;  %v2342_v15 = vmul.f32 %v10188_v60, %v10187_v7  ;;  %v10190_v35 = vld [vmem:[#allocation73_spill] sm:$0xff]  ;;  %v2346_v22 = vmul.f32 %v10191_v25, %v10187_v7  ;;  %v2490_v63 = vsel %vm6519_vm6, %v6863_v42, 0.0  ;;  %v2492_v2 = vsel %vm6519_vm6, %v6869_v28, 0.0 }
 0x2bf   : > { %10182 = vst [vmem:[#allocation29_spill] sm:$0xff] %v7193_v0  ;;  %v2344_v30 = vmul.f32 %v10190_v35, %v10189_v23  ;;  %v2348_v0 = vmul.f32 %v10192_v17, %v10189_v23  ;;  %v4079_v27 = vpack.c.bf16 %v4053_v49, %v4051_v16  ;;  %v2594_v8 = vmul.f32 %v6857_v20, %v10193_v1  ;;  %v10194_v23 = vld [vmem:[#allocation106_spill] sm:$0xff]  ;;  %v10236_v7 = vld [vmem:[#allocation37_spill] sm:$0xff] }
 0x2c0   : > { %v2406_v61 = vadd.f32 %v2342_v15, %v2228_v12  ;;  %v2410_v47 = vadd.f32 %v2346_v22, %v2232_v18  ;;  %v2590_v14 = vmul.f32 %v10193_v1, %v2490_v63  ;;  %v2592_v16 = vmul.f32 %v10194_v23, %v2492_v2 }
 0x2c1   : > { %v2408_v53 = vadd.f32 %v2344_v30, %v2230_v10  ;;  %v2412_v13 = vadd.f32 %v2348_v0, %v2234_v55  ;;  %4273 = vmatprep.mubr.bf16.mxu0 %v4079_v27  ;;  %v2596_v49 = vmul.f32 %v6875_v38, %v10194_v23  ;;  %v2742_v42 = vsel %vm6523_vm7, %v6903_v50, 0.0  ;;  %v10195_v30 = vld [vmem:[#allocation107_spill] sm:$0xff]  ;;  %v10196_v55 = vld [vmem:[#allocation108_spill] sm:$0xff] }
 0x2c2   : > { %v2658_v28 = vadd.f32 %v2594_v8, %v2410_v47  ;;  %v2744_v15 = vsel %vm6523_vm7, %v6909_v4, 0.0  ;;  %v2838_v20 = vmul.f32 %v6897_v29, %v10195_v30  ;;  %v2840_v22 = vmul.f32 %v10179_v37, %v10196_v55 }
 0x2c3   : > { %v2654_v0 = vadd.f32 %v2590_v14, %v2406_v61  ;;  %v2656_v12 = vadd.f32 %v2592_v16, %v2408_v53  ;;  %v2660_v10 = vadd.f32 %v2596_v49, %v2412_v13  ;;  %v2842_v38 = vmul.f32 %v10195_v30, %v2742_v42  ;;  %v10201_v61 = vld [vmem:[#allocation103_spill] sm:$0xff]  ;;  %v10202_v53 = vld [vmem:[#allocation109_spill] sm:$0xff]  ;;  %v10204_v14 = vld [vmem:[#allocation110_spill] sm:$0xff] }
 0x2c4   : > { %v2844_v18 = vmul.f32 %v10196_v55, %v2744_v15  ;;  %v7232_v50 = vunpack.c.l.bf16 %v7017_v62  ;;  %v7235_v27 = vunpack.c.l.bf16 %v7027_v21  ;;  %v7238_v4 = vunpack.c.l.bf16 %v7029_v52  ;;  %v10203_v13 = vld [vmem:[#allocation123_spill] sm:$0xff] }
 0x2c5   : > { %v2902_v29 = vadd.f32 %v2838_v20, %v2654_v0  ;;  %v2904_v63 = vadd.f32 %v2840_v22, %v2656_v12  ;;  %v2906_v2 = vadd.f32 %v2842_v38, %v2658_v28  ;;  %v7241_v37 = vunpack.c.l.bf16 %v7031_v48  ;;  %v10215_v30 = vld [vmem:[#allocation43_spill] sm:$0xff] }
 0x2c6   : > { %10197 = vst [vmem:[#allocation62_spill] sm:$0xff] %v7232_v50  ;;  %10198 = vst [vmem:[#allocation63_spill] sm:$0xff] %v7235_v27  ;;  %v2908_v8 = vadd.f32 %v2844_v18, %v2660_v10  ;;  %v3100_v47 = vmul.f32 %v10202_v53, %v10201_v61  ;;  %v3102_v62 = vmul.f32 %v10204_v14, %v10203_v13  ;;  %v3228_v16 = vrot.slane %v10201_v61, 7 }
 0x2c7   : > { %10199 = vst [vmem:[#allocation30_spill] sm:$0xff] %v7238_v4  ;;  %10200 = vst [vmem:[#allocation124_spill] sm:$0xff] %v7241_v37  ;;  %v3104_v21 = vmul.f32 %v10202_v53, %v7232_v50  ;;  %v3106_v52 = vmul.f32 %v10204_v14, %v7235_v27  ;;  %v3230_v49 = vrot.slane %v10203_v13, 7  ;;  %v9620_v48 = vrot.slane %v7232_v50, 7 }
 0x2c8   : > { %v3164_v42 = vadd.f32 %v3100_v47, %v2902_v29  ;;  %v3166_v28 = vadd.f32 %v3102_v62, %v2904_v63  ;;  %v9619_v20 = vrot.slane %v7235_v27, 7  ;;  %v10205_v12 = vrot.slane %v10191_v25, 7 }
 0x2c9   : > { %v3168_v15 = vadd.f32 %v3104_v21, %v2906_v2  ;;  %v3170_v22 = vadd.f32 %v3106_v52, %v2908_v8  ;;  %v7259_v0 = vsel %vm1562_vm0, %v3228_v16, %v9620_v48  ;;  %v10206_v38 = vrot.slane %v10192_v17, 7  ;;  %v10207_v8 = vld [vmem:[#allocation111_spill] sm:$0xff]  ;;  %v10208_v21 = vld [vmem:[#allocation112_spill] sm:$0xff] }
 0x2ca   : > { %v7265_v10 = vsel %vm1562_vm0, %v10205_v12, %v3228_v16  ;;  %v7277_v29 = vsel %vm1562_vm0, %v3230_v49, %v9619_v20  ;;  %v3460_v47 = vmul.f32 %v10207_v8, %v7259_v0  ;;  %v9625_v20 = vrot.slane %v7238_v4, 1 }
 0x2cb   : > { %v7271_v18 = vsel %vm1562_vm0, %v10206_v38, %v3230_v49  ;;  %v3356_v63 = vsel %vm6519_vm6, %v7265_v10, 0.0  ;;  %v3462_v16 = vmul.f32 %v10208_v21, %v7277_v29  ;;  %v3588_v49 = vrot.slane %v7232_v50, 1 }
 0x2cc   : > { %v3358_v2 = vsel %vm6519_vm6, %v7271_v18, 0.0  ;;  %v3456_v62 = vmul.f32 %v10207_v8, %v3356_v63  ;;  %v3524_v12 = vadd.f32 %v3460_v47, %v3168_v15  ;;  %v3590_v38 = vrot.slane %v7235_v27, 1  ;;  %v10216_v27 = vld [vmem:[#allocation115_spill] sm:$0xff] }
 0x2cd   : > { %v3458_v52 = vmul.f32 %v10208_v21, %v3358_v2  ;;  %v9624_v56 = vrot.slane %v7241_v37, 1  ;;  %v3526_v53 = vadd.f32 %v3462_v16, %v3170_v22  ;;  %v10209_v55 = vrot.slane %v10201_v61, 1  ;;  %v10214_v37 = vld [vmem:[#allocation42_spill] sm:$0xff]  ;;  %v10217_v61 = vld [vmem:[#allocation116_spill] sm:$0xff] }
 0x2ce   : > { %v3520_v48 = vadd.f32 %v3456_v62, %v3164_v42  ;;  %v7305_v15 = vsel %vm1951_vm3, %v3588_v49, %v9625_v20  ;;  %v10210_v42 = vrot.slane %v10203_v13, 1  ;;  %v1245_v20 = vadd.s32 72, %v5463_v44 }
 0x2cf   : > { %v3522_v14 = vadd.f32 %v3458_v52, %v3166_v28  ;;  %v7299_v63 = vsel %vm1951_vm3, %v10209_v55, %v3588_v49  ;;  %v7311_v2 = vsel %vm1951_vm3, %v3590_v38, %v9624_v56  ;;  %v10212_v55 = vld [vmem:[#allocation113_spill] sm:$0xff]  ;;  %v3716_v47 = vsel %vm6523_vm7, %v7305_v15, 0.0  ;;  %v10213_v52 = vld [vmem:[#allocation114_spill] sm:$0xff] }
 0x2d0   : > { %v7317_v28 = vsel %vm1951_vm3, %v10210_v42, %v3590_v38  ;;  %v3812_v22 = vmul.f32 %v10212_v55, %v7299_v63  ;;  %v3718_v62 = vsel %vm6523_vm7, %v7311_v2, 0.0  ;;  %v1244_v49 = vadd.s32 64, %v5463_v44 }
 0x2d1   : > { %10211 = vst [vmem:[#allocation27_spill] sm:$0xff] %v7317_v28  ;;  %v3814_v16 = vmul.f32 %v10213_v52, %v7317_v28  ;;  %v3816_v56 = vmul.f32 %v10212_v55, %v3716_v47  ;;  %v3818_v38 = vmul.f32 %v10213_v52, %v3718_v62  ;;  %v1459_v4 = vmul.f32 %v10150_v59, %v10214_v37  ;;  %v10235_v52 = vld [vmem:[#allocation35_spill] sm:$0xff] }
 0x2d2   : > { %v3876_v42 = vadd.f32 %v3812_v22, %v3520_v48  ;;  %v1260_v8 = vand.u32 15, %v1244_v49  ;;  %v1461_v11 = vmul.f32 %v10152_v43, %v10215_v30  ;;  %v1261_v13 = vand.u32 15, %v1245_v20  ;;  %v10220_v48 = vld [vmem:[#allocation61_spill] sm:$0xff] }
 0x2d3   : > { %v3878_v21 = vadd.f32 %v3814_v16, %v3522_v14  ;;  %v3880_v23 = vadd.f32 %v3816_v56, %v3524_v12  ;;  %v3882_v1 = vadd.f32 %v3818_v38, %v3526_v53  ;;  %v1463_v14 = vmul.f32 %v10153_v36, %v10214_v37  ;;  %v10223_v20 = vld [vmem:[#allocation117_spill] sm:$0xff]  ;;  %v10225_v56 = vld [vmem:[#allocation47_spill] sm:$0xff]  ;;  %v10226_v16 = vld [vmem:[#allocation118_spill] sm:$0xff] }
 0x2d4   : > { %v3962_v50 = vadd.f32 %v10216_v27, %v3876_v42  ;;  %vm7339_vm10 = vcmp.ne.s32.totalorder %v1260_v8, 0  ;;  %v1465_v59 = vmul.f32 %v10220_v48, %v10215_v30  ;;  %vm7349_vm11 = vcmp.ne.s32.totalorder %v1261_v13, 15  ;;  %v10229_v38 = vld [vmem:[#allocation119_spill] sm:$0xff]  ;;  %v10234_v30 = vld [vmem:[#allocation70_spill] sm:$0xff] }
 0x2d5   : > { %v3964_v47 = vadd.f32 %v10217_v61, %v3878_v21  ;;  %v3966_v22 = vadd.f32 %v10216_v27, %v3880_v23  ;;  %v3968_v43 = vadd.f32 %v10217_v61, %v3882_v1  ;;  %v1692_v8 = vsel %vm7339_vm10, %v10223_v20, 0.0  ;;  %v10224_v21 = vld [vmem:[#allocation81_spill] sm:$0xff]  ;;  %v10228_v23 = vld [vmem:[#allocation48_spill] sm:$0xff]  ;;  %v10233_v61 = vld [vmem:[#allocation67_spill] sm:$0xff] }
 0x2d6   : > { %v4018_v53 = vmax.f32 %v3962_v50, 0.0  ;;  %v1694_v36 = vsel %vm7339_vm10, %v10224_v21, 0.0  ;;  %v7361_v49 = vmul.f32 %v10226_v16, %v10225_v56  ;;  %v7365_v1 = vmul.f32 %v10229_v38, %v10228_v23 }
 0x2d7   : > { %v4020_v50 = vmax.f32 %v3966_v22, 0.0  ;;  %v7368_v42 = vmul.f32 %v10225_v56, %v1692_v8  ;;  %v7371_v48 = vmul.f32 %v10228_v23, %v1694_v36  ;;  %v1848_v27 = vadd.f32 %v10233_v61, %v1459_v4  ;;  %v10239_v4 = vld [vmem:[#allocation54_spill] sm:$0xff]  ;;  %v10245_v36 = vld [vmem:[#allocation64_spill] sm:$0xff] }
 0x2d8   : > { %10227 = vst [vmem:[#allocation28_spill] sm:$0xff] %v7361_v49  ;;  %10230 = vst [vmem:[#allocation96_spill] sm:$0xff] %v7365_v1  ;;  %v4050_v13 = vmul.f32 %v4018_v53, %v3964_v47  ;;  %v1850_v37 = vadd.f32 %v10234_v30, %v1461_v11  ;;  %v1852_v55 = vadd.f32 %v10235_v52, %v1463_v14  ;;  %v2085_v22 = vsel %vm7349_vm11, %v7119_v46, 0.0  ;;  %v10237_v53 = vld [vmem:[#allocation53_spill] sm:$0xff]  ;;  %v10243_v52 = vld [vmem:[#allocation120_spill] sm:$0xff] }
 0x2d9   : > { %10231 = vst [vmem:[#allocation97_spill] sm:$0xff] %v7368_v42  ;;  %10232 = vst [vmem:[#allocation71_spill] sm:$0xff] %v7371_v48  ;;  %v1854_v49 = vadd.f32 %v10236_v7, %v1465_v59  ;;  %v4052_v28 = vmul.f32 %v4020_v50, %v3968_v43  ;;  %v2087_v47 = vsel %vm7349_vm11, %v7125_v24, 0.0  ;;  %v7385_v8 = vmul.f32 %v7107_v31, %v10237_v53  ;;  %v10244_v59 = vld [vmem:[#allocation121_spill] sm:$0xff]  ;;  %v10246_v1 = vld [vmem:[#allocation46_spill] sm:$0xff] }
 0x2da   : > { %v7389_v30 = vmul.f32 %v7113_v54, %v10239_v4  ;;  %v7392_v61 = vmul.f32 %v10237_v53, %v2085_v22  ;;  %v7395_v7 = vmul.f32 %v10239_v4, %v2087_v47  ;;  %v2237_v11 = vadd.f32 %v10243_v52, %v1848_v27  ;;  %v10248_v23 = vld [vmem:[#allocation60_spill] sm:$0xff] }
 0x2db   : > { %10238 = vst [vmem:[#allocation73_spill] sm:$0xff] %v7385_v8  ;;  %v4078_v14 = vpack.c.bf16 %v4052_v28, %v4050_v13  ;;  %v2239_v43 = vadd.f32 %v10244_v59, %v1850_v37  ;;  %v2241_v50 = vadd.f32 %v10245_v36, %v1852_v55  ;;  %v2243_v48 = vadd.f32 %v10246_v1, %v1854_v49  ;;  %v10247_v8 = vld [vmem:[#allocation59_spill] sm:$0xff]  ;;  %v10249_v28 = vld [vmem:[#allocation65_spill] sm:$0xff]  ;;  %v10250_v49 = vld [vmem:[#allocation66_spill] sm:$0xff] }
 0x2dc   : > { %10240 = vst [vmem:[#allocation102_spill] sm:$0xff] %v7389_v30  ;;  %10241 = vst [vmem:[#allocation104_spill] sm:$0xff] %v7392_v61  ;;  %v2351_v42 = vmul.f32 %v10159_v51, %v10247_v8  ;;  %v2353_v30 = vmul.f32 %v10161_v41, %v10248_v23  ;;  %v2355_v22 = vmul.f32 %v7040_v19, %v10247_v8  ;;  %v2499_v27 = vsel %vm6937_vm8, %v10223_v20, 0.0  ;;  %v7429_v8 = vld [vmem:[#allocation2 + $0x88] sm:$0xff] }
 0x2dd   : > { %10242 = vst [vmem:[#allocation61_spill] sm:$0xff] %v7395_v7  ;;  %v2357_v47 = vmul.f32 %v7043_v33, %v10248_v23  ;;  %4274 = vmatmul.mubr.bf16.gmra.mxu0 %v4078_v14  ;;  %v2501_v37 = vsel %vm6937_vm8, %v10224_v21, 0.0  ;;  %v2603_v55 = vmul.f32 %v10226_v16, %v10249_v28  ;;  %v2605_v1 = vmul.f32 %v10229_v38, %v10250_v49  ;;  %v7419_v23 = vld [vmem:[#allocation2 + $0xe0] sm:$0xff] }
 0x2de   : > { %v2415_v13 = vadd.f32 %v2351_v42, %v2237_v11  ;;  %v2417_v52 = vadd.f32 %v2353_v30, %v2239_v43  ;;  %v2419_v59 = vadd.f32 %v2355_v22, %v2241_v50  ;;  %v2599_v14 = vmul.f32 %v10249_v28, %v2499_v27  ;;  %v7431_v38 = vld [vmem:[#allocation2 + $0xc0] sm:$0xff]  ;;  %v7433_v42 = vld [vmem:[#allocation2 + $0x118] sm:$0xff] }
 0x2df   : > { %v2421_v36 = vadd.f32 %v2357_v47, %v2243_v48  ;;  %v2601_v20 = vmul.f32 %v10250_v49, %v2501_v37  ;;  %v2751_v21 = vsel %vm6947_vm9, %v7119_v46, 0.0  ;;  %v2753_v16 = vsel %vm6947_vm9, %v7125_v24, 0.0  ;;  %v10251_v11 = vld [vmem:[#allocation68_spill] sm:$0xff]  ;;  %v10252_v50 = vld [vmem:[#allocation69_spill] sm:$0xff] }
 0x2e0   : > { %v2667_v48 = vadd.f32 %v2603_v55, %v2419_v59  ;;  %v2847_v43 = vmul.f32 %v7107_v31, %v10251_v11  ;;  %v2849_v22 = vmul.f32 %v7113_v54, %v10252_v50  ;;  %v2663_v47 = vadd.f32 %v2599_v14, %v2415_v13  ;;  %v10253_v59 = vld [vmem:[#allocation79_spill] sm:$0xff]  ;;  %v10254_v14 = vld [vmem:[#allocation80_spill] sm:$0xff] }
 0x2e1   : > { %v2669_v30 = vadd.f32 %v2605_v1, %v2421_v36  ;;  %v2665_v46 = vadd.f32 %v2601_v20, %v2417_v52  ;;  %v2851_v27 = vmul.f32 %v10251_v11, %v2751_v21  ;;  %v2853_v24 = vmul.f32 %v10252_v50, %v2753_v16 }
 0x2e2   : > { %v7442_v37 = vunpack.c.h.bf16 %v7419_v23  ;;  %v7445_v49 = vunpack.c.h.bf16 %v7429_v8  ;;  %v7448_v55 = vunpack.c.h.bf16 %v7431_v38  ;;  %v7451_v31 = vunpack.c.h.bf16 %v7433_v42 }
 0x2e3   : > { %v2911_v1 = vadd.f32 %v2847_v43, %v2663_v47  ;;  %v2913_v54 = vadd.f32 %v2849_v22, %v2665_v46  ;;  %v2915_v13 = vadd.f32 %v2851_v27, %v2667_v48  ;;  %v2917_v52 = vadd.f32 %v2853_v24, %v2669_v30 }
 0x2e4   : > { %v3109_v36 = vmul.f32 %v10253_v59, %v7046_v32  ;;  %v3111_v20 = vmul.f32 %v10254_v14, %v7049_v26  ;;  %v3113_v21 = vmul.f32 %v10253_v59, %v7442_v37  ;;  %v3115_v16 = vmul.f32 %v10254_v14, %v7445_v49 }
 0x2e5   : > { %v3237_v50 = vrot.slane %v7046_v32, 7  ;;  %v3239_v11 = vrot.slane %v7049_v26, 7  ;;  %v9658_v43 = vrot.slane %v7442_v37, 7  ;;  %v9657_v48 = vrot.slane %v7445_v49, 7 }
 0x2e6   : > { %v3173_v30 = vadd.f32 %v3109_v36, %v2911_v1  ;;  %v3175_v22 = vadd.f32 %v3111_v20, %v2913_v54  ;;  %v3177_v47 = vadd.f32 %v3113_v21, %v2915_v13  ;;  %v3179_v46 = vadd.f32 %v3115_v16, %v2917_v52 }
 0x2e7   : > { %v7469_v27 = vsel %vm1562_vm0, %v3237_v50, %v9658_v43  ;;  %v7475_v24 = vsel %vm1562_vm0, %v3239_v11, %v9657_v48  ;;  %v10255_v14 = vrot.slane %v7040_v19, 7  ;;  %v10256_v54 = vrot.slane %v7043_v33, 7 }
 0x2e8   : > { %v3469_v20 = vmul.f32 %v10169_v34, %v7469_v27  ;;  %v9664_v59 = vrot.slane %v7448_v55, 1  ;;  %v9663_v28 = vrot.slane %v7451_v31, 1  ;;  %v10258_v4 = vrot.slane %v7046_v32, 1 }
 0x2e9   : > { %v7481_v1 = vsel %vm1562_vm0, %v10255_v14, %v3237_v50  ;;  %v7487_v13 = vsel %vm1562_vm0, %v10256_v54, %v3239_v11  ;;  %v10257_v50 = vld [vmem:[#allocation83_spill] sm:$0xff]  ;;  %v3597_v11 = vrot.slane %v7442_v37, 1  ;;  %v3599_v54 = vrot.slane %v7445_v49, 1 }
 0x2ea   : > { %v3365_v52 = vsel %vm6937_vm8, %v7481_v1, 0.0  ;;  %v3367_v36 = vsel %vm6937_vm8, %v7487_v13, 0.0  ;;  %v3471_v14 = vmul.f32 %v10257_v50, %v7475_v24  ;;  %v3533_v48 = vadd.f32 %v3469_v20, %v3177_v47 }
 0x2eb   : > { %v3465_v21 = vmul.f32 %v10169_v34, %v3365_v52  ;;  %v3467_v16 = vmul.f32 %v10257_v50, %v3367_v36  ;;  %v7509_v53 = vsel %vm1951_vm3, %v10258_v4, %v3597_v11  ;;  %v10259_v52 = vrot.slane %v7049_v26, 1 }
 0x2ec   : > { %v3535_v43 = vadd.f32 %v3471_v14, %v3179_v46  ;;  %v7521_v47 = vsel %vm1951_vm3, %v3597_v11, %v9664_v59  ;;  %v3821_v4 = vmul.f32 %v10071_v57, %v7509_v53  ;;  %v1458_v14 = vmul.f32 %v10188_v60, %v10073_v58 }
 0x2ed   : > { %v3529_v7 = vadd.f32 %v3465_v21, %v3173_v30  ;;  %v3531_v61 = vadd.f32 %v3467_v16, %v3175_v22  ;;  %v7515_v36 = vsel %vm1951_vm3, %v10259_v52, %v3599_v54  ;;  %v7527_v30 = vsel %vm1951_vm3, %v3599_v54, %v9663_v28 }
 0x2ee   : > { %v3823_v22 = vmul.f32 %v10072_v45, %v7515_v36  ;;  %v3725_v46 = vsel %vm6947_vm9, %v7521_v47, 0.0  ;;  %v3727_v20 = vsel %vm6947_vm9, %v7527_v30, 0.0  ;;  %v1460_v21 = vmul.f32 %v10190_v35, %v10074_v6 }
 0x2ef   : > { %v3825_v16 = vmul.f32 %v10071_v57, %v3725_v46  ;;  %v3827_v11 = vmul.f32 %v10072_v45, %v3727_v20  ;;  %v3885_v54 = vadd.f32 %v3821_v4, %v3529_v7  ;;  %v1462_v28 = vmul.f32 %v10191_v25, %v10073_v58  ;;  %v10260_v7 = vld [vmem:[#allocation89_spill] sm:$0xff]  ;;  %v10263_v25 = vld [vmem:[#allocation94_spill] sm:$0xff] }
 0x2f0   : > { %v3887_v52 = vadd.f32 %v3823_v22, %v3531_v61  ;;  %v1464_v59 = vmul.f32 %v10192_v17, %v10074_v6  ;;  %v1691_v50 = vsel %vm7339_vm10, %v7265_v10, 0.0  ;;  %v1693_v60 = vsel %vm7339_vm10, %v7271_v18, 0.0  ;;  %v10261_v4 = vld [vmem:[#allocation33_spill] sm:$0xff] }
 0x2f1   : > { %v3889_v35 = vadd.f32 %v3825_v16, %v3533_v48  ;;  %v3891_v46 = vadd.f32 %v3827_v11, %v3535_v43  ;;  %v3971_v20 = vadd.f32 %v10075_v3, %v3885_v54  ;;  %v7558_v22 = vmul.f32 %v10261_v4, %v1691_v50  ;;  %v10267_v11 = vld [vmem:[#allocation122_spill] sm:$0xff]  ;;  %v10268_v50 = vld [vmem:[#allocation84_spill] sm:$0xff]  ;;  %v10282_v57 = vld [vmem:[#allocation101_spill] sm:$0xff] }
 0x2f2   : > { %v3973_v61 = vadd.f32 %v10260_v7, %v3887_v52  ;;  %v7561_v58 = vmul.f32 %v10263_v25, %v1693_v60  ;;  %v7565_v17 = vmul.f32 %v7259_v0, %v10261_v4  ;;  %v7569_v6 = vmul.f32 %v7277_v29, %v10263_v25 }
 0x2f3   : > { %10262 = vst [vmem:[#allocation117_spill] sm:$0xff] %v7558_v22  ;;  %v3975_v43 = vadd.f32 %v10075_v3, %v3889_v35  ;;  %v3977_v48 = vadd.f32 %v10260_v7, %v3891_v46  ;;  %v4023_v16 = vmax.f32 %v3971_v20, 0.0  ;;  %v1847_v54 = vadd.f32 %v10267_v11, %v1458_v14  ;;  %v10269_v22 = vld [vmem:[#allocation85_spill] sm:$0xff]  ;;  %v10272_v14 = vld [vmem:[#allocation27_spill] sm:$0xff] }
 0x2f4   : > { %10264 = vst [vmem:[#allocation81_spill] sm:$0xff] %v7561_v58  ;;  %10265 = vst [vmem:[#allocation118_spill] sm:$0xff] %v7565_v17  ;;  %v1849_v52 = vadd.f32 %v10268_v50, %v1460_v21  ;;  %v1851_v60 = vadd.f32 %v10269_v22, %v1462_v28  ;;  %v10270_v58 = vld [vmem:[#allocation86_spill] sm:$0xff]  ;;  %v2084_v17 = vsel %vm7349_vm11, %v7305_v15, 0.0  ;;  %v2086_v35 = vsel %vm7349_vm11, %v7311_v2, 0.0  ;;  %v10277_v22 = vld [vmem:[#allocation72_spill] sm:$0xff] }
 0x2f5   : > { %10266 = vst [vmem:[#allocation119_spill] sm:$0xff] %v7569_v6  ;;  %v1853_v45 = vadd.f32 %v10270_v58, %v1464_v59  ;;  %v4025_v4 = vmax.f32 %v3975_v43, 0.0  ;;  %v4055_v25 = vmul.f32 %v4023_v16, %v3973_v61  ;;  %v7585_v46 = vmul.f32 %v7299_v63, %v6295_v9  ;;  %v10276_v59 = vld [vmem:[#allocation87_spill] sm:$0xff]  ;;  %v10278_v16 = vld [vmem:[#allocation74_spill] sm:$0xff]  ;;  %v10279_v50 = vld [vmem:[#allocation29_spill] sm:$0xff] }
 0x2f6   : > { %v7589_v21 = vmul.f32 %v10272_v14, %v6303_v39  ;;  %v7592_v58 = vmul.f32 %v6295_v9, %v2084_v17  ;;  %v7595_v28 = vmul.f32 %v6303_v39, %v2086_v35  ;;  %v2236_v20 = vadd.f32 %v10276_v59, %v1847_v54  ;;  %v10281_v7 = vld [vmem:[#allocation103_spill] sm:$0xff]  ;;  %v10284_v17 = vld [vmem:[#allocation62_spill] sm:$0xff] }
 0x2f7   : > { %10271 = vst [vmem:[#allocation67_spill] sm:$0xff] %v7585_v46  ;;  %v4057_v61 = vmul.f32 %v4025_v4, %v3977_v48  ;;  %v2238_v43 = vadd.f32 %v10277_v22, %v1849_v52  ;;  %v2240_v11 = vadd.f32 %v10278_v16, %v1851_v60  ;;  %v2242_v6 = vadd.f32 %v10279_v50, %v1853_v45  ;;  %v10280_v46 = vld [vmem:[#allocation100_spill] sm:$0xff]  ;;  %v10285_v35 = vld [vmem:[#allocation63_spill] sm:$0xff]  ;;  %v10286_v48 = vld [vmem:[#allocation105_spill] sm:$0xff] }
 0x2f8   : > { %10273 = vst [vmem:[#allocation70_spill] sm:$0xff] %v7589_v21  ;;  %10274 = vst [vmem:[#allocation35_spill] sm:$0xff] %v7592_v58  ;;  %v2350_v3 = vmul.f32 %v10281_v7, %v10280_v46  ;;  %v10283_v21 = vld [vmem:[#allocation123_spill] sm:$0xff]  ;;  %v2354_v58 = vmul.f32 %v10284_v17, %v10280_v46  ;;  %v2498_v4 = vsel %vm6937_vm8, %v7265_v10, 0.0  ;;  %v2500_v45 = vsel %vm6937_vm8, %v7271_v18, 0.0 }
 0x2f9   : > { %10275 = vst [vmem:[#allocation37_spill] sm:$0xff] %v7595_v28  ;;  %v2352_v34 = vmul.f32 %v10283_v21, %v10282_v57  ;;  %v2356_v28 = vmul.f32 %v10285_v35, %v10282_v57  ;;  %v4081_v54 = vpack.c.bf16 %v4057_v61, %v4055_v25  ;;  %v2602_v52 = vmul.f32 %v7259_v0, %v10286_v48  ;;  %v10287_v57 = vld [vmem:[#allocation106_spill] sm:$0xff]  ;;  %v10289_v0 = vld [vmem:[#allocation108_spill] sm:$0xff] }
 0x2fa   : > { %v2414_v60 = vadd.f32 %v2350_v3, %v2236_v20  ;;  %v2418_v22 = vadd.f32 %v2354_v58, %v2240_v11  ;;  %v2598_v50 = vmul.f32 %v10286_v48, %v2498_v4  ;;  %v2600_v25 = vmul.f32 %v10287_v57, %v2500_v45 }
 0x2fb   : > { %v2416_v59 = vadd.f32 %v2352_v34, %v2238_v43  ;;  %v2420_v16 = vadd.f32 %v2356_v28, %v2242_v6  ;;  %4281 = vmatprep.mubr.bf16.mxu0 %v4081_v54  ;;  %v2604_v61 = vmul.f32 %v7277_v29, %v10287_v57  ;;  %v2750_v10 = vsel %vm6947_vm9, %v7305_v15, 0.0  ;;  %v10288_v34 = vld [vmem:[#allocation107_spill] sm:$0xff] }
 0x2fc   : > { %v2666_v18 = vadd.f32 %v2602_v52, %v2418_v22  ;;  %v2752_v3 = vsel %vm6947_vm9, %v7311_v2, 0.0  ;;  %v2846_v6 = vmul.f32 %v7299_v63, %v10288_v34  ;;  %v2848_v58 = vmul.f32 %v10272_v14, %v10289_v0 }
 0x2fd   : > { %v2662_v28 = vadd.f32 %v2598_v50, %v2414_v60  ;;  %v2664_v20 = vadd.f32 %v2600_v25, %v2416_v59  ;;  %v2668_v43 = vadd.f32 %v2604_v61, %v2420_v16  ;;  %v2850_v29 = vmul.f32 %v10288_v34, %v2750_v10  ;;  %v10294_v60 = vld [vmem:[#allocation30_spill] sm:$0xff]  ;;  %v10295_v59 = vld [vmem:[#allocation109_spill] sm:$0xff]  ;;  %v10296_v16 = vld [vmem:[#allocation124_spill] sm:$0xff] }
 0x2fe   : > { %v2852_v11 = vmul.f32 %v10289_v0, %v2752_v3  ;;  %v7634_v15 = vunpack.c.l.bf16 %v7419_v23  ;;  %v7637_v54 = vunpack.c.l.bf16 %v7429_v8  ;;  %v7640_v2 = vunpack.c.l.bf16 %v7431_v38  ;;  %v10297_v50 = vld [vmem:[#allocation110_spill] sm:$0xff]  ;;  %v10307_v34 = vld [vmem:[#allocation43_spill] sm:$0xff] }
 0x2ff   : > { %v2910_v63 = vadd.f32 %v2846_v6, %v2662_v28  ;;  %v2912_v4 = vadd.f32 %v2848_v58, %v2664_v20  ;;  %v2914_v45 = vadd.f32 %v2850_v29, %v2666_v18  ;;  %v7643_v14 = vunpack.c.l.bf16 %v7433_v42 }
 0x300   : > { %10290 = vst [vmem:[#allocation120_spill] sm:$0xff] %v7634_v15  ;;  %10291 = vst [vmem:[#allocation121_spill] sm:$0xff] %v7637_v54  ;;  %v2916_v52 = vadd.f32 %v2852_v11, %v2668_v43  ;;  %v3108_v22 = vmul.f32 %v10295_v59, %v10294_v60  ;;  %v3110_v23 = vmul.f32 %v10297_v50, %v10296_v16  ;;  %v3236_v25 = vrot.slane %v10294_v60, 7 }
 0x301   : > { %10292 = vst [vmem:[#allocation64_spill] sm:$0xff] %v7640_v2  ;;  %10293 = vst [vmem:[#allocation46_spill] sm:$0xff] %v7643_v14  ;;  %v3112_v8 = vmul.f32 %v10295_v59, %v7634_v15  ;;  %v3114_v38 = vmul.f32 %v10297_v50, %v7637_v54  ;;  %v3238_v61 = vrot.slane %v10296_v16, 7  ;;  %v9677_v42 = vrot.slane %v7634_v15, 7 }
 0x302   : > { %v3172_v10 = vadd.f32 %v3108_v22, %v2910_v63  ;;  %v3174_v18 = vadd.f32 %v3110_v23, %v2912_v4  ;;  %v9676_v6 = vrot.slane %v7637_v54, 7  ;;  %v10298_v20 = vrot.slane %v10284_v17, 7 }
 0x303   : > { %v3176_v3 = vadd.f32 %v3112_v8, %v2914_v45  ;;  %v3178_v58 = vadd.f32 %v3114_v38, %v2916_v52  ;;  %v7661_v28 = vsel %vm1562_vm0, %v3236_v25, %v9677_v42  ;;  %v10299_v29 = vrot.slane %v10285_v35, 7  ;;  %v10300_v52 = vld [vmem:[#allocation111_spill] sm:$0xff]  ;;  %v10301_v8 = vld [vmem:[#allocation112_spill] sm:$0xff] }
 0x304   : > { %v7667_v43 = vsel %vm1562_vm0, %v10298_v20, %v3236_v25  ;;  %v7679_v63 = vsel %vm1562_vm0, %v3238_v61, %v9676_v6  ;;  %v3468_v22 = vmul.f32 %v10300_v52, %v7661_v28  ;;  %v9682_v6 = vrot.slane %v7640_v2, 1 }
 0x305   : > { %v7673_v11 = vsel %vm1562_vm0, %v10299_v29, %v3238_v61  ;;  %v3364_v4 = vsel %vm6937_vm8, %v7667_v43, 0.0  ;;  %v3470_v25 = vmul.f32 %v10301_v8, %v7679_v63  ;;  %v3596_v61 = vrot.slane %v7634_v15, 1 }
 0x306   : > { %v3366_v45 = vsel %vm6937_vm8, %v7673_v11, 0.0  ;;  %v3464_v23 = vmul.f32 %v10300_v52, %v3364_v4  ;;  %v3532_v20 = vadd.f32 %v3468_v22, %v3176_v3  ;;  %v3598_v29 = vrot.slane %v7637_v54, 1  ;;  %v10308_v54 = vld [vmem:[#allocation115_spill] sm:$0xff] }
 0x307   : > { %v3466_v38 = vmul.f32 %v10301_v8, %v3366_v45  ;;  %v9681_v5 = vrot.slane %v7643_v14, 1  ;;  %v3534_v59 = vadd.f32 %v3470_v25, %v3178_v58  ;;  %v10302_v0 = vrot.slane %v10294_v60, 1  ;;  %v10306_v14 = vld [vmem:[#allocation42_spill] sm:$0xff]  ;;  %v10309_v60 = vld [vmem:[#allocation116_spill] sm:$0xff] }
 0x308   : > { %v3528_v42 = vadd.f32 %v3464_v23, %v3172_v10  ;;  %v7707_v3 = vsel %vm1951_vm3, %v3596_v61, %v9682_v6  ;;  %v10303_v10 = vrot.slane %v10296_v16, 1  ;;  %v1247_v6 = vadd.s32 88, %v5463_v44 }
 0x309   : > { %v3530_v50 = vadd.f32 %v3466_v38, %v3174_v18  ;;  %v7701_v4 = vsel %vm1951_vm3, %v10302_v0, %v3596_v61  ;;  %v7713_v45 = vsel %vm1951_vm3, %v3598_v29, %v9681_v5  ;;  %v10304_v0 = vld [vmem:[#allocation113_spill] sm:$0xff]  ;;  %v3724_v22 = vsel %vm6947_vm9, %v7707_v3, 0.0  ;;  %v10305_v38 = vld [vmem:[#allocation114_spill] sm:$0xff] }
 0x30a   : > { %v7719_v18 = vsel %vm1951_vm3, %v10303_v10, %v3598_v29  ;;  %v3820_v58 = vmul.f32 %v10304_v0, %v7701_v4  ;;  %v3726_v23 = vsel %vm6947_vm9, %v7713_v45, 0.0  ;;  %v1246_v61 = vadd.s32 80, %v5463_v44 }
 0x30b   : > { %v3822_v25 = vmul.f32 %v10305_v38, %v7719_v18  ;;  %v3824_v5 = vmul.f32 %v10304_v0, %v3724_v22  ;;  %v3826_v29 = vmul.f32 %v10305_v38, %v3726_v23  ;;  %v1467_v2 = vmul.f32 %v10159_v51, %v10306_v14 }
 0x30c   : > { %v3884_v10 = vadd.f32 %v3820_v58, %v3528_v42  ;;  %v1262_v52 = vand.u32 15, %v1246_v61  ;;  %v1469_v40 = vmul.f32 %v10161_v41, %v10307_v34  ;;  %v1263_v16 = vand.u32 15, %v1247_v6 }
 0x30d   : > { %v3886_v8 = vadd.f32 %v3822_v25, %v3530_v50  ;;  %v3888_v57 = vadd.f32 %v3824_v5, %v3532_v20  ;;  %v3890_v48 = vadd.f32 %v3826_v29, %v3534_v59  ;;  %v1471_v50 = vmul.f32 %v7040_v19, %v10306_v14  ;;  %v10319_v5 = vld [vmem:[#allocation97_spill] sm:$0xff]  ;;  %v10320_v25 = vld [vmem:[#allocation71_spill] sm:$0xff]  ;;  %v10321_v29 = vld [vmem:[#allocation28_spill] sm:$0xff] }
 0x30e   : > { %v3970_v15 = vadd.f32 %v10308_v54, %v3884_v10  ;;  %vm7741_vm12 = vcmp.ne.s32.totalorder %v1262_v52, 0  ;;  %v1473_v51 = vmul.f32 %v7043_v33, %v10307_v34  ;;  %vm7751_vm13 = vcmp.ne.s32.totalorder %v1263_v16, 15 }
 0x30f   : > { %v3972_v22 = vadd.f32 %v10309_v60, %v3886_v8  ;;  %v3974_v42 = vadd.f32 %v10308_v54, %v3888_v57  ;;  %v3976_v41 = vadd.f32 %v10309_v60, %v3890_v48  ;;  %v1700_v6 = vsel %vm7741_vm12, %v7481_v1, 0.0  ;;  %v10315_v57 = vld [vmem:[#allocation48_spill] sm:$0xff] }
 0x310   : > { %v4022_v59 = vmax.f32 %v3970_v15, 0.0  ;;  %v1702_v19 = vsel %vm7741_vm12, %v7487_v13, 0.0  ;;  %v7763_v33 = vmul.f32 %v7469_v27, %v10225_v56  ;;  %v7767_v48 = vmul.f32 %v7475_v24, %v10315_v57  ;;  %v10322_v60 = vld [vmem:[#allocation96_spill] sm:$0xff] }
 0x311   : > { %v4024_v15 = vmax.f32 %v3974_v42, 0.0  ;;  %v7770_v52 = vmul.f32 %v10225_v56, %v1700_v6  ;;  %v7773_v8 = vmul.f32 %v10315_v57, %v1702_v19  ;;  %v1856_v58 = vadd.f32 %v10319_v5, %v1467_v2  ;;  %v10325_v2 = vld [vmem:[#allocation54_spill] sm:$0xff]  ;;  %v10334_v57 = vld [vmem:[#allocation60_spill] sm:$0xff] }
 0x312   : > { %10314 = vst [vmem:[#allocation122_spill] sm:$0xff] %v7763_v33  ;;  %10316 = vst [vmem:[#allocation84_spill] sm:$0xff] %v7767_v48  ;;  %v4054_v16 = vmul.f32 %v4022_v59, %v3972_v22  ;;  %v1858_v61 = vadd.f32 %v10320_v25, %v1469_v40  ;;  %v1860_v10 = vadd.f32 %v10321_v29, %v1471_v50  ;;  %v2093_v42 = vsel %vm7751_vm13, %v7521_v47, 0.0  ;;  %v10323_v59 = vld [vmem:[#allocation53_spill] sm:$0xff]  ;;  %v10331_v25 = vld [vmem:[#allocation104_spill] sm:$0xff] }
 0x313   : > { %10317 = vst [vmem:[#allocation85_spill] sm:$0xff] %v7770_v52  ;;  %10318 = vst [vmem:[#allocation86_spill] sm:$0xff] %v7773_v8  ;;  %v1862_v33 = vadd.f32 %v10322_v60, %v1473_v51  ;;  %v4056_v54 = vmul.f32 %v4024_v15, %v3976_v41  ;;  %v2095_v22 = vsel %vm7751_vm13, %v7527_v30, 0.0  ;;  %v7787_v6 = vmul.f32 %v7509_v53, %v10323_v59  ;;  %v10329_v51 = vld [vmem:[#allocation73_spill] sm:$0xff]  ;;  %v10330_v15 = vld [vmem:[#allocation102_spill] sm:$0xff] }
 0x314   : > { %v7791_v40 = vmul.f32 %v7515_v36, %v10325_v2  ;;  %v7794_v50 = vmul.f32 %v10323_v59, %v2093_v42  ;;  %v7797_v60 = vmul.f32 %v10325_v2, %v2095_v22  ;;  %v2245_v41 = vadd.f32 %v10329_v51, %v1856_v58  ;;  %v10332_v48 = vld [vmem:[#allocation61_spill] sm:$0xff]  ;;  %v10336_v58 = vld [vmem:[#allocation66_spill] sm:$0xff] }
 0x315   : > { %10324 = vst [vmem:[#allocation27_spill] sm:$0xff] %v7787_v6  ;;  %v4080_v19 = vpack.c.bf16 %v4056_v54, %v4054_v16  ;;  %v2247_v5 = vadd.f32 %v10330_v15, %v1858_v61  ;;  %v2249_v29 = vadd.f32 %v10331_v25, %v1860_v10  ;;  %v2251_v8 = vadd.f32 %v10332_v48, %v1862_v33  ;;  %v10333_v6 = vld [vmem:[#allocation59_spill] sm:$0xff]  ;;  %v10335_v48 = vld [vmem:[#allocation65_spill] sm:$0xff] }
 0x316   : > { %10326 = vst [vmem:[#allocation87_spill] sm:$0xff] %v7791_v40  ;;  %10327 = vst [vmem:[#allocation72_spill] sm:$0xff] %v7794_v50  ;;  %v2359_v52 = vmul.f32 %v7046_v32, %v10333_v6  ;;  %v2361_v40 = vmul.f32 %v7049_v26, %v10334_v57  ;;  %v2363_v42 = vmul.f32 %v7442_v37, %v10333_v6  ;;  %v2507_v54 = vsel %vm7339_vm10, %v7481_v1, 0.0  ;;  %v7831_v6 = vld [vmem:[#allocation2 + $0xa0] sm:$0xff] }
 0x317   : > { %10328 = vst [vmem:[#allocation74_spill] sm:$0xff] %v7797_v60  ;;  %v2365_v22 = vmul.f32 %v7445_v49, %v10334_v57  ;;  %4282 = vmatmul.mubr.bf16.gmra.mxu0 %v4080_v19  ;;  %v2509_v33 = vsel %vm7339_vm10, %v7487_v13, 0.0  ;;  %v2611_v16 = vmul.f32 %v7469_v27, %v10335_v48  ;;  %v2613_v61 = vmul.f32 %v7475_v24, %v10336_v58  ;;  %v7821_v57 = vld [vmem:[#allocation2 + $0xd8] sm:$0xff]  ;;  %v7833_v24 = vld [vmem:[#allocation2 + $0x68] sm:$0xff] }
 0x318   : > { %v2423_v10 = vadd.f32 %v2359_v52, %v2245_v41  ;;  %v2425_v51 = vadd.f32 %v2361_v40, %v2247_v5  ;;  %v2427_v15 = vadd.f32 %v2363_v42, %v2249_v29  ;;  %v2607_v19 = vmul.f32 %v10335_v48, %v2507_v54  ;;  %v7835_v52 = vld [vmem:[#allocation2 + $0x130] sm:$0xff]  ;;  %v10337_v41 = vld [vmem:[#allocation68_spill] sm:$0xff]  ;;  %v10338_v29 = vld [vmem:[#allocation69_spill] sm:$0xff] }
 0x319   : > { %v2429_v25 = vadd.f32 %v2365_v22, %v2251_v8  ;;  %v2609_v1 = vmul.f32 %v10336_v58, %v2509_v33  ;;  %v2759_v13 = vsel %vm7349_vm11, %v7521_v47, 0.0  ;;  %v2761_v27 = vsel %vm7349_vm11, %v7527_v30, 0.0 }
 0x31a   : > { %v2675_v8 = vadd.f32 %v2611_v16, %v2427_v15  ;;  %v2855_v5 = vmul.f32 %v7509_v53, %v10337_v41  ;;  %v2857_v42 = vmul.f32 %v7515_v36, %v10338_v29  ;;  %v2671_v22 = vadd.f32 %v2607_v19, %v2423_v10  ;;  %v10343_v15 = vld [vmem:[#allocation79_spill] sm:$0xff]  ;;  %v10344_v19 = vld [vmem:[#allocation80_spill] sm:$0xff] }
 0x31b   : > { %v2677_v40 = vadd.f32 %v2613_v61, %v2429_v25  ;;  %v2673_v47 = vadd.f32 %v2609_v1, %v2425_v51  ;;  %v2859_v54 = vmul.f32 %v10337_v41, %v2759_v13  ;;  %v2861_v30 = vmul.f32 %v10338_v29, %v2761_v27 }
 0x31c   : > { %v7844_v33 = vunpack.c.h.bf16 %v7821_v57  ;;  %v7847_v58 = vunpack.c.h.bf16 %v7831_v6  ;;  %v7850_v16 = vunpack.c.h.bf16 %v7833_v24  ;;  %v7853_v53 = vunpack.c.h.bf16 %v7835_v52 }
 0x31d   : > { %v2919_v61 = vadd.f32 %v2855_v5, %v2671_v22  ;;  %v2921_v36 = vadd.f32 %v2857_v42, %v2673_v47  ;;  %v2923_v10 = vadd.f32 %v2859_v54, %v2675_v8  ;;  %v2925_v51 = vadd.f32 %v2861_v30, %v2677_v40 }
 0x31e   : > { %10339 = vst [vmem:[#allocation29_spill] sm:$0xff] %v7844_v33  ;;  %10340 = vst [vmem:[#allocation100_spill] sm:$0xff] %v7847_v58  ;;  %v3117_v25 = vmul.f32 %v10343_v15, %v7448_v55  ;;  %v3119_v1 = vmul.f32 %v10344_v19, %v7451_v31  ;;  %v3121_v13 = vmul.f32 %v10343_v15, %v7844_v33  ;;  %v3245_v29 = vrot.slane %v7448_v55, 7 }
 0x31f   : > { %10341 = vst [vmem:[#allocation103_spill] sm:$0xff] %v7850_v16  ;;  %10342 = vst [vmem:[#allocation123_spill] sm:$0xff] %v7853_v53  ;;  %v3123_v27 = vmul.f32 %v10344_v19, %v7847_v58  ;;  %v3247_v41 = vrot.slane %v7451_v31, 7  ;;  %v9708_v5 = vrot.slane %v7844_v33, 7  ;;  %v9707_v8 = vrot.slane %v7847_v58, 7 }
 0x320   : > { %v3181_v40 = vadd.f32 %v3117_v25, %v2919_v61  ;;  %v3183_v42 = vadd.f32 %v3119_v1, %v2921_v36  ;;  %v3185_v22 = vadd.f32 %v3121_v13, %v2923_v10  ;;  %v10345_v19 = vrot.slane %v7442_v37, 7  ;;  %v10347_v1 = vld [vmem:[#allocation82_spill] sm:$0xff] }
 0x321   : > { %v3187_v47 = vadd.f32 %v3123_v27, %v2925_v51  ;;  %v7871_v54 = vsel %vm1562_vm0, %v3245_v29, %v9708_v5  ;;  %v7877_v30 = vsel %vm1562_vm0, %v3247_v41, %v9707_v8  ;;  %v10346_v36 = vrot.slane %v7445_v49, 7 }
 0x322   : > { %v7883_v61 = vsel %vm1562_vm0, %v10345_v19, %v3245_v29  ;;  %v3477_v13 = vmul.f32 %v10347_v1, %v7871_v54  ;;  %v10348_v29 = vld [vmem:[#allocation83_spill] sm:$0xff]  ;;  %v7906_v48 = vrot.slane %v7850_v16, 1  ;;  %v7909_v60 = vrot.slane %v7853_v53, 1 }
 0x323   : > { %v7889_v10 = vsel %vm1562_vm0, %v10346_v36, %v3247_v41  ;;  %v3373_v51 = vsel %vm7339_vm10, %v7883_v61, 0.0  ;;  %v3479_v19 = vmul.f32 %v10348_v29, %v7877_v30  ;;  %v3605_v41 = vrot.slane %v7844_v33, 1 }
 0x324   : > { %v3375_v25 = vsel %vm7339_vm10, %v7889_v10, 0.0  ;;  %v3473_v27 = vmul.f32 %v10347_v1, %v3373_v51  ;;  %v3607_v36 = vrot.slane %v7847_v58, 1  ;;  %v3541_v5 = vadd.f32 %v3477_v13, %v3185_v22  ;;  %10349 = vst [vmem:[#allocation62_spill] sm:$0xff] %v7906_v48  ;;  %10350 = vst [vmem:[#allocation63_spill] sm:$0xff] %v7909_v60 }
 0x325   : > { %v3475_v8 = vmul.f32 %v10348_v29, %v3375_v25  ;;  %v3543_v15 = vadd.f32 %v3479_v19, %v3187_v47  ;;  %v10351_v59 = vrot.slane %v7448_v55, 1  ;;  %v10352_v25 = vrot.slane %v7451_v31, 1 }
 0x326   : > { %v3537_v50 = vadd.f32 %v3473_v27, %v3181_v40  ;;  %v7926_v47 = vsel %vm1951_vm3, %v3605_v41, %v7906_v48  ;;  %v10353_v40 = vld [vmem:[#allocation90_spill] sm:$0xff]  ;;  %v10356_v48 = vld [vmem:[#allocation93_spill] sm:$0xff]  ;;  %v1699_v33 = vsel %vm7741_vm12, %v7667_v43, 0.0  ;;  %v1477_v12 = vmul.f32 %v7049_v26, %v10307_v34 }
 0x327   : > { %v3539_v2 = vadd.f32 %v3475_v8, %v3183_v42  ;;  %v7915_v51 = vsel %vm1951_vm3, %v10351_v59, %v3605_v41  ;;  %v7921_v22 = vsel %vm1951_vm3, %v10352_v25, %v3607_v36  ;;  %v7931_v8 = vsel %vm1951_vm3, %v3607_v36, %v7909_v60  ;;  %v10354_v42 = vld [vmem:[#allocation91_spill] sm:$0xff]  ;;  %v10355_v41 = vld [vmem:[#allocation92_spill] sm:$0xff] }
 0x328   : > { %v3829_v59 = vmul.f32 %v10353_v40, %v7915_v51  ;;  %v3831_v13 = vmul.f32 %v10354_v42, %v7921_v22  ;;  %v3733_v19 = vsel %vm7349_vm11, %v7926_v47, 0.0  ;;  %v3735_v27 = vsel %vm7349_vm11, %v7931_v8, 0.0 }
 0x329   : > { %v1466_v25 = vmul.f32 %v10281_v7, %v10355_v41  ;;  %v1468_v36 = vmul.f32 %v10283_v21, %v10356_v48  ;;  %v3833_v60 = vmul.f32 %v10353_v40, %v3733_v19  ;;  %v3835_v29 = vmul.f32 %v10354_v42, %v3735_v27  ;;  %v10357_v40 = vld [vmem:[#allocation88_spill] sm:$0xff] }
 0x32a   : > { %v3893_v1 = vadd.f32 %v3829_v59, %v3537_v50  ;;  %v3895_v53 = vadd.f32 %v3831_v13, %v3539_v2  ;;  %v1470_v16 = vmul.f32 %v10284_v17, %v10355_v41  ;;  %v1472_v58 = vmul.f32 %v10285_v35, %v10356_v48  ;;  %v10358_v50 = vld [vmem:[#allocation89_spill] sm:$0xff]  ;;  %v10361_v17 = vld [vmem:[#allocation94_spill] sm:$0xff] }
 0x32b   : > { %v1701_v7 = vsel %vm7741_vm12, %v7673_v11, 0.0  ;;  %v3897_v21 = vadd.f32 %v3833_v60, %v3541_v5  ;;  %v3899_v19 = vadd.f32 %v3835_v29, %v3543_v15  ;;  %v10359_v59 = vld [vmem:[#allocation33_spill] sm:$0xff]  ;;  %v7973_v48 = vmul.f32 %v7679_v63, %v10361_v17 }
 0x32c   : > { %v3979_v27 = vadd.f32 %v10357_v40, %v3893_v1  ;;  %v3981_v2 = vadd.f32 %v10358_v50, %v3895_v53  ;;  %v7962_v13 = vmul.f32 %v10359_v59, %v1699_v33  ;;  %v7965_v41 = vmul.f32 %v10361_v17, %v1701_v7  ;;  %v10365_v53 = vld [vmem:[#allocation117_spill] sm:$0xff] }
 0x32d   : > { %v7969_v35 = vmul.f32 %v7661_v28, %v10359_v59  ;;  %10364 = vst [vmem:[#allocation96_spill] sm:$0xff] %v7973_v48  ;;  %v3983_v60 = vadd.f32 %v10357_v40, %v3897_v21  ;;  %v3985_v15 = vadd.f32 %v10358_v50, %v3899_v19  ;;  %v1855_v1 = vadd.f32 %v10365_v53, %v1466_v25  ;;  %v10366_v33 = vld [vmem:[#allocation81_spill] sm:$0xff] }
 0x32e   : > { %10360 = vst [vmem:[#allocation97_spill] sm:$0xff] %v7962_v13  ;;  %10362 = vst [vmem:[#allocation71_spill] sm:$0xff] %v7965_v41  ;;  %v4027_v5 = vmax.f32 %v3979_v27, 0.0  ;;  %v1857_v29 = vadd.f32 %v10366_v33, %v1468_v36  ;;  %v10367_v13 = vld [vmem:[#allocation118_spill] sm:$0xff]  ;;  %v10368_v41 = vld [vmem:[#allocation119_spill] sm:$0xff]  ;;  %v2094_v21 = vsel %vm7751_vm13, %v7713_v45, 0.0  ;;  %v7989_v19 = vmul.f32 %v7701_v4, %v6295_v9 }
 0x32f   : > { %10363 = vst [vmem:[#allocation28_spill] sm:$0xff] %v7969_v35  ;;  %v1859_v7 = vadd.f32 %v10367_v13, %v1470_v16  ;;  %v1861_v42 = vadd.f32 %v10368_v41, %v1472_v58  ;;  %v2092_v35 = vsel %vm7751_vm13, %v7707_v3, 0.0  ;;  %v4029_v59 = vmax.f32 %v3983_v60, 0.0  ;;  %v10373_v41 = vld [vmem:[#allocation67_spill] sm:$0xff]  ;;  %v10376_v53 = vld [vmem:[#allocation37_spill] sm:$0xff] }
 0x330   : > { %v4059_v17 = vmul.f32 %v4027_v5, %v3981_v2  ;;  %10369 = vst [vmem:[#allocation73_spill] sm:$0xff] %v7989_v19  ;;  %v7993_v25 = vmul.f32 %v7719_v18, %v6303_v39  ;;  %v7996_v58 = vmul.f32 %v6295_v9, %v2092_v35  ;;  %v7999_v16 = vmul.f32 %v6303_v39, %v2094_v21  ;;  %v10374_v2 = vld [vmem:[#allocation70_spill] sm:$0xff]  ;;  %v10375_v60 = vld [vmem:[#allocation35_spill] sm:$0xff]  ;;  %v10378_v50 = vld [vmem:[#allocation101_spill] sm:$0xff] }
 0x331   : > { %v2244_v36 = vadd.f32 %v10373_v41, %v1855_v1  ;;  %v4061_v27 = vmul.f32 %v4029_v59, %v3985_v15  ;;  %v2246_v13 = vadd.f32 %v10374_v2, %v1857_v29  ;;  %v2248_v5 = vadd.f32 %v10375_v60, %v1859_v7  ;;  %v10377_v19 = vld [vmem:[#allocation30_spill] sm:$0xff]  ;;  %v10380_v35 = vld [vmem:[#allocation120_spill] sm:$0xff]  ;;  %v10381_v21 = vld [vmem:[#allocation121_spill] sm:$0xff] }
 0x332   : > { %10370 = vst [vmem:[#allocation102_spill] sm:$0xff] %v7993_v25  ;;  %10371 = vst [vmem:[#allocation104_spill] sm:$0xff] %v7996_v58  ;;  %v2250_v33 = vadd.f32 %v10376_v53, %v1861_v42  ;;  %v2358_v48 = vmul.f32 %v10377_v19, %v10280_v46  ;;  %v10379_v25 = vld [vmem:[#allocation124_spill] sm:$0xff]  ;;  %v2362_v58 = vmul.f32 %v10380_v35, %v10280_v46  ;;  %v2506_v59 = vsel %vm7339_vm10, %v7667_v43, 0.0  ;;  %v10382_v15 = vld [vmem:[#allocation105_spill] sm:$0xff] }
 0x333   : > { %10372 = vst [vmem:[#allocation61_spill] sm:$0xff] %v7999_v16  ;;  %v2360_v40 = vmul.f32 %v10379_v25, %v10378_v50  ;;  %v2364_v16 = vmul.f32 %v10381_v21, %v10378_v50  ;;  %v4083_v1 = vpack.c.bf16 %v4061_v27, %v4059_v17  ;;  %v2508_v42 = vsel %vm7339_vm10, %v7673_v11, 0.0  ;;  %v10383_v50 = vld [vmem:[#allocation106_spill] sm:$0xff] }
 0x334   : > { %v2610_v29 = vmul.f32 %v7661_v28, %v10382_v15  ;;  %v2422_v7 = vadd.f32 %v2358_v48, %v2244_v36  ;;  %v2426_v2 = vadd.f32 %v2362_v58, %v2248_v5  ;;  %v2606_v53 = vmul.f32 %v10382_v15, %v2506_v59  ;;  %v10384_v48 = vld [vmem:[#allocation107_spill] sm:$0xff]  ;;  %v10385_v58 = vld [vmem:[#allocation108_spill] sm:$0xff] }
 0x335   : > { %v2424_v41 = vadd.f32 %v2360_v40, %v2246_v13  ;;  %v2428_v60 = vadd.f32 %v2364_v16, %v2250_v33  ;;  %4289 = vmatprep.mubr.bf16.mxu0 %v4083_v1  ;;  %v2608_v17 = vmul.f32 %v10383_v50, %v2508_v42  ;;  %v2612_v27 = vmul.f32 %v7679_v63, %v10383_v50  ;;  %v10401_v15 = vld [vmem:[#allocation116_spill] sm:$0xff] }
 0x336   : > { %v2758_v43 = vsel %vm7349_vm11, %v7707_v3, 0.0  ;;  %v2674_v11 = vadd.f32 %v2610_v29, %v2426_v2  ;;  %v2760_v28 = vsel %vm7349_vm11, %v7713_v45, 0.0  ;;  %v2854_v40 = vmul.f32 %v7701_v4, %v10384_v48 }
 0x337   : > { %v2856_v16 = vmul.f32 %v7719_v18, %v10385_v58  ;;  %v2670_v36 = vadd.f32 %v2606_v53, %v2422_v7  ;;  %v2672_v13 = vadd.f32 %v2608_v17, %v2424_v41  ;;  %v2676_v5 = vadd.f32 %v2612_v27, %v2428_v60  ;;  %v10388_v7 = vld [vmem:[#allocation64_spill] sm:$0xff]  ;;  %v10389_v41 = vld [vmem:[#allocation109_spill] sm:$0xff]  ;;  %v10390_v60 = vld [vmem:[#allocation46_spill] sm:$0xff] }
 0x338   : > { %v2858_v63 = vmul.f32 %v10384_v48, %v2758_v43  ;;  %v2860_v33 = vmul.f32 %v10385_v58, %v2760_v28  ;;  %v8038_v3 = vunpack.c.l.bf16 %v7821_v57  ;;  %v8041_v1 = vunpack.c.l.bf16 %v7831_v6  ;;  %v10391_v53 = vld [vmem:[#allocation110_spill] sm:$0xff]  ;;  %v10400_v58 = vld [vmem:[#allocation115_spill] sm:$0xff] }
 0x339   : > { %v8044_v45 = vunpack.c.l.bf16 %v7833_v24  ;;  %v2918_v4 = vadd.f32 %v2854_v40, %v2670_v36  ;;  %v2920_v59 = vadd.f32 %v2856_v16, %v2672_v13  ;;  %v8047_v18 = vunpack.c.l.bf16 %v7835_v52 }
 0x33a   : > { %v2922_v42 = vadd.f32 %v2858_v63, %v2674_v11  ;;  %v2924_v29 = vadd.f32 %v2860_v33, %v2676_v5  ;;  %v3116_v2 = vmul.f32 %v10389_v41, %v10388_v7  ;;  %v3118_v57 = vmul.f32 %v10391_v53, %v10390_v60 }
 0x33b   : > { %10386 = vst [vmem:[#allocation117_spill] sm:$0xff] %v8044_v45  ;;  %10387 = vst [vmem:[#allocation81_spill] sm:$0xff] %v8047_v18  ;;  %v3120_v6 = vmul.f32 %v10389_v41, %v8038_v3  ;;  %v3122_v24 = vmul.f32 %v10391_v53, %v8041_v1  ;;  %v3244_v17 = vrot.slane %v10388_v7, 7  ;;  %v3246_v27 = vrot.slane %v10390_v60, 7 }
 0x33c   : > { %v9737_v52 = vrot.slane %v8038_v3, 7  ;;  %v3180_v43 = vadd.f32 %v3116_v2, %v2918_v4  ;;  %v3182_v11 = vadd.f32 %v3118_v57, %v2920_v59  ;;  %v9736_v40 = vrot.slane %v8041_v1, 7 }
 0x33d   : > { %v3184_v28 = vadd.f32 %v3120_v6, %v2922_v42  ;;  %v3186_v16 = vadd.f32 %v3122_v24, %v2924_v29  ;;  %v10392_v13 = vrot.slane %v10380_v35, 7  ;;  %v10393_v63 = vrot.slane %v10381_v21, 7  ;;  %v10394_v29 = vld [vmem:[#allocation111_spill] sm:$0xff]  ;;  %v10395_v6 = vld [vmem:[#allocation112_spill] sm:$0xff] }
 0x33e   : > { %v8065_v36 = vsel %vm1562_vm0, %v3244_v17, %v9737_v52  ;;  %v8083_v4 = vsel %vm1562_vm0, %v3246_v27, %v9736_v40  ;;  %v8100_v40 = vrot.slane %v8044_v45, 1  ;;  %v8103_v62 = vrot.slane %v8047_v18, 1 }
 0x33f   : > { %v8071_v5 = vsel %vm1562_vm0, %v10392_v13, %v3244_v17  ;;  %v8077_v33 = vsel %vm1562_vm0, %v10393_v63, %v3246_v27  ;;  %v3476_v2 = vmul.f32 %v10394_v29, %v8065_v36  ;;  %v3478_v17 = vmul.f32 %v10395_v6, %v8083_v4 }
 0x340   : > { %v3372_v59 = vsel %vm7339_vm10, %v8071_v5, 0.0  ;;  %v3374_v42 = vsel %vm7339_vm10, %v8077_v33, 0.0  ;;  %v3604_v27 = vrot.slane %v8038_v3, 1  ;;  %v3606_v63 = vrot.slane %v8041_v1, 1  ;;  %10396 = vst [vmem:[#allocation118_spill] sm:$0xff] %v8100_v40  ;;  %10397 = vst [vmem:[#allocation119_spill] sm:$0xff] %v8103_v62 }
 0x341   : > { %v3472_v57 = vmul.f32 %v10394_v29, %v3372_v59  ;;  %v3474_v24 = vmul.f32 %v10395_v6, %v3374_v42  ;;  %v3540_v13 = vadd.f32 %v3476_v2, %v3184_v28  ;;  %v3542_v41 = vadd.f32 %v3478_v17, %v3186_v16 }
 0x342   : > { %v10398_v59 = vrot.slane %v10388_v7, 1  ;;  %v8114_v28 = vsel %vm1951_vm3, %v3604_v27, %v8100_v40  ;;  %v8119_v2 = vsel %vm1951_vm3, %v3606_v63, %v8103_v62  ;;  %v1249_v62 = vadd.s32 104, %v5463_v44 }
 0x343   : > { %v3536_v52 = vadd.f32 %v3472_v57, %v3180_v43  ;;  %v3538_v53 = vadd.f32 %v3474_v24, %v3182_v11  ;;  %v10399_v43 = vrot.slane %v10390_v60, 1  ;;  %v3732_v57 = vsel %vm7349_vm11, %v8114_v28, 0.0 }
 0x344   : > { %v8109_v42 = vsel %vm1951_vm3, %v10398_v59, %v3604_v27  ;;  %v3734_v24 = vsel %vm7349_vm11, %v8119_v2, 0.0  ;;  %v1248_v27 = vadd.s32 96, %v5463_v44  ;;  %v3832_v59 = vmul.f32 %v10304_v0, %v3732_v57 }
 0x345   : > { %v8125_v11 = vsel %vm1951_vm3, %v10399_v43, %v3606_v63  ;;  %v3828_v16 = vmul.f32 %v10304_v0, %v8109_v42  ;;  %v3834_v63 = vmul.f32 %v10305_v38, %v3734_v24  ;;  %v1475_v29 = vmul.f32 %v7046_v32, %v10306_v14 }
 0x346   : > { %v3830_v17 = vmul.f32 %v10305_v38, %v8125_v11  ;;  %v1264_v6 = vand.u32 15, %v1248_v27  ;;  %v3896_v18 = vadd.f32 %v3832_v59, %v3540_v13  ;;  %v1265_v50 = vand.u32 15, %v1249_v62  ;;  %v10412_v27 = vld [vmem:[#allocation86_spill] sm:$0xff] }
 0x347   : > { %v3892_v43 = vadd.f32 %v3828_v16, %v3536_v52  ;;  %v3898_v45 = vadd.f32 %v3834_v63, %v3542_v41  ;;  %v1481_v32 = vmul.f32 %v7445_v49, %v10307_v34  ;;  %v8169_v49 = vmul.f32 %v7871_v54, %v10225_v56  ;;  %v10411_v16 = vld [vmem:[#allocation85_spill] sm:$0xff]  ;;  %v10413_v63 = vld [vmem:[#allocation122_spill] sm:$0xff] }
 0x348   : > { %v3894_v40 = vadd.f32 %v3830_v17, %v3538_v53  ;;  %vm8147_vm14 = vcmp.ne.s32.totalorder %v1264_v6, 0  ;;  %v1479_v53 = vmul.f32 %v7442_v37, %v10306_v14  ;;  %v3982_v52 = vadd.f32 %v10400_v58, %v3896_v18  ;;  %v10407_v18 = vld [vmem:[#allocation48_spill] sm:$0xff] }
 0x349   : > { %v3978_v48 = vadd.f32 %v10400_v58, %v3892_v43  ;;  %v3984_v26 = vadd.f32 %v10401_v15, %v3898_v45  ;;  %vm8157_vm15 = vcmp.ne.s32.totalorder %v1265_v50, 15  ;;  %v1710_v37 = vsel %vm8147_vm14, %v7889_v10, 0.0  ;;  %10406 = vst [vmem:[#allocation67_spill] sm:$0xff] %v8169_v49 }
 0x34a   : > { %v3980_v57 = vadd.f32 %v10401_v15, %v3894_v40  ;;  %v1708_v40 = vsel %vm8147_vm14, %v7883_v61, 0.0  ;;  %v8173_v45 = vmul.f32 %v7877_v30, %v10407_v18  ;;  %v4028_v50 = vmax.f32 %v3982_v52, 0.0  ;;  %v10414_v15 = vld [vmem:[#allocation84_spill] sm:$0xff] }
 0x34b   : > { %v4026_v41 = vmax.f32 %v3978_v48, 0.0  ;;  %v8176_v6 = vmul.f32 %v10225_v56, %v1708_v40  ;;  %v8179_v62 = vmul.f32 %v10407_v18, %v1710_v37  ;;  %v1864_v17 = vadd.f32 %v10411_v16, %v1475_v29  ;;  %v10417_v29 = vld [vmem:[#allocation54_spill] sm:$0xff]  ;;  %v10426_v18 = vld [vmem:[#allocation60_spill] sm:$0xff] }
 0x34c   : > { %10408 = vst [vmem:[#allocation70_spill] sm:$0xff] %v8173_v45  ;;  %v1866_v59 = vadd.f32 %v10412_v27, %v1477_v12  ;;  %v1868_v43 = vadd.f32 %v10413_v63, %v1479_v53  ;;  %v1870_v49 = vadd.f32 %v10414_v15, %v1481_v32  ;;  %v4060_v58 = vmul.f32 %v4028_v50, %v3984_v26  ;;  %v10421_v32 = vld [vmem:[#allocation27_spill] sm:$0xff]  ;;  %v10423_v27 = vld [vmem:[#allocation72_spill] sm:$0xff]  ;;  %v10424_v45 = vld [vmem:[#allocation74_spill] sm:$0xff] }
 0x34d   : > { %v4058_v48 = vmul.f32 %v4026_v41, %v3980_v57  ;;  %10409 = vst [vmem:[#allocation35_spill] sm:$0xff] %v8176_v6  ;;  %10410 = vst [vmem:[#allocation37_spill] sm:$0xff] %v8179_v62  ;;  %v2101_v52 = vsel %vm8157_vm15, %v7926_v47, 0.0  ;;  %v2103_v57 = vsel %vm8157_vm15, %v7931_v8, 0.0  ;;  %v10415_v41 = vld [vmem:[#allocation53_spill] sm:$0xff]  ;;  %v8197_v12 = vmul.f32 %v7921_v22, %v10417_v29  ;;  %v10422_v50 = vld [vmem:[#allocation87_spill] sm:$0xff] }
 0x34e   : > { %v8193_v40 = vmul.f32 %v7915_v51, %v10415_v41  ;;  %v8200_v53 = vmul.f32 %v10415_v41, %v2101_v52  ;;  %v8203_v15 = vmul.f32 %v10417_v29, %v2103_v57  ;;  %v2253_v26 = vadd.f32 %v10421_v32, %v1864_v17  ;;  %v10427_v52 = vld [vmem:[#allocation29_spill] sm:$0xff]  ;;  %v10428_v57 = vld [vmem:[#allocation100_spill] sm:$0xff]  ;;  %v10430_v17 = vld [vmem:[#allocation66_spill] sm:$0xff] }
 0x34f   : > { %10418 = vst [vmem:[#allocation124_spill] sm:$0xff] %v8197_v12  ;;  %v4082_v37 = vpack.c.bf16 %v4060_v58, %v4058_v48  ;;  %v2255_v16 = vadd.f32 %v10422_v50, %v1866_v59  ;;  %v2257_v63 = vadd.f32 %v10423_v27, %v1868_v43  ;;  %v2259_v62 = vadd.f32 %v10424_v45, %v1870_v49  ;;  %v10429_v45 = vld [vmem:[#allocation65_spill] sm:$0xff] }
 0x350   : > { %10416 = vst [vmem:[#allocation30_spill] sm:$0xff] %v8193_v40  ;;  %10419 = vst [vmem:[#allocation120_spill] sm:$0xff] %v8200_v53  ;;  %v10425_v40 = vld [vmem:[#allocation59_spill] sm:$0xff]  ;;  %v2369_v12 = vmul.f32 %v7451_v31, %v10426_v18  ;;  %v2373_v29 = vmul.f32 %v10428_v57, %v10426_v18  ;;  %v2515_v58 = vsel %vm7741_vm12, %v7883_v61, 0.0  ;;  %v2517_v49 = vsel %vm7741_vm12, %v7889_v10, 0.0 }
 0x351   : > { %10420 = vst [vmem:[#allocation121_spill] sm:$0xff] %v8203_v15  ;;  %v2367_v6 = vmul.f32 %v7448_v55, %v10425_v40  ;;  %v2371_v41 = vmul.f32 %v10427_v52, %v10425_v40  ;;  %4290 = vmatmul.mubr.bf16.gmra.mxu0 %v4082_v37  ;;  %v2619_v48 = vmul.f32 %v7871_v54, %v10429_v45  ;;  %v8227_v18 = vld [vmem:[#allocation2 + $0x50] sm:$0xff]  ;;  %v2767_v10 = vsel %vm7751_vm13, %v7926_v47, 0.0  ;;  %v8237_v15 = vld [vmem:[#allocation2 + $0xe8] sm:$0xff] }
 0x352   : > { %v2621_v59 = vmul.f32 %v7877_v30, %v10430_v17  ;;  %v2433_v32 = vadd.f32 %v2369_v12, %v2255_v16  ;;  %v2437_v27 = vadd.f32 %v2373_v29, %v2259_v62  ;;  %v2615_v37 = vmul.f32 %v10429_v45, %v2515_v58  ;;  %v8239_v30 = vld [vmem:[#allocation2 + $0x58] sm:$0xff] }
 0x353   : > { %v2431_v43 = vadd.f32 %v2367_v6, %v2253_v26  ;;  %v2435_v50 = vadd.f32 %v2371_v41, %v2257_v63  ;;  %v2617_v61 = vmul.f32 %v10430_v17, %v2517_v49  ;;  %v2769_v54 = vsel %vm7751_vm13, %v7931_v8, 0.0  ;;  %v8241_v6 = vld [vmem:[#allocation2 + $0x78] sm:$0xff]  ;;  %v10432_v26 = vld [vmem:[#allocation69_spill] sm:$0xff] }
 0x354   : > { %v2685_v41 = vadd.f32 %v2621_v59, %v2437_v27  ;;  %v10431_v29 = vld [vmem:[#allocation68_spill] sm:$0xff]  ;;  %v2865_v16 = vmul.f32 %v7921_v22, %v10432_v26  ;;  %v2869_v8 = vmul.f32 %v10432_v26, %v2769_v54  ;;  %v8250_v49 = vunpack.c.h.bf16 %v8227_v18  ;;  %v10438_v27 = vld [vmem:[#allocation79_spill] sm:$0xff] }
 0x355   : > { %v2683_v62 = vadd.f32 %v2619_v48, %v2435_v50  ;;  %v2863_v12 = vmul.f32 %v7915_v51, %v10431_v29  ;;  %v2679_v63 = vadd.f32 %v2615_v37, %v2431_v43  ;;  %v2681_v47 = vadd.f32 %v2617_v61, %v2433_v32  ;;  %v10437_v50 = vld [vmem:[#allocation103_spill] sm:$0xff] }
 0x356   : > { %v2867_v58 = vmul.f32 %v10431_v29, %v2767_v10  ;;  %10433 = vst [vmem:[#allocation64_spill] sm:$0xff] %v8250_v49  ;;  %v8253_v17 = vunpack.c.h.bf16 %v8237_v15  ;;  %v8256_v48 = vunpack.c.h.bf16 %v8239_v30  ;;  %v8259_v51 = vunpack.c.h.bf16 %v8241_v6  ;;  %v10439_v61 = vld [vmem:[#allocation123_spill] sm:$0xff]  ;;  %v10440_v10 = vld [vmem:[#allocation80_spill] sm:$0xff] }
 0x357   : > { %v2927_v59 = vadd.f32 %v2863_v12, %v2679_v63  ;;  %v2929_v22 = vadd.f32 %v2865_v16, %v2681_v47  ;;  %v2933_v32 = vadd.f32 %v2869_v8, %v2685_v41  ;;  %v3125_v37 = vmul.f32 %v10438_v27, %v10437_v50 }
 0x358   : > { %10434 = vst [vmem:[#allocation46_spill] sm:$0xff] %v8253_v17  ;;  %10435 = vst [vmem:[#allocation85_spill] sm:$0xff] %v8256_v48  ;;  %v2931_v43 = vadd.f32 %v2867_v58, %v2683_v62  ;;  %v3127_v54 = vmul.f32 %v10440_v10, %v10439_v61  ;;  %v3129_v26 = vmul.f32 %v10438_v27, %v8250_v49  ;;  %v8270_v45 = vrot.slane %v10437_v50, 7 }
 0x359   : > { %10436 = vst [vmem:[#allocation86_spill] sm:$0xff] %v8259_v51  ;;  %v3131_v29 = vmul.f32 %v10440_v10, %v8253_v17  ;;  %v8273_v12 = vrot.slane %v10439_v61, 7  ;;  %v9767_v62 = vrot.slane %v8250_v49, 7  ;;  %v9766_v41 = vrot.slane %v8253_v17, 7 }
 0x35a   : > { %v3189_v16 = vadd.f32 %v3125_v37, %v2927_v59  ;;  %v3191_v63 = vadd.f32 %v3127_v54, %v2929_v22  ;;  %v3193_v47 = vadd.f32 %v3129_v26, %v2931_v43  ;;  %v10441_v27 = vrot.slane %v10427_v52, 7  ;;  %v10446_v54 = vld [vmem:[#allocation83_spill] sm:$0xff] }
 0x35b   : > { %v3195_v58 = vadd.f32 %v3131_v29, %v2933_v32  ;;  %v3293_v8 = vsel %vm1562_vm0, %v8270_v45, %v9767_v62  ;;  %v3295_v10 = vsel %vm1562_vm0, %v8273_v12, %v9766_v41  ;;  %v10443_v29 = vrot.slane %v10428_v57, 7  ;;  %v10445_v32 = vld [vmem:[#allocation82_spill] sm:$0xff] }
 0x35c   : > { %v8292_v59 = vsel %vm1562_vm0, %v10441_v27, %v8270_v45  ;;  %v3485_v37 = vmul.f32 %v10445_v32, %v3293_v8  ;;  %v3487_v27 = vmul.f32 %v10446_v54, %v3295_v10  ;;  %v3613_v61 = vrot.slane %v8250_v49, 1 }
 0x35d   : > { %10442 = vst [vmem:[#allocation122_spill] sm:$0xff] %v8292_v59  ;;  %v8299_v26 = vsel %vm1562_vm0, %v10443_v29, %v8273_v12  ;;  %v3381_v22 = vsel %vm7741_vm12, %v8292_v59, 0.0  ;;  %v3615_v29 = vrot.slane %v8253_v17, 1  ;;  %v8314_v40 = vrot.slane %v8256_v48, 1  ;;  %v10447_v59 = vld [vmem:[#allocation62_spill] sm:$0xff]  ;;  %v10452_v17 = vld [vmem:[#allocation93_spill] sm:$0xff] }
 0x35e   : > { %10444 = vst [vmem:[#allocation84_spill] sm:$0xff] %v8299_v26  ;;  %v3383_v43 = vsel %vm7741_vm12, %v8299_v26, 0.0  ;;  %v3481_v41 = vmul.f32 %v10445_v32, %v3381_v22  ;;  %v3549_v53 = vadd.f32 %v3485_v37, %v3193_v47  ;;  %v3551_v50 = vadd.f32 %v3487_v27, %v3195_v58  ;;  %v10448_v22 = vld [vmem:[#allocation63_spill] sm:$0xff]  ;;  %v10449_v37 = vld [vmem:[#allocation90_spill] sm:$0xff] }
 0x35f   : > { %v3483_v62 = vmul.f32 %v10446_v54, %v3383_v43  ;;  %v8317_v56 = vrot.slane %v8259_v51, 1  ;;  %v3649_v10 = vsel %vm1951_vm3, %v10447_v59, %v3613_v61  ;;  %v3651_v43 = vsel %vm1951_vm3, %v10448_v22, %v3615_v29  ;;  %v10451_v54 = vld [vmem:[#allocation92_spill] sm:$0xff] }
 0x360   : > { %v3545_v26 = vadd.f32 %v3481_v41, %v3189_v16  ;;  %v3645_v47 = vsel %vm1951_vm3, %v3613_v61, %v8314_v40  ;;  %v3837_v27 = vmul.f32 %v10449_v37, %v3649_v10  ;;  %v10450_v41 = vld [vmem:[#allocation91_spill] sm:$0xff]  ;;  %v1474_v32 = vmul.f32 %v10377_v19, %v10451_v54 }
 0x361   : > { %v3547_v8 = vadd.f32 %v3483_v62, %v3191_v63  ;;  %v3647_v58 = vsel %vm1951_vm3, %v3615_v29, %v8317_v56  ;;  %v3839_v62 = vmul.f32 %v10450_v41, %v3651_v43  ;;  %v3741_v16 = vsel %vm7751_vm13, %v3645_v47, 0.0 }
 0x362   : > { %v3743_v63 = vsel %vm7751_vm13, %v3647_v58, 0.0  ;;  %v1476_v61 = vmul.f32 %v10379_v25, %v10452_v17  ;;  %v3841_v49 = vmul.f32 %v10449_v37, %v3741_v16  ;;  %v3901_v51 = vadd.f32 %v3837_v27, %v3545_v26  ;;  %v10453_v37 = vld [vmem:[#allocation88_spill] sm:$0xff]  ;;  %v10454_v26 = vld [vmem:[#allocation89_spill] sm:$0xff] }
 0x363   : > { %v3843_v29 = vmul.f32 %v10450_v41, %v3743_v63  ;;  %v3903_v10 = vadd.f32 %v3839_v62, %v3547_v8  ;;  %v1478_v43 = vmul.f32 %v10380_v35, %v10451_v54  ;;  %v1480_v47 = vmul.f32 %v10381_v21, %v10452_v17  ;;  %v10455_v27 = vld [vmem:[#allocation33_spill] sm:$0xff]  ;;  %v10457_v35 = vld [vmem:[#allocation94_spill] sm:$0xff] }
 0x364   : > { %v1707_v58 = vsel %vm8147_vm14, %v8071_v5, 0.0  ;;  %v1709_v19 = vsel %vm8147_vm14, %v8077_v33, 0.0  ;;  %v3905_v25 = vadd.f32 %v3841_v49, %v3549_v53  ;;  %v3987_v63 = vadd.f32 %v10453_v37, %v3901_v51 }
 0x365   : > { %v3907_v16 = vadd.f32 %v3843_v29, %v3551_v50  ;;  %v3989_v8 = vadd.f32 %v10454_v26, %v3903_v10  ;;  %v8356_v62 = vmul.f32 %v10455_v27, %v1707_v58  ;;  %v8359_v54 = vmul.f32 %v10457_v35, %v1709_v19  ;;  %v10461_v50 = vld [vmem:[#allocation97_spill] sm:$0xff]  ;;  %v10462_v10 = vld [vmem:[#allocation71_spill] sm:$0xff] }
 0x366   : > { %v8363_v21 = vmul.f32 %v8065_v36, %v10455_v27  ;;  %v8367_v17 = vmul.f32 %v8083_v4, %v10457_v35  ;;  %v3991_v53 = vadd.f32 %v10453_v37, %v3905_v25  ;;  %v4031_v51 = vmax.f32 %v3987_v63, 0.0 }
 0x367   : > { %10456 = vst [vmem:[#allocation27_spill] sm:$0xff] %v8356_v62  ;;  %10458 = vst [vmem:[#allocation87_spill] sm:$0xff] %v8359_v54  ;;  %v3993_v49 = vadd.f32 %v10454_v26, %v3907_v16  ;;  %v1863_v29 = vadd.f32 %v10461_v50, %v1474_v32  ;;  %v1865_v58 = vadd.f32 %v10462_v10, %v1476_v61  ;;  %v10463_v62 = vld [vmem:[#allocation28_spill] sm:$0xff]  ;;  %v2102_v25 = vsel %vm8157_vm15, %v8119_v2, 0.0  ;;  %v10470_v50 = vld [vmem:[#allocation61_spill] sm:$0xff] }
 0x368   : > { %10459 = vst [vmem:[#allocation72_spill] sm:$0xff] %v8363_v21  ;;  %10460 = vst [vmem:[#allocation74_spill] sm:$0xff] %v8367_v17  ;;  %v1867_v19 = vadd.f32 %v10463_v62, %v1478_v43  ;;  %v10464_v54 = vld [vmem:[#allocation96_spill] sm:$0xff]  ;;  %v2100_v21 = vsel %vm8157_vm15, %v8114_v28, 0.0  ;;  %v4033_v27 = vmax.f32 %v3991_v53, 0.0  ;;  %v4063_v35 = vmul.f32 %v4031_v51, %v3989_v8  ;;  %v10467_v43 = vld [vmem:[#allocation73_spill] sm:$0xff] }
 0x369   : > { %v1869_v41 = vadd.f32 %v10464_v54, %v1480_v47  ;;  %v8383_v16 = vmul.f32 %v8109_v42, %v6295_v9  ;;  %v8387_v32 = vmul.f32 %v8125_v11, %v6303_v39  ;;  %v8390_v54 = vmul.f32 %v6295_v9, %v2100_v21  ;;  %v10468_v8 = vld [vmem:[#allocation102_spill] sm:$0xff]  ;;  %v10469_v53 = vld [vmem:[#allocation104_spill] sm:$0xff]  ;;  %v10471_v17 = vld [vmem:[#allocation101_spill] sm:$0xff] }
 0x36a   : > { %v8393_v61 = vmul.f32 %v6303_v39, %v2102_v25  ;;  %v2252_v47 = vadd.f32 %v10467_v43, %v1863_v29  ;;  %v4065_v63 = vmul.f32 %v4033_v27, %v3993_v49  ;;  %v2254_v62 = vadd.f32 %v10468_v8, %v1865_v58  ;;  %v10472_v49 = vld [vmem:[#allocation105_spill] sm:$0xff]  ;;  %v10473_v39 = vld [vmem:[#allocation106_spill] sm:$0xff] }
 0x36b   : > { %10465 = vst [vmem:[#allocation29_spill] sm:$0xff] %v8383_v16  ;;  %10466 = vst [vmem:[#allocation100_spill] sm:$0xff] %v8387_v32  ;;  %v2256_v51 = vadd.f32 %v10469_v53, %v1867_v19  ;;  %v2258_v10 = vadd.f32 %v10470_v50, %v1869_v41  ;;  %v2366_v16 = vmul.f32 %v10388_v7, %v10280_v46  ;;  %v2514_v27 = vsel %vm7741_vm12, %v8071_v5, 0.0 }
 0x36c   : > { %v2368_v32 = vmul.f32 %v10390_v60, %v10471_v17  ;;  %v2370_v21 = vmul.f32 %v8038_v3, %v10280_v46  ;;  %v2372_v25 = vmul.f32 %v8041_v1, %v10471_v17  ;;  %v4085_v29 = vpack.c.bf16 %v4065_v63, %v4063_v35 }
 0x36d   : > { %v2516_v41 = vsel %vm7741_vm12, %v8077_v33, 0.0  ;;  %v2618_v58 = vmul.f32 %v8065_v36, %v10472_v49  ;;  %v2430_v19 = vadd.f32 %v2366_v16, %v2252_v47  ;;  %v2614_v50 = vmul.f32 %v10472_v49, %v2514_v27  ;;  %v10474_v16 = vld [vmem:[#allocation107_spill] sm:$0xff]  ;;  %v10475_v47 = vld [vmem:[#allocation108_spill] sm:$0xff] }
 0x36e   : > { %v2432_v43 = vadd.f32 %v2368_v32, %v2254_v62  ;;  %v2434_v8 = vadd.f32 %v2370_v21, %v2256_v51  ;;  %v2436_v53 = vadd.f32 %v2372_v25, %v2258_v10  ;;  %4297 = vmatprep.mubr.bf16.mxu0 %v4085_v29  ;;  %v2616_v35 = vmul.f32 %v10473_v39, %v2516_v41 }
 0x36f   : > { %v2620_v63 = vmul.f32 %v8083_v4, %v10473_v39  ;;  %v2766_v5 = vsel %vm7751_vm13, %v8114_v28, 0.0  ;;  %v2768_v36 = vsel %vm7751_vm13, %v8119_v2, 0.0  ;;  %v2862_v32 = vmul.f32 %v8109_v42, %v10474_v16 }
 0x370   : > { %v2682_v33 = vadd.f32 %v2618_v58, %v2434_v8  ;;  %v2864_v62 = vmul.f32 %v8125_v11, %v10475_v47  ;;  %v2678_v51 = vadd.f32 %v2614_v50, %v2430_v19  ;;  %v2680_v10 = vadd.f32 %v2616_v35, %v2432_v43  ;;  %v10479_v19 = vld [vmem:[#allocation117_spill] sm:$0xff]  ;;  %v10482_v50 = vld [vmem:[#allocation110_spill] sm:$0xff] }
 0x371   : > { %v2684_v21 = vadd.f32 %v2620_v63, %v2436_v53  ;;  %v2866_v4 = vmul.f32 %v10474_v16, %v2766_v5  ;;  %v2868_v25 = vmul.f32 %v10475_v47, %v2768_v36  ;;  %v8432_v28 = vunpack.c.l.bf16 %v8227_v18  ;;  %v10480_v43 = vld [vmem:[#allocation109_spill] sm:$0xff]  ;;  %v10487_v16 = vld [vmem:[#allocation118_spill] sm:$0xff] }
 0x372   : > { %v8435_v29 = vunpack.c.l.bf16 %v8237_v15  ;;  %v8438_v2 = vunpack.c.l.bf16 %v8239_v30  ;;  %v2926_v42 = vadd.f32 %v2862_v32, %v2678_v51  ;;  %v2928_v27 = vadd.f32 %v2864_v62, %v2680_v10  ;;  %v10481_v53 = vld [vmem:[#allocation81_spill] sm:$0xff] }
 0x373   : > { %10476 = vst [vmem:[#allocation62_spill] sm:$0xff] %v8432_v28  ;;  %v2930_v41 = vadd.f32 %v2866_v4, %v2682_v33  ;;  %v8441_v11 = vunpack.c.l.bf16 %v8241_v6  ;;  %v2932_v58 = vadd.f32 %v2868_v25, %v2684_v21  ;;  %v3124_v8 = vmul.f32 %v10480_v43, %v10479_v19 }
 0x374   : > { %10477 = vst [vmem:[#allocation63_spill] sm:$0xff] %v8435_v29  ;;  %v3126_v18 = vmul.f32 %v10482_v50, %v10481_v53  ;;  %v3128_v15 = vmul.f32 %v10480_v43, %v8432_v28  ;;  %v3130_v30 = vmul.f32 %v10482_v50, %v8435_v29  ;;  %v8452_v35 = vrot.slane %v10479_v19, 7 }
 0x375   : > { %10478 = vst [vmem:[#allocation97_spill] sm:$0xff] %v8441_v11  ;;  %v8455_v63 = vrot.slane %v10481_v53, 7  ;;  %v9790_v6 = vrot.slane %v8432_v28, 7  ;;  %v3188_v5 = vadd.f32 %v3124_v8, %v2926_v42  ;;  %v9791_v32 = vrot.slane %v8435_v29, 7 }
 0x376   : > { %v3190_v33 = vadd.f32 %v3126_v18, %v2928_v27  ;;  %v3192_v36 = vadd.f32 %v3128_v15, %v2930_v41  ;;  %v3194_v62 = vadd.f32 %v3130_v30, %v2932_v58  ;;  %v10483_v10 = vrot.slane %v8038_v3, 7  ;;  %v10485_v58 = vld [vmem:[#allocation111_spill] sm:$0xff]  ;;  %v10486_v15 = vld [vmem:[#allocation112_spill] sm:$0xff] }
 0x377   : > { %v3292_v51 = vsel %vm1562_vm0, %v8452_v35, %v9790_v6  ;;  %v10484_v4 = vrot.slane %v8041_v1, 7  ;;  %v3294_v42 = vsel %vm1562_vm0, %v8455_v63, %v9791_v32  ;;  %v3614_v32 = vrot.slane %v8435_v29, 1  ;;  %v10489_v29 = vld [vmem:[#allocation115_spill] sm:$0xff] }
 0x378   : > { %v8469_v21 = vsel %vm1562_vm0, %v10483_v10, %v8452_v35  ;;  %v3484_v8 = vmul.f32 %v10485_v58, %v3292_v51  ;;  %v3486_v10 = vmul.f32 %v10486_v15, %v3294_v42  ;;  %v8496_v50 = vrot.slane %v8438_v2, 1 }
 0x379   : > { %v8476_v25 = vsel %vm1562_vm0, %v10484_v4, %v8455_v63  ;;  %v3380_v27 = vsel %vm7741_vm12, %v8469_v21, 0.0  ;;  %v3612_v4 = vrot.slane %v8432_v28, 1  ;;  %v8499_v43 = vrot.slane %v8441_v11, 1 }
 0x37a   : > { %v3382_v41 = vsel %vm7741_vm12, %v8476_v25, 0.0  ;;  %v3480_v18 = vmul.f32 %v10485_v58, %v3380_v27  ;;  %v3548_v6 = vadd.f32 %v3484_v8, %v3192_v36  ;;  %v3550_v51 = vadd.f32 %v3486_v10, %v3194_v62 }
 0x37b   : > { %v3482_v30 = vmul.f32 %v10486_v15, %v3382_v41  ;;  %v3648_v27 = vsel %vm1951_vm3, %v10487_v16, %v3612_v4  ;;  %v3644_v42 = vsel %vm1951_vm3, %v3612_v4, %v8496_v50  ;;  %v3646_v36 = vsel %vm1951_vm3, %v3614_v32, %v8499_v43  ;;  %v10488_v41 = vld [vmem:[#allocation119_spill] sm:$0xff] }
 0x37c   : > { %v3544_v23 = vadd.f32 %v3480_v18, %v3188_v5  ;;  %v3650_v8 = vsel %vm1951_vm3, %v10488_v41, %v3614_v32  ;;  %v3836_v5 = vmul.f32 %v10304_v0, %v3648_v27  ;;  %v3742_v62 = vsel %vm7751_vm13, %v3646_v36, 0.0 }
 0x37d   : > { %v3546_v47 = vadd.f32 %v3482_v30, %v3190_v33  ;;  %v3740_v33 = vsel %vm7751_vm13, %v3644_v42, 0.0  ;;  %v3838_v18 = vmul.f32 %v10305_v38, %v3650_v8  ;;  %v1250_v30 = vadd.s32 112, %v5463_v44 }
 0x37e   : > { %v3840_v10 = vmul.f32 %v10304_v0, %v3740_v33  ;;  %v3842_v4 = vmul.f32 %v10305_v38, %v3742_v62  ;;  %v3900_v15 = vadd.f32 %v3836_v5, %v3544_v23  ;;  %v1483_v32 = vmul.f32 %v7448_v55, %v10306_v14  ;;  %v10490_v62 = vld [vmem:[#allocation116_spill] sm:$0xff]  ;;  %v10506_v38 = vld [vmem:[#allocation70_spill] sm:$0xff] }
 0x37f   : > { %v3902_v58 = vadd.f32 %v3838_v18, %v3546_v47  ;;  %v1266_v27 = vand.u32 15, %v1250_v30  ;;  %v1485_v42 = vmul.f32 %v7451_v31, %v10307_v34  ;;  %v1487_v20 = vmul.f32 %v10427_v52, %v10306_v14  ;;  %v10493_v55 = vld [vmem:[#allocation44_spill] sm:$0xff]  ;;  %v10494_v47 = vld [vmem:[#allocation45_spill] sm:$0xff]  ;;  %v10664_v5 = vld [vmem:[#allocation34_spill] sm:$0xff] }
 0x380   : > { %v3904_v36 = vadd.f32 %v3840_v10, %v3548_v6  ;;  %v3906_v8 = vadd.f32 %v3842_v4, %v3550_v51  ;;  %v3986_v28 = vadd.f32 %v10489_v29, %v3900_v15  ;;  %v1489_v33 = vmul.f32 %v10428_v57, %v10307_v34  ;;  %v10496_v18 = vld [vmem:[#allocation84_spill] sm:$0xff]  ;;  %v10497_v10 = vld [vmem:[#allocation47_spill] sm:$0xff] }
 0x381   : > { %v3988_v23 = vadd.f32 %v10490_v62, %v3902_v58  ;;  %vm8532_vm1 = vcmp.ne.s32.totalorder %v1266_v27, 0  ;;  %v1564_v31 = vsel %vm1562_vm0, %v8270_v45, %v10493_v55  ;;  %v1566_v52 = vsel %vm1562_vm0, %v8273_v12, %v10494_v47  ;;  %v10495_v58 = vld [vmem:[#allocation122_spill] sm:$0xff]  ;;  %v10500_v12 = vld [vmem:[#allocation48_spill] sm:$0xff]  ;;  %v10503_v47 = vld [vmem:[#allocation35_spill] sm:$0xff] }
 0x382   : > { %v3990_v6 = vadd.f32 %v10489_v29, %v3904_v36  ;;  %v3992_v57 = vadd.f32 %v10490_v62, %v3906_v8  ;;  %v4030_v15 = vmax.f32 %v3986_v28, 0.0  ;;  %v1716_v51 = vsel %vm8532_vm1, %v10495_v58, 0.0  ;;  %v10504_v62 = vld [vmem:[#allocation37_spill] sm:$0xff]  ;;  %v10505_v34 = vld [vmem:[#allocation67_spill] sm:$0xff] }
 0x383   : > { %v1718_v30 = vsel %vm8532_vm1, %v10496_v18, 0.0  ;;  %v8553_v45 = vmul.f32 %v10497_v10, %v1716_v51  ;;  %v8556_v4 = vmul.f32 %v10497_v10, %v1564_v31  ;;  %v8559_v27 = vmul.f32 %v10500_v12, %v1566_v52 }
 0x384   : > { %v4032_v36 = vmax.f32 %v3990_v6, 0.0  ;;  %v4062_v8 = vmul.f32 %v4030_v15, %v3988_v23  ;;  %v8562_v28 = vmul.f32 %v10500_v12, %v1718_v30  ;;  %v1872_v55 = vadd.f32 %v10503_v47, %v1483_v32  ;;  %v10510_v6 = vld [vmem:[#allocation30_spill] sm:$0xff]  ;;  %v10511_v15 = vld [vmem:[#allocation59_spill] sm:$0xff] }
 0x385   : > { %10498 = vst [vmem:[#allocation71_spill] sm:$0xff] %v8553_v45  ;;  %10499 = vst [vmem:[#allocation28_spill] sm:$0xff] %v8556_v4  ;;  %v1874_v29 = vadd.f32 %v10504_v62, %v1485_v42  ;;  %v1876_v14 = vadd.f32 %v10505_v34, %v1487_v20  ;;  %v1878_v51 = vadd.f32 %v10506_v38, %v1489_v33  ;;  %v10507_v45 = vld [vmem:[#allocation39_spill] sm:$0xff]  ;;  %v10508_v4 = vld [vmem:[#allocation41_spill] sm:$0xff] }
 0x386   : > { %10501 = vst [vmem:[#allocation96_spill] sm:$0xff] %v8559_v27  ;;  %10502 = vst [vmem:[#allocation73_spill] sm:$0xff] %v8562_v28  ;;  %v8569_v0 = vrot.slane %v10507_v45, 1  ;;  %v4064_v10 = vmul.f32 %v4032_v36, %v3992_v57  ;;  %v8572_v11 = vrot.slane %v10508_v4, 1  ;;  %v2261_v23 = vadd.f32 %v10510_v6, %v1872_v55  ;;  %v10512_v30 = vld [vmem:[#allocation103_spill] sm:$0xff]  ;;  %v10513_v34 = vld [vmem:[#allocation124_spill] sm:$0xff] }
 0x387   : > { %v2375_v12 = vmul.f32 %v10512_v30, %v10511_v15  ;;  %v2263_v42 = vadd.f32 %v10513_v34, %v1874_v29  ;;  %v10514_v38 = vld [vmem:[#allocation120_spill] sm:$0xff]  ;;  %v10515_v33 = vld [vmem:[#allocation121_spill] sm:$0xff]  ;;  %v10519_v27 = vld [vmem:[#allocation123_spill] sm:$0xff] }
 0x388   : > { %10509 = vst [vmem:[#allocation102_spill] sm:$0xff] %v8572_v11  ;;  %v1953_v32 = vsel %vm1951_vm3, %v10447_v59, %v8569_v0  ;;  %v2265_v20 = vadd.f32 %v10514_v38, %v1876_v14  ;;  %v2267_v62 = vadd.f32 %v10515_v33, %v1878_v51  ;;  %v4084_v47 = vpack.c.bf16 %v4064_v10, %v4062_v8  ;;  %v10516_v57 = vld [vmem:[#allocation53_spill] sm:$0xff]  ;;  %v10518_v6 = vld [vmem:[#allocation60_spill] sm:$0xff]  ;;  %v10520_v30 = vld [vmem:[#allocation54_spill] sm:$0xff] }
 0x389   : > { %v1955_v55 = vsel %vm1951_vm3, %v10448_v22, %v8572_v11  ;;  %v8589_v36 = vmul.f32 %v10516_v57, %v1953_v32  ;;  %v2377_v28 = vmul.f32 %v10519_v27, %v10518_v6  ;;  %v2379_v14 = vmul.f32 %v10511_v15, %v10507_v45  ;;  %v10522_v34 = vld [vmem:[#allocation65_spill] sm:$0xff] }
 0x38a   : > { %v8594_v59 = vmul.f32 %v10520_v30, %v1955_v55  ;;  %v2381_v29 = vmul.f32 %v10518_v6, %v10508_v4  ;;  %v2439_v8 = vadd.f32 %v2375_v12, %v2261_v23  ;;  %4298 = vmatmul.mubr.bf16.gmra.mxu0 %v4084_v47  ;;  %v2523_v22 = vsel %vm8147_vm14, %v10495_v58, 0.0  ;;  %v10523_v30 = vld [vmem:[#allocation66_spill] sm:$0xff] }
 0x38b   : > { %10517 = vst [vmem:[#allocation104_spill] sm:$0xff] %v8589_v36  ;;  %v2441_v51 = vadd.f32 %v2377_v28, %v2263_v42  ;;  %v2525_v10 = vsel %vm8147_vm14, %v10496_v18, 0.0  ;;  %v2627_v38 = vmul.f32 %v10522_v34, %v1564_v31  ;;  %v2443_v33 = vadd.f32 %v2379_v14, %v2265_v20  ;;  %v10524_v18 = vld [vmem:[#allocation68_spill] sm:$0xff]  ;;  %v8619_v12 = vld [vmem:[#allocation2 + $0x30] sm:$0xff]  ;;  %v8625_v14 = vld [vmem:[#allocation2 + $0x28] sm:$0xff] }
 0x38c   : > { %10521 = vst [vmem:[#allocation61_spill] sm:$0xff] %v8594_v59  ;;  %v2445_v59 = vadd.f32 %v2381_v29, %v2267_v62  ;;  %v2623_v15 = vmul.f32 %v10522_v34, %v2523_v22  ;;  %v2625_v57 = vmul.f32 %v10523_v30, %v2525_v10  ;;  %v2629_v23 = vmul.f32 %v10523_v30, %v1566_v52  ;;  %v8621_v42 = vld [vmem:[#allocation2 + $0x40] sm:$0xff]  ;;  %v10533_v36 = vld [vmem:[#allocation46_spill] sm:$0xff] }
 0x38d   : > { %v2715_v28 = vsel %vm1951_vm3, %v8569_v0, %v8314_v40  ;;  %v2717_v58 = vsel %vm1951_vm3, %v8572_v11, %v8317_v56  ;;  %v2871_v31 = vmul.f32 %v10524_v18, %v1953_v32  ;;  %v2691_v47 = vadd.f32 %v2627_v38, %v2443_v33  ;;  %v8627_v29 = vld [vmem:[#allocation2] sm:$0xff] }
 0x38e   : > { %v2687_v20 = vadd.f32 %v2623_v15, %v2439_v8  ;;  %v2689_v62 = vadd.f32 %v2625_v57, %v2441_v51  ;;  %v2775_v52 = vsel %vm8157_vm15, %v2715_v28, 0.0  ;;  %v2693_v22 = vadd.f32 %v2629_v23, %v2445_v59  ;;  %v10525_v30 = vld [vmem:[#allocation69_spill] sm:$0xff]  ;;  %v10526_v23 = vld [vmem:[#allocation79_spill] sm:$0xff] }
 0x38f   : > { %v2777_v10 = vsel %vm8157_vm15, %v2717_v58, 0.0  ;;  %v2873_v32 = vmul.f32 %v10525_v30, %v1955_v55  ;;  %v2875_v34 = vmul.f32 %v10524_v18, %v2775_v52  ;;  %v8635_v57 = vunpack.c.h.bf16 %v8619_v12  ;;  %v10527_v58 = vld [vmem:[#allocation86_spill] sm:$0xff] }
 0x390   : > { %v2877_v6 = vmul.f32 %v10525_v30, %v2777_v10  ;;  %v2935_v15 = vadd.f32 %v2871_v31, %v2687_v20  ;;  %v8638_v8 = vunpack.c.h.bf16 %v8621_v42  ;;  %v8641_v59 = vunpack.c.h.bf16 %v8625_v14  ;;  %v10528_v31 = vld [vmem:[#allocation80_spill] sm:$0xff] }
 0x391   : > { %v2937_v51 = vadd.f32 %v2873_v32, %v2689_v62  ;;  %v2939_v38 = vadd.f32 %v2875_v34, %v2691_v47  ;;  %v8644_v33 = vunpack.c.h.bf16 %v8627_v29  ;;  %v3133_v28 = vmul.f32 %v10526_v23, %v8256_v48 }
 0x392   : > { %v2941_v55 = vadd.f32 %v2877_v6, %v2693_v22  ;;  %v3135_v20 = vmul.f32 %v10528_v31, %v10527_v58  ;;  %v3137_v52 = vmul.f32 %v10526_v23, %v8635_v57  ;;  %v3139_v62 = vmul.f32 %v10528_v31, %v8638_v8  ;;  %v10531_v23 = vld [vmem:[#allocation64_spill] sm:$0xff] }
 0x393   : > { %v8655_v34 = vrot.slane %v8256_v48, 7  ;;  %v8658_v47 = vrot.slane %v10527_v58, 7  ;;  %v9818_v6 = vrot.slane %v8635_v57, 7  ;;  %v3197_v22 = vadd.f32 %v3133_v28, %v2935_v15  ;;  %v10535_v28 = vld [vmem:[#allocation82_spill] sm:$0xff] }
 0x394   : > { %v3199_v10 = vadd.f32 %v3135_v20, %v2937_v51  ;;  %v3201_v32 = vadd.f32 %v3137_v52, %v2939_v38  ;;  %v9821_v30 = vrot.slane %v8638_v8, 7  ;;  %v3203_v18 = vadd.f32 %v3139_v62, %v2941_v55 }
 0x395   : > { %10529 = vst [vmem:[#allocation101_spill] sm:$0xff] %v8655_v34  ;;  %10530 = vst [vmem:[#allocation105_spill] sm:$0xff] %v8658_v47  ;;  %v3285_v31 = vsel %vm1562_vm0, %v8655_v34, %v9818_v6  ;;  %v10532_v48 = vrot.slane %v10531_v23, 7  ;;  %v10534_v15 = vrot.slane %v10533_v36, 7  ;;  %v10536_v36 = vld [vmem:[#allocation83_spill] sm:$0xff] }
 0x396   : > { %v3287_v38 = vsel %vm1562_vm0, %v8658_v47, %v9821_v30  ;;  %v9826_v30 = vrot.slane %v8641_v59, 1 }
 0x397   : > { %v3289_v58 = vsel %vm1562_vm0, %v10532_v48, %v8655_v34  ;;  %v3291_v51 = vsel %vm1562_vm0, %v10534_v15, %v8658_v47  ;;  %v3493_v48 = vmul.f32 %v10535_v28, %v3285_v31  ;;  %v3495_v62 = vmul.f32 %v10536_v36, %v3287_v38 }
 0x398   : > { %v3389_v55 = vsel %vm8147_vm14, %v3289_v58, 0.0  ;;  %v3391_v23 = vsel %vm8147_vm14, %v3291_v51, 0.0  ;;  %v3621_v15 = vrot.slane %v8635_v57, 1  ;;  %v3623_v34 = vrot.slane %v8638_v8, 1 }
 0x399   : > { %v3489_v20 = vmul.f32 %v10535_v28, %v3389_v55  ;;  %v3491_v52 = vmul.f32 %v10536_v36, %v3391_v23  ;;  %v3557_v6 = vadd.f32 %v3493_v48, %v3201_v32  ;;  %v9825_v58 = vrot.slane %v8644_v33, 1  ;;  %v10538_v48 = vld [vmem:[#allocation91_spill] sm:$0xff]  ;;  %v10540_v36 = vld [vmem:[#allocation93_spill] sm:$0xff] }
 0x39a   : > { %v3559_v51 = vadd.f32 %v3495_v62, %v3203_v18  ;;  %v3641_v31 = vsel %vm1951_vm3, %v8314_v40, %v3621_v15  ;;  %v3637_v38 = vsel %vm1951_vm3, %v3621_v15, %v9826_v30  ;;  %v10541_v28 = vld [vmem:[#allocation31_spill] sm:$0xff] }
 0x39b   : > { %v3553_v47 = vadd.f32 %v3489_v20, %v3197_v22  ;;  %v3555_v11 = vadd.f32 %v3491_v52, %v3199_v10  ;;  %v3639_v32 = vsel %vm1951_vm3, %v3623_v34, %v9825_v58  ;;  %v3643_v22 = vsel %vm1951_vm3, %v8317_v56, %v3623_v34  ;;  %v10537_v10 = vld [vmem:[#allocation90_spill] sm:$0xff]  ;;  %v10539_v52 = vld [vmem:[#allocation92_spill] sm:$0xff] }
 0x39c   : > { %v3845_v18 = vmul.f32 %v10537_v10, %v3641_v31  ;;  %v3749_v55 = vsel %vm8157_vm15, %v3637_v38, 0.0  ;;  %v3751_v23 = vsel %vm8157_vm15, %v3639_v32, 0.0  ;;  %v3847_v20 = vmul.f32 %v10538_v48, %v3643_v22 }
 0x39d   : > { %v1482_v62 = vmul.f32 %v10388_v7, %v10539_v52  ;;  %v3849_v15 = vmul.f32 %v10537_v10, %v3749_v55  ;;  %v3851_v58 = vmul.f32 %v10538_v48, %v3751_v23  ;;  %v1484_v34 = vmul.f32 %v10390_v60, %v10540_v36  ;;  %v10551_v48 = vld [vmem:[#allocation72_spill] sm:$0xff] }
 0x39e   : > { %v3909_v30 = vadd.f32 %v3845_v18, %v3553_v47  ;;  %v3911_v31 = vadd.f32 %v3847_v20, %v3555_v11  ;;  %v1486_v38 = vmul.f32 %v8038_v3, %v10539_v52  ;;  %v1488_v32 = vmul.f32 %v8041_v1, %v10540_v36  ;;  %v10542_v47 = vld [vmem:[#allocation32_spill] sm:$0xff]  ;;  %v10546_v18 = vld [vmem:[#allocation94_spill] sm:$0xff] }
 0x39f   : > { %v1563_v7 = vsel %vm1562_vm0, %v8452_v35, %v10541_v28  ;;  %v3913_v22 = vadd.f32 %v3849_v15, %v3557_v6  ;;  %v3915_v55 = vadd.f32 %v3851_v58, %v3559_v51  ;;  %v1565_v60 = vsel %vm1562_vm0, %v8455_v63, %v10542_v47  ;;  %v10543_v35 = vld [vmem:[#allocation33_spill] sm:$0xff]  ;;  %v10550_v28 = vld [vmem:[#allocation87_spill] sm:$0xff] }
 0x3a0   : > { %v3995_v23 = vadd.f32 %v10453_v37, %v3909_v30  ;;  %v3997_v11 = vadd.f32 %v10454_v26, %v3911_v31  ;;  %v1715_v3 = vsel %vm8532_vm1, %v8469_v21, 0.0  ;;  %v1717_v1 = vsel %vm8532_vm1, %v8476_v25, 0.0  ;;  %v10549_v31 = vld [vmem:[#allocation27_spill] sm:$0xff] }
 0x3a1   : > { %v8741_v6 = vmul.f32 %v10543_v35, %v1563_v7  ;;  %v3999_v30 = vadd.f32 %v10453_v37, %v3913_v22  ;;  %v4001_v58 = vadd.f32 %v10454_v26, %v3915_v55  ;;  %v8746_v63 = vmul.f32 %v10543_v35, %v1715_v3  ;;  %v10552_v37 = vld [vmem:[#allocation74_spill] sm:$0xff]  ;;  %v10554_v3 = vld [vmem:[#allocation40_spill] sm:$0xff] }
 0x3a2   : > { %v4035_v51 = vmax.f32 %v3995_v23, 0.0  ;;  %v8749_v20 = vmul.f32 %v10546_v18, %v1717_v1  ;;  %v8752_v15 = vmul.f32 %v10546_v18, %v1565_v60  ;;  %v1871_v47 = vadd.f32 %v10549_v31, %v1482_v62  ;;  %v10553_v23 = vld [vmem:[#allocation38_spill] sm:$0xff]  ;;  %v10555_v1 = vld [vmem:[#allocation29_spill] sm:$0xff]  ;;  %v10556_v18 = vld [vmem:[#allocation100_spill] sm:$0xff] }
 0x3a3   : > { %10544 = vst [vmem:[#allocation106_spill] sm:$0xff] %v8741_v6  ;;  %10545 = vst [vmem:[#allocation117_spill] sm:$0xff] %v8746_v63  ;;  %v1873_v36 = vadd.f32 %v10550_v28, %v1484_v34  ;;  %v4037_v52 = vmax.f32 %v3999_v30, 0.0  ;;  %v1875_v22 = vadd.f32 %v10551_v48, %v1486_v38  ;;  %v1877_v55 = vadd.f32 %v10552_v37, %v1488_v32  ;;  %v10557_v38 = vld [vmem:[#allocation99_spill] sm:$0xff] }
 0x3a4   : > { %10547 = vst [vmem:[#allocation81_spill] sm:$0xff] %v8749_v20  ;;  %10548 = vst [vmem:[#allocation118_spill] sm:$0xff] %v8752_v15  ;;  %v4067_v6 = vmul.f32 %v4035_v51, %v3997_v11  ;;  %v8759_v26 = vrot.slane %v10553_v23, 1  ;;  %v8762_v35 = vrot.slane %v10554_v3, 1  ;;  %v2260_v20 = vadd.f32 %v10555_v1, %v1871_v47 }
 0x3a5   : > { %v2262_v15 = vadd.f32 %v10556_v18, %v1873_v36  ;;  %v4069_v63 = vmul.f32 %v4037_v52, %v4001_v58  ;;  %v2264_v62 = vadd.f32 %v8390_v54, %v1875_v22  ;;  %v2266_v28 = vadd.f32 %v8393_v61, %v1877_v55  ;;  %v10558_v18 = vld [vmem:[#allocation107_spill] sm:$0xff] }
 0x3a6   : > { %v2374_v48 = vmul.f32 %v10479_v19, %v10280_v46  ;;  %v1952_v37 = vsel %vm1951_vm3, %v10487_v16, %v8759_v26  ;;  %v1954_v34 = vsel %vm1951_vm3, %v10488_v41, %v8762_v35  ;;  %v2376_v36 = vmul.f32 %v10481_v53, %v10471_v17 }
 0x3a7   : > { %v2378_v54 = vmul.f32 %v10280_v46, %v10553_v23  ;;  %v4087_v61 = vpack.c.bf16 %v4069_v63, %v4067_v6  ;;  %v8783_v52 = vmul.f32 %v6295_v9, %v1952_v37  ;;  %v8786_v32 = vmul.f32 %v10557_v38, %v1954_v34 }
 0x3a8   : > { %v2380_v16 = vmul.f32 %v10471_v17, %v10554_v3  ;;  %v2438_v47 = vadd.f32 %v2374_v48, %v2260_v20  ;;  %v2440_v11 = vadd.f32 %v2376_v36, %v2262_v15  ;;  %v2522_v41 = vsel %vm8147_vm14, %v8469_v21, 0.0 }
 0x3a9   : > { %v2442_v30 = vadd.f32 %v2378_v54, %v2264_v62  ;;  %4305 = vmatprep.mubr.bf16.mxu0 %v4087_v61  ;;  %v2524_v6 = vsel %vm8147_vm14, %v8476_v25, 0.0  ;;  %v2622_v51 = vmul.f32 %v10472_v49, %v2522_v41  ;;  %v2626_v63 = vmul.f32 %v10472_v49, %v1563_v7 }
 0x3aa   : > { %v2444_v58 = vadd.f32 %v2380_v16, %v2266_v28  ;;  %v2624_v31 = vmul.f32 %v10473_v39, %v2524_v6  ;;  %v2628_v20 = vmul.f32 %v10473_v39, %v1565_v60  ;;  %v2714_v15 = vsel %vm1951_vm3, %v8759_v26, %v8496_v50  ;;  %v10559_v28 = vld [vmem:[#allocation108_spill] sm:$0xff] }
 0x3ab   : > { %v2716_v21 = vsel %vm1951_vm3, %v8762_v35, %v8499_v43  ;;  %v2686_v22 = vadd.f32 %v2622_v51, %v2438_v47  ;;  %v2690_v25 = vadd.f32 %v2626_v63, %v2442_v30  ;;  %v2774_v55 = vsel %vm8157_vm15, %v2714_v15, 0.0  ;;  %v10563_v51 = vld [vmem:[#allocation97_spill] sm:$0xff]  ;;  %v10564_v63 = vld [vmem:[#allocation110_spill] sm:$0xff] }
 0x3ac   : > { %v2776_v7 = vsel %vm8157_vm15, %v2716_v21, 0.0  ;;  %v2688_v1 = vadd.f32 %v2624_v31, %v2440_v11  ;;  %v2692_v60 = vadd.f32 %v2628_v20, %v2444_v58  ;;  %v2870_v62 = vmul.f32 %v10558_v18, %v1952_v37  ;;  %v10562_v58 = vld [vmem:[#allocation109_spill] sm:$0xff] }
 0x3ad   : > { %v2872_v48 = vmul.f32 %v10559_v28, %v1954_v34  ;;  %v2874_v36 = vmul.f32 %v10558_v18, %v2774_v55  ;;  %v2876_v54 = vmul.f32 %v10559_v28, %v2776_v7  ;;  %v8817_v61 = vunpack.c.l.bf16 %v8619_v12  ;;  %v10565_v7 = vld [vmem:[#allocation62_spill] sm:$0xff] }
 0x3ae   : > { %v8820_v16 = vunpack.c.l.bf16 %v8621_v42  ;;  %v2934_v47 = vadd.f32 %v2870_v62, %v2686_v22  ;;  %v8823_v41 = vunpack.c.l.bf16 %v8625_v14  ;;  %v8826_v11 = vunpack.c.l.bf16 %v8627_v29  ;;  %v10567_v62 = vld [vmem:[#allocation63_spill] sm:$0xff] }
 0x3af   : > { %10560 = vst [vmem:[#allocation119_spill] sm:$0xff] %v8817_v61  ;;  %v2936_v30 = vadd.f32 %v2872_v48, %v2688_v1  ;;  %v2938_v37 = vadd.f32 %v2874_v36, %v2690_v25  ;;  %v2940_v34 = vadd.f32 %v2876_v54, %v2692_v60  ;;  %v3132_v6 = vmul.f32 %v10562_v58, %v8438_v2 }
 0x3b0   : > { %10561 = vst [vmem:[#allocation122_spill] sm:$0xff] %v8820_v16  ;;  %v3134_v12 = vmul.f32 %v10564_v63, %v10563_v51  ;;  %v3136_v42 = vmul.f32 %v10562_v58, %v8817_v61  ;;  %v3138_v31 = vmul.f32 %v10564_v63, %v8820_v16  ;;  %v8837_v14 = vrot.slane %v8438_v2, 7  ;;  %v10580_v63 = vld [vmem:[#allocation71_spill] sm:$0xff] }
 0x3b1   : > { %v8840_v29 = vrot.slane %v10563_v51, 7  ;;  %v3196_v20 = vadd.f32 %v3132_v6, %v2934_v47  ;;  %v9835_v21 = vrot.slane %v8817_v61, 7  ;;  %v9834_v22 = vrot.slane %v8820_v16, 7 }
 0x3b2   : > { %v3198_v15 = vadd.f32 %v3134_v12, %v2936_v30  ;;  %v3200_v25 = vadd.f32 %v3136_v42, %v2938_v37  ;;  %v3202_v55 = vadd.f32 %v3138_v31, %v2940_v34  ;;  %v10566_v1 = vrot.slane %v10565_v7, 7  ;;  %v10569_v34 = vld [vmem:[#allocation111_spill] sm:$0xff]  ;;  %v10570_v12 = vld [vmem:[#allocation112_spill] sm:$0xff] }
 0x3b3   : > { %v10568_v48 = vrot.slane %v10567_v62, 7  ;;  %v3284_v54 = vsel %vm1562_vm0, %v8837_v14, %v9835_v21  ;;  %v3286_v47 = vsel %vm1562_vm0, %v8840_v29, %v9834_v22  ;;  %v3622_v62 = vrot.slane %v8820_v16, 1  ;;  %v10577_v16 = vld [vmem:[#allocation43_spill] sm:$0xff] }
 0x3b4   : > { %v3288_v60 = vsel %vm1562_vm0, %v10566_v1, %v8837_v14  ;;  %v3492_v31 = vmul.f32 %v10569_v34, %v3284_v54  ;;  %v3494_v7 = vmul.f32 %v10570_v12, %v3286_v47  ;;  %v3620_v1 = vrot.slane %v8817_v61, 1  ;;  %v10579_v61 = vld [vmem:[#allocation116_spill] sm:$0xff] }
 0x3b5   : > { %v3290_v36 = vsel %vm1562_vm0, %v10568_v48, %v8840_v29  ;;  %v3388_v30 = vsel %vm8147_vm14, %v3288_v60, 0.0  ;;  %v9837_v48 = vrot.slane %v8823_v41, 1  ;;  %v9836_v22 = vrot.slane %v8826_v11, 1  ;;  %v8876_v60 = vpop.f32.mrf.mxu0 }
 0x3b6   : > { %v3390_v37 = vsel %vm8147_vm14, %v3290_v36, 0.0  ;;  %v3488_v6 = vmul.f32 %v10569_v34, %v3388_v30  ;;  %10571 = vst [vmem:[#allocation84_spill] sm:$0xff] %v8876_v60  ;;  %v3556_v21 = vadd.f32 %v3492_v31, %v3200_v25  ;;  %v3558_v30 = vadd.f32 %v3494_v7, %v3202_v55  ;;  %v10572_v55 = vld [vmem:[#allocation113_spill] sm:$0xff]  ;;  %v10575_v60 = vld [vmem:[#allocation103_spill] sm:$0xff] }
 0x3b7   : > { %v3490_v42 = vmul.f32 %v10570_v12, %v3390_v37  ;;  %v3636_v54 = vsel %vm1951_vm3, %v3620_v1, %v9837_v48  ;;  %v3638_v47 = vsel %vm1951_vm3, %v3622_v62, %v9836_v22  ;;  %v3640_v37 = vsel %vm1951_vm3, %v8496_v50, %v3620_v1  ;;  %v10574_v48 = vld [vmem:[#allocation42_spill] sm:$0xff] }
 0x3b8   : > { %v3552_v24 = vadd.f32 %v3488_v6, %v3196_v20  ;;  %v3642_v20 = vsel %vm1951_vm3, %v8499_v43, %v3622_v62  ;;  %v3750_v25 = vsel %vm8157_vm15, %v3638_v47, 0.0  ;;  %v3844_v6 = vmul.f32 %v10572_v55, %v3640_v37  ;;  %v8903_v62 = vpop.f32.mrf.mxu0 }
 0x3b9   : > { %v3554_v36 = vadd.f32 %v3490_v42, %v3198_v15  ;;  %v3748_v15 = vsel %vm8157_vm15, %v3636_v54, 0.0  ;;  %v10573_v42 = vld [vmem:[#allocation114_spill] sm:$0xff]  ;;  %v1251_v1 = vadd.s32 120, %v5463_v44  ;;  %v1491_v12 = vmul.f32 %v10575_v60, %v10574_v48  ;;  %10576 = vst [vmem:[#allocation47_spill] sm:$0xff] %v8903_v62 }
 0x3ba   : > { %v3846_v31 = vmul.f32 %v10573_v42, %v3642_v20  ;;  %v3848_v7 = vmul.f32 %v10572_v55, %v3748_v15  ;;  %v3850_v22 = vmul.f32 %v10573_v42, %v3750_v25  ;;  %v3908_v34 = vadd.f32 %v3844_v6, %v3552_v24  ;;  %v10578_v42 = vld [vmem:[#allocation115_spill] sm:$0xff]  ;;  %v10581_v24 = vld [vmem:[#allocation73_spill] sm:$0xff] }
 0x3bb   : > { %v1493_v13 = vmul.f32 %v10519_v27, %v10577_v16  ;;  %v1495_v47 = vmul.f32 %v10574_v48, %v10507_v45  ;;  %v1267_v15 = vand.u32 15, %v1251_v1  ;;  %v1497_v25 = vmul.f32 %v10577_v16, %v10508_v4  ;;  %v8922_v48 = vpop.f32.mrf.mxu0  ;;  %v10586_v16 = vld [vmem:[#allocation96_spill] sm:$0xff]  ;;  %v10591_v1 = vld [vmem:[#allocation102_spill] sm:$0xff] }
 0x3bc   : > { %v3910_v54 = vadd.f32 %v3846_v31, %v3554_v36  ;;  %v3912_v37 = vadd.f32 %v3848_v7, %v3556_v21  ;;  %v3914_v20 = vadd.f32 %v3850_v22, %v3558_v30  ;;  %v3994_v55 = vadd.f32 %v10578_v42, %v3908_v34  ;;  %v10584_v21 = vld [vmem:[#allocation28_spill] sm:$0xff]  ;;  %10585 = vst [vmem:[#allocation48_spill] sm:$0xff] %v8922_v48 }
 0x3bd   : > { %v1880_v62 = vadd.f32 %v10580_v63, %v1491_v12  ;;  %v1882_v36 = vadd.f32 %v10581_v24, %v1493_v13  ;;  %vm8917_vm2 = vcmp.ne.s32.totalorder %v1267_v15, 15  ;;  %v1884_v22 = vadd.f32 %v10584_v21, %v1495_v47  ;;  %v10587_v30 = vld [vmem:[#allocation24_spill] sm:$0xff]  ;;  %v10589_v12 = vld [vmem:[#allocation26_spill] sm:$0xff] }
 0x3be   : > { %v3996_v60 = vadd.f32 %v10579_v61, %v3910_v54  ;;  %v3998_v6 = vadd.f32 %v10578_v42, %v3912_v37  ;;  %v4000_v27 = vadd.f32 %v10579_v61, %v3914_v20  ;;  %v4034_v4 = vmax.f32 %v3994_v55, 0.0  ;;  %v10592_v37 = vld [vmem:[#allocation104_spill] sm:$0xff]  ;;  %v10594_v21 = vld [vmem:[#allocation54_spill] sm:$0xff]  ;;  %v10597_v61 = vld [vmem:[#allocation85_spill] sm:$0xff] }
 0x3bf   : > { %v1886_v34 = vadd.f32 %v10586_v16, %v1497_v25  ;;  %v10588_v31 = vrot.slane %v10587_v30, 1  ;;  %v10590_v7 = vrot.slane %v10589_v12, 1  ;;  %v2269_v20 = vadd.f32 %v10592_v37, %v1880_v62  ;;  %v10593_v25 = vld [vmem:[#allocation53_spill] sm:$0xff]  ;;  %v10596_v12 = vld [vmem:[#allocation59_spill] sm:$0xff] }
 0x3c0   : > { %v4036_v13 = vmax.f32 %v3998_v6, 0.0  ;;  %v4066_v15 = vmul.f32 %v4034_v4, %v3996_v60  ;;  %v10595_v16 = vld [vmem:[#allocation61_spill] sm:$0xff]  ;;  %v10598_v6 = vld [vmem:[#allocation60_spill] sm:$0xff]  ;;  %v10601_v4 = vld [vmem:[#allocation58_spill] sm:$0xff] }
 0x3c1   : > { %v2013_v63 = vsel %vm1951_vm3, %v8569_v0, %v10588_v31  ;;  %v2015_v54 = vsel %vm1951_vm3, %v10591_v1, %v10590_v7  ;;  %v2271_v30 = vadd.f32 %v10595_v16, %v1882_v36  ;;  %v2383_v7 = vmul.f32 %v10597_v61, %v10596_v12  ;;  %v10599_v1 = vld [vmem:[#allocation86_spill] sm:$0xff]  ;;  %v10603_v36 = vld [vmem:[#allocation101_spill] sm:$0xff] }
 0x3c2   : > { %v2109_v47 = vsel %vm8917_vm2, %v2013_v63, 0.0  ;;  %v2111_v55 = vsel %vm8917_vm2, %v2015_v54, 0.0  ;;  %v4068_v31 = vmul.f32 %v4036_v13, %v4000_v27  ;;  %v2385_v42 = vmul.f32 %v10599_v1, %v10598_v6  ;;  %v10600_v63 = vld [vmem:[#allocation56_spill] sm:$0xff]  ;;  %v8949_v54 = vpop.f32.mrf.mxu0 }
 0x3c3   : > { %v2209_v24 = vmul.f32 %v10593_v25, %v2109_v47  ;;  %v2211_v0 = vmul.f32 %v10594_v21, %v2111_v55  ;;  %v2387_v48 = vmul.f32 %v10596_v12, %v10600_v63  ;;  %v2389_v47 = vmul.f32 %v10598_v6, %v10601_v4  ;;  %v10605_v21 = vld [vmem:[#allocation105_spill] sm:$0xff] }
 0x3c4   : > { %v10602_v55 = vrot.slane %v10600_v63, 7  ;;  %v4086_v61 = vpack.c.bf16 %v4068_v31, %v4066_v15  ;;  %v2447_v13 = vadd.f32 %v2383_v7, %v2269_v20  ;;  %v2449_v37 = vadd.f32 %v2385_v42, %v2271_v30  ;;  %v10607_v12 = vld [vmem:[#allocation45_spill] sm:$0xff]  ;;  %v10609_v31 = vld [vmem:[#allocation66_spill] sm:$0xff]  ;;  %v8977_v6 = vpop.f32.mrf.mxu0 }
 0x3c5   : > { %v2273_v62 = vadd.f32 %v2209_v24, %v1884_v22  ;;  %v2275_v60 = vadd.f32 %v2211_v0, %v1886_v34  ;;  %v10604_v25 = vrot.slane %v10601_v4, 7  ;;  %v10606_v24 = vld [vmem:[#allocation44_spill] sm:$0xff]  ;;  %v2469_v15 = vsel %vm1562_vm0, %v10607_v12, %v10605_v21  ;;  %v10608_v30 = vld [vmem:[#allocation65_spill] sm:$0xff]  ;;  %10610 = vst [vmem:[#allocation35_spill] sm:$0xff] %v8977_v6 }
 0x3c6   : > { %v2463_v27 = vsel %vm1562_vm0, %v10603_v36, %v10602_v55  ;;  %v2467_v0 = vsel %vm1562_vm0, %v10606_v24, %v10603_v36  ;;  %4306 = vmatmul.mubr.bf16.gmra.mxu0 %v4086_v61  ;;  %v2533_v20 = vsel %vm8532_vm1, %v2469_v15, 0.0  ;;  %v10611_v61 = vld [vmem:[#allocation79_spill] sm:$0xff]  ;;  %v10613_v12 = vld [vmem:[#allocation49_spill] sm:$0xff]  ;;  %v10615_v15 = vld [vmem:[#allocation68_spill] sm:$0xff] }
 0x3c7   : > { %v2465_v16 = vsel %vm1562_vm0, %v10605_v21, %v10604_v25  ;;  %v2451_v22 = vadd.f32 %v2387_v48, %v2273_v62  ;;  %v2453_v34 = vadd.f32 %v2389_v47, %v2275_v60  ;;  %v2531_v42 = vsel %vm8532_vm1, %v2467_v0, 0.0  ;;  %v10612_v21 = vld [vmem:[#allocation80_spill] sm:$0xff] }
 0x3c8   : > { %v2635_v48 = vmul.f32 %v10608_v30, %v2463_v27  ;;  %v2637_v7 = vmul.f32 %v10609_v31, %v2465_v16  ;;  %v2631_v1 = vmul.f32 %v10608_v30, %v2531_v42  ;;  %v2633_v62 = vmul.f32 %v10609_v31, %v2533_v20  ;;  %v9001_v20 = vpop.f32.mrf.mxu0  ;;  %v10618_v30 = vld [vmem:[#allocation76_spill] sm:$0xff]  ;;  %v10619_v31 = vld [vmem:[#allocation78_spill] sm:$0xff] }
 0x3c9   : > { %v2707_v60 = vrot.slane %v10600_v63, 1  ;;  %v2709_v47 = vrot.slane %v10601_v4, 1  ;;  %v3141_v25 = vmul.f32 %v10611_v61, %v8641_v59  ;;  %v3143_v27 = vmul.f32 %v10612_v21, %v8644_v33  ;;  %10617 = vst [vmem:[#allocation37_spill] sm:$0xff] %v9001_v20 }
 0x3ca   : > { %v2699_v55 = vadd.f32 %v2635_v48, %v2451_v22  ;;  %v2701_v36 = vadd.f32 %v2637_v7, %v2453_v34  ;;  %v2695_v24 = vadd.f32 %v2631_v1, %v2447_v13  ;;  %v2697_v16 = vadd.f32 %v2633_v62, %v2449_v37  ;;  %v10614_v22 = vld [vmem:[#allocation50_spill] sm:$0xff]  ;;  %v10616_v13 = vld [vmem:[#allocation69_spill] sm:$0xff]  ;;  %v9017_v6 = vpop.f32.mrf.mxu0 }
 0x3cb   : > { %v2711_v0 = vsel %vm1951_vm3, %v8314_v40, %v2707_v60  ;;  %v2713_v63 = vsel %vm1951_vm3, %v8317_v56, %v2709_v47  ;;  %v2719_v4 = vsel %vm1951_vm3, %v2707_v60, %v10613_v12  ;;  %v2721_v34 = vsel %vm1951_vm3, %v2709_v47, %v10614_v22 }
 0x3cc   : > { %v2879_v42 = vmul.f32 %v10615_v15, %v2711_v0  ;;  %v2881_v37 = vmul.f32 %v10616_v13, %v2713_v63  ;;  %v2783_v40 = vsel %vm8917_vm2, %v2719_v4, 0.0  ;;  %v2785_v56 = vsel %vm8917_vm2, %v2721_v34, 0.0 }
 0x3cd   : > { %v3145_v48 = vmul.f32 %v10611_v61, %v10618_v30  ;;  %v3147_v7 = vmul.f32 %v10612_v21, %v10619_v31  ;;  %v2883_v1 = vmul.f32 %v10615_v15, %v2783_v40  ;;  %v2885_v62 = vmul.f32 %v10616_v13, %v2785_v56  ;;  %v10624_v56 = vld [vmem:[#allocation82_spill] sm:$0xff] }
 0x3ce   : > { %v2943_v60 = vadd.f32 %v2879_v42, %v2695_v24  ;;  %v2945_v47 = vadd.f32 %v2881_v37, %v2697_v16  ;;  %v3269_v0 = vrot.slane %v8641_v59, 7  ;;  %v3271_v63 = vrot.slane %v8644_v33, 7 }
 0x3cf   : > { %v3629_v12 = vrot.slane %v10618_v30, 1  ;;  %v3631_v4 = vrot.slane %v10619_v31, 1  ;;  %v2947_v22 = vadd.f32 %v2883_v1, %v2699_v55  ;;  %v2949_v34 = vadd.f32 %v2885_v62, %v2701_v36 }
 0x3d0   : > { %v3205_v61 = vadd.f32 %v3141_v25, %v2943_v60  ;;  %v3207_v20 = vadd.f32 %v3143_v27, %v2945_v47  ;;  %v10620_v21 = vrot.slane %v10618_v30, 7  ;;  %v10621_v16 = vrot.slane %v10619_v31, 7  ;;  %v10625_v31 = vld [vmem:[#allocation83_spill] sm:$0xff] }
 0x3d1   : > { %v10622_v42 = vrot.slane %v8635_v57, 7  ;;  %v10623_v36 = vrot.slane %v8638_v8, 7  ;;  %v3209_v27 = vadd.f32 %v3145_v48, %v2947_v22  ;;  %v3211_v13 = vadd.f32 %v3147_v7, %v2949_v34  ;;  %v10628_v47 = vld [vmem:[#allocation51_spill] sm:$0xff]  ;;  %v9057_v34 = vpop.f32.mrf.mxu0 }
 0x3d2   : > { %v3277_v24 = vsel %vm1562_vm0, %v3269_v0, %v10620_v21  ;;  %v3279_v15 = vsel %vm1562_vm0, %v3271_v63, %v10621_v16  ;;  %v10626_v8 = vrot.slane %v8641_v59, 1  ;;  %v10627_v7 = vrot.slane %v8644_v33, 1 }
 0x3d3   : > { %v3281_v55 = vsel %vm1562_vm0, %v10622_v42, %v3269_v0  ;;  %v3283_v25 = vsel %vm1562_vm0, %v10623_v36, %v3271_v63  ;;  %v3501_v1 = vmul.f32 %v10624_v56, %v3277_v24  ;;  %v3503_v62 = vmul.f32 %v10625_v31, %v3279_v15  ;;  %v10629_v63 = vld [vmem:[#allocation52_spill] sm:$0xff] }
 0x3d4   : > { %v3397_v37 = vsel %vm8532_vm1, %v3281_v55, 0.0  ;;  %v3399_v40 = vsel %vm8532_vm1, %v3283_v25, 0.0  ;;  %v3633_v48 = vsel %vm1951_vm3, %v10626_v8, %v3629_v12  ;;  %v3635_v60 = vsel %vm1951_vm3, %v10627_v7, %v3631_v4  ;;  %v10630_v55 = vld [vmem:[#allocation91_spill] sm:$0xff]  ;;  %v10631_v25 = vld [vmem:[#allocation92_spill] sm:$0xff]  ;;  %v10636_v7 = vld [vmem:[#allocation89_spill] sm:$0xff] }
 0x3d5   : > { %v3497_v30 = vmul.f32 %v10624_v56, %v3397_v37  ;;  %v3499_v57 = vmul.f32 %v10625_v31, %v3399_v40  ;;  %v3693_v0 = vsel %vm1951_vm3, %v3629_v12, %v10628_v47  ;;  %v3695_v22 = vsel %vm1951_vm3, %v3631_v4, %v10629_v63 }
 0x3d6   : > { %v3565_v24 = vadd.f32 %v3501_v1, %v3209_v27  ;;  %v3567_v16 = vadd.f32 %v3503_v62, %v3211_v13  ;;  %v3757_v33 = vsel %vm8917_vm2, %v3693_v0, 0.0  ;;  %v3759_v15 = vsel %vm8917_vm2, %v3695_v22, 0.0  ;;  %v10634_v62 = vld [vmem:[#allocation81_spill] sm:$0xff]  ;;  %v10638_v0 = vld [vmem:[#allocation118_spill] sm:$0xff]  ;;  %v10639_v22 = vld [vmem:[#allocation23_spill] sm:$0xff] }
 0x3d7   : > { %v3561_v21 = vadd.f32 %v3497_v30, %v3205_v61  ;;  %v3563_v59 = vadd.f32 %v3499_v57, %v3207_v20  ;;  %v3853_v42 = vmul.f32 %v10537_v10, %v3633_v48  ;;  %v3855_v12 = vmul.f32 %v10630_v55, %v3635_v60  ;;  %v10632_v20 = vld [vmem:[#allocation93_spill] sm:$0xff]  ;;  %v9075_v30 = vpop.f32.mrf.mxu0  ;;  %v10637_v60 = vld [vmem:[#allocation106_spill] sm:$0xff] }
 0x3d8   : > { %v3857_v36 = vmul.f32 %v10537_v10, %v3757_v33  ;;  %v3859_v4 = vmul.f32 %v10630_v55, %v3759_v15  ;;  %v1490_v61 = vmul.f32 %v10479_v19, %v10631_v25  ;;  %v1492_v27 = vmul.f32 %v10481_v53, %v10632_v20  ;;  %v10633_v57 = vld [vmem:[#allocation117_spill] sm:$0xff]  ;;  %v10635_v19 = vld [vmem:[#allocation88_spill] sm:$0xff] }
 0x3d9   : > { %v3917_v13 = vadd.f32 %v3853_v42, %v3561_v21  ;;  %v3919_v37 = vadd.f32 %v3855_v12, %v3563_v59  ;;  %v1494_v40 = vmul.f32 %v10631_v25, %v10553_v23  ;;  %v1496_v56 = vmul.f32 %v10632_v20, %v10554_v3 }
 0x3da   : > { %v3921_v31 = vadd.f32 %v3857_v36, %v3565_v24  ;;  %v3923_v10 = vadd.f32 %v3859_v4, %v3567_v16  ;;  %v1879_v1 = vadd.f32 %v10633_v57, %v1490_v61  ;;  %v1881_v8 = vadd.f32 %v10634_v62, %v1492_v27  ;;  %v10641_v24 = vld [vmem:[#allocation25_spill] sm:$0xff]  ;;  %v9100_v36 = vpop.f32.mrf.mxu0 }
 0x3db   : > { %v4003_v48 = vadd.f32 %v10635_v19, %v3917_v13  ;;  %v4005_v53 = vadd.f32 %v10636_v7, %v3919_v37  ;;  %v1883_v47 = vadd.f32 %v10637_v60, %v1494_v40  ;;  %v1885_v63 = vadd.f32 %v10638_v0, %v1496_v56  ;;  %v10643_v13 = vld [vmem:[#allocation55_spill] sm:$0xff] }
 0x3dc   : > { %v4007_v23 = vadd.f32 %v10635_v19, %v3921_v31  ;;  %v4009_v3 = vadd.f32 %v10636_v7, %v3923_v10  ;;  %v10640_v21 = vrot.slane %v10639_v22, 1  ;;  %v10642_v16 = vrot.slane %v10641_v24, 1  ;;  %v10644_v31 = vld [vmem:[#allocation57_spill] sm:$0xff] }
 0x3dd   : > { %v4039_v15 = vmax.f32 %v4003_v48, 0.0  ;;  %v2268_v12 = vadd.f32 %v8783_v52, %v1879_v1  ;;  %v2270_v61 = vadd.f32 %v8786_v32, %v1881_v8  ;;  %v2384_v27 = vmul.f32 %v10563_v51, %v10471_v17  ;;  %v9123_v51 = vpop.f32.mrf.mxu0  ;;  %v10648_v48 = vld [vmem:[#allocation32_spill] sm:$0xff] }
 0x3de   : > { %v2012_v59 = vsel %vm1951_vm3, %v8759_v26, %v10640_v21  ;;  %v2014_v33 = vsel %vm1951_vm3, %v8762_v35, %v10642_v16  ;;  %v4041_v4 = vmax.f32 %v4007_v23, 0.0  ;;  %v2382_v35 = vmul.f32 %v8438_v2, %v10280_v46 }
 0x3df   : > { %v2108_v42 = vsel %vm8917_vm2, %v2012_v59, 0.0  ;;  %v2110_v55 = vsel %vm8917_vm2, %v2014_v33, 0.0  ;;  %v4071_v20 = vmul.f32 %v4039_v15, %v4005_v53  ;;  %v2386_v37 = vmul.f32 %v10280_v46, %v10643_v13  ;;  %v9145_v59 = vpop.f32.mrf.mxu0  ;;  %v10649_v33 = vld [vmem:[#allocation95_spill] sm:$0xff] }
 0x3e0   : > { %v2208_v26 = vmul.f32 %v6295_v9, %v2108_v42  ;;  %v2210_v25 = vmul.f32 %v10557_v38, %v2110_v55  ;;  %v4073_v52 = vmul.f32 %v4041_v4, %v4009_v3  ;;  %v2388_v9 = vmul.f32 %v10471_v17, %v10644_v31  ;;  %v10647_v17 = vld [vmem:[#allocation31_spill] sm:$0xff]  ;;  %v10650_v42 = vld [vmem:[#allocation98_spill] sm:$0xff] }
 0x3e1   : > { %v2446_v10 = vadd.f32 %v2382_v35, %v2268_v12  ;;  %v2448_v38 = vadd.f32 %v2384_v27, %v2270_v61  ;;  %v10645_v32 = vrot.slane %v10643_v13, 7  ;;  %v10646_v57 = vrot.slane %v10644_v31, 7  ;;  %v10652_v27 = vld [vmem:[#allocation75_spill] sm:$0xff] }
 0x3e2   : > { %v2272_v40 = vadd.f32 %v2208_v26, %v1883_v47  ;;  %v2274_v56 = vadd.f32 %v2210_v25, %v1885_v63  ;;  %v4089_v1 = vpack.c.bf16 %v4073_v52, %v4071_v20  ;;  %v2466_v19 = vsel %vm1562_vm0, %v10647_v17, %v8837_v14  ;;  %v10651_v25 = vld [vmem:[#allocation110_spill] sm:$0xff]  ;;  %v10656_v17 = vld [vmem:[#allocation119_spill] sm:$0xff] }
 0x3e3   : > { %v2462_v2 = vsel %vm1562_vm0, %v8837_v14, %v10645_v32  ;;  %v2464_v46 = vsel %vm1562_vm0, %v8840_v29, %v10646_v57  ;;  %v2468_v7 = vsel %vm1562_vm0, %v10648_v48, %v8840_v29  ;;  %v2530_v53 = vsel %vm8532_vm1, %v2466_v19, 0.0 }
 0x3e4   : > { %v2450_v62 = vadd.f32 %v2386_v37, %v2272_v40  ;;  %v2452_v8 = vadd.f32 %v2388_v9, %v2274_v56  ;;  %v2634_v60 = vmul.f32 %v10472_v49, %v2462_v2  ;;  %v2636_v47 = vmul.f32 %v10473_v39, %v2464_v46  ;;  %4313 = vmatprep.mubr.bf16.mxu0 %v4089_v1  ;;  %v10653_v37 = vld [vmem:[#allocation77_spill] sm:$0xff]  ;;  %v4701_v40 = vpop.f32.mrf.mxu0 }
 0x3e5   : > { %v2532_v0 = vsel %vm8532_vm1, %v2468_v7, 0.0  ;;  %v2630_v63 = vmul.f32 %v10472_v49, %v2530_v53  ;;  %v2706_v14 = vrot.slane %v10643_v13, 1  ;;  %v2708_v23 = vrot.slane %v10644_v31, 1  ;;  %v10658_v7 = vld [vmem:[#allocation122_spill] sm:$0xff] }
 0x3e6   : > { %v2632_v3 = vmul.f32 %v10473_v39, %v2532_v0  ;;  %v2698_v29 = vadd.f32 %v2634_v60, %v2450_v62  ;;  %v2700_v22 = vadd.f32 %v2636_v47, %v2452_v8  ;;  %v3140_v21 = vmul.f32 %v10562_v58, %v8823_v41  ;;  %v10660_v47 = vld [vmem:[#allocation111_spill] sm:$0xff] }
 0x3e7   : > { %v2694_v24 = vadd.f32 %v2630_v63, %v2446_v10  ;;  %v2710_v16 = vsel %vm1951_vm3, %v8496_v50, %v2706_v14  ;;  %v2712_v49 = vsel %vm1951_vm3, %v8499_v43, %v2708_v23  ;;  %v2718_v39 = vsel %vm1951_vm3, %v2706_v14, %v10649_v33  ;;  %v4702_v63 = vpop.f32.mrf.mxu0 }
 0x3e8   : > { %v2696_v15 = vadd.f32 %v2632_v3, %v2448_v38  ;;  %v2720_v55 = vsel %vm1951_vm3, %v2708_v23, %v10650_v42  ;;  %v2782_v12 = vsel %vm8917_vm2, %v2718_v39, 0.0  ;;  %v2878_v4 = vmul.f32 %v10558_v18, %v2710_v16  ;;  %v10661_v3 = vld [vmem:[#allocation112_spill] sm:$0xff] }
 0x3e9   : > { %v2784_v50 = vsel %vm8917_vm2, %v2720_v55, 0.0  ;;  %v2880_v26 = vmul.f32 %v10559_v28, %v2712_v49  ;;  %v2882_v43 = vmul.f32 %v10558_v18, %v2782_v12  ;;  %v3142_v61 = vmul.f32 %v10651_v25, %v8826_v11  ;;  %v10665_v55 = vld [vmem:[#allocation36_spill] sm:$0xff]  ;;  %v10666_v12 = vld [vmem:[#allocation113_spill] sm:$0xff] }
 0x3ea   : > { %v2884_v20 = vmul.f32 %v10559_v28, %v2784_v50  ;;  %v2942_v35 = vadd.f32 %v2878_v4, %v2694_v24  ;;  %v3144_v13 = vmul.f32 %v10562_v58, %v10652_v27  ;;  %v3146_v52 = vmul.f32 %v10651_v25, %v10653_v37  ;;  %v9223_v25 = vld [vmem:[%s9331_s6] ss:$0 sm:$0xff] }
 0x3eb   : > { %v2944_v56 = vadd.f32 %v2880_v26, %v2696_v15  ;;  %v2946_v31 = vadd.f32 %v2882_v43, %v2698_v29  ;;  %v3268_v9 = vrot.slane %v8823_v41, 7  ;;  %v3270_v10 = vrot.slane %v8826_v11, 7 }
 0x3ec   : > { %v2948_v18 = vadd.f32 %v2884_v20, %v2700_v22  ;;  %v3204_v38 = vadd.f32 %v3140_v21, %v2942_v35  ;;  %v3628_v32 = vrot.slane %v10652_v27, 1  ;;  %v3630_v28 = vrot.slane %v10653_v37, 1  ;;  %v10667_v20 = vld [vmem:[#allocation114_spill] sm:$0xff] }
 0x3ed   : > { %v3206_v2 = vadd.f32 %v3142_v61, %v2944_v56  ;;  %v3208_v57 = vadd.f32 %v3144_v13, %v2946_v31  ;;  %v10654_v58 = vrot.slane %v10652_v27, 7  ;;  %v10655_v1 = vrot.slane %v10653_v37, 7  ;;  %v4704_v61 = vpop.f32.mrf.mxu0  ;;  %v10668_v13 = vld [vmem:[#allocation84_spill] sm:$0xff]  ;;  %v10669_v37 = vld [vmem:[#allocation47_spill] sm:$0xff] }
 0x3ee   : > { %v3210_v8 = vadd.f32 %v3146_v52, %v2948_v18  ;;  %v10657_v19 = vrot.slane %v10656_v17, 7  ;;  %v10659_v53 = vrot.slane %v10658_v7, 7  ;;  %v10662_v22 = vrot.slane %v8823_v41, 1  ;;  %v10670_v31 = vld [vmem:[#allocation48_spill] sm:$0xff] }
 0x3ef   : > { %v3276_v46 = vsel %vm1562_vm0, %v3268_v9, %v10654_v58  ;;  %v3278_v62 = vsel %vm1562_vm0, %v3270_v10, %v10655_v1  ;;  %v10663_v33 = vrot.slane %v8826_v11, 1  ;;  %v3692_v42 = vsel %vm1951_vm3, %v3628_v32, %v10664_v5  ;;  %v10673_v58 = vld [vmem:[#allocation115_spill] sm:$0xff]  ;;  %v10674_v17 = vld [vmem:[#allocation116_spill] sm:$0xff] }
 0x3f0   : > { %v3280_v48 = vsel %vm1562_vm0, %v10657_v19, %v3268_v9  ;;  %v3282_v60 = vsel %vm1562_vm0, %v10659_v53, %v3270_v10  ;;  %v3500_v0 = vmul.f32 %v10660_v47, %v3276_v46  ;;  %v3502_v29 = vmul.f32 %v10661_v3, %v3278_v62  ;;  %v10671_v9 = vld [vmem:[#allocation35_spill] sm:$0xff]  ;;  %v10672_v10 = vld [vmem:[#allocation37_spill] sm:$0xff] }
 0x3f1   : > { %v3396_v14 = vsel %vm8532_vm1, %v3280_v48, 0.0  ;;  %v3398_v23 = vsel %vm8532_vm1, %v3282_v60, 0.0  ;;  %v3632_v21 = vsel %vm1951_vm3, %v10662_v22, %v3628_v32  ;;  %v3634_v39 = vsel %vm1951_vm3, %v10663_v33, %v3630_v28 }
 0x3f2   : > { %v3496_v24 = vmul.f32 %v10660_v47, %v3396_v14  ;;  %v3498_v16 = vmul.f32 %v10661_v3, %v3398_v23  ;;  %v3564_v49 = vadd.f32 %v3500_v0, %v3208_v57  ;;  %v3566_v15 = vadd.f32 %v3502_v29, %v3210_v8 }
 0x3f3   : > { %v3694_v41 = vsel %vm1951_vm3, %v3630_v28, %v10665_v55  ;;  %v3852_v4 = vmul.f32 %v10666_v12, %v3632_v21  ;;  %v3756_v43 = vsel %vm8917_vm2, %v3692_v42, 0.0  ;;  %v3854_v35 = vmul.f32 %v10667_v20, %v3634_v39 }
 0x3f4   : > { %v3560_v50 = vadd.f32 %v3496_v24, %v3204_v38  ;;  %v3562_v26 = vadd.f32 %v3498_v16, %v3206_v2  ;;  %v3758_v11 = vsel %vm8917_vm2, %v3694_v41, 0.0  ;;  %v3856_v44 = vmul.f32 %v10666_v12, %v3756_v43 }
 0x3f5   : > { %v3858_v27 = vmul.f32 %v10667_v20, %v3758_v11  ;;  %v4685_v52 = vadd.f32 %v10669_v37, %v10668_v13  ;;  %v4688_v45 = vadd.f32 %v8949_v54, %v10670_v31  ;;  %v4691_v18 = vadd.f32 %v10672_v10, %v10671_v9  ;;  %v4705_v54 = vpop.f32.mrf.mxu0 }
 0x3f6   : > { %v3916_v56 = vadd.f32 %v3852_v4, %v3560_v50  ;;  %v4694_v38 = vadd.f32 %v9057_v34, %v9017_v6  ;;  %v3918_v32 = vadd.f32 %v3854_v35, %v3562_v26  ;;  %v3920_v28 = vadd.f32 %v3856_v44, %v3564_v49 }
 0x3f7   : > { %v3922_v2 = vadd.f32 %v3858_v27, %v3566_v15  ;;  %v4260_v57 = vadd.f32 %v4685_v52, %v9223_v25  ;;  %v4263_v1 = vadd.f32 %v4688_v45, %v9223_v25  ;;  %v4268_v62 = vadd.f32 %v4691_v18, %v9223_v25 }
 0x3f8   : > { %v4002_v46 = vadd.f32 %v10673_v58, %v3916_v56  ;;  %v4271_v8 = vadd.f32 %v4694_v38, %v9223_v25  ;;  %v4004_v19 = vadd.f32 %v10674_v17, %v3918_v32  ;;  %v4006_v48 = vadd.f32 %v10673_v58, %v3920_v28 }
 0x3f9   : > { %v4008_v6 = vadd.f32 %v10674_v17, %v3922_v2  ;;  %v4697_v34 = vadd.f32 %v9100_v36, %v9075_v30  ;;  %v4322_v53 = vmax.f32 %v4260_v57, %v4268_v62  ;;  %v4700_v47 = vadd.f32 %v9145_v59, %v9123_v51 }
 0x3fa   : > { %v4038_v7 = vmax.f32 %v4002_v46, 0.0  ;;  %v4323_v60 = vmax.f32 %v4263_v1, %v4271_v8  ;;  %v4040_v0 = vmax.f32 %v4006_v48, 0.0  ;;  %v4703_v14 = vadd.f32 %v4702_v63, %v4701_v40 }
 0x3fb   : > { %v4706_v23 = vadd.f32 %v4705_v54, %v4704_v61  ;;  %4330 = vst [vmem:[#allocation3] sm:$0xff] %v4322_v53  ;;  %v4276_v29 = vadd.f32 %v4697_v34, %v9223_v25  ;;  %v4279_v21 = vadd.f32 %v4700_v47, %v9223_v25 }
 0x3fc   : > { %v4070_v3 = vmul.f32 %v4038_v7, %v4004_v19  ;;  %4331 = vst [vmem:[#allocation3 + $0x8] sm:$0xff] %v4323_v60  ;;  %v4072_v22 = vmul.f32 %v4040_v0, %v4008_v6  ;;  %v4284_v30 = vadd.f32 %v4703_v14, %v9223_v25 }
 0x3fd   : > { %v4287_v36 = vadd.f32 %v4706_v23, %v9223_v25 }
 0x3fe   : > { %v4088_v24 = vpack.c.bf16 %v4072_v22, %v4070_v3  ;;  %v4324_v16 = vmax.f32 %v4276_v29, %v4284_v30 }
 0x3ff   : > { %v4325_v51 = vmax.f32 %v4279_v21, %v4287_v36 }
 0x400   : > { %4314 = vmatmul.mubr.bf16.gmra.mxu0 %v4088_v24  ;;  %4332 = vst [vmem:[#allocation3 + $0x10] sm:$0xff] %v4324_v16 }
 0x401   : > { %4333 = vst [vmem:[#allocation3 + $0x18] sm:$0xff] %v4325_v51 }
 0x403   : > { %v4338_v59 = vld [vmem:[#allocation3] ss:$2 sm:$0xff]  ;;  %v4346_v40 = vld [vmem:[#allocation3 + $0x1] ss:$2 sm:$0xff] }
 0x404   : > { %v4353_v63 = vmax.f32 %v4338_v59, %v4346_v40 }
 0x406   : > { %4357 = vst [vmem:[%s5576_s11] sm:$0xff] %v4353_v63 }
 0x408   : > { %v4340_v49 = vld [vmem:[#allocation3 + $0x10] ss:$2 sm:$0xff]  ;;  %v4348_v33 = vld [vmem:[#allocation3 + $0x11] ss:$2 sm:$0xff] }
 0x409   : > { %v4354_v39 = vmax.f32 %v4340_v49, %v4348_v33 }
 0x40b   : > { %4358 = vst [vmem:[%s5576_s11 + $0x8] sm:$0xff] %v4354_v39 }
 0x411   : > { %v4707_v15 = vpop.f32.mrf.mxu0 }
 0x413   : > { %v4708_v5 = vpop.f32.mrf.mxu0 }
 0x414   : > { %v4709_v12 = vadd.f32 %v4708_v5, %v4707_v15 }
 0x415   : > { %v4710_v42 = vpop.f32.mrf.mxu0 }
 0x416   : > { %v4292_v43 = vadd.f32 %v4709_v12, %v9223_v25 }
 0x417   : > { %v4711_v55 = vpop.f32.mrf.mxu0 }
 0x418   : > { %v4712_v11 = vadd.f32 %v4711_v55, %v4710_v42 }
 0x41a   : > { %v4295_v27 = vadd.f32 %v4712_v11, %v9223_v25 }
 0x44a   : > { %v4713_v41 = vpop.f32.mrf.mxu0 }
 0x44c   : > { %v4714_v4 = vpop.f32.mrf.mxu0 }
 0x44d   : > { %v4715_v50 = vadd.f32 %v4714_v4, %v4713_v41 }
 0x44e   : > { %v4716_v26 = vpop.f32.mrf.mxu0 }
 0x44f   : > { %v4300_v61 = vadd.f32 %v4715_v50, %v9223_v25 }
 0x450   : > { %v4717_v20 = vpop.f32.mrf.mxu0 }
 0x451   : > { %v4326_v35 = vmax.f32 %v4292_v43, %v4300_v61  ;;  %v4718_v44 = vadd.f32 %v4717_v20, %v4716_v26 }
 0x453   : > { %4334 = vst [vmem:[#allocation3 + $0x20] sm:$0xff] %v4326_v35  ;;  %v4303_v13 = vadd.f32 %v4718_v44, %v9223_v25 }
 0x455   : > { %v4327_v37 = vmax.f32 %v4295_v27, %v4303_v13 }
 0x457   : > { %4335 = vst [vmem:[#allocation3 + $0x28] sm:$0xff] %v4327_v37 }
 0x45e   : > { %v4342_v52 = vld [vmem:[#allocation3 + $0x20] ss:$2 sm:$0xff]  ;;  %v4350_v56 = vld [vmem:[#allocation3 + $0x21] ss:$2 sm:$0xff] }
 0x45f   : > { %v4355_v31 = vmax.f32 %v4342_v52, %v4350_v56 }
 0x461   : > { %4359 = vst [vmem:[%s5576_s11 + $0x10] sm:$0xff] %v4355_v31 }
 0x486   : > { %v4719_v45 = vpop.f32.mrf.mxu0 }
 0x488   : > { %v4720_v9 = vpop.f32.mrf.mxu0 }
 0x489   : > { %v4721_v32 = vadd.f32 %v4720_v9, %v4719_v45 }
 0x48a   : > { %v4722_v10 = vpop.f32.mrf.mxu0 }
 0x48b   : > { %v4308_v58 = vadd.f32 %v4721_v32, %v9223_v25 }
 0x48c   : > { %v4723_v18 = vpop.f32.mrf.mxu0 }
 0x48d   : > { %v4724_v46 = vadd.f32 %v4723_v18, %v4722_v10 }
 0x48f   : > { %v4311_v17 = vadd.f32 %v4724_v46, %v9223_v25 }
 0x4c0   : > { %v4725_v38 = vpop.f32.mrf.mxu0 }
 0x4c2   : > { %v4726_v28 = vpop.f32.mrf.mxu0 }
 0x4c3   : > { %v4727_v2 = vadd.f32 %v4726_v28, %v4725_v38 }
 0x4c4   : > { %v4728_v57 = vpop.f32.mrf.mxu0 }
 0x4c5   : > { %v4316_v1 = vadd.f32 %v4727_v2, %v9223_v25 }
 0x4c6   : > { %v4729_v62 = vpop.f32.mrf.mxu0 }
 0x4c7   : > { %v4328_v8 = vmax.f32 %v4308_v58, %v4316_v1  ;;  %v4730_v54 = vadd.f32 %v4729_v62, %v4728_v57 }
 0x4c9   : > { %4336 = vst [vmem:[#allocation3 + $0x30] sm:$0xff] %v4328_v8  ;;  %v4319_v19 = vadd.f32 %v4730_v54, %v9223_v25 }
 0x4cb   : > { %v4329_v48 = vmax.f32 %v4311_v17, %v4319_v19 }
 0x4cd   : > { %4337 = vst [vmem:[#allocation3 + $0x38] sm:$0xff] %v4329_v48 }
 0x4d4   : > { %v4344_v6 = vld [vmem:[#allocation3 + $0x30] ss:$2 sm:$0xff]  ;;  %v4352_v34 = vld [vmem:[#allocation3 + $0x31] ss:$2 sm:$0xff] }
 0x4d5   : > { %v4356_v25 = vmax.f32 %v4344_v6, %v4352_v34 }
 0x4d7   : > { %4360 = vst [vmem:[%s5576_s11 + $0x18] sm:$0xff] %v4356_v25 }
 0x4d8   : > { %5098 = shalt.err (!%p5095_p6)
}
 0x4d9   : > { %s5099_s17 = scalar_lea.hbm %s9269_s1, 512  ;;  %s5103_s13 = scalar_lea.hbm %s10675_s21, 2048 }
 0x4da   : > { %p5100_p9 = scmp.ne.s32.totalorder %s9269_s1, %s5099_s17  ;;  %p5104_p4 = scmp.lt.s32.totalorder %s9269_s1, %s10675_s21 }
 0x4db   : > { %p5105_p13 = scmp.lt.s32.totalorder %s5103_s13, %s5099_s17 }
 0x4dc   : > { %p5101_p12 = pnand %p5100_p9, %p5376_p1 }
 0x4dd   : > { %p5106_p3 = por %p5105_p13, %p5104_p4 }
 0x4de   : > { %p5102_p10 = pneg %p5101_p12 }
 0x4e0   : > { %p5107_p2 = pnand %p5106_p3, %p5102_p10 }
 0x4e2   : > { %5110 = shalt.err (!%p5107_p2)
}
 0x4e3   : > { %s5204_s19 = smov 128   ;;  %s5205_s9 = smov 8  }
 0x4e4   : > { %4769 = dma.vmem_to_hbm [thread:$0]  (%p5376_p1), %s9271_s22, 512, %s9269_s1, %s4362_s27, %s5204_s19, %s5204_s19, %s5205_s9  }
 0x4e5 PF: > { %s10676_s23 = sld [smem:[#allocation19_spill]] }
 0x4e6   : > { %s10677_s12 = sld [smem:[#allocation18_spill]] }
 0x4e7   : > { %s10678_s18 = sld [smem:[#allocation20_spill]] }
 0x4eb   : > { %p4801_p0 = scmp.ge.s32.totalorder %s10676_s23, 2 }
 0x4ec   : > { %s4392_s2 = sand.u32 1, %s10677_s12  }
 0x4ed   : > { %p10679_p5 = scmp.ne.s32.totalorder %s10678_s18, 0  ;;  %s4393_s14 = scalar_lea.sflag [#allocation6], %s4392_s2 }
 0x4ef   : > { %p4789_p8 = pnand %p4801_p0, %p10679_p5 }
 0x4f1   : > { %p4790_p7 = pneg %p4789_p8 }
 0x4f3   : > { %5156 = dma.done.wait (%p4790_p7), %s4393_s14, 512  }
 0x4f4   : > { %5158 = vsyncadd (%p4790_p7), %s4393_s14, 4294966784  ;;  %s25_s8 = sadd.s32 1, %s10676_s23   ;;  %s10680_s20 = sld [smem:[#allocation21_spill]] }
 0x4f5   : > { %p22_p11 = scmp.ge.s32.totalorder %s25_s8, 6   ;;  %s10681_s22 = sld [smem:[#allocation22_spill]] }
 0x4f6   : > { %s10682_s24 = smov %s5165_s25  ;;  %s10683_s25 = smov %s5169_s26 }
 0x4f7   : > { %s10684_s26 = smov %s5395_s5  ;;  %s10685_s27 = smov %s5181_s29 }
 0x4f8   : > { %s10686_s28 = smov %s5185_s30  ;;  %24 = sbr.rel (!%p22_p11) target bundleno = 15 (0xf), region = 124 }
 0x4fa   : > { %s10687_s29 = smov %s10680_s20 }
 0x4fb   : > { %s10688_s30 = smov %s10681_s22 }
 0x4fd   :  { %4398 = vsyncpa [#allocation5], 1 }
 0x4fe   :  { %4400 = vsyncpa [#allocation5 + $0x1], 1 }
 0x4ff   :  { %4401 = vsyncpa [#allocation8], 1 }
 0x500   :  { %4402 = vsyncpa [#allocation11], 1 }
 0x501   :  { %4403 = vsyncpa [#allocation6], 1 }
 0x502   :  { %4405 = vsyncpa [#allocation6 + $0x1], 1 }

</bundles_post_ra>
